<compile_context>
chip_gen: v6e
topology: v6e:2x2x1
jax: 0.10.0
libtpu: 0.0.40
codegen_flags: <defaults>
</compile_context>

<pallas_src>
import functools

import jax
import jax.numpy as jnp
from jax.experimental import pallas as pl
from jax.experimental.pallas import tpu as pltpu


# ------------------------------ static helpers ------------------------------ #

def _up8(v):
    return ((v + 7) // 8) * 8


def _lstm_offsets(h2, h4):
    """8-aligned row offsets of the packed LSTM slab (lane width 4*h4)."""
    o_wih0 = 0
    o_whh0 = _up8(o_wih0 + h2)
    o_b0 = o_whh0 + h4
    o_wih1 = _up8(o_b0 + 1)
    o_whh1 = o_wih1 + h4
    o_b1 = o_whh1 + h4
    total = o_b1 + 1
    return o_wih0, o_whh0, o_b0, o_wih1, o_whh1, o_b1, total


# ------------------------------- fused kernel ------------------------------- #

def _cnn_fused_kernel(x_ref, c1_ref, c2_ref, lstm_ref, w3_ref, col_ref,
                      fc1_ref, fc2_ref, o_ref, pad_scr, seq_scr, fcin_scr,
                      *, N, L):
    f32 = jnp.float32
    rows = N * L
    Cin = x_ref.shape[1] // 3
    H = c1_ref.shape[1]
    H2 = c2_ref.shape[1]
    H4 = lstm_ref.shape[1] // 4
    L2 = w3_ref.shape[0] // N

    # ---- conv1d_1 + relu1 (dropout = identity).  Taps pre-fused along K in the
    # wrapper, so this is one matmul. ----
    ob1 = _up8(3 * Cin)
    a = jnp.dot(x_ref[...], c1_ref[0:3 * Cin, :], preferred_element_type=f32)
    a = jnp.maximum(a + c1_ref[ob1:ob1 + 1, :], 0.0)                 # (rows, H)

    # ---- conv1d_2 + relu2 + bn_1 (eval).  +/-1 time shifts through a
    # zero-padded VMEM buffer (no shift-matrix matmuls). ----
    pad_scr[...] = jnp.zeros_like(pad_scr)
    pad_scr[N:N + rows, :] = a
    a_prev = pad_scr[0:rows, :]
    a_next = pad_scr[2 * N:2 * N + rows, :]
    acc = jnp.dot(a_prev, c2_ref[0:H, :], preferred_element_type=f32)
    acc = acc + jnp.dot(a, c2_ref[H:2 * H, :], preferred_element_type=f32)
    acc = acc + jnp.dot(a_next, c2_ref[2 * H:3 * H, :], preferred_element_type=f32)
    ob2 = _up8(3 * H)
    acc = jnp.maximum(acc + c2_ref[ob2:ob2 + 1, :], 0.0)
    a2 = acc * c2_ref[ob2 + 8:ob2 + 9, :] + c2_ref[ob2 + 16:ob2 + 17, :]  # (rows, 2H)

    # ---- 2-layer LSTM (batch_first, h0=c0=0), wavefront-interleaved. ----
    o_wih0, o_whh0, o_b0, o_wih1, o_whh1, o_b1, _ = _lstm_offsets(H2, H4)
    whh0 = lstm_ref[o_whh0:o_whh0 + H4, :]
    wih1 = lstm_ref[o_wih1:o_wih1 + H4, :]
    whh1 = lstm_ref[o_whh1:o_whh1 + H4, :]
    b1l = lstm_ref[o_b1:o_b1 + 1, :]

    # layer-1 input-to-hidden matmul hoisted out of the recurrent loop.
    g0_all = (jnp.dot(a2, lstm_ref[o_wih0:o_wih0 + H2, :], preferred_element_type=f32)
              + lstm_ref[o_b0:o_b0 + 1, :])                          # (rows, 16H)

    def gates(g):
        return (jax.nn.sigmoid(g[:, 0:H4]),
                jax.nn.sigmoid(g[:, H4:2 * H4]),
                jnp.tanh(g[:, 2 * H4:3 * H4]),
                jax.nn.sigmoid(g[:, 3 * H4:4 * H4]))

    h0 = jnp.zeros((N, H4), f32)
    cell0 = jnp.zeros((N, H4), f32)
    h1 = jnp.zeros((N, H4), f32)
    cell1 = jnp.zeros((N, H4), f32)
    for t in range(L):   # static unroll; layer-2 step t overlaps layer-1 step t+1
        # layer 1, step t: static-slice gather, only h0 @ Whh0 on the serial path.
        g = g0_all[t * N:(t + 1) * N, :] + jnp.dot(h0, whh0, preferred_element_type=f32)
        ig, fg, gg, og = gates(g)
        cell0 = fg * cell0 + ig * gg
        h0 = og * jnp.tanh(cell0)
        # layer 2, step t (per-step x @ Wih1 keeps the two chains independent).
        g2 = (jnp.dot(h0, wih1, preferred_element_type=f32) + b1l
              + jnp.dot(h1, whh1, preferred_element_type=f32))
        ig, fg, gg, og = gates(g2)
        cell1 = fg * cell1 + ig * gg
        h1 = og * jnp.tanh(cell1)
        seq_scr[t * N:(t + 1) * N, :] = h1                           # scatter via store
    seq1 = seq_scr[...]                                              # (rows, 4H), row = t*N + n

    # ---- conv1d_3 + relu3 + bn_2 (eval) + relu4.  +/-1 shifts along the 4H
    # "length" axis via XLU lane roll + boundary mask; 3 taps fused into one
    # K = 3*L*N matmul against the batch-block-diagonal operator built at init. ----
    lane = jax.lax.broadcasted_iota(jnp.int32, (rows, H4), 1)
    s_prev = jnp.where(lane == 0, 0.0, pltpu.roll(seq1, shift=1, axis=1))
    s_next = jnp.where(lane == H4 - 1, 0.0, pltpu.roll(seq1, shift=H4 - 1, axis=1))
    s_stack = jnp.concatenate([s_prev, seq1, s_next], axis=0)        # (3*rows, 4H)
    z = jnp.dot(w3_ref[...], s_stack, preferred_element_type=f32)    # (N*L2, 4H), row co*N+n
    stride3 = col_ref.shape[0] // 3
    z = jnp.maximum(z + col_ref[0:N * L2, :], 0.0)
    z = z * col_ref[stride3:stride3 + N * L2, :] + col_ref[2 * stride3:2 * stride3 + N * L2, :]
    z = jnp.maximum(z, 0.0)

    # ---- fc1 + relu5 + fc2: channel-major rows of z packed into a lane-dense
    # (N, 2L*4H) slab (feature order co*4H + d; fc1 rows were permuted at init,
    # so torch's permute(0,2,1)+reshape is free), then one K=2L*4H matmul. ----
    for co in range(L2):
        fcin_scr[:, co * H4:(co + 1) * H4] = z[co * N:(co + 1) * N, :]
    d_fc1 = L2 * H4
    ofc1b = _up8(d_fc1)
    y = jnp.dot(fcin_scr[...], fc1_ref[0:d_fc1, :], preferred_element_type=f32)
    y = jnp.maximum(y + fc1_ref[ofc1b:ofc1b + 1, :], 0.0)
    k2 = fc2_ref.shape[0] - 1
    o_ref[...] = (jnp.dot(y, fc2_ref[0:k2, :], preferred_element_type=f32)
                  + fc2_ref[k2:k2 + 1, :])


# ------------------------------ pallas_call wrapper -------------------------- #

_VMEM = pl.BlockSpec(memory_space=pltpu.MemorySpace.VMEM)


def cnn_forward(p, x):
    """x: (N, input_size, len_seq) — NCL, same convention as the PyTorch module."""
    N, Cin, L = x.shape
    H = p["c1"].shape[1]
    H4 = p["lstm"].shape[1] // 4
    L2 = p["w3"].shape[0] // N
    num_classes = p["fc2"].shape[1]
    rows = L * N
    if p["w3"].shape[1] != 3 * rows:
        raise ValueError("params were packed for a different (batch, len_seq)")

    # Per-call input plumbing only: time-major channel-last rows (row = l*N + n)
    # with the three conv1d_1 taps pre-concatenated along lanes.
    x2 = jnp.transpose(x, (2, 0, 1)).reshape(rows, Cin).astype(jnp.float32)
    zpad = jnp.zeros((N, Cin), jnp.float32)
    x_cat = jnp.concatenate(
        [jnp.concatenate([zpad, x2[:rows - N]], axis=0),
         x2,
         jnp.concatenate([x2[N:], zpad], axis=0)],
        axis=1)                                                      # (rows, 3*Cin)

    # TODO(synk): for large batches on v7x, add a batch grid with
    # dimension_semantics=("parallel",) so the work shards across both TensorCores.
    return pl.pallas_call(
        functools.partial(_cnn_fused_kernel, N=N, L=L),
        out_shape=jax.ShapeDtypeStruct((N, num_classes), jnp.float32),
        in_specs=[_VMEM] * 8,
        out_specs=_VMEM,
        scratch_shapes=[
            pltpu.VMEM((rows + 2 * N, H), jnp.float32),    # conv2 zero-padded shift buffer
            pltpu.VMEM((rows, H4), jnp.float32),           # LSTM layer-2 output sequence
            pltpu.VMEM((N, L2 * H4), jnp.float32),         # lane-dense fc1 input slab
        ],
    )(x_cat, p["c1"], p["c2"], p["lstm"], p["w3"], p["col3"], p["fc1"], p["fc2"])


# ------------------------------ params + init -------------------------------- #

def _uniform(key, shape, fan_in):
    s = 1.0 / (fan_in ** 0.5)
    return jax.random.uniform(key, shape, jnp.float32, -s, s)


def init_params(key, input_size, hidden_size, len_seq, num_classes, batch):
    """Builds kernel-ready packed parameter slabs (all layout work hoisted here).

    Conventions: conv w[k, ci, co] == torch_weight[co, ci, k] (taps stacked along
    rows); LSTM weights stored transposed, gate order i|f|g|o, bias = b_ih + b_hh;
    fc1 rows permuted to feature order co*4H + d; BatchNorm folded to eval-mode
    scale/shift; dropout is identity.
    """
    Cin, H, L, N = input_size, hidden_size, len_seq, batch
    H2, H4, L2 = 2 * H, 4 * H, 2 * len_seq
    ks = jax.random.split(key, 26)

    # conv1d_1 slab: taps at rows [0:3*Cin], bias row at _up8(3*Cin).
    w1 = _uniform(ks[0], (3, Cin, H), Cin * 3).reshape(3 * Cin, H)
    b1 = _uniform(ks[1], (1, H), Cin * 3)
    ob1 = _up8(3 * Cin)
    c1 = (jnp.zeros((ob1 + 1, H), jnp.float32)
          .at[0:3 * Cin].set(w1).at[ob1:ob1 + 1].set(b1))

    # conv1d_2 + bn_1 slab: taps [0:3H], bias at _up8(3H), bn scale/shift at +8/+16.
    w2 = _uniform(ks[2], (3, H, H2), H * 3).reshape(3 * H, H2)
    b2 = _uniform(ks[3], (1, H2), H * 3)
    g1 = 1.0 + 0.1 * jax.random.normal(ks[4], (1, H2), jnp.float32)
    be1 = 0.1 * jax.random.normal(ks[5], (1, H2), jnp.float32)
    rm1 = 0.1 * jax.random.normal(ks[6], (1, H2), jnp.float32)
    rv1 = 1.0 + 0.1 * jnp.abs(jax.random.normal(ks[7], (1, H2), jnp.float32))
    bn1_s = g1 / jnp.sqrt(rv1 + 1e-5)
    bn1_b = be1 - rm1 * bn1_s
    ob2 = _up8(3 * H)
    c2 = (jnp.zeros((ob2 + 17, H2), jnp.float32)
          .at[0:3 * H].set(w2).at[ob2:ob2 + 1].set(b2)
          .at[ob2 + 8:ob2 + 9].set(bn1_s).at[ob2 + 16:ob2 + 17].set(bn1_b))

    # 2-layer LSTM slab (lane width 16H), 8-aligned row offsets.
    o_wih0, o_whh0, o_b0, o_wih1, o_whh1, o_b1, tot = _lstm_offsets(H2, H4)
    lstm = (jnp.zeros((tot, 4 * H4), jnp.float32)
            .at[o_wih0:o_wih0 + H2].set(_uniform(ks[8], (H2, 4 * H4), H4))
            .at[o_whh0:o_whh0 + H4].set(_uniform(ks[9], (H4, 4 * H4), H4))
            .at[o_b0:o_b0 + 1].set(_uniform(ks[10], (1, 4 * H4), H4)
                                   + _uniform(ks[11], (1, 4 * H4), H4))
            .at[o_wih1:o_wih1 + H4].set(_uniform(ks[12], (H4, 4 * H4), H4))
            .at[o_whh1:o_whh1 + H4].set(_uniform(ks[13], (H4, 4 * H4), H4))
            .at[o_b1:o_b1 + 1].set(_uniform(ks[14], (1, 4 * H4), H4)
                                   + _uniform(ks[15], (1, 4 * H4), H4)))

    # conv1d_3 as a fused batch-block-diagonal operator (channel-major rows):
    #   w3big[co*N + n, k*L*N + l*N + n'] = w3[k, co, l] * (n == n')
    w3 = _uniform(ks[16], (3, L2, L), L * 3)
    b3 = _uniform(ks[17], (L2, 1), L * 3)
    eye_n = jnp.eye(N, dtype=jnp.float32)
    w3big = w3[:, :, None, :, None] * eye_n[None, None, :, None, :]
    w3big = jnp.transpose(w3big, (1, 2, 0, 3, 4)).reshape(L2 * N, 3 * L * N)

    # conv3 bias + bn_2 (eval) tiled to channel-major rows (co*N + n), one column slab.
    g2 = 1.0 + 0.1 * jax.random.normal(ks[18], (L2, 1), jnp.float32)
    be2 = 0.1 * jax.random.normal(ks[19], (L2, 1), jnp.float32)
    rm2 = 0.1 * jax.random.normal(ks[20], (L2, 1), jnp.float32)
    rv2 = 1.0 + 0.1 * jnp.abs(jax.random.normal(ks[21], (L2, 1), jnp.float32))
    bn2_s = g2 / jnp.sqrt(rv2 + 1e-5)
    bn2_b = be2 - rm2 * bn2_s
    stride3 = _up8(L2 * N)
    col3 = (jnp.zeros((3 * stride3, 1), jnp.float32)
            .at[0:L2 * N].set(jnp.repeat(b3, N, axis=0))
            .at[stride3:stride3 + L2 * N].set(jnp.repeat(bn2_s, N, axis=0))
            .at[2 * stride3:2 * stride3 + L2 * N].set(jnp.repeat(bn2_b, N, axis=0)))

    # fc1: torch flat order d*2L + co -> kernel row order co*4H + d (permuted once).
    d_fc1 = L2 * H4
    w_fc1 = _uniform(ks[22], (d_fc1, 256), d_fc1)
    w_fc1 = jnp.transpose(w_fc1.reshape(H4, L2, 256), (1, 0, 2)).reshape(d_fc1, 256)
    b_fc1 = _uniform(ks[23], (1, 256), d_fc1)
    ofc1b = _up8(d_fc1)
    fc1 = (jnp.zeros((ofc1b + 1, 256), jnp.float32)
           .at[0:d_fc1].set(w_fc1).at[ofc1b:ofc1b + 1].set(b_fc1))

    # fc2 (weight rows + bias row).
    fc2 = jnp.concatenate([_uniform(ks[24], (256, num_classes), 256),
                           _uniform(ks[25], (1, num_classes), 256)], axis=0)

    return {"c1": c1, "c2": c2, "lstm": lstm, "w3": w3big, "col3": col3,
            "fc1": fc1, "fc2": fc2}


if __name__ == "__main__":
    input_size, hidden_size, len_seq, num_classes = 4, 32, 8, 5
    batch = 2

    key = jax.random.PRNGKey(0)
    kx, kp = jax.random.split(key)
    x = jax.random.normal(kx, (batch, input_size, len_seq), jnp.float32)
    params = init_params(kp, input_size, hidden_size, len_seq, num_classes, batch)

    out = jax.jit(cnn_forward)(params, x)
    out = jax.block_until_ready(out)
    assert out.shape == (batch, num_classes)
    assert out.dtype == jnp.float32
    assert bool(jnp.all(jnp.isfinite(out)))
    print("KERNEL_OK")
</pallas_src>

<mosaic_0001>
module attributes {stable_mosaic.version = 11 : i64} {
  func.func @_cnn_fused_kernel(%arg0: memref<16x12xf32, #tpu.memory_space<vmem>>, %arg1: memref<17x32xf32, #tpu.memory_space<vmem>>, %arg2: memref<113x64xf32, #tpu.memory_space<vmem>>, %arg3: memref<457x512xf32, #tpu.memory_space<vmem>>, %arg4: memref<32x48xf32, #tpu.memory_space<vmem>>, %arg5: memref<96x1xf32, #tpu.memory_space<vmem>>, %arg6: memref<2049x256xf32, #tpu.memory_space<vmem>>, %arg7: memref<257x5xf32, #tpu.memory_space<vmem>>, %arg8: memref<2x5xf32, #tpu.memory_space<vmem>>, %arg9: memref<20x32xf32, #tpu.memory_space<vmem>>, %arg10: memref<16x128xf32, #tpu.memory_space<vmem>>, %arg11: memref<2x2048xf32, #tpu.memory_space<vmem>>) attributes {dimension_semantics = [], scalar_prefetch = 0 : i64, scratch_operands = 3 : i64, tpu.core_type = #tpu.core_type<tc>} {
    %c0 = arith.constant 0 : index
    %c0_0 = arith.constant 0 : index
    %0 = vector.load %arg0[%c0, %c0_0] : memref<16x12xf32, #tpu.memory_space<vmem>>, vector<16x12xf32>
    %c0_1 = arith.constant 0 : index
    %c0_2 = arith.constant 0 : index
    %1 = vector.load %arg1[%c0_1, %c0_2] : memref<17x32xf32, #tpu.memory_space<vmem>>, vector<12x32xf32>
    %cst = arith.constant dense<0.000000e+00> : vector<16x32xf32>
    %2 = tpu.matmul %0, %1, %cst {dimension_numbers = #tpu.dot_dimension_numbers<[1], [0], [0], [1], [0, 0, 1, 1], [], []>} : vector<16x12xf32>, vector<12x32xf32>, vector<16x32xf32> -> vector<16x32xf32>
    %c16 = arith.constant 16 : index
    %c0_3 = arith.constant 0 : index
    %3 = vector.load %arg1[%c16, %c0_3] : memref<17x32xf32, #tpu.memory_space<vmem>>, vector<1x32xf32>
    %4 = vector.broadcast %3 : vector<1x32xf32> to vector<16x32xf32>
    %5 = arith.addf %2, %4 : vector<16x32xf32>
    %cst_4 = arith.constant 0.000000e+00 : f32
    %6 = vector.broadcast %cst_4 : f32 to vector<16x32xf32>
    %7 = arith.maximumf %5, %6 : vector<16x32xf32>
    %cst_5 = arith.constant 0.000000e+00 : f32
    %8 = vector.broadcast %cst_5 : f32 to vector<20x32xf32>
    %c0_6 = arith.constant 0 : index
    %c0_7 = arith.constant 0 : index
    %9 = vector.load %arg9[%c0_6, %c0_7] : memref<20x32xf32, #tpu.memory_space<vmem>>, vector<20x32xf32>
    tpu.vector_store %arg9[%c0_6, %c0_7], %8 {strides = array<i32>} : memref<20x32xf32, #tpu.memory_space<vmem>>, vector<20x32xf32>,
    %c2 = arith.constant 2 : index
    %c0_8 = arith.constant 0 : index
    %10 = vector.load %arg9[%c2, %c0_8] : memref<20x32xf32, #tpu.memory_space<vmem>>, vector<16x32xf32>
    tpu.vector_store %arg9[%c2, %c0_8], %7 {strides = array<i32>} : memref<20x32xf32, #tpu.memory_space<vmem>>, vector<16x32xf32>,
    %c0_9 = arith.constant 0 : index
    %c0_10 = arith.constant 0 : index
    %11 = vector.load %arg9[%c0_9, %c0_10] : memref<20x32xf32, #tpu.memory_space<vmem>>, vector<16x32xf32>
    %c4 = arith.constant 4 : index
    %c0_11 = arith.constant 0 : index
    %12 = vector.load %arg9[%c4, %c0_11] : memref<20x32xf32, #tpu.memory_space<vmem>>, vector<16x32xf32>
    %c0_12 = arith.constant 0 : index
    %c0_13 = arith.constant 0 : index
    %13 = vector.load %arg2[%c0_12, %c0_13] : memref<113x64xf32, #tpu.memory_space<vmem>>, vector<32x64xf32>
    %cst_14 = arith.constant dense<0.000000e+00> : vector<16x64xf32>
    %14 = tpu.matmul %11, %13, %cst_14 {dimension_numbers = #tpu.dot_dimension_numbers<[1], [0], [0], [1], [0, 0, 1, 1], [], []>} : vector<16x32xf32>, vector<32x64xf32>, vector<16x64xf32> -> vector<16x64xf32>
    %c32 = arith.constant 32 : index
    %c0_15 = arith.constant 0 : index
    %15 = vector.load %arg2[%c32, %c0_15] : memref<113x64xf32, #tpu.memory_space<vmem>>, vector<32x64xf32>
    %cst_16 = arith.constant dense<0.000000e+00> : vector<16x64xf32>
    %16 = tpu.matmul %7, %15, %cst_16 {dimension_numbers = #tpu.dot_dimension_numbers<[1], [0], [0], [1], [0, 0, 1, 1], [], []>} : vector<16x32xf32>, vector<32x64xf32>, vector<16x64xf32> -> vector<16x64xf32>
    %17 = arith.addf %14, %16 : vector<16x64xf32>
    %c64 = arith.constant 64 : index
    %c0_17 = arith.constant 0 : index
    %18 = vector.load %arg2[%c64, %c0_17] : memref<113x64xf32, #tpu.memory_space<vmem>>, vector<32x64xf32>
    %cst_18 = arith.constant dense<0.000000e+00> : vector<16x64xf32>
    %19 = tpu.matmul %12, %18, %cst_18 {dimension_numbers = #tpu.dot_dimension_numbers<[1], [0], [0], [1], [0, 0, 1, 1], [], []>} : vector<16x32xf32>, vector<32x64xf32>, vector<16x64xf32> -> vector<16x64xf32>
    %20 = arith.addf %17, %19 : vector<16x64xf32>
    %c96 = arith.constant 96 : index
    %c0_19 = arith.constant 0 : index
    %21 = vector.load %arg2[%c96, %c0_19] : memref<113x64xf32, #tpu.memory_space<vmem>>, vector<1x64xf32>
    %22 = vector.broadcast %21 : vector<1x64xf32> to vector<16x64xf32>
    %23 = arith.addf %20, %22 : vector<16x64xf32>
    %cst_20 = arith.constant 0.000000e+00 : f32
    %24 = vector.broadcast %cst_20 : f32 to vector<16x64xf32>
    %25 = arith.maximumf %23, %24 : vector<16x64xf32>
    %c104 = arith.constant 104 : index
    %c0_21 = arith.constant 0 : index
    %26 = vector.load %arg2[%c104, %c0_21] : memref<113x64xf32, #tpu.memory_space<vmem>>, vector<1x64xf32>
    %27 = vector.broadcast %26 : vector<1x64xf32> to vector<16x64xf32>
    %28 = arith.mulf %25, %27 : vector<16x64xf32>
    %c112 = arith.constant 112 : index
    %c0_22 = arith.constant 0 : index
    %29 = vector.load %arg2[%c112, %c0_22] : memref<113x64xf32, #tpu.memory_space<vmem>>, vector<1x64xf32>
    %30 = vector.broadcast %29 : vector<1x64xf32> to vector<16x64xf32>
    %31 = arith.addf %28, %30 : vector<16x64xf32>
    %c64_23 = arith.constant 64 : index
    %c0_24 = arith.constant 0 : index
    %32 = vector.load %arg3[%c64_23, %c0_24] : memref<457x512xf32, #tpu.memory_space<vmem>>, vector<128x512xf32>
    %c200 = arith.constant 200 : index
    %c0_25 = arith.constant 0 : index
    %33 = vector.load %arg3[%c200, %c0_25] : memref<457x512xf32, #tpu.memory_space<vmem>>, vector<128x512xf32>
    %c328 = arith.constant 328 : index
    %c0_26 = arith.constant 0 : index
    %34 = vector.load %arg3[%c328, %c0_26] : memref<457x512xf32, #tpu.memory_space<vmem>>, vector<128x512xf32>
    %c456 = arith.constant 456 : index
    %c0_27 = arith.constant 0 : index
    %35 = vector.load %arg3[%c456, %c0_27] : memref<457x512xf32, #tpu.memory_space<vmem>>, vector<1x512xf32>
    %c0_28 = arith.constant 0 : index
    %c0_29 = arith.constant 0 : index
    %36 = vector.load %arg3[%c0_28, %c0_29] : memref<457x512xf32, #tpu.memory_space<vmem>>, vector<64x512xf32>
    %cst_30 = arith.constant dense<0.000000e+00> : vector<16x512xf32>
    %37 = tpu.matmul %31, %36, %cst_30 {dimension_numbers = #tpu.dot_dimension_numbers<[1], [0], [0], [1], [0, 0, 1, 1], [], []>} : vector<16x64xf32>, vector<64x512xf32>, vector<16x512xf32> -> vector<16x512xf32>
    %c192 = arith.constant 192 : index
    %c0_31 = arith.constant 0 : index
    %38 = vector.load %arg3[%c192, %c0_31] : memref<457x512xf32, #tpu.memory_space<vmem>>, vector<1x512xf32>
    %39 = vector.broadcast %38 : vector<1x512xf32> to vector<16x512xf32>
    %40 = arith.addf %37, %39 : vector<16x512xf32>
    %cst_32 = arith.constant 0.000000e+00 : f32
    %41 = vector.broadcast %cst_32 : f32 to vector<2x128xf32>
    %cst_33 = arith.constant 0.000000e+00 : f32
    %42 = vector.broadcast %cst_33 : f32 to vector<2x128xf32>
    %cst_34 = arith.constant 0.000000e+00 : f32
    %43 = vector.broadcast %cst_34 : f32 to vector<2x128xf32>
    %cst_35 = arith.constant 0.000000e+00 : f32
    %44 = vector.broadcast %cst_35 : f32 to vector<2x128xf32>
    %45 = vector.extract_strided_slice %40 {offsets = [0, 0], sizes = [2, 512], strides = [1, 1]} : vector<16x512xf32> to vector<2x512xf32>
    %cst_36 = arith.constant dense<0.000000e+00> : vector<2x512xf32>
    %46 = tpu.matmul %41, %32, %cst_36 {dimension_numbers = #tpu.dot_dimension_numbers<[1], [0], [0], [1], [0, 0, 1, 1], [], []>} : vector<2x128xf32>, vector<128x512xf32>, vector<2x512xf32> -> vector<2x512xf32>
    %47 = arith.addf %45, %46 : vector<2x512xf32>
    %48 = vector.extract_strided_slice %47 {offsets = [0, 0], sizes = [2, 128], strides = [1, 1]} : vector<2x512xf32> to vector<2x128xf32>
    %49 = arith.negf %48 : vector<2x128xf32>
    %50 = math.exp %49 : vector<2x128xf32>
    %cst_37 = arith.constant 1.000000e+00 : f32
    %51 = vector.broadcast %cst_37 : f32 to vector<2x128xf32>
    %52 = arith.addf %51, %50 : vector<2x128xf32>
    %53 = arith.divf %51, %52 : vector<2x128xf32>
    %54 = vector.extract_strided_slice %47 {offsets = [0, 128], sizes = [2, 128], strides = [1, 1]} : vector<2x512xf32> to vector<2x128xf32>
    %55 = arith.negf %54 : vector<2x128xf32>
    %56 = math.exp %55 : vector<2x128xf32>
    %cst_38 = arith.constant 1.000000e+00 : f32
    %57 = vector.broadcast %cst_38 : f32 to vector<2x128xf32>
    %58 = arith.addf %57, %56 : vector<2x128xf32>
    %59 = arith.divf %57, %58 : vector<2x128xf32>
    %60 = vector.extract_strided_slice %47 {offsets = [0, 256], sizes = [2, 128], strides = [1, 1]} : vector<2x512xf32> to vector<2x128xf32>
    %61 = math.tanh %60 : vector<2x128xf32>
    %62 = vector.extract_strided_slice %47 {offsets = [0, 384], sizes = [2, 128], strides = [1, 1]} : vector<2x512xf32> to vector<2x128xf32>
    %63 = arith.negf %62 : vector<2x128xf32>
    %64 = math.exp %63 : vector<2x128xf32>
    %cst_39 = arith.constant 1.000000e+00 : f32
    %65 = vector.broadcast %cst_39 : f32 to vector<2x128xf32>
    %66 = arith.addf %65, %64 : vector<2x128xf32>
    %67 = arith.divf %65, %66 : vector<2x128xf32>
    %68 = arith.mulf %59, %42 : vector<2x128xf32>
    %69 = arith.mulf %53, %61 : vector<2x128xf32>
    %70 = arith.addf %68, %69 : vector<2x128xf32>
    %71 = math.tanh %70 : vector<2x128xf32>
    %72 = arith.mulf %67, %71 : vector<2x128xf32>
    %cst_40 = arith.constant dense<0.000000e+00> : vector<2x512xf32>
    %73 = tpu.matmul %72, %33, %cst_40 {dimension_numbers = #tpu.dot_dimension_numbers<[1], [0], [0], [1], [0, 0, 1, 1], [], []>} : vector<2x128xf32>, vector<128x512xf32>, vector<2x512xf32> -> vector<2x512xf32>
    %74 = vector.broadcast %35 : vector<1x512xf32> to vector<2x512xf32>
    %75 = arith.addf %73, %74 : vector<2x512xf32>
    %cst_41 = arith.constant dense<0.000000e+00> : vector<2x512xf32>
    %76 = tpu.matmul %43, %34, %cst_41 {dimension_numbers = #tpu.dot_dimension_numbers<[1], [0], [0], [1], [0, 0, 1, 1], [], []>} : vector<2x128xf32>, vector<128x512xf32>, vector<2x512xf32> -> vector<2x512xf32>
    %77 = arith.addf %75, %76 : vector<2x512xf32>
    %78 = vector.extract_strided_slice %77 {offsets = [0, 0], sizes = [2, 128], strides = [1, 1]} : vector<2x512xf32> to vector<2x128xf32>
    %79 = arith.negf %78 : vector<2x128xf32>
    %80 = math.exp %79 : vector<2x128xf32>
    %cst_42 = arith.constant 1.000000e+00 : f32
    %81 = vector.broadcast %cst_42 : f32 to vector<2x128xf32>
    %82 = arith.addf %81, %80 : vector<2x128xf32>
    %83 = arith.divf %81, %82 : vector<2x128xf32>
    %84 = vector.extract_strided_slice %77 {offsets = [0, 128], sizes = [2, 128], strides = [1, 1]} : vector<2x512xf32> to vector<2x128xf32>
    %85 = arith.negf %84 : vector<2x128xf32>
    %86 = math.exp %85 : vector<2x128xf32>
    %cst_43 = arith.constant 1.000000e+00 : f32
    %87 = vector.broadcast %cst_43 : f32 to vector<2x128xf32>
    %88 = arith.addf %87, %86 : vector<2x128xf32>
    %89 = arith.divf %87, %88 : vector<2x128xf32>
    %90 = vector.extract_strided_slice %77 {offsets = [0, 256], sizes = [2, 128], strides = [1, 1]} : vector<2x512xf32> to vector<2x128xf32>
    %91 = math.tanh %90 : vector<2x128xf32>
    %92 = vector.extract_strided_slice %77 {offsets = [0, 384], sizes = [2, 128], strides = [1, 1]} : vector<2x512xf32> to vector<2x128xf32>
    %93 = arith.negf %92 : vector<2x128xf32>
    %94 = math.exp %93 : vector<2x128xf32>
    %cst_44 = arith.constant 1.000000e+00 : f32
    %95 = vector.broadcast %cst_44 : f32 to vector<2x128xf32>
    %96 = arith.addf %95, %94 : vector<2x128xf32>
    %97 = arith.divf %95, %96 : vector<2x128xf32>
    %98 = arith.mulf %89, %44 : vector<2x128xf32>
    %99 = arith.mulf %83, %91 : vector<2x128xf32>
    %100 = arith.addf %98, %99 : vector<2x128xf32>
    %101 = math.tanh %100 : vector<2x128xf32>
    %102 = arith.mulf %97, %101 : vector<2x128xf32>
    %c0_45 = arith.constant 0 : index
    %c0_46 = arith.constant 0 : index
    %103 = vector.load %arg10[%c0_45, %c0_46] : memref<16x128xf32, #tpu.memory_space<vmem>>, vector<2x128xf32>
    tpu.vector_store %arg10[%c0_45, %c0_46], %102 {strides = array<i32>} : memref<16x128xf32, #tpu.memory_space<vmem>>, vector<2x128xf32>,
    %104 = vector.extract_strided_slice %40 {offsets = [2, 0], sizes = [2, 512], strides = [1, 1]} : vector<16x512xf32> to vector<2x512xf32>
    %cst_47 = arith.constant dense<0.000000e+00> : vector<2x512xf32>
    %105 = tpu.matmul %72, %32, %cst_47 {dimension_numbers = #tpu.dot_dimension_numbers<[1], [0], [0], [1], [0, 0, 1, 1], [], []>} : vector<2x128xf32>, vector<128x512xf32>, vector<2x512xf32> -> vector<2x512xf32>
    %106 = arith.addf %104, %105 : vector<2x512xf32>
    %107 = vector.extract_strided_slice %106 {offsets = [0, 0], sizes = [2, 128], strides = [1, 1]} : vector<2x512xf32> to vector<2x128xf32>
    %108 = arith.negf %107 : vector<2x128xf32>
    %109 = math.exp %108 : vector<2x128xf32>
    %cst_48 = arith.constant 1.000000e+00 : f32
    %110 = vector.broadcast %cst_48 : f32 to vector<2x128xf32>
    %111 = arith.addf %110, %109 : vector<2x128xf32>
    %112 = arith.divf %110, %111 : vector<2x128xf32>
    %113 = vector.extract_strided_slice %106 {offsets = [0, 128], sizes = [2, 128], strides = [1, 1]} : vector<2x512xf32> to vector<2x128xf32>
    %114 = arith.negf %113 : vector<2x128xf32>
    %115 = math.exp %114 : vector<2x128xf32>
    %cst_49 = arith.constant 1.000000e+00 : f32
    %116 = vector.broadcast %cst_49 : f32 to vector<2x128xf32>
    %117 = arith.addf %116, %115 : vector<2x128xf32>
    %118 = arith.divf %116, %117 : vector<2x128xf32>
    %119 = vector.extract_strided_slice %106 {offsets = [0, 256], sizes = [2, 128], strides = [1, 1]} : vector<2x512xf32> to vector<2x128xf32>
    %120 = math.tanh %119 : vector<2x128xf32>
    %121 = vector.extract_strided_slice %106 {offsets = [0, 384], sizes = [2, 128], strides = [1, 1]} : vector<2x512xf32> to vector<2x128xf32>
    %122 = arith.negf %121 : vector<2x128xf32>
    %123 = math.exp %122 : vector<2x128xf32>
    %cst_50 = arith.constant 1.000000e+00 : f32
    %124 = vector.broadcast %cst_50 : f32 to vector<2x128xf32>
    %125 = arith.addf %124, %123 : vector<2x128xf32>
    %126 = arith.divf %124, %125 : vector<2x128xf32>
    %127 = arith.mulf %118, %70 : vector<2x128xf32>
    %128 = arith.mulf %112, %120 : vector<2x128xf32>
    %129 = arith.addf %127, %128 : vector<2x128xf32>
    %130 = math.tanh %129 : vector<2x128xf32>
    %131 = arith.mulf %126, %130 : vector<2x128xf32>
    %cst_51 = arith.constant dense<0.000000e+00> : vector<2x512xf32>
    %132 = tpu.matmul %131, %33, %cst_51 {dimension_numbers = #tpu.dot_dimension_numbers<[1], [0], [0], [1], [0, 0, 1, 1], [], []>} : vector<2x128xf32>, vector<128x512xf32>, vector<2x512xf32> -> vector<2x512xf32>
    %133 = vector.broadcast %35 : vector<1x512xf32> to vector<2x512xf32>
    %134 = arith.addf %132, %133 : vector<2x512xf32>
    %cst_52 = arith.constant dense<0.000000e+00> : vector<2x512xf32>
    %135 = tpu.matmul %102, %34, %cst_52 {dimension_numbers = #tpu.dot_dimension_numbers<[1], [0], [0], [1], [0, 0, 1, 1], [], []>} : vector<2x128xf32>, vector<128x512xf32>, vector<2x512xf32> -> vector<2x512xf32>
    %136 = arith.addf %134, %135 : vector<2x512xf32>
    %137 = vector.extract_strided_slice %136 {offsets = [0, 0], sizes = [2, 128], strides = [1, 1]} : vector<2x512xf32> to vector<2x128xf32>
    %138 = arith.negf %137 : vector<2x128xf32>
    %139 = math.exp %138 : vector<2x128xf32>
    %cst_53 = arith.constant 1.000000e+00 : f32
    %140 = vector.broadcast %cst_53 : f32 to vector<2x128xf32>
    %141 = arith.addf %140, %139 : vector<2x128xf32>
    %142 = arith.divf %140, %141 : vector<2x128xf32>
    %143 = vector.extract_strided_slice %136 {offsets = [0, 128], sizes = [2, 128], strides = [1, 1]} : vector<2x512xf32> to vector<2x128xf32>
    %144 = arith.negf %143 : vector<2x128xf32>
    %145 = math.exp %144 : vector<2x128xf32>
    %cst_54 = arith.constant 1.000000e+00 : f32
    %146 = vector.broadcast %cst_54 : f32 to vector<2x128xf32>
    %147 = arith.addf %146, %145 : vector<2x128xf32>
    %148 = arith.divf %146, %147 : vector<2x128xf32>
    %149 = vector.extract_strided_slice %136 {offsets = [0, 256], sizes = [2, 128], strides = [1, 1]} : vector<2x512xf32> to vector<2x128xf32>
    %150 = math.tanh %149 : vector<2x128xf32>
    %151 = vector.extract_strided_slice %136 {offsets = [0, 384], sizes = [2, 128], strides = [1, 1]} : vector<2x512xf32> to vector<2x128xf32>
    %152 = arith.negf %151 : vector<2x128xf32>
    %153 = math.exp %152 : vector<2x128xf32>
    %cst_55 = arith.constant 1.000000e+00 : f32
    %154 = vector.broadcast %cst_55 : f32 to vector<2x128xf32>
    %155 = arith.addf %154, %153 : vector<2x128xf32>
    %156 = arith.divf %154, %155 : vector<2x128xf32>
    %157 = arith.mulf %148, %100 : vector<2x128xf32>
    %158 = arith.mulf %142, %150 : vector<2x128xf32>
    %159 = arith.addf %157, %158 : vector<2x128xf32>
    %160 = math.tanh %159 : vector<2x128xf32>
    %161 = arith.mulf %156, %160 : vector<2x128xf32>
    %c2_56 = arith.constant 2 : index
    %c0_57 = arith.constant 0 : index
    %162 = vector.load %arg10[%c2_56, %c0_57] : memref<16x128xf32, #tpu.memory_space<vmem>>, vector<2x128xf32>
    tpu.vector_store %arg10[%c2_56, %c0_57], %161 {strides = array<i32>} : memref<16x128xf32, #tpu.memory_space<vmem>>, vector<2x128xf32>,
    %163 = vector.extract_strided_slice %40 {offsets = [4, 0], sizes = [2, 512], strides = [1, 1]} : vector<16x512xf32> to vector<2x512xf32>
    %cst_58 = arith.constant dense<0.000000e+00> : vector<2x512xf32>
    %164 = tpu.matmul %131, %32, %cst_58 {dimension_numbers = #tpu.dot_dimension_numbers<[1], [0], [0], [1], [0, 0, 1, 1], [], []>} : vector<2x128xf32>, vector<128x512xf32>, vector<2x512xf32> -> vector<2x512xf32>
    %165 = arith.addf %163, %164 : vector<2x512xf32>
    %166 = vector.extract_strided_slice %165 {offsets = [0, 0], sizes = [2, 128], strides = [1, 1]} : vector<2x512xf32> to vector<2x128xf32>
    %167 = arith.negf %166 : vector<2x128xf32>
    %168 = math.exp %167 : vector<2x128xf32>
    %cst_59 = arith.constant 1.000000e+00 : f32
    %169 = vector.broadcast %cst_59 : f32 to vector<2x128xf32>
    %170 = arith.addf %169, %168 : vector<2x128xf32>
    %171 = arith.divf %169, %170 : vector<2x128xf32>
    %172 = vector.extract_strided_slice %165 {offsets = [0, 128], sizes = [2, 128], strides = [1, 1]} : vector<2x512xf32> to vector<2x128xf32>
    %173 = arith.negf %172 : vector<2x128xf32>
    %174 = math.exp %173 : vector<2x128xf32>
    %cst_60 = arith.constant 1.000000e+00 : f32
    %175 = vector.broadcast %cst_60 : f32 to vector<2x128xf32>
    %176 = arith.addf %175, %174 : vector<2x128xf32>
    %177 = arith.divf %175, %176 : vector<2x128xf32>
    %178 = vector.extract_strided_slice %165 {offsets = [0, 256], sizes = [2, 128], strides = [1, 1]} : vector<2x512xf32> to vector<2x128xf32>
    %179 = math.tanh %178 : vector<2x128xf32>
    %180 = vector.extract_strided_slice %165 {offsets = [0, 384], sizes = [2, 128], strides = [1, 1]} : vector<2x512xf32> to vector<2x128xf32>
    %181 = arith.negf %180 : vector<2x128xf32>
    %182 = math.exp %181 : vector<2x128xf32>
    %cst_61 = arith.constant 1.000000e+00 : f32
    %183 = vector.broadcast %cst_61 : f32 to vector<2x128xf32>
    %184 = arith.addf %183, %182 : vector<2x128xf32>
    %185 = arith.divf %183, %184 : vector<2x128xf32>
    %186 = arith.mulf %177, %129 : vector<2x128xf32>
    %187 = arith.mulf %171, %179 : vector<2x128xf32>
    %188 = arith.addf %186, %187 : vector<2x128xf32>
    %189 = math.tanh %188 : vector<2x128xf32>
    %190 = arith.mulf %185, %189 : vector<2x128xf32>
    %cst_62 = arith.constant dense<0.000000e+00> : vector<2x512xf32>
    %191 = tpu.matmul %190, %33, %cst_62 {dimension_numbers = #tpu.dot_dimension_numbers<[1], [0], [0], [1], [0, 0, 1, 1], [], []>} : vector<2x128xf32>, vector<128x512xf32>, vector<2x512xf32> -> vector<2x512xf32>
    %192 = vector.broadcast %35 : vector<1x512xf32> to vector<2x512xf32>
    %193 = arith.addf %191, %192 : vector<2x512xf32>
    %cst_63 = arith.constant dense<0.000000e+00> : vector<2x512xf32>
    %194 = tpu.matmul %161, %34, %cst_63 {dimension_numbers = #tpu.dot_dimension_numbers<[1], [0], [0], [1], [0, 0, 1, 1], [], []>} : vector<2x128xf32>, vector<128x512xf32>, vector<2x512xf32> -> vector<2x512xf32>
    %195 = arith.addf %193, %194 : vector<2x512xf32>
    %196 = vector.extract_strided_slice %195 {offsets = [0, 0], sizes = [2, 128], strides = [1, 1]} : vector<2x512xf32> to vector<2x128xf32>
    %197 = arith.negf %196 : vector<2x128xf32>
    %198 = math.exp %197 : vector<2x128xf32>
    %cst_64 = arith.constant 1.000000e+00 : f32
    %199 = vector.broadcast %cst_64 : f32 to vector<2x128xf32>
    %200 = arith.addf %199, %198 : vector<2x128xf32>
    %201 = arith.divf %199, %200 : vector<2x128xf32>
    %202 = vector.extract_strided_slice %195 {offsets = [0, 128], sizes = [2, 128], strides = [1, 1]} : vector<2x512xf32> to vector<2x128xf32>
    %203 = arith.negf %202 : vector<2x128xf32>
    %204 = math.exp %203 : vector<2x128xf32>
    %cst_65 = arith.constant 1.000000e+00 : f32
    %205 = vector.broadcast %cst_65 : f32 to vector<2x128xf32>
    %206 = arith.addf %205, %204 : vector<2x128xf32>
    %207 = arith.divf %205, %206 : vector<2x128xf32>
    %208 = vector.extract_strided_slice %195 {offsets = [0, 256], sizes = [2, 128], strides = [1, 1]} : vector<2x512xf32> to vector<2x128xf32>
    %209 = math.tanh %208 : vector<2x128xf32>
    %210 = vector.extract_strided_slice %195 {offsets = [0, 384], sizes = [2, 128], strides = [1, 1]} : vector<2x512xf32> to vector<2x128xf32>
    %211 = arith.negf %210 : vector<2x128xf32>
    %212 = math.exp %211 : vector<2x128xf32>
    %cst_66 = arith.constant 1.000000e+00 : f32
    %213 = vector.broadcast %cst_66 : f32 to vector<2x128xf32>
    %214 = arith.addf %213, %212 : vector<2x128xf32>
    %215 = arith.divf %213, %214 : vector<2x128xf32>
    %216 = arith.mulf %207, %159 : vector<2x128xf32>
    %217 = arith.mulf %201, %209 : vector<2x128xf32>
    %218 = arith.addf %216, %217 : vector<2x128xf32>
    %219 = math.tanh %218 : vector<2x128xf32>
    %220 = arith.mulf %215, %219 : vector<2x128xf32>
    %c4_67 = arith.constant 4 : index
    %c0_68 = arith.constant 0 : index
    %221 = vector.load %arg10[%c4_67, %c0_68] : memref<16x128xf32, #tpu.memory_space<vmem>>, vector<2x128xf32>
    tpu.vector_store %arg10[%c4_67, %c0_68], %220 {strides = array<i32>} : memref<16x128xf32, #tpu.memory_space<vmem>>, vector<2x128xf32>,
    %222 = vector.extract_strided_slice %40 {offsets = [6, 0], sizes = [2, 512], strides = [1, 1]} : vector<16x512xf32> to vector<2x512xf32>
    %cst_69 = arith.constant dense<0.000000e+00> : vector<2x512xf32>
    %223 = tpu.matmul %190, %32, %cst_69 {dimension_numbers = #tpu.dot_dimension_numbers<[1], [0], [0], [1], [0, 0, 1, 1], [], []>} : vector<2x128xf32>, vector<128x512xf32>, vector<2x512xf32> -> vector<2x512xf32>
    %224 = arith.addf %222, %223 : vector<2x512xf32>
    %225 = vector.extract_strided_slice %224 {offsets = [0, 0], sizes = [2, 128], strides = [1, 1]} : vector<2x512xf32> to vector<2x128xf32>
    %226 = arith.negf %225 : vector<2x128xf32>
    %227 = math.exp %226 : vector<2x128xf32>
    %cst_70 = arith.constant 1.000000e+00 : f32
    %228 = vector.broadcast %cst_70 : f32 to vector<2x128xf32>
    %229 = arith.addf %228, %227 : vector<2x128xf32>
    %230 = arith.divf %228, %229 : vector<2x128xf32>
    %231 = vector.extract_strided_slice %224 {offsets = [0, 128], sizes = [2, 128], strides = [1, 1]} : vector<2x512xf32> to vector<2x128xf32>
    %232 = arith.negf %231 : vector<2x128xf32>
    %233 = math.exp %232 : vector<2x128xf32>
    %cst_71 = arith.constant 1.000000e+00 : f32
    %234 = vector.broadcast %cst_71 : f32 to vector<2x128xf32>
    %235 = arith.addf %234, %233 : vector<2x128xf32>
    %236 = arith.divf %234, %235 : vector<2x128xf32>
    %237 = vector.extract_strided_slice %224 {offsets = [0, 256], sizes = [2, 128], strides = [1, 1]} : vector<2x512xf32> to vector<2x128xf32>
    %238 = math.tanh %237 : vector<2x128xf32>
    %239 = vector.extract_strided_slice %224 {offsets = [0, 384], sizes = [2, 128], strides = [1, 1]} : vector<2x512xf32> to vector<2x128xf32>
    %240 = arith.negf %239 : vector<2x128xf32>
    %241 = math.exp %240 : vector<2x128xf32>
    %cst_72 = arith.constant 1.000000e+00 : f32
    %242 = vector.broadcast %cst_72 : f32 to vector<2x128xf32>
    %243 = arith.addf %242, %241 : vector<2x128xf32>
    %244 = arith.divf %242, %243 : vector<2x128xf32>
    %245 = arith.mulf %236, %188 : vector<2x128xf32>
    %246 = arith.mulf %230, %238 : vector<2x128xf32>
    %247 = arith.addf %245, %246 : vector<2x128xf32>
    %248 = math.tanh %247 : vector<2x128xf32>
    %249 = arith.mulf %244, %248 : vector<2x128xf32>
    %cst_73 = arith.constant dense<0.000000e+00> : vector<2x512xf32>
    %250 = tpu.matmul %249, %33, %cst_73 {dimension_numbers = #tpu.dot_dimension_numbers<[1], [0], [0], [1], [0, 0, 1, 1], [], []>} : vector<2x128xf32>, vector<128x512xf32>, vector<2x512xf32> -> vector<2x512xf32>
    %251 = vector.broadcast %35 : vector<1x512xf32> to vector<2x512xf32>
    %252 = arith.addf %250, %251 : vector<2x512xf32>
    %cst_74 = arith.constant dense<0.000000e+00> : vector<2x512xf32>
    %253 = tpu.matmul %220, %34, %cst_74 {dimension_numbers = #tpu.dot_dimension_numbers<[1], [0], [0], [1], [0, 0, 1, 1], [], []>} : vector<2x128xf32>, vector<128x512xf32>, vector<2x512xf32> -> vector<2x512xf32>
    %254 = arith.addf %252, %253 : vector<2x512xf32>
    %255 = vector.extract_strided_slice %254 {offsets = [0, 0], sizes = [2, 128], strides = [1, 1]} : vector<2x512xf32> to vector<2x128xf32>
    %256 = arith.negf %255 : vector<2x128xf32>
    %257 = math.exp %256 : vector<2x128xf32>
    %cst_75 = arith.constant 1.000000e+00 : f32
    %258 = vector.broadcast %cst_75 : f32 to vector<2x128xf32>
    %259 = arith.addf %258, %257 : vector<2x128xf32>
    %260 = arith.divf %258, %259 : vector<2x128xf32>
    %261 = vector.extract_strided_slice %254 {offsets = [0, 128], sizes = [2, 128], strides = [1, 1]} : vector<2x512xf32> to vector<2x128xf32>
    %262 = arith.negf %261 : vector<2x128xf32>
    %263 = math.exp %262 : vector<2x128xf32>
    %cst_76 = arith.constant 1.000000e+00 : f32
    %264 = vector.broadcast %cst_76 : f32 to vector<2x128xf32>
    %265 = arith.addf %264, %263 : vector<2x128xf32>
    %266 = arith.divf %264, %265 : vector<2x128xf32>
    %267 = vector.extract_strided_slice %254 {offsets = [0, 256], sizes = [2, 128], strides = [1, 1]} : vector<2x512xf32> to vector<2x128xf32>
    %268 = math.tanh %267 : vector<2x128xf32>
    %269 = vector.extract_strided_slice %254 {offsets = [0, 384], sizes = [2, 128], strides = [1, 1]} : vector<2x512xf32> to vector<2x128xf32>
    %270 = arith.negf %269 : vector<2x128xf32>
    %271 = math.exp %270 : vector<2x128xf32>
    %cst_77 = arith.constant 1.000000e+00 : f32
    %272 = vector.broadcast %cst_77 : f32 to vector<2x128xf32>
    %273 = arith.addf %272, %271 : vector<2x128xf32>
    %274 = arith.divf %272, %273 : vector<2x128xf32>
    %275 = arith.mulf %266, %218 : vector<2x128xf32>
    %276 = arith.mulf %260, %268 : vector<2x128xf32>
    %277 = arith.addf %275, %276 : vector<2x128xf32>
    %278 = math.tanh %277 : vector<2x128xf32>
    %279 = arith.mulf %274, %278 : vector<2x128xf32>
    %c6 = arith.constant 6 : index
    %c0_78 = arith.constant 0 : index
    %280 = vector.load %arg10[%c6, %c0_78] : memref<16x128xf32, #tpu.memory_space<vmem>>, vector<2x128xf32>
    tpu.vector_store %arg10[%c6, %c0_78], %279 {strides = array<i32>} : memref<16x128xf32, #tpu.memory_space<vmem>>, vector<2x128xf32>,
    %281 = vector.extract_strided_slice %40 {offsets = [8, 0], sizes = [2, 512], strides = [1, 1]} : vector<16x512xf32> to vector<2x512xf32>
    %cst_79 = arith.constant dense<0.000000e+00> : vector<2x512xf32>
    %282 = tpu.matmul %249, %32, %cst_79 {dimension_numbers = #tpu.dot_dimension_numbers<[1], [0], [0], [1], [0, 0, 1, 1], [], []>} : vector<2x128xf32>, vector<128x512xf32>, vector<2x512xf32> -> vector<2x512xf32>
    %283 = arith.addf %281, %282 : vector<2x512xf32>
    %284 = vector.extract_strided_slice %283 {offsets = [0, 0], sizes = [2, 128], strides = [1, 1]} : vector<2x512xf32> to vector<2x128xf32>
    %285 = arith.negf %284 : vector<2x128xf32>
    %286 = math.exp %285 : vector<2x128xf32>
    %cst_80 = arith.constant 1.000000e+00 : f32
    %287 = vector.broadcast %cst_80 : f32 to vector<2x128xf32>
    %288 = arith.addf %287, %286 : vector<2x128xf32>
    %289 = arith.divf %287, %288 : vector<2x128xf32>
    %290 = vector.extract_strided_slice %283 {offsets = [0, 128], sizes = [2, 128], strides = [1, 1]} : vector<2x512xf32> to vector<2x128xf32>
    %291 = arith.negf %290 : vector<2x128xf32>
    %292 = math.exp %291 : vector<2x128xf32>
    %cst_81 = arith.constant 1.000000e+00 : f32
    %293 = vector.broadcast %cst_81 : f32 to vector<2x128xf32>
    %294 = arith.addf %293, %292 : vector<2x128xf32>
    %295 = arith.divf %293, %294 : vector<2x128xf32>
    %296 = vector.extract_strided_slice %283 {offsets = [0, 256], sizes = [2, 128], strides = [1, 1]} : vector<2x512xf32> to vector<2x128xf32>
    %297 = math.tanh %296 : vector<2x128xf32>
    %298 = vector.extract_strided_slice %283 {offsets = [0, 384], sizes = [2, 128], strides = [1, 1]} : vector<2x512xf32> to vector<2x128xf32>
    %299 = arith.negf %298 : vector<2x128xf32>
    %300 = math.exp %299 : vector<2x128xf32>
    %cst_82 = arith.constant 1.000000e+00 : f32
    %301 = vector.broadcast %cst_82 : f32 to vector<2x128xf32>
    %302 = arith.addf %301, %300 : vector<2x128xf32>
    %303 = arith.divf %301, %302 : vector<2x128xf32>
    %304 = arith.mulf %295, %247 : vector<2x128xf32>
    %305 = arith.mulf %289, %297 : vector<2x128xf32>
    %306 = arith.addf %304, %305 : vector<2x128xf32>
    %307 = math.tanh %306 : vector<2x128xf32>
    %308 = arith.mulf %303, %307 : vector<2x128xf32>
    %cst_83 = arith.constant dense<0.000000e+00> : vector<2x512xf32>
    %309 = tpu.matmul %308, %33, %cst_83 {dimension_numbers = #tpu.dot_dimension_numbers<[1], [0], [0], [1], [0, 0, 1, 1], [], []>} : vector<2x128xf32>, vector<128x512xf32>, vector<2x512xf32> -> vector<2x512xf32>
    %310 = vector.broadcast %35 : vector<1x512xf32> to vector<2x512xf32>
    %311 = arith.addf %309, %310 : vector<2x512xf32>
    %cst_84 = arith.constant dense<0.000000e+00> : vector<2x512xf32>
    %312 = tpu.matmul %279, %34, %cst_84 {dimension_numbers = #tpu.dot_dimension_numbers<[1], [0], [0], [1], [0, 0, 1, 1], [], []>} : vector<2x128xf32>, vector<128x512xf32>, vector<2x512xf32> -> vector<2x512xf32>
    %313 = arith.addf %311, %312 : vector<2x512xf32>
    %314 = vector.extract_strided_slice %313 {offsets = [0, 0], sizes = [2, 128], strides = [1, 1]} : vector<2x512xf32> to vector<2x128xf32>
    %315 = arith.negf %314 : vector<2x128xf32>
    %316 = math.exp %315 : vector<2x128xf32>
    %cst_85 = arith.constant 1.000000e+00 : f32
    %317 = vector.broadcast %cst_85 : f32 to vector<2x128xf32>
    %318 = arith.addf %317, %316 : vector<2x128xf32>
    %319 = arith.divf %317, %318 : vector<2x128xf32>
    %320 = vector.extract_strided_slice %313 {offsets = [0, 128], sizes = [2, 128], strides = [1, 1]} : vector<2x512xf32> to vector<2x128xf32>
    %321 = arith.negf %320 : vector<2x128xf32>
    %322 = math.exp %321 : vector<2x128xf32>
    %cst_86 = arith.constant 1.000000e+00 : f32
    %323 = vector.broadcast %cst_86 : f32 to vector<2x128xf32>
    %324 = arith.addf %323, %322 : vector<2x128xf32>
    %325 = arith.divf %323, %324 : vector<2x128xf32>
    %326 = vector.extract_strided_slice %313 {offsets = [0, 256], sizes = [2, 128], strides = [1, 1]} : vector<2x512xf32> to vector<2x128xf32>
    %327 = math.tanh %326 : vector<2x128xf32>
    %328 = vector.extract_strided_slice %313 {offsets = [0, 384], sizes = [2, 128], strides = [1, 1]} : vector<2x512xf32> to vector<2x128xf32>
    %329 = arith.negf %328 : vector<2x128xf32>
    %330 = math.exp %329 : vector<2x128xf32>
    %cst_87 = arith.constant 1.000000e+00 : f32
    %331 = vector.broadcast %cst_87 : f32 to vector<2x128xf32>
    %332 = arith.addf %331, %330 : vector<2x128xf32>
    %333 = arith.divf %331, %332 : vector<2x128xf32>
    %334 = arith.mulf %325, %277 : vector<2x128xf32>
    %335 = arith.mulf %319, %327 : vector<2x128xf32>
    %336 = arith.addf %334, %335 : vector<2x128xf32>
    %337 = math.tanh %336 : vector<2x128xf32>
    %338 = arith.mulf %333, %337 : vector<2x128xf32>
    %c8 = arith.constant 8 : index
    %c0_88 = arith.constant 0 : index
    %339 = vector.load %arg10[%c8, %c0_88] : memref<16x128xf32, #tpu.memory_space<vmem>>, vector<2x128xf32>
    tpu.vector_store %arg10[%c8, %c0_88], %338 {strides = array<i32>} : memref<16x128xf32, #tpu.memory_space<vmem>>, vector<2x128xf32>,
    %340 = vector.extract_strided_slice %40 {offsets = [10, 0], sizes = [2, 512], strides = [1, 1]} : vector<16x512xf32> to vector<2x512xf32>
    %cst_89 = arith.constant dense<0.000000e+00> : vector<2x512xf32>
    %341 = tpu.matmul %308, %32, %cst_89 {dimension_numbers = #tpu.dot_dimension_numbers<[1], [0], [0], [1], [0, 0, 1, 1], [], []>} : vector<2x128xf32>, vector<128x512xf32>, vector<2x512xf32> -> vector<2x512xf32>
    %342 = arith.addf %340, %341 : vector<2x512xf32>
    %343 = vector.extract_strided_slice %342 {offsets = [0, 0], sizes = [2, 128], strides = [1, 1]} : vector<2x512xf32> to vector<2x128xf32>
    %344 = arith.negf %343 : vector<2x128xf32>
    %345 = math.exp %344 : vector<2x128xf32>
    %cst_90 = arith.constant 1.000000e+00 : f32
    %346 = vector.broadcast %cst_90 : f32 to vector<2x128xf32>
    %347 = arith.addf %346, %345 : vector<2x128xf32>
    %348 = arith.divf %346, %347 : vector<2x128xf32>
    %349 = vector.extract_strided_slice %342 {offsets = [0, 128], sizes = [2, 128], strides = [1, 1]} : vector<2x512xf32> to vector<2x128xf32>
    %350 = arith.negf %349 : vector<2x128xf32>
    %351 = math.exp %350 : vector<2x128xf32>
    %cst_91 = arith.constant 1.000000e+00 : f32
    %352 = vector.broadcast %cst_91 : f32 to vector<2x128xf32>
    %353 = arith.addf %352, %351 : vector<2x128xf32>
    %354 = arith.divf %352, %353 : vector<2x128xf32>
    %355 = vector.extract_strided_slice %342 {offsets = [0, 256], sizes = [2, 128], strides = [1, 1]} : vector<2x512xf32> to vector<2x128xf32>
    %356 = math.tanh %355 : vector<2x128xf32>
    %357 = vector.extract_strided_slice %342 {offsets = [0, 384], sizes = [2, 128], strides = [1, 1]} : vector<2x512xf32> to vector<2x128xf32>
    %358 = arith.negf %357 : vector<2x128xf32>
    %359 = math.exp %358 : vector<2x128xf32>
    %cst_92 = arith.constant 1.000000e+00 : f32
    %360 = vector.broadcast %cst_92 : f32 to vector<2x128xf32>
    %361 = arith.addf %360, %359 : vector<2x128xf32>
    %362 = arith.divf %360, %361 : vector<2x128xf32>
    %363 = arith.mulf %354, %306 : vector<2x128xf32>
    %364 = arith.mulf %348, %356 : vector<2x128xf32>
    %365 = arith.addf %363, %364 : vector<2x128xf32>
    %366 = math.tanh %365 : vector<2x128xf32>
    %367 = arith.mulf %362, %366 : vector<2x128xf32>
    %cst_93 = arith.constant dense<0.000000e+00> : vector<2x512xf32>
    %368 = tpu.matmul %367, %33, %cst_93 {dimension_numbers = #tpu.dot_dimension_numbers<[1], [0], [0], [1], [0, 0, 1, 1], [], []>} : vector<2x128xf32>, vector<128x512xf32>, vector<2x512xf32> -> vector<2x512xf32>
    %369 = vector.broadcast %35 : vector<1x512xf32> to vector<2x512xf32>
    %370 = arith.addf %368, %369 : vector<2x512xf32>
    %cst_94 = arith.constant dense<0.000000e+00> : vector<2x512xf32>
    %371 = tpu.matmul %338, %34, %cst_94 {dimension_numbers = #tpu.dot_dimension_numbers<[1], [0], [0], [1], [0, 0, 1, 1], [], []>} : vector<2x128xf32>, vector<128x512xf32>, vector<2x512xf32> -> vector<2x512xf32>
    %372 = arith.addf %370, %371 : vector<2x512xf32>
    %373 = vector.extract_strided_slice %372 {offsets = [0, 0], sizes = [2, 128], strides = [1, 1]} : vector<2x512xf32> to vector<2x128xf32>
    %374 = arith.negf %373 : vector<2x128xf32>
    %375 = math.exp %374 : vector<2x128xf32>
    %cst_95 = arith.constant 1.000000e+00 : f32
    %376 = vector.broadcast %cst_95 : f32 to vector<2x128xf32>
    %377 = arith.addf %376, %375 : vector<2x128xf32>
    %378 = arith.divf %376, %377 : vector<2x128xf32>
    %379 = vector.extract_strided_slice %372 {offsets = [0, 128], sizes = [2, 128], strides = [1, 1]} : vector<2x512xf32> to vector<2x128xf32>
    %380 = arith.negf %379 : vector<2x128xf32>
    %381 = math.exp %380 : vector<2x128xf32>
    %cst_96 = arith.constant 1.000000e+00 : f32
    %382 = vector.broadcast %cst_96 : f32 to vector<2x128xf32>
    %383 = arith.addf %382, %381 : vector<2x128xf32>
    %384 = arith.divf %382, %383 : vector<2x128xf32>
    %385 = vector.extract_strided_slice %372 {offsets = [0, 256], sizes = [2, 128], strides = [1, 1]} : vector<2x512xf32> to vector<2x128xf32>
    %386 = math.tanh %385 : vector<2x128xf32>
    %387 = vector.extract_strided_slice %372 {offsets = [0, 384], sizes = [2, 128], strides = [1, 1]} : vector<2x512xf32> to vector<2x128xf32>
    %388 = arith.negf %387 : vector<2x128xf32>
    %389 = math.exp %388 : vector<2x128xf32>
    %cst_97 = arith.constant 1.000000e+00 : f32
    %390 = vector.broadcast %cst_97 : f32 to vector<2x128xf32>
    %391 = arith.addf %390, %389 : vector<2x128xf32>
    %392 = arith.divf %390, %391 : vector<2x128xf32>
    %393 = arith.mulf %384, %336 : vector<2x128xf32>
    %394 = arith.mulf %378, %386 : vector<2x128xf32>
    %395 = arith.addf %393, %394 : vector<2x128xf32>
    %396 = math.tanh %395 : vector<2x128xf32>
    %397 = arith.mulf %392, %396 : vector<2x128xf32>
    %c10 = arith.constant 10 : index
    %c0_98 = arith.constant 0 : index
    %398 = vector.load %arg10[%c10, %c0_98] : memref<16x128xf32, #tpu.memory_space<vmem>>, vector<2x128xf32>
    tpu.vector_store %arg10[%c10, %c0_98], %397 {strides = array<i32>} : memref<16x128xf32, #tpu.memory_space<vmem>>, vector<2x128xf32>,
    %399 = vector.extract_strided_slice %40 {offsets = [12, 0], sizes = [2, 512], strides = [1, 1]} : vector<16x512xf32> to vector<2x512xf32>
    %cst_99 = arith.constant dense<0.000000e+00> : vector<2x512xf32>
    %400 = tpu.matmul %367, %32, %cst_99 {dimension_numbers = #tpu.dot_dimension_numbers<[1], [0], [0], [1], [0, 0, 1, 1], [], []>} : vector<2x128xf32>, vector<128x512xf32>, vector<2x512xf32> -> vector<2x512xf32>
    %401 = arith.addf %399, %400 : vector<2x512xf32>
    %402 = vector.extract_strided_slice %401 {offsets = [0, 0], sizes = [2, 128], strides = [1, 1]} : vector<2x512xf32> to vector<2x128xf32>
    %403 = arith.negf %402 : vector<2x128xf32>
    %404 = math.exp %403 : vector<2x128xf32>
    %cst_100 = arith.constant 1.000000e+00 : f32
    %405 = vector.broadcast %cst_100 : f32 to vector<2x128xf32>
    %406 = arith.addf %405, %404 : vector<2x128xf32>
    %407 = arith.divf %405, %406 : vector<2x128xf32>
    %408 = vector.extract_strided_slice %401 {offsets = [0, 128], sizes = [2, 128], strides = [1, 1]} : vector<2x512xf32> to vector<2x128xf32>
    %409 = arith.negf %408 : vector<2x128xf32>
    %410 = math.exp %409 : vector<2x128xf32>
    %cst_101 = arith.constant 1.000000e+00 : f32
    %411 = vector.broadcast %cst_101 : f32 to vector<2x128xf32>
    %412 = arith.addf %411, %410 : vector<2x128xf32>
    %413 = arith.divf %411, %412 : vector<2x128xf32>
    %414 = vector.extract_strided_slice %401 {offsets = [0, 256], sizes = [2, 128], strides = [1, 1]} : vector<2x512xf32> to vector<2x128xf32>
    %415 = math.tanh %414 : vector<2x128xf32>
    %416 = vector.extract_strided_slice %401 {offsets = [0, 384], sizes = [2, 128], strides = [1, 1]} : vector<2x512xf32> to vector<2x128xf32>
    %417 = arith.negf %416 : vector<2x128xf32>
    %418 = math.exp %417 : vector<2x128xf32>
    %cst_102 = arith.constant 1.000000e+00 : f32
    %419 = vector.broadcast %cst_102 : f32 to vector<2x128xf32>
    %420 = arith.addf %419, %418 : vector<2x128xf32>
    %421 = arith.divf %419, %420 : vector<2x128xf32>
    %422 = arith.mulf %413, %365 : vector<2x128xf32>
    %423 = arith.mulf %407, %415 : vector<2x128xf32>
    %424 = arith.addf %422, %423 : vector<2x128xf32>
    %425 = math.tanh %424 : vector<2x128xf32>
    %426 = arith.mulf %421, %425 : vector<2x128xf32>
    %cst_103 = arith.constant dense<0.000000e+00> : vector<2x512xf32>
    %427 = tpu.matmul %426, %33, %cst_103 {dimension_numbers = #tpu.dot_dimension_numbers<[1], [0], [0], [1], [0, 0, 1, 1], [], []>} : vector<2x128xf32>, vector<128x512xf32>, vector<2x512xf32> -> vector<2x512xf32>
    %428 = vector.broadcast %35 : vector<1x512xf32> to vector<2x512xf32>
    %429 = arith.addf %427, %428 : vector<2x512xf32>
    %cst_104 = arith.constant dense<0.000000e+00> : vector<2x512xf32>
    %430 = tpu.matmul %397, %34, %cst_104 {dimension_numbers = #tpu.dot_dimension_numbers<[1], [0], [0], [1], [0, 0, 1, 1], [], []>} : vector<2x128xf32>, vector<128x512xf32>, vector<2x512xf32> -> vector<2x512xf32>
    %431 = arith.addf %429, %430 : vector<2x512xf32>
    %432 = vector.extract_strided_slice %431 {offsets = [0, 0], sizes = [2, 128], strides = [1, 1]} : vector<2x512xf32> to vector<2x128xf32>
    %433 = arith.negf %432 : vector<2x128xf32>
    %434 = math.exp %433 : vector<2x128xf32>
    %cst_105 = arith.constant 1.000000e+00 : f32
    %435 = vector.broadcast %cst_105 : f32 to vector<2x128xf32>
    %436 = arith.addf %435, %434 : vector<2x128xf32>
    %437 = arith.divf %435, %436 : vector<2x128xf32>
    %438 = vector.extract_strided_slice %431 {offsets = [0, 128], sizes = [2, 128], strides = [1, 1]} : vector<2x512xf32> to vector<2x128xf32>
    %439 = arith.negf %438 : vector<2x128xf32>
    %440 = math.exp %439 : vector<2x128xf32>
    %cst_106 = arith.constant 1.000000e+00 : f32
    %441 = vector.broadcast %cst_106 : f32 to vector<2x128xf32>
    %442 = arith.addf %441, %440 : vector<2x128xf32>
    %443 = arith.divf %441, %442 : vector<2x128xf32>
    %444 = vector.extract_strided_slice %431 {offsets = [0, 256], sizes = [2, 128], strides = [1, 1]} : vector<2x512xf32> to vector<2x128xf32>
    %445 = math.tanh %444 : vector<2x128xf32>
    %446 = vector.extract_strided_slice %431 {offsets = [0, 384], sizes = [2, 128], strides = [1, 1]} : vector<2x512xf32> to vector<2x128xf32>
    %447 = arith.negf %446 : vector<2x128xf32>
    %448 = math.exp %447 : vector<2x128xf32>
    %cst_107 = arith.constant 1.000000e+00 : f32
    %449 = vector.broadcast %cst_107 : f32 to vector<2x128xf32>
    %450 = arith.addf %449, %448 : vector<2x128xf32>
    %451 = arith.divf %449, %450 : vector<2x128xf32>
    %452 = arith.mulf %443, %395 : vector<2x128xf32>
    %453 = arith.mulf %437, %445 : vector<2x128xf32>
    %454 = arith.addf %452, %453 : vector<2x128xf32>
    %455 = math.tanh %454 : vector<2x128xf32>
    %456 = arith.mulf %451, %455 : vector<2x128xf32>
    %c12 = arith.constant 12 : index
    %c0_108 = arith.constant 0 : index
    %457 = vector.load %arg10[%c12, %c0_108] : memref<16x128xf32, #tpu.memory_space<vmem>>, vector<2x128xf32>
    tpu.vector_store %arg10[%c12, %c0_108], %456 {strides = array<i32>} : memref<16x128xf32, #tpu.memory_space<vmem>>, vector<2x128xf32>,
    %458 = vector.extract_strided_slice %40 {offsets = [14, 0], sizes = [2, 512], strides = [1, 1]} : vector<16x512xf32> to vector<2x512xf32>
    %cst_109 = arith.constant dense<0.000000e+00> : vector<2x512xf32>
    %459 = tpu.matmul %426, %32, %cst_109 {dimension_numbers = #tpu.dot_dimension_numbers<[1], [0], [0], [1], [0, 0, 1, 1], [], []>} : vector<2x128xf32>, vector<128x512xf32>, vector<2x512xf32> -> vector<2x512xf32>
    %460 = arith.addf %458, %459 : vector<2x512xf32>
    %461 = vector.extract_strided_slice %460 {offsets = [0, 0], sizes = [2, 128], strides = [1, 1]} : vector<2x512xf32> to vector<2x128xf32>
    %462 = arith.negf %461 : vector<2x128xf32>
    %463 = math.exp %462 : vector<2x128xf32>
    %cst_110 = arith.constant 1.000000e+00 : f32
    %464 = vector.broadcast %cst_110 : f32 to vector<2x128xf32>
    %465 = arith.addf %464, %463 : vector<2x128xf32>
    %466 = arith.divf %464, %465 : vector<2x128xf32>
    %467 = vector.extract_strided_slice %460 {offsets = [0, 128], sizes = [2, 128], strides = [1, 1]} : vector<2x512xf32> to vector<2x128xf32>
    %468 = arith.negf %467 : vector<2x128xf32>
    %469 = math.exp %468 : vector<2x128xf32>
    %cst_111 = arith.constant 1.000000e+00 : f32
    %470 = vector.broadcast %cst_111 : f32 to vector<2x128xf32>
    %471 = arith.addf %470, %469 : vector<2x128xf32>
    %472 = arith.divf %470, %471 : vector<2x128xf32>
    %473 = vector.extract_strided_slice %460 {offsets = [0, 256], sizes = [2, 128], strides = [1, 1]} : vector<2x512xf32> to vector<2x128xf32>
    %474 = math.tanh %473 : vector<2x128xf32>
    %475 = vector.extract_strided_slice %460 {offsets = [0, 384], sizes = [2, 128], strides = [1, 1]} : vector<2x512xf32> to vector<2x128xf32>
    %476 = arith.negf %475 : vector<2x128xf32>
    %477 = math.exp %476 : vector<2x128xf32>
    %cst_112 = arith.constant 1.000000e+00 : f32
    %478 = vector.broadcast %cst_112 : f32 to vector<2x128xf32>
    %479 = arith.addf %478, %477 : vector<2x128xf32>
    %480 = arith.divf %478, %479 : vector<2x128xf32>
    %481 = arith.mulf %472, %424 : vector<2x128xf32>
    %482 = arith.mulf %466, %474 : vector<2x128xf32>
    %483 = arith.addf %481, %482 : vector<2x128xf32>
    %484 = math.tanh %483 : vector<2x128xf32>
    %485 = arith.mulf %480, %484 : vector<2x128xf32>
    %cst_113 = arith.constant dense<0.000000e+00> : vector<2x512xf32>
    %486 = tpu.matmul %485, %33, %cst_113 {dimension_numbers = #tpu.dot_dimension_numbers<[1], [0], [0], [1], [0, 0, 1, 1], [], []>} : vector<2x128xf32>, vector<128x512xf32>, vector<2x512xf32> -> vector<2x512xf32>
    %487 = vector.broadcast %35 : vector<1x512xf32> to vector<2x512xf32>
    %488 = arith.addf %486, %487 : vector<2x512xf32>
    %cst_114 = arith.constant dense<0.000000e+00> : vector<2x512xf32>
    %489 = tpu.matmul %456, %34, %cst_114 {dimension_numbers = #tpu.dot_dimension_numbers<[1], [0], [0], [1], [0, 0, 1, 1], [], []>} : vector<2x128xf32>, vector<128x512xf32>, vector<2x512xf32> -> vector<2x512xf32>
    %490 = arith.addf %488, %489 : vector<2x512xf32>
    %491 = vector.extract_strided_slice %490 {offsets = [0, 0], sizes = [2, 128], strides = [1, 1]} : vector<2x512xf32> to vector<2x128xf32>
    %492 = arith.negf %491 : vector<2x128xf32>
    %493 = math.exp %492 : vector<2x128xf32>
    %cst_115 = arith.constant 1.000000e+00 : f32
    %494 = vector.broadcast %cst_115 : f32 to vector<2x128xf32>
    %495 = arith.addf %494, %493 : vector<2x128xf32>
    %496 = arith.divf %494, %495 : vector<2x128xf32>
    %497 = vector.extract_strided_slice %490 {offsets = [0, 128], sizes = [2, 128], strides = [1, 1]} : vector<2x512xf32> to vector<2x128xf32>
    %498 = arith.negf %497 : vector<2x128xf32>
    %499 = math.exp %498 : vector<2x128xf32>
    %cst_116 = arith.constant 1.000000e+00 : f32
    %500 = vector.broadcast %cst_116 : f32 to vector<2x128xf32>
    %501 = arith.addf %500, %499 : vector<2x128xf32>
    %502 = arith.divf %500, %501 : vector<2x128xf32>
    %503 = vector.extract_strided_slice %490 {offsets = [0, 256], sizes = [2, 128], strides = [1, 1]} : vector<2x512xf32> to vector<2x128xf32>
    %504 = math.tanh %503 : vector<2x128xf32>
    %505 = vector.extract_strided_slice %490 {offsets = [0, 384], sizes = [2, 128], strides = [1, 1]} : vector<2x512xf32> to vector<2x128xf32>
    %506 = arith.negf %505 : vector<2x128xf32>
    %507 = math.exp %506 : vector<2x128xf32>
    %cst_117 = arith.constant 1.000000e+00 : f32
    %508 = vector.broadcast %cst_117 : f32 to vector<2x128xf32>
    %509 = arith.addf %508, %507 : vector<2x128xf32>
    %510 = arith.divf %508, %509 : vector<2x128xf32>
    %511 = arith.mulf %502, %454 : vector<2x128xf32>
    %512 = arith.mulf %496, %504 : vector<2x128xf32>
    %513 = arith.addf %511, %512 : vector<2x128xf32>
    %514 = math.tanh %513 : vector<2x128xf32>
    %515 = arith.mulf %510, %514 : vector<2x128xf32>
    %c14 = arith.constant 14 : index
    %c0_118 = arith.constant 0 : index
    %516 = vector.load %arg10[%c14, %c0_118] : memref<16x128xf32, #tpu.memory_space<vmem>>, vector<2x128xf32>
    tpu.vector_store %arg10[%c14, %c0_118], %515 {strides = array<i32>} : memref<16x128xf32, #tpu.memory_space<vmem>>, vector<2x128xf32>,
    %c0_119 = arith.constant 0 : index
    %c0_120 = arith.constant 0 : index
    %517 = vector.load %arg10[%c0_119, %c0_120] : memref<16x128xf32, #tpu.memory_space<vmem>>, vector<16x128xf32>
    %518 = tpu.iota {dimensions = array<i32: 1>} : vector<16x128xi32>
    %c0_i32 = arith.constant 0 : i32
    %519 = vector.broadcast %c0_i32 : i32 to vector<16x128xi32>
    %520 = arith.cmpi eq, %518, %519 : vector<16x128xi32>
    %c1_i32 = arith.constant 1 : i32
    %521 = tpu.dynamic_rotate %517 by %c1_i32 dim 1 : vector<16x128xf32>, i32 -> vector<16x128xf32>
    %cst_121 = arith.constant 0.000000e+00 : f32
    %522 = vector.broadcast %cst_121 : f32 to vector<16x128xf32>
    %523 = arith.select %520, %522, %521 : vector<16x128xi1>, vector<16x128xf32>
    %c127_i32 = arith.constant 127 : i32
    %524 = vector.broadcast %c127_i32 : i32 to vector<16x128xi32>
    %525 = arith.cmpi eq, %518, %524 : vector<16x128xi32>
    %c127_i32_122 = arith.constant 127 : i32
    %526 = tpu.dynamic_rotate %517 by %c127_i32_122 dim 1 : vector<16x128xf32>, i32 -> vector<16x128xf32>
    %cst_123 = arith.constant 0.000000e+00 : f32
    %527 = vector.broadcast %cst_123 : f32 to vector<16x128xf32>
    %528 = arith.select %525, %527, %526 : vector<16x128xi1>, vector<16x128xf32>
    %529 = tpu.concatenate %523, %517, %528 in 0 : vector<16x128xf32>, vector<16x128xf32>, vector<16x128xf32> -> vector<48x128xf32>
    %c0_124 = arith.constant 0 : index
    %c0_125 = arith.constant 0 : index
    %530 = vector.load %arg4[%c0_124, %c0_125] : memref<32x48xf32, #tpu.memory_space<vmem>>, vector<32x48xf32>
    %cst_126 = arith.constant dense<0.000000e+00> : vector<32x128xf32>
    %531 = tpu.matmul %530, %529, %cst_126 {dimension_numbers = #tpu.dot_dimension_numbers<[1], [0], [0], [1], [0, 0, 1, 1], [], []>} : vector<32x48xf32>, vector<48x128xf32>, vector<32x128xf32> -> vector<32x128xf32>
    %c0_127 = arith.constant 0 : index
    %c0_128 = arith.constant 0 : index
    %532 = vector.load %arg5[%c0_127, %c0_128] : memref<96x1xf32, #tpu.memory_space<vmem>>, vector<32x1xf32>
    %533 = vector.broadcast %532 : vector<32x1xf32> to vector<32x128xf32>
    %534 = arith.addf %531, %533 : vector<32x128xf32>
    %cst_129 = arith.constant 0.000000e+00 : f32
    %535 = vector.broadcast %cst_129 : f32 to vector<32x128xf32>
    %536 = arith.maximumf %534, %535 : vector<32x128xf32>
    %c32_130 = arith.constant 32 : index
    %c0_131 = arith.constant 0 : index
    %537 = vector.load %arg5[%c32_130, %c0_131] : memref<96x1xf32, #tpu.memory_space<vmem>>, vector<32x1xf32>
    %538 = vector.broadcast %537 : vector<32x1xf32> to vector<32x128xf32>
    %539 = arith.mulf %536, %538 : vector<32x128xf32>
    %c64_132 = arith.constant 64 : index
    %c0_133 = arith.constant 0 : index
    %540 = vector.load %arg5[%c64_132, %c0_133] : memref<96x1xf32, #tpu.memory_space<vmem>>, vector<32x1xf32>
    %541 = vector.broadcast %540 : vector<32x1xf32> to vector<32x128xf32>
    %542 = arith.addf %539, %541 : vector<32x128xf32>
    %cst_134 = arith.constant 0.000000e+00 : f32
    %543 = vector.broadcast %cst_134 : f32 to vector<32x128xf32>
    %544 = arith.maximumf %542, %543 : vector<32x128xf32>
    %545 = vector.extract_strided_slice %544 {offsets = [0, 0], sizes = [2, 128], strides = [1, 1]} : vector<32x128xf32> to vector<2x128xf32>
    %c0_135 = arith.constant 0 : index
    %c0_136 = arith.constant 0 : index
    %546 = vector.load %arg11[%c0_135, %c0_136] : memref<2x2048xf32, #tpu.memory_space<vmem>>, vector<2x128xf32>
    tpu.vector_store %arg11[%c0_135, %c0_136], %545 {strides = array<i32>} : memref<2x2048xf32, #tpu.memory_space<vmem>>, vector<2x128xf32>,
    %547 = vector.extract_strided_slice %544 {offsets = [2, 0], sizes = [2, 128], strides = [1, 1]} : vector<32x128xf32> to vector<2x128xf32>
    %c0_137 = arith.constant 0 : index
    %c128 = arith.constant 128 : index
    %548 = vector.load %arg11[%c0_137, %c128] : memref<2x2048xf32, #tpu.memory_space<vmem>>, vector<2x128xf32>
    tpu.vector_store %arg11[%c0_137, %c128], %547 {strides = array<i32>} : memref<2x2048xf32, #tpu.memory_space<vmem>>, vector<2x128xf32>,
    %549 = vector.extract_strided_slice %544 {offsets = [4, 0], sizes = [2, 128], strides = [1, 1]} : vector<32x128xf32> to vector<2x128xf32>
    %c0_138 = arith.constant 0 : index
    %c256 = arith.constant 256 : index
    %550 = vector.load %arg11[%c0_138, %c256] : memref<2x2048xf32, #tpu.memory_space<vmem>>, vector<2x128xf32>
    tpu.vector_store %arg11[%c0_138, %c256], %549 {strides = array<i32>} : memref<2x2048xf32, #tpu.memory_space<vmem>>, vector<2x128xf32>,
    %551 = vector.extract_strided_slice %544 {offsets = [6, 0], sizes = [2, 128], strides = [1, 1]} : vector<32x128xf32> to vector<2x128xf32>
    %c0_139 = arith.constant 0 : index
    %c384 = arith.constant 384 : index
    %552 = vector.load %arg11[%c0_139, %c384] : memref<2x2048xf32, #tpu.memory_space<vmem>>, vector<2x128xf32>
    tpu.vector_store %arg11[%c0_139, %c384], %551 {strides = array<i32>} : memref<2x2048xf32, #tpu.memory_space<vmem>>, vector<2x128xf32>,
    %553 = vector.extract_strided_slice %544 {offsets = [8, 0], sizes = [2, 128], strides = [1, 1]} : vector<32x128xf32> to vector<2x128xf32>
    %c0_140 = arith.constant 0 : index
    %c512 = arith.constant 512 : index
    %554 = vector.load %arg11[%c0_140, %c512] : memref<2x2048xf32, #tpu.memory_space<vmem>>, vector<2x128xf32>
    tpu.vector_store %arg11[%c0_140, %c512], %553 {strides = array<i32>} : memref<2x2048xf32, #tpu.memory_space<vmem>>, vector<2x128xf32>,
    %555 = vector.extract_strided_slice %544 {offsets = [10, 0], sizes = [2, 128], strides = [1, 1]} : vector<32x128xf32> to vector<2x128xf32>
    %c0_141 = arith.constant 0 : index
    %c640 = arith.constant 640 : index
    %556 = vector.load %arg11[%c0_141, %c640] : memref<2x2048xf32, #tpu.memory_space<vmem>>, vector<2x128xf32>
    tpu.vector_store %arg11[%c0_141, %c640], %555 {strides = array<i32>} : memref<2x2048xf32, #tpu.memory_space<vmem>>, vector<2x128xf32>,
    %557 = vector.extract_strided_slice %544 {offsets = [12, 0], sizes = [2, 128], strides = [1, 1]} : vector<32x128xf32> to vector<2x128xf32>
    %c0_142 = arith.constant 0 : index
    %c768 = arith.constant 768 : index
    %558 = vector.load %arg11[%c0_142, %c768] : memref<2x2048xf32, #tpu.memory_space<vmem>>, vector<2x128xf32>
    tpu.vector_store %arg11[%c0_142, %c768], %557 {strides = array<i32>} : memref<2x2048xf32, #tpu.memory_space<vmem>>, vector<2x128xf32>,
    %559 = vector.extract_strided_slice %544 {offsets = [14, 0], sizes = [2, 128], strides = [1, 1]} : vector<32x128xf32> to vector<2x128xf32>
    %c0_143 = arith.constant 0 : index
    %c896 = arith.constant 896 : index
    %560 = vector.load %arg11[%c0_143, %c896] : memref<2x2048xf32, #tpu.memory_space<vmem>>, vector<2x128xf32>
    tpu.vector_store %arg11[%c0_143, %c896], %559 {strides = array<i32>} : memref<2x2048xf32, #tpu.memory_space<vmem>>, vector<2x128xf32>,
    %561 = vector.extract_strided_slice %544 {offsets = [16, 0], sizes = [2, 128], strides = [1, 1]} : vector<32x128xf32> to vector<2x128xf32>
    %c0_144 = arith.constant 0 : index
    %c1024 = arith.constant 1024 : index
    %562 = vector.load %arg11[%c0_144, %c1024] : memref<2x2048xf32, #tpu.memory_space<vmem>>, vector<2x128xf32>
    tpu.vector_store %arg11[%c0_144, %c1024], %561 {strides = array<i32>} : memref<2x2048xf32, #tpu.memory_space<vmem>>, vector<2x128xf32>,
    %563 = vector.extract_strided_slice %544 {offsets = [18, 0], sizes = [2, 128], strides = [1, 1]} : vector<32x128xf32> to vector<2x128xf32>
    %c0_145 = arith.constant 0 : index
    %c1152 = arith.constant 1152 : index
    %564 = vector.load %arg11[%c0_145, %c1152] : memref<2x2048xf32, #tpu.memory_space<vmem>>, vector<2x128xf32>
    tpu.vector_store %arg11[%c0_145, %c1152], %563 {strides = array<i32>} : memref<2x2048xf32, #tpu.memory_space<vmem>>, vector<2x128xf32>,
    %565 = vector.extract_strided_slice %544 {offsets = [20, 0], sizes = [2, 128], strides = [1, 1]} : vector<32x128xf32> to vector<2x128xf32>
    %c0_146 = arith.constant 0 : index
    %c1280 = arith.constant 1280 : index
    %566 = vector.load %arg11[%c0_146, %c1280] : memref<2x2048xf32, #tpu.memory_space<vmem>>, vector<2x128xf32>
    tpu.vector_store %arg11[%c0_146, %c1280], %565 {strides = array<i32>} : memref<2x2048xf32, #tpu.memory_space<vmem>>, vector<2x128xf32>,
    %567 = vector.extract_strided_slice %544 {offsets = [22, 0], sizes = [2, 128], strides = [1, 1]} : vector<32x128xf32> to vector<2x128xf32>
    %c0_147 = arith.constant 0 : index
    %c1408 = arith.constant 1408 : index
    %568 = vector.load %arg11[%c0_147, %c1408] : memref<2x2048xf32, #tpu.memory_space<vmem>>, vector<2x128xf32>
    tpu.vector_store %arg11[%c0_147, %c1408], %567 {strides = array<i32>} : memref<2x2048xf32, #tpu.memory_space<vmem>>, vector<2x128xf32>,
    %569 = vector.extract_strided_slice %544 {offsets = [24, 0], sizes = [2, 128], strides = [1, 1]} : vector<32x128xf32> to vector<2x128xf32>
    %c0_148 = arith.constant 0 : index
    %c1536 = arith.constant 1536 : index
    %570 = vector.load %arg11[%c0_148, %c1536] : memref<2x2048xf32, #tpu.memory_space<vmem>>, vector<2x128xf32>
    tpu.vector_store %arg11[%c0_148, %c1536], %569 {strides = array<i32>} : memref<2x2048xf32, #tpu.memory_space<vmem>>, vector<2x128xf32>,
    %571 = vector.extract_strided_slice %544 {offsets = [26, 0], sizes = [2, 128], strides = [1, 1]} : vector<32x128xf32> to vector<2x128xf32>
    %c0_149 = arith.constant 0 : index
    %c1664 = arith.constant 1664 : index
    %572 = vector.load %arg11[%c0_149, %c1664] : memref<2x2048xf32, #tpu.memory_space<vmem>>, vector<2x128xf32>
    tpu.vector_store %arg11[%c0_149, %c1664], %571 {strides = array<i32>} : memref<2x2048xf32, #tpu.memory_space<vmem>>, vector<2x128xf32>,
    %573 = vector.extract_strided_slice %544 {offsets = [28, 0], sizes = [2, 128], strides = [1, 1]} : vector<32x128xf32> to vector<2x128xf32>
    %c0_150 = arith.constant 0 : index
    %c1792 = arith.constant 1792 : index
    %574 = vector.load %arg11[%c0_150, %c1792] : memref<2x2048xf32, #tpu.memory_space<vmem>>, vector<2x128xf32>
    tpu.vector_store %arg11[%c0_150, %c1792], %573 {strides = array<i32>} : memref<2x2048xf32, #tpu.memory_space<vmem>>, vector<2x128xf32>,
    %575 = vector.extract_strided_slice %544 {offsets = [30, 0], sizes = [2, 128], strides = [1, 1]} : vector<32x128xf32> to vector<2x128xf32>
    %c0_151 = arith.constant 0 : index
    %c1920 = arith.constant 1920 : index
    %576 = vector.load %arg11[%c0_151, %c1920] : memref<2x2048xf32, #tpu.memory_space<vmem>>, vector<2x128xf32>
    tpu.vector_store %arg11[%c0_151, %c1920], %575 {strides = array<i32>} : memref<2x2048xf32, #tpu.memory_space<vmem>>, vector<2x128xf32>,
    %c0_152 = arith.constant 0 : index
    %c0_153 = arith.constant 0 : index
    %577 = vector.load %arg11[%c0_152, %c0_153] : memref<2x2048xf32, #tpu.memory_space<vmem>>, vector<2x2048xf32>
    %c0_154 = arith.constant 0 : index
    %c0_155 = arith.constant 0 : index
    %578 = vector.load %arg6[%c0_154, %c0_155] : memref<2049x256xf32, #tpu.memory_space<vmem>>, vector<2048x256xf32>
    %cst_156 = arith.constant dense<0.000000e+00> : vector<2x256xf32>
    %579 = tpu.matmul %577, %578, %cst_156 {dimension_numbers = #tpu.dot_dimension_numbers<[1], [0], [0], [1], [0, 0, 1, 1], [], []>} : vector<2x2048xf32>, vector<2048x256xf32>, vector<2x256xf32> -> vector<2x256xf32>
    %c2048 = arith.constant 2048 : index
    %c0_157 = arith.constant 0 : index
    %580 = vector.load %arg6[%c2048, %c0_157] : memref<2049x256xf32, #tpu.memory_space<vmem>>, vector<1x256xf32>
    %581 = vector.broadcast %580 : vector<1x256xf32> to vector<2x256xf32>
    %582 = arith.addf %579, %581 : vector<2x256xf32>
    %cst_158 = arith.constant 0.000000e+00 : f32
    %583 = vector.broadcast %cst_158 : f32 to vector<2x256xf32>
    %584 = arith.maximumf %582, %583 : vector<2x256xf32>
    %c0_159 = arith.constant 0 : index
    %c0_160 = arith.constant 0 : index
    %585 = vector.load %arg7[%c0_159, %c0_160] : memref<257x5xf32, #tpu.memory_space<vmem>>, vector<256x5xf32>
    %cst_161 = arith.constant dense<0.000000e+00> : vector<2x5xf32>
    %586 = tpu.matmul %584, %585, %cst_161 {dimension_numbers = #tpu.dot_dimension_numbers<[1], [0], [0], [1], [0, 0, 1, 1], [], []>} : vector<2x256xf32>, vector<256x5xf32>, vector<2x5xf32> -> vector<2x5xf32>
    %c256_162 = arith.constant 256 : index
    %c0_163 = arith.constant 0 : index
    %587 = vector.load %arg7[%c256_162, %c0_163] : memref<257x5xf32, #tpu.memory_space<vmem>>, vector<1x5xf32>
    %588 = vector.broadcast %587 : vector<1x5xf32> to vector<2x5xf32>
    %589 = arith.addf %586, %588 : vector<2x5xf32>
    %c0_164 = arith.constant 0 : index
    %c0_165 = arith.constant 0 : index
    %590 = vector.load %arg8[%c0_164, %c0_165] : memref<2x5xf32, #tpu.memory_space<vmem>>, vector<2x5xf32>
    tpu.vector_store %arg8[%c0_164, %c0_165], %589 {strides = array<i32>} : memref<2x5xf32, #tpu.memory_space<vmem>>, vector<2x5xf32>,
    return
  }
}

</mosaic_0001>

<bundles_post_ra>
// kernel: cnn_forward.1
= control target key start
LH: loop header
LB: loop body
LE: loop exit
PB: predicated region body
PF: predicated region fallthrough
CT: control target
= control target key end

     0   :  { %13 = vsyncpa [#allocation6], 0  ;;  %s11390_s0 = inlined_call_operand.vmem [shape: f32[16,12], index: 0, kind: input, shape index: {}]   ;;  %s11391_s1 = inlined_call_operand.hbm [shape: f32[17,32], index: 1, kind: input, shape index: {}]   ;;  %s11392_s2 = inlined_call_operand.vmem [shape: f32[113,64], index: 2, kind: input, shape index: {}]   ;;  %s11393_s3 = inlined_call_operand.hbm [shape: f32[457,512], index: 3, kind: input, shape index: {}]   ;;  %s11394_s4 = inlined_call_operand.hbm [shape: f32[32,48], index: 4, kind: input, shape index: {}]   ;;  %s11395_s5 = inlined_call_operand.vmem [shape: f32[96,1], index: 5, kind: input, shape index: {}]   ;;  %s11396_s6 = inlined_call_operand.hbm [shape: f32[2049,256], index: 6, kind: input, shape index: {}]   ;;  %s11397_s7 = inlined_call_operand.vmem [shape: f32[257,5], index: 7, kind: input, shape index: {}]   ;;  %s11398_s8 = inlined_call_operand.hbm [shape: f32[2,5], index: 8, kind: output, shape index: {}]  }
   0x1   :  { %14 = vsyncpa [#allocation9], 0 }
   0x2   :  { %15 = vsyncpa [#allocation12], 0 }
   0x3   :  { %16 = vsyncpa [#allocation7], 0  ;;  %s7671_s27 = smov [#allocation8]  }
   0x4   :  { %s38_s28 = sshll.u32 %s7671_s27, 4  ;;  %s39_s28 = int_to_ptr.vmem [resolvable:$true] %s38_s28 }
   0x5   :  { %s7571_s29 = scalar_lea.vmem %s39_s28, 29696  ;;  %p7576_p1 = scmp.lt.s32.totalorder %s39_s28, %s39_s28 }
   0x6   :  { %p7572_p0 = scmp.ne.s32.totalorder %s39_s28, %s7571_s29  ;;  %p7577_p2 = scmp.lt.s32.totalorder %s7571_s29, %s7571_s29 }
   0x8   :  { %p7578_p3 = por %p7577_p2, %p7576_p1 }
   0xa   :  { %p7579_p4 = pnand %p7578_p3, %p7572_p0 }
   0xc   :  { %7582 = shalt.err (!%p7579_p4)
}
   0xd   :  { %s7672_s30 = smov 512   ;;  %s7673_s9 = smov 32  }
   0xe   :  { %44 = dma.hbm_to_vmem [thread:$0]  %s11393_s3, 29696, %s39_s28, [#allocation9], %s7672_s30, %s7672_s30, %s7673_s9  }
   0xf   :  { %s7674_s12 = smov [#allocation5]  }
  0x10   :  { %s24_s13 = sshll.u32 %s7674_s12, 4  ;;  %s25_s13 = int_to_ptr.vmem [resolvable:$true] %s24_s13 }
  0x11   :  { %s7591_s14 = scalar_lea.vmem %s25_s13, 384  ;;  %p7596_p6 = scmp.lt.s32.totalorder %s25_s13, %s25_s13 }
  0x12   :  { %p7592_p5 = scmp.ne.s32.totalorder %s25_s13, %s7591_s14  ;;  %p7597_p7 = scmp.lt.s32.totalorder %s7591_s14, %s7591_s14 }
  0x14   :  { %p7598_p8 = por %p7597_p7, %p7596_p6 }
  0x16   :  { %p7599_p9 = pnand %p7598_p8, %p7592_p5 }
  0x18   :  { %7602 = shalt.err (!%p7599_p9)
}
  0x19   :  { %s7675_s15 = smov 128   ;;  %s7676_s16 = smov 8  }
  0x1a   :  { %30 = dma.hbm_to_vmem [thread:$0]  %s11391_s1, 384, %s25_s13, [#allocation6], %s7675_s15, %s7675_s15, %s7676_s16  }
  0x1b   :  { %s7677_s19 = smov [#allocation10]   ;;  %s7678_s21 = smov [#allocation11]  }
  0x1c   :  { %s50_s20 = sshll.u32 %s7677_s19, 4  ;;  %s64_s3 = sshll.u32 %s7678_s21, 4  ;;  %s51_s20 = int_to_ptr.vmem [resolvable:$true] %s50_s20  ;;  %s65_s3 = int_to_ptr.vmem [resolvable:$true] %s64_s3 }
  0x1d   :  { %s7611_s22 = scalar_lea.vmem %s51_s20, 512  ;;  %p7616_p11 = scmp.lt.s32.totalorder %s51_s20, %s51_s20 }
  0x1e   :  { %p7612_p10 = scmp.ne.s32.totalorder %s51_s20, %s7611_s22  ;;  %p7617_p12 = scmp.lt.s32.totalorder %s7611_s22, %s7611_s22 }
  0x20   :  { %p7618_p13 = por %p7617_p12, %p7616_p11 }
  0x22   :  { %p7619_p0 = pnand %p7618_p13, %p7612_p10 }
  0x24   :  { %7622 = shalt.err (!%p7619_p0)
}
  0x25   :  { %56 = dma.hbm_to_vmem [thread:$0]  %s11394_s4, 512, %s51_s20, [#allocation9], %s7675_s15, %s7675_s15, %s7676_s16  }
  0x26   :  { %s7631_s25 = scalar_lea.vmem %s65_s3, 65792  ;;  %p7636_p2 = scmp.lt.s32.totalorder %s65_s3, %s65_s3 }
  0x27   :  { %p7632_p1 = scmp.ne.s32.totalorder %s65_s3, %s7631_s25  ;;  %p7637_p3 = scmp.lt.s32.totalorder %s7631_s25, %s7631_s25 }
  0x29   :  { %p7638_p4 = por %p7637_p3, %p7636_p2 }
  0x2b   :  { %p7639_p5 = pnand %p7638_p4, %p7632_p1 }
  0x2d   :  { %7642 = shalt.err (!%p7639_p5)
}
  0x2e   :  { %s7679_s1 = smov 256   ;;  %s7680_s26 = smov 16  }
  0x2f   :  { %70 = dma.hbm_to_vmem [thread:$0]  %s11396_s6, 65792, %s65_s3, [#allocation12], %s7679_s1, %s7679_s1, %s7680_s26  }
  0x30   :  { %7663 = dma.done.wait [#allocation6], 384  }
  0x31   :  { %7664 = vsyncadd [#allocation6], 4294966912 }
  0x32   :  { %7665 = dma.done.wait [#allocation9], 30208  }
  0x33   :  { %7666 = vsyncadd [#allocation9], 4294937088 }
  0x34   :  { %7667 = dma.done.wait [#allocation12], 65792  }
  0x35   :  { %7668 = vsyncadd [#allocation12], 4294901504  ;;  %vm101_vm0 = vcmask 1043456   ;;  %vm94_vm1 = vcmask 97280   ;;  %v88_v0 = vld [vmem:[#allocation5 + $0x8] sm:$0xf] }
  0x36   :  { %v87_v1 = vld [vmem:[#allocation5] sm:$0xff]  ;;  %v85_v2 = vld [vmem:[%s11390_s0] sm:$0xff]  ;;  %6651 = vmatprep.subr.msk.mxu0 %vm101_vm0, %v88_v0  ;;  %v200_v4 = vld [vmem:[%s11392_s2 + $0x38] sm:$0xff]  ;;  %vm182_vm2 = vcmask 261120   ;;  %vm185_vm3 = vcmask 257024   ;;  %v11399_v7 = vmov 0.0  }
  0x37   :  { %6655 = vmatprep.mubr.msk.f32.mxu0 %vm94_vm1, %v85_v2  ;;  %6652 = vmatpush3.msk.msra.mxu0 %vm101_vm0, %v88_v0  ;;  %v86_v3 = vld [vmem:[%s11390_s0 + $0x8] sm:$0xff]  ;;  %v199_v5 = vld [vmem:[%s11392_s2 + $0x30] sm:$0xff]  ;;  %184 = vst.msk [vmem:[#allocation2 + $0x8] sm:$0xff] %vm182_vm2, %v11399_v7  ;;  %183 = vst.msk [vmem:[#allocation2] sm:$0xff] %vm182_vm2, %v11399_v7  ;;  %vm722_vm4 = vcmask 523264   ;;  %s7683_s12 = smov 127  }
  0x38   :  { %6653 = vmatprep.subr.mxu0 %v87_v1  ;;  %v198_v6 = vld [vmem:[%s11392_s2 + $0x28] sm:$0xff]  ;;  %186 = vst.msk [vmem:[#allocation2 + $0x10] sm:$0xf] %vm185_vm3, %v11399_v7  ;;  %v197_v8 = vld [vmem:[%s11392_s2 + $0x20] sm:$0xff]  ;;  %v196_v9 = vld [vmem:[%s11392_s2 + $0x18] sm:$0xff]  ;;  %vm4925_vm5 = vcmask 392192  }
  0x39   :  { %6654 = vmatpush3.msra.mxu0 %v87_v1  ;;  %v366_v10 = vld [vmem:[%s11392_s2 + $0x58] sm:$0xff]  ;;  %v365_v11 = vld [vmem:[%s11392_s2 + $0x50] sm:$0xff]  ;;  %v364_v12 = vld [vmem:[%s11392_s2 + $0x48] sm:$0xff]  ;;  %s7686_s15 = smov [#allocation13]   ;;  %vm6481_vm8 = vcmask 33792  }
  0x3a   :  { %6656 = vmatmul.mubr.msk.f32.vlgmr.msra.gmra.mxu0 %vm94_vm1, %v86_v3  ;;  %6658 = vmatprep.subr.mxu0 %v200_v4  ;;  %v363_v13 = vld [vmem:[%s11392_s2 + $0x40] sm:$0xff]  ;;  %v6500_v14 = vld [vmem:[#allocation5 + $0x10] ss:$0 sm:$0xff]  ;;  %v195_v21 = vld [vmem:[%s11392_s2 + $0x10] sm:$0xff]  ;;  %s6489_s16 = sshll.u32 %s7686_s15, 4  ;;  %s6490_s16 = int_to_ptr.vmem [resolvable:$true] %s6489_s16 }
  0x3b   :  { %6659 = vmatpush3.msra.mxu0 %v200_v4  ;;  %6680 = vmatprep.subr.mxu1 %v366_v10  ;;  %v194_v22 = vld [vmem:[%s11392_s2 + $0x8] sm:$0xff]  ;;  %v193_v23 = vld [vmem:[%s11392_s2] sm:$0xff]  ;;  %v698_v29 = vld [vmem:[#allocation8 + $0xf8] sm:$0xff]  ;;  %s7643_s17 = scalar_lea.vmem %s6490_s16, 32  ;;  %p7648_p7 = scmp.lt.s32.totalorder %s6490_s16, %s6490_s16 }
  0x3c   :  { %6660 = vmatprep.subr.mxu0 %v199_v5  ;;  %6681 = vmatpush3.msra.mxu1 %v366_v10  ;;  %v696_v28 = vld [vmem:[#allocation8 + $0xe8] sm:$0xff]  ;;  %v695_v30 = vld [vmem:[#allocation8 + $0xe0] sm:$0xff]  ;;  %v697_v31 = vld [vmem:[#allocation8 + $0xf0] sm:$0xff]  ;;  %p7644_p6 = scmp.ne.s32.totalorder %s6490_s16, %s7643_s17  ;;  %p7649_p8 = scmp.lt.s32.totalorder %s7643_s17, %s7643_s17 }
  0x3d   :  { %6661 = vmatpush3.msra.mxu0 %v199_v5  ;;  %6682 = vmatprep.subr.mxu1 %v365_v11  ;;  %v692_v32 = vld [vmem:[#allocation8 + $0xc8] sm:$0xff]  ;;  %v694_v33 = vld [vmem:[#allocation8 + $0xd8] sm:$0xff]  ;;  %v691_v34 = vld [vmem:[#allocation8 + $0xc0] sm:$0xff] }
  0x3e   :  { %6662 = vmatprep.subr.mxu0 %v198_v6  ;;  %6683 = vmatpush3.msra.mxu1 %v365_v11  ;;  %v693_v35 = vld [vmem:[#allocation8 + $0xd0] sm:$0xff]  ;;  %v688_v36 = vld [vmem:[#allocation8 + $0xa8] sm:$0xff]  ;;  %v690_v37 = vld [vmem:[#allocation8 + $0xb8] sm:$0xff]  ;;  %p7650_p9 = por %p7649_p8, %p7648_p7 }
  0x3f   :  { %6663 = vmatpush3.msra.mxu0 %v198_v6  ;;  %6684 = vmatprep.subr.mxu1 %v364_v12  ;;  %v687_v38 = vld [vmem:[#allocation8 + $0xa0] sm:$0xff]  ;;  %v689_v39 = vld [vmem:[#allocation8 + $0xb0] sm:$0xff]  ;;  %v684_v40 = vld [vmem:[#allocation8 + $0x88] sm:$0xff] }
  0x40   :  { %6664 = vmatprep.subr.mxu0 %v197_v8  ;;  %6685 = vmatpush3.msra.mxu1 %v364_v12  ;;  %v686_v41 = vld [vmem:[#allocation8 + $0x98] sm:$0xff]  ;;  %v683_v42 = vld [vmem:[#allocation8 + $0x80] sm:$0xff]  ;;  %v685_v43 = vld [vmem:[#allocation8 + $0x90] sm:$0xff]  ;;  %p7651_p10 = pnand %p7650_p9, %p7644_p6 }
  0x41   :  { %6665 = vmatpush3.msra.mxu0 %v197_v8  ;;  %6686 = vmatprep.subr.mxu1 %v363_v13  ;;  %v680_v44 = vld [vmem:[#allocation8 + $0x68] sm:$0xff]  ;;  %v682_v45 = vld [vmem:[#allocation8 + $0x78] sm:$0xff]  ;;  %v679_v46 = vld [vmem:[#allocation8 + $0x60] sm:$0xff] }
  0x42   :  { %6669 = vmatprep.subr.mxu0 %v196_v9  ;;  %6687 = vmatpush3.msra.mxu1 %v363_v13  ;;  %v681_v47 = vld [vmem:[#allocation8 + $0x70] sm:$0xff]  ;;  %v676_v48 = vld [vmem:[#allocation8 + $0x48] sm:$0xff]  ;;  %v678_v49 = vld [vmem:[#allocation8 + $0x58] sm:$0xff] }
  0x43   :  { %822 = vmatprep.subr.mxu1 %v698_v29  ;;  %v675_v50 = vld [vmem:[#allocation8 + $0x40] sm:$0xff]  ;;  %v677_v51 = vld [vmem:[#allocation8 + $0x50] sm:$0xff]  ;;  %v672_v52 = vld [vmem:[#allocation8 + $0x28] sm:$0xff] }
  0x44   :  { %v674_v53 = vld [vmem:[#allocation8 + $0x38] sm:$0xff]  ;;  %v671_v54 = vld [vmem:[#allocation8 + $0x20] sm:$0xff]  ;;  %v673_v55 = vld [vmem:[#allocation8 + $0x30] sm:$0xff] }
  0x45   :  { %v668_v56 = vld [vmem:[#allocation8 + $0x8] sm:$0xff]  ;;  %v670_v57 = vld [vmem:[#allocation8 + $0x18] sm:$0xff]  ;;  %v667_v58 = vld [vmem:[#allocation8] sm:$0xff] }
  0x46   :  { %v669_v59 = vld [vmem:[#allocation8 + $0x10] sm:$0xff]  ;;  %v7801_v60 = vld [vmem:[#allocation8 + $0x2e8] sm:$0xff]  ;;  %v7803_v61 = vld [vmem:[#allocation8 + $0x2f8] sm:$0xff] }
  0x47   :  { %v6510_v6 = vld [vmem:[%s11392_s2 + $0x60] ss:$0 sm:$0xff]  ;;  %v6511_v13 = vld [vmem:[%s11392_s2 + $0x68] ss:$0 sm:$0xff]  ;;  %v7844_v29 = vld [vmem:[#allocation8 + $0x2b0] sm:$0xff] }
  0xfa   :  { %v6657_v15 = vpop.f32.mrf.mxu0 }
  0xfb   :  { %v177_v16 = vadd.f32 %v6657_v15, %v6500_v14 }
  0xfc   :  { %v171_v17 = vpop.f32.mrf.mxu0 }
  0xfd   :  { %v181_v18 = vmax.f32 %v177_v16, 0.0  ;;  %v172_v19 = vadd.f32 %v6500_v14, %v171_v17  ;;  %v6512_v16 = vld [vmem:[%s11392_s2 + $0x70] ss:$0 sm:$0xff]  ;;  %s7682_s2 = smov 1  }
  0xff   :  { %188 = vst.msk [vmem:[#allocation2 + $0xa] sm:$0xff] %vm182_vm2, %v181_v18  ;;  %v180_v20 = vmax.f32 %v172_v19, 0.0  ;;  %v7818_v19 = vld [vmem:[#allocation8 + $0x2f0] sm:$0xff] }
 0x101   :  { %187 = vst.msk [vmem:[#allocation2 + $0x2] sm:$0xff] %vm182_vm2, %v180_v20  ;;  %6666 = vmatprep.mubr.msk.f32.mxu0 %vm182_vm2, %v180_v20  ;;  %v7820_v20 = vld [vmem:[#allocation8 + $0x2c8] sm:$0xff] }
 0x102   :  { %6667 = vmatmul.mubr.msk.f32.vlgmr.msra.gmra.mxu0 %vm182_vm2, %v181_v18  ;;  %v7816_v18 = vld [vmem:[#allocation8 + $0x2e0] sm:$0xff] }
 0x103   :  { %6670 = vmatpush3.msra.mxu0 %v196_v9 }
 0x104   :  { %6671 = vmatprep.subr.mxu0 %v195_v21 }
 0x105   :  { %6672 = vmatpush3.msra.mxu0 %v195_v21  ;;  %v7822_v21 = vld [vmem:[#allocation8 + $0x2d8] sm:$0xff] }
 0x106   :  { %6673 = vmatprep.subr.mxu0 %v194_v22  ;;  %v192_v27 = vld [vmem:[#allocation2 + $0xc] sm:$0xff] }
 0x107   :  { %6674 = vmatpush3.msra.mxu0 %v194_v22 }
 0x108   :  { %6675 = vmatprep.subr.mxu0 %v193_v23  ;;  %v189_v24 = vld [vmem:[#allocation2] sm:$0xff]  ;;  %v190_v26 = vld [vmem:[#allocation2 + $0x8] sm:$0xff] }
 0x109   :  { %v191_v25 = vld [vmem:[#allocation2 + $0x4] sm:$0xff]  ;;  %6676 = vmatpush3.msra.mxu0 %v193_v23  ;;  %6677 = vmatprep.mubr.msk.f32.mxu0 %vm182_vm2, %v189_v24  ;;  %v7828_v24 = vld [vmem:[#allocation8 + $0x2d0] sm:$0xff] }
 0x10a   :  { %6688 = vmatprep.mubr.msk.f32.mxu1 %vm182_vm2, %v191_v25  ;;  %6678 = vmatmul.mubr.msk.f32.vlgmr.msra.gmra.mxu0 %vm182_vm2, %v190_v26  ;;  %v7826_v23 = vld [vmem:[#allocation8 + $0x2c0] sm:$0xff]  ;;  %v7834_v25 = vld [vmem:[#allocation8 + $0x2a8] sm:$0xff]  ;;  %v7836_v26 = vld [vmem:[#allocation8 + $0x2b8] sm:$0xff] }
 0x10b   :  { %6689 = vmatmul.mubr.msk.f32.vlgmr.msra.gmra.mxu1 %vm182_vm2, %v192_v27  ;;  %793 = vmatprep.mubr.f32.mxu0 %v11399_v7 }
 0x10c   :  { %870 = vmatprep.mubr.f32.mxu1 %v11399_v7  ;;  %745 = vmatprep.subr.mxu0 %v696_v28  ;;  %v7842_v28 = vld [vmem:[#allocation8 + $0x2a0] sm:$0xff] }
 0x10d   :  { %746 = vmatpush1.msra.mxu0 %v695_v30  ;;  %823 = vmatpush1.msra.mxu1 %v697_v31  ;;  %v7848_v30 = vld [vmem:[#allocation8 + $0x288] sm:$0xff]  ;;  %v7850_v31 = vld [vmem:[#allocation8 + $0x298] sm:$0xff] }
 0x10e   :  { %747 = vmatprep.subr.mxu0 %v692_v32  ;;  %824 = vmatprep.subr.mxu1 %v694_v33  ;;  %v7854_v32 = vld [vmem:[#allocation8 + $0x280] sm:$0xff]  ;;  %v7856_v33 = vld [vmem:[#allocation8 + $0x290] sm:$0xff] }
 0x10f   :  { %748 = vmatpush1.msra.mxu0 %v691_v34  ;;  %825 = vmatpush1.msra.mxu1 %v693_v35  ;;  %v7860_v34 = vld [vmem:[#allocation8 + $0x268] sm:$0xff]  ;;  %v7862_v35 = vld [vmem:[#allocation8 + $0x278] sm:$0xff] }
 0x110   :  { %749 = vmatprep.subr.mxu0 %v688_v36  ;;  %826 = vmatprep.subr.mxu1 %v690_v37  ;;  %v7866_v36 = vld [vmem:[#allocation8 + $0x260] sm:$0xff]  ;;  %v7868_v37 = vld [vmem:[#allocation8 + $0x270] sm:$0xff] }
 0x111   :  { %750 = vmatpush1.msra.mxu0 %v687_v38  ;;  %827 = vmatpush1.msra.mxu1 %v689_v39  ;;  %v7872_v38 = vld [vmem:[#allocation8 + $0x248] sm:$0xff]  ;;  %v7874_v39 = vld [vmem:[#allocation8 + $0x258] sm:$0xff] }
 0x112   :  { %751 = vmatprep.subr.mxu0 %v684_v40  ;;  %828 = vmatprep.subr.mxu1 %v686_v41  ;;  %v7878_v40 = vld [vmem:[#allocation8 + $0x240] sm:$0xff]  ;;  %v7880_v41 = vld [vmem:[#allocation8 + $0x250] sm:$0xff] }
 0x113   :  { %752 = vmatpush1.msra.mxu0 %v683_v42  ;;  %829 = vmatpush1.msra.mxu1 %v685_v43  ;;  %v7884_v42 = vld [vmem:[#allocation8 + $0x228] sm:$0xff]  ;;  %v7886_v43 = vld [vmem:[#allocation8 + $0x238] sm:$0xff] }
 0x114   :  { %753 = vmatprep.subr.mxu0 %v680_v44  ;;  %830 = vmatprep.subr.mxu1 %v682_v45  ;;  %v7890_v44 = vld [vmem:[#allocation8 + $0x220] sm:$0xff]  ;;  %v7892_v45 = vld [vmem:[#allocation8 + $0x230] sm:$0xff] }
 0x115   :  { %754 = vmatpush1.msra.mxu0 %v679_v46  ;;  %831 = vmatpush1.msra.mxu1 %v681_v47  ;;  %v7896_v46 = vld [vmem:[#allocation8 + $0x208] sm:$0xff]  ;;  %v7898_v47 = vld [vmem:[#allocation8 + $0x218] sm:$0xff] }
 0x116   :  { %755 = vmatprep.subr.mxu0 %v676_v48  ;;  %832 = vmatprep.subr.mxu1 %v678_v49  ;;  %v7902_v48 = vld [vmem:[#allocation8 + $0x200] sm:$0xff]  ;;  %v7904_v49 = vld [vmem:[#allocation8 + $0x210] sm:$0xff] }
 0x117   :  { %756 = vmatpush1.msra.mxu0 %v675_v50  ;;  %833 = vmatpush1.msra.mxu1 %v677_v51  ;;  %v7908_v50 = vld [vmem:[#allocation8 + $0x1e8] sm:$0xff]  ;;  %v7910_v51 = vld [vmem:[#allocation8 + $0x1f8] sm:$0xff] }
 0x118   :  { %757 = vmatprep.subr.mxu0 %v672_v52  ;;  %834 = vmatprep.subr.mxu1 %v674_v53  ;;  %v7914_v52 = vld [vmem:[#allocation8 + $0x1e0] sm:$0xff]  ;;  %v7916_v53 = vld [vmem:[#allocation8 + $0x1f0] sm:$0xff] }
 0x119   :  { %758 = vmatpush1.msra.mxu0 %v671_v54  ;;  %835 = vmatpush1.msra.mxu1 %v673_v55  ;;  %v7920_v54 = vld [vmem:[#allocation8 + $0x1c8] sm:$0xff]  ;;  %v7922_v55 = vld [vmem:[#allocation8 + $0x1d8] sm:$0xff] }
 0x11a   :  { %759 = vmatprep.subr.mxu0 %v668_v56  ;;  %836 = vmatprep.subr.mxu1 %v670_v57  ;;  %v7926_v56 = vld [vmem:[#allocation8 + $0x1c0] sm:$0xff]  ;;  %v7928_v57 = vld [vmem:[#allocation8 + $0x1d0] sm:$0xff] }
 0x11b   :  { %760 = vmatpush1.msra.mxu0 %v667_v58  ;;  %837 = vmatpush1.msra.mxu1 %v669_v59  ;;  %11974 = vst [vmem:[#allocation18_spill] sm:$0xff] %v7928_v57  ;;  %v7932_v58 = vld [vmem:[#allocation8 + $0x1a8] sm:$0xff]  ;;  %v7934_v59 = vld [vmem:[#allocation8 + $0x1b8] sm:$0xff] }
 0x11c   :  { %883 = vmatprep.subr.mxu0 %v7801_v60  ;;  %954 = vmatprep.subr.mxu1 %v7803_v61  ;;  %11975 = vst [vmem:[#allocation19_spill] sm:$0xff] %v7932_v58  ;;  %11976 = vst [vmem:[#allocation20_spill] sm:$0xff] %v7934_v59 }
 0x1c2   :  { %v6668_v62 = vpop.f32.mrf.mxu0 }
 0x1c4   :  { %v273_v63 = vpop.f32.mrf.mxu0 }
 0x1ca   :  { %v6679_v0 = vpop.f32.mrf.mxu0 }
 0x1cb   :  { %v360_v1 = vadd.f32 %v6679_v0, %v6668_v62  ;;  %v6690_v2 = vpop.f32.mrf.mxu1  ;;  %v7938_v62 = vld [vmem:[#allocation8 + $0x1a0] sm:$0xff]  ;;  %v7944_v0 = vld [vmem:[#allocation8 + $0x188] sm:$0xff] }
 0x1cc   :  { %v354_v3 = vpop.f32.mrf.mxu0  ;;  %11977 = vst [vmem:[#allocation21_spill] sm:$0xff] %v7938_v62  ;;  %11979 = vst [vmem:[#allocation23_spill] sm:$0xff] %v7944_v0 }
 0x1cd   :  { %v449_v4 = vadd.f32 %v6690_v2, %v360_v1  ;;  %v355_v5 = vadd.f32 %v354_v3, %v273_v63  ;;  %v439_v8 = vpop.f32.mrf.mxu1  ;;  %v7940_v63 = vld [vmem:[#allocation8 + $0x1b0] sm:$0xff]  ;;  %v7946_v1 = vld [vmem:[#allocation8 + $0x198] sm:$0xff]  ;;  %v7950_v2 = vld [vmem:[#allocation8 + $0x180] sm:$0xff] }
 0x1ce   :  { %11978 = vst [vmem:[#allocation22_spill] sm:$0xff] %v7940_v63  ;;  %11980 = vst [vmem:[#allocation24_spill] sm:$0xff] %v7946_v1  ;;  %v7952_v3 = vld [vmem:[#allocation8 + $0x190] sm:$0xff] }
 0x1cf   :  { %v448_v9 = vadd.f32 %v439_v8, %v355_v5  ;;  %v456_v10 = vadd.f32 %v6510_v6, %v449_v4  ;;  %11981 = vst [vmem:[#allocation25_spill] sm:$0xff] %v7950_v2  ;;  %11982 = vst [vmem:[#allocation26_spill] sm:$0xff] %v7952_v3  ;;  %v7956_v4 = vld [vmem:[#allocation8 + $0x168] sm:$0xff]  ;;  %v7958_v5 = vld [vmem:[#allocation8 + $0x178] sm:$0xff] }
 0x1d0   :  { %11983 = vst [vmem:[#allocation27_spill] sm:$0xff] %v7956_v4  ;;  %11984 = vst [vmem:[#allocation28_spill] sm:$0xff] %v7958_v5  ;;  %v7964_v8 = vld [vmem:[#allocation8 + $0x170] sm:$0xff] }
 0x1d1   :  { %v455_v11 = vadd.f32 %v6510_v6, %v448_v9  ;;  %v458_v14 = vmax.f32 %v456_v10, 0.0  ;;  %v7962_v6 = vld [vmem:[#allocation8 + $0x160] sm:$0xff]  ;;  %11986 = vst [vmem:[#allocation30_spill] sm:$0xff] %v7964_v8  ;;  %v7968_v9 = vld [vmem:[#allocation8 + $0x148] sm:$0xff]  ;;  %v7970_v10 = vld [vmem:[#allocation8 + $0x158] sm:$0xff] }
 0x1d2   :  { %11985 = vst [vmem:[#allocation29_spill] sm:$0xff] %v7962_v6  ;;  %11987 = vst [vmem:[#allocation31_spill] sm:$0xff] %v7968_v9 }
 0x1d3   :  { %v457_v12 = vmax.f32 %v455_v11, 0.0  ;;  %v465_v22 = vmul.f32 %v6511_v13, %v458_v14  ;;  %11988 = vst [vmem:[#allocation32_spill] sm:$0xff] %v7970_v10  ;;  %v7974_v11 = vld [vmem:[#allocation8 + $0x140] sm:$0xff]  ;;  %v7982_v14 = vld [vmem:[#allocation8 + $0x138] sm:$0xff] }
 0x1d4   :  { %11989 = vst [vmem:[#allocation33_spill] sm:$0xff] %v7974_v11  ;;  %11992 = vst [vmem:[#allocation36_spill] sm:$0xff] %v7982_v14 }
 0x1d5   :  { %v464_v15 = vmul.f32 %v6511_v13, %v457_v12  ;;  %v472_v27 = vadd.f32 %v6512_v16, %v465_v22  ;;  %v7976_v12 = vld [vmem:[#allocation8 + $0x150] sm:$0xff]  ;;  %v7980_v13 = vld [vmem:[#allocation8 + $0x128] sm:$0xff]  ;;  %v7994_v22 = vld [vmem:[#allocation8 + $0x118] sm:$0xff] }
 0x1d6   :  { %11990 = vst [vmem:[#allocation34_spill] sm:$0xff] %v7976_v12  ;;  %11991 = vst [vmem:[#allocation35_spill] sm:$0xff] %v7980_v13 }
 0x1d7   :  { %v471_v17 = vadd.f32 %v6512_v16, %v464_v15  ;;  %v7986_v15 = vld [vmem:[#allocation8 + $0x120] sm:$0xff]  ;;  %v7988_v16 = vld [vmem:[#allocation8 + $0x130] sm:$0xff]  ;;  %11996 = vst [vmem:[#allocation40_spill] sm:$0xff] %v7994_v22 }
 0x1d8   :  { %11993 = vst [vmem:[#allocation37_spill] sm:$0xff] %v7986_v15  ;;  %11994 = vst [vmem:[#allocation38_spill] sm:$0xff] %v7988_v16 }
 0x1d9   :  { %6513 = vmatmul.mubr.msk.f32.vlgmr.msra.gmra.mxu0 %vm722_vm4, %v471_v17  ;;  %6515 = vmatmul.mubr.msk.f32.vlgmr.msra.gmra.mxu1 %vm722_vm4, %v471_v17  ;;  %v7992_v17 = vld [vmem:[#allocation8 + $0x108] sm:$0xff] }
 0x1da   :  { %884 = vmatpush1.msra.mxu0 %v7816_v18  ;;  %955 = vmatpush1.msra.mxu1 %v7818_v19  ;;  %11995 = vst [vmem:[#allocation39_spill] sm:$0xff] %v7992_v17 }
 0x1db   :  { %885 = vmatprep.subr.mxu0 %v7820_v20  ;;  %956 = vmatprep.subr.mxu1 %v7822_v21 }
 0x1dc   :  { %886 = vmatpush1.msra.mxu0 %v7826_v23  ;;  %957 = vmatpush1.msra.mxu1 %v7828_v24 }
 0x1dd   :  { %799 = vmatprep.mubr.f32.mxu0 %v11399_v7  ;;  %876 = vmatprep.mubr.f32.mxu1 %v11399_v7  ;;  %v8002_v7 = vld [vmem:[#allocation8 + $0x110] sm:$0xff] }
 0x1de   :  { %887 = vmatprep.subr.mxu0 %v7834_v25  ;;  %958 = vmatprep.subr.mxu1 %v7836_v26  ;;  %11998 = vst [vmem:[#allocation42_spill] sm:$0xff] %v8002_v7 }
 0x1df   :  { %6514 = vmatmul.mubr.msk.f32.gmra.mxu0 %vm722_vm4, %v472_v27  ;;  %6516 = vmatmul.mubr.msk.f32.gmra.mxu1 %vm722_vm4, %v472_v27  ;;  %v7998_v27 = vld [vmem:[#allocation8 + $0x100] sm:$0xff] }
 0x1e0   :  { %888 = vmatpush1.msra.mxu0 %v7842_v28  ;;  %959 = vmatpush1.msra.mxu1 %v7844_v29  ;;  %11997 = vst [vmem:[#allocation41_spill] sm:$0xff] %v7998_v27 }
 0x1e1   :  { %889 = vmatprep.subr.mxu0 %v7848_v30  ;;  %960 = vmatprep.subr.mxu1 %v7850_v31 }
 0x1e2   :  { %890 = vmatpush1.msra.mxu0 %v7854_v32  ;;  %961 = vmatpush1.msra.mxu1 %v7856_v33 }
 0x1e3   :  { %891 = vmatprep.subr.mxu0 %v7860_v34  ;;  %962 = vmatprep.subr.mxu1 %v7862_v35 }
 0x1e4   :  { %892 = vmatpush1.msra.mxu0 %v7866_v36  ;;  %963 = vmatpush1.msra.mxu1 %v7868_v37 }
 0x1e5   :  { %893 = vmatprep.subr.mxu0 %v7872_v38  ;;  %964 = vmatprep.subr.mxu1 %v7874_v39 }
 0x1e6   :  { %894 = vmatpush1.msra.mxu0 %v7878_v40  ;;  %965 = vmatpush1.msra.mxu1 %v7880_v41 }
 0x1e7   :  { %895 = vmatprep.subr.mxu0 %v7884_v42  ;;  %966 = vmatprep.subr.mxu1 %v7886_v43 }
 0x1e8   :  { %896 = vmatpush1.msra.mxu0 %v7890_v44  ;;  %967 = vmatpush1.msra.mxu1 %v7892_v45 }
 0x1e9   :  { %897 = vmatprep.subr.mxu0 %v7896_v46  ;;  %968 = vmatprep.subr.mxu1 %v7898_v47 }
 0x1ea   :  { %898 = vmatpush1.msra.mxu0 %v7902_v48  ;;  %969 = vmatpush1.msra.mxu1 %v7904_v49 }
 0x1eb   :  { %899 = vmatprep.subr.mxu0 %v7908_v50  ;;  %970 = vmatprep.subr.mxu1 %v7910_v51 }
 0x1ec   :  { %900 = vmatpush1.msra.mxu0 %v7914_v52  ;;  %971 = vmatpush1.msra.mxu1 %v7916_v53 }
 0x1ed   :  { %901 = vmatprep.subr.mxu0 %v7920_v54  ;;  %972 = vmatprep.subr.mxu1 %v7922_v55 }
 0x1ee   :  { %902 = vmatpush1.msra.mxu0 %v7926_v56  ;;  %973 = vmatpush1.msra.mxu1 %v7928_v57 }
 0x1ef   :  { %903 = vmatprep.subr.mxu0 %v7932_v58  ;;  %974 = vmatprep.subr.mxu1 %v7934_v59 }
 0x1f0   :  { %904 = vmatpush1.msra.mxu0 %v7938_v62  ;;  %975 = vmatpush1.msra.mxu1 %v7940_v63 }
 0x1f1   :  { %905 = vmatprep.subr.mxu0 %v7944_v0  ;;  %976 = vmatprep.subr.mxu1 %v7946_v1 }
 0x1f2   :  { %906 = vmatpush1.msra.mxu0 %v7950_v2  ;;  %977 = vmatpush1.msra.mxu1 %v7952_v3 }
 0x1f3   :  { %907 = vmatprep.subr.mxu0 %v7956_v4  ;;  %978 = vmatprep.subr.mxu1 %v7958_v5 }
 0x1f4   :  { %908 = vmatpush1.msra.mxu0 %v7962_v6  ;;  %979 = vmatpush1.msra.mxu1 %v7964_v8 }
 0x1f5   :  { %909 = vmatprep.subr.mxu0 %v7968_v9  ;;  %980 = vmatprep.subr.mxu1 %v7970_v10  ;;  %v8144_v10 = vld [vmem:[#allocation8 + $0x3b8] sm:$0xff]  ;;  %v8160_v9 = vld [vmem:[#allocation8 + $0x380] sm:$0xff] }
 0x1f6   :  { %910 = vmatpush1.msra.mxu0 %v7974_v11  ;;  %981 = vmatpush1.msra.mxu1 %v7976_v12  ;;  %v11999_v12 = vmov 0.0   ;;  %v8136_v11 = vld [vmem:[#allocation8 + $0x3c0] sm:$0xff]  ;;  %12045 = vst [vmem:[#allocation88_spill] sm:$0xff] %v8144_v10  ;;  %12050 = vst [vmem:[#allocation93_spill] sm:$0xff] %v8160_v9 }
 0x1f7   :  { %911 = vmatprep.subr.mxu0 %v7980_v13  ;;  %982 = vmatprep.subr.mxu1 %v7982_v14  ;;  %v8032_v14 = vld [vmem:[#allocation8 + $0x4e0] sm:$0xff]  ;;  %v8128_v13 = vld [vmem:[#allocation8 + $0x3f0] sm:$0xff]  ;;  %12042 = vst [vmem:[#allocation85_spill] sm:$0xff] %v8136_v11 }
 0x1f8   :  { %912 = vmatpush1.msra.mxu0 %v7986_v15  ;;  %983 = vmatpush1.msra.mxu1 %v7988_v16  ;;  %v8014_v16 = vld [vmem:[#allocation8 + $0x508] sm:$0xff]  ;;  %v8028_v15 = vld [vmem:[#allocation8 + $0x4f8] sm:$0xff]  ;;  %12006 = vst [vmem:[#allocation49_spill] sm:$0xff] %v8032_v14  ;;  %12039 = vst [vmem:[#allocation82_spill] sm:$0xff] %v8128_v13 }
 0x1f9   :  { %913 = vmatprep.subr.mxu0 %v7992_v17  ;;  %984 = vmatprep.subr.mxu1 %v7994_v22  ;;  %12000 = vst [vmem:[#allocation43_spill] sm:$0xff] %v8014_v16  ;;  %v8016_v17 = vld [vmem:[#allocation8 + $0x518] sm:$0xff]  ;;  %v8026_v22 = vld [vmem:[#allocation8 + $0x4e8] sm:$0xff]  ;;  %12005 = vst [vmem:[#allocation48_spill] sm:$0xff] %v8028_v15 }
 0x1fa   :  { %914 = vmatpush1.msra.mxu0 %v7998_v27  ;;  %947 = vmatprep.mubr.f32.mxu0 %v11999_v12  ;;  %12001 = vst [vmem:[#allocation44_spill] sm:$0xff] %v8016_v17  ;;  %v8020_v27 = vld [vmem:[#allocation8 + $0x500] sm:$0xff]  ;;  %12004 = vst [vmem:[#allocation47_spill] sm:$0xff] %v8026_v22 }
 0x1fb   :  { %985 = vmatpush1.msra.mxu1 %v8002_v7  ;;  %1018 = vmatprep.mubr.f32.mxu1 %v11999_v12  ;;  %12002 = vst [vmem:[#allocation45_spill] sm:$0xff] %v8020_v27  ;;  %v8022_v7 = vld [vmem:[#allocation8 + $0x510] sm:$0xff] }
 0x1fc   :  { %948 = vmatmul.mubr.f32.vlgmr.msra.gmra.mxu0 %v11999_v12  ;;  %1019 = vmatmul.mubr.f32.vlgmr.msra.gmra.mxu1 %v11999_v12  ;;  %12003 = vst [vmem:[#allocation46_spill] sm:$0xff] %v8022_v7 }
 0x1fd   :  { %1138 = vmatprep.mubr.f32.mxu0 %v11999_v12  ;;  %1209 = vmatprep.mubr.f32.mxu1 %v11999_v12 }
 0x1fe   :  { %1074 = vmatprep.subr.mxu0 %v8014_v16  ;;  %1145 = vmatprep.subr.mxu1 %v8016_v17  ;;  %v8034_v16 = vld [vmem:[#allocation8 + $0x4f0] sm:$0xff]  ;;  %v8038_v17 = vld [vmem:[#allocation8 + $0x4c8] sm:$0xff] }
 0x1ff   :  { %1075 = vmatpush1.msra.mxu0 %v8020_v27  ;;  %1146 = vmatpush1.msra.mxu1 %v8022_v7  ;;  %12007 = vst [vmem:[#allocation50_spill] sm:$0xff] %v8034_v16  ;;  %12008 = vst [vmem:[#allocation51_spill] sm:$0xff] %v8038_v17  ;;  %v8040_v27 = vld [vmem:[#allocation8 + $0x4d8] sm:$0xff]  ;;  %v8044_v7 = vld [vmem:[#allocation8 + $0x4c0] sm:$0xff] }
 0x200   :  { %1076 = vmatprep.subr.mxu0 %v8026_v22  ;;  %1147 = vmatprep.subr.mxu1 %v8028_v15  ;;  %12009 = vst [vmem:[#allocation52_spill] sm:$0xff] %v8040_v27  ;;  %12010 = vst [vmem:[#allocation53_spill] sm:$0xff] %v8044_v7  ;;  %v8046_v22 = vld [vmem:[#allocation8 + $0x4d0] sm:$0xff]  ;;  %v8050_v15 = vld [vmem:[#allocation8 + $0x4a8] sm:$0xff] }
 0x201   :  { %1077 = vmatpush1.msra.mxu0 %v8032_v14  ;;  %1148 = vmatpush1.msra.mxu1 %v8034_v16  ;;  %12011 = vst [vmem:[#allocation54_spill] sm:$0xff] %v8046_v22  ;;  %12012 = vst [vmem:[#allocation55_spill] sm:$0xff] %v8050_v15  ;;  %v8052_v14 = vld [vmem:[#allocation8 + $0x4b8] sm:$0xff]  ;;  %v8056_v16 = vld [vmem:[#allocation8 + $0x4a0] sm:$0xff] }
 0x202   :  { %1078 = vmatprep.subr.mxu0 %v8038_v17  ;;  %1149 = vmatprep.subr.mxu1 %v8040_v27  ;;  %12013 = vst [vmem:[#allocation56_spill] sm:$0xff] %v8052_v14  ;;  %12014 = vst [vmem:[#allocation57_spill] sm:$0xff] %v8056_v16  ;;  %v8058_v17 = vld [vmem:[#allocation8 + $0x4b0] sm:$0xff]  ;;  %v8062_v27 = vld [vmem:[#allocation8 + $0x488] sm:$0xff] }
 0x203   :  { %1079 = vmatpush1.msra.mxu0 %v8044_v7  ;;  %1150 = vmatpush1.msra.mxu1 %v8046_v22  ;;  %12015 = vst [vmem:[#allocation58_spill] sm:$0xff] %v8058_v17  ;;  %12016 = vst [vmem:[#allocation59_spill] sm:$0xff] %v8062_v27  ;;  %v8064_v7 = vld [vmem:[#allocation8 + $0x498] sm:$0xff]  ;;  %v8068_v22 = vld [vmem:[#allocation8 + $0x480] sm:$0xff] }
 0x204   :  { %1080 = vmatprep.subr.mxu0 %v8050_v15  ;;  %1151 = vmatprep.subr.mxu1 %v8052_v14  ;;  %12017 = vst [vmem:[#allocation60_spill] sm:$0xff] %v8064_v7  ;;  %12018 = vst [vmem:[#allocation61_spill] sm:$0xff] %v8068_v22  ;;  %v8070_v15 = vld [vmem:[#allocation8 + $0x490] sm:$0xff]  ;;  %v8074_v14 = vld [vmem:[#allocation8 + $0x468] sm:$0xff] }
 0x205   :  { %1081 = vmatpush1.msra.mxu0 %v8056_v16  ;;  %1152 = vmatpush1.msra.mxu1 %v8058_v17  ;;  %12019 = vst [vmem:[#allocation62_spill] sm:$0xff] %v8070_v15  ;;  %12020 = vst [vmem:[#allocation63_spill] sm:$0xff] %v8074_v14  ;;  %v8076_v16 = vld [vmem:[#allocation8 + $0x478] sm:$0xff]  ;;  %v8080_v17 = vld [vmem:[#allocation8 + $0x460] sm:$0xff] }
 0x206   :  { %1082 = vmatprep.subr.mxu0 %v8062_v27  ;;  %1153 = vmatprep.subr.mxu1 %v8064_v7  ;;  %12021 = vst [vmem:[#allocation64_spill] sm:$0xff] %v8076_v16  ;;  %12022 = vst [vmem:[#allocation65_spill] sm:$0xff] %v8080_v17  ;;  %v8082_v27 = vld [vmem:[#allocation8 + $0x470] sm:$0xff]  ;;  %v8086_v7 = vld [vmem:[#allocation8 + $0x448] sm:$0xff] }
 0x207   :  { %1083 = vmatpush1.msra.mxu0 %v8068_v22  ;;  %1154 = vmatpush1.msra.mxu1 %v8070_v15  ;;  %12023 = vst [vmem:[#allocation66_spill] sm:$0xff] %v8082_v27  ;;  %12024 = vst [vmem:[#allocation67_spill] sm:$0xff] %v8086_v7  ;;  %v8088_v22 = vld [vmem:[#allocation8 + $0x458] sm:$0xff]  ;;  %v8092_v15 = vld [vmem:[#allocation8 + $0x440] sm:$0xff] }
 0x208   :  { %1084 = vmatprep.subr.mxu0 %v8074_v14  ;;  %1155 = vmatprep.subr.mxu1 %v8076_v16  ;;  %12025 = vst [vmem:[#allocation68_spill] sm:$0xff] %v8088_v22  ;;  %12026 = vst [vmem:[#allocation69_spill] sm:$0xff] %v8092_v15  ;;  %v8094_v14 = vld [vmem:[#allocation8 + $0x450] sm:$0xff]  ;;  %v8098_v16 = vld [vmem:[#allocation8 + $0x428] sm:$0xff] }
 0x209   :  { %1085 = vmatpush1.msra.mxu0 %v8080_v17  ;;  %1156 = vmatpush1.msra.mxu1 %v8082_v27  ;;  %12027 = vst [vmem:[#allocation70_spill] sm:$0xff] %v8094_v14  ;;  %12028 = vst [vmem:[#allocation71_spill] sm:$0xff] %v8098_v16  ;;  %v8100_v17 = vld [vmem:[#allocation8 + $0x438] sm:$0xff]  ;;  %v8104_v27 = vld [vmem:[#allocation8 + $0x420] sm:$0xff] }
 0x20a   :  { %1086 = vmatprep.subr.mxu0 %v8086_v7  ;;  %1157 = vmatprep.subr.mxu1 %v8088_v22  ;;  %12029 = vst [vmem:[#allocation72_spill] sm:$0xff] %v8100_v17  ;;  %12030 = vst [vmem:[#allocation73_spill] sm:$0xff] %v8104_v27  ;;  %v8106_v7 = vld [vmem:[#allocation8 + $0x430] sm:$0xff]  ;;  %v8110_v22 = vld [vmem:[#allocation8 + $0x408] sm:$0xff] }
 0x20b   :  { %1087 = vmatpush1.msra.mxu0 %v8092_v15  ;;  %1158 = vmatpush1.msra.mxu1 %v8094_v14  ;;  %12031 = vst [vmem:[#allocation74_spill] sm:$0xff] %v8106_v7  ;;  %12032 = vst [vmem:[#allocation75_spill] sm:$0xff] %v8110_v22  ;;  %v8112_v15 = vld [vmem:[#allocation8 + $0x418] sm:$0xff]  ;;  %v8116_v14 = vld [vmem:[#allocation8 + $0x400] sm:$0xff] }
 0x20c   :  { %1088 = vmatprep.subr.mxu0 %v8098_v16  ;;  %1159 = vmatprep.subr.mxu1 %v8100_v17  ;;  %12033 = vst [vmem:[#allocation76_spill] sm:$0xff] %v8112_v15  ;;  %12034 = vst [vmem:[#allocation77_spill] sm:$0xff] %v8116_v14  ;;  %v8118_v16 = vld [vmem:[#allocation8 + $0x410] sm:$0xff]  ;;  %v8120_v17 = vld [vmem:[#allocation8 + $0x3e8] sm:$0xff] }
 0x20d   :  { %1089 = vmatpush1.msra.mxu0 %v8104_v27  ;;  %1160 = vmatpush1.msra.mxu1 %v8106_v7  ;;  %12035 = vst [vmem:[#allocation78_spill] sm:$0xff] %v8118_v16  ;;  %12036 = vst [vmem:[#allocation79_spill] sm:$0xff] %v8120_v17  ;;  %v8124_v27 = vld [vmem:[#allocation8 + $0x3f8] sm:$0xff]  ;;  %v8126_v7 = vld [vmem:[#allocation8 + $0x3e0] sm:$0xff] }
 0x20e   :  { %1090 = vmatprep.subr.mxu0 %v8110_v22  ;;  %1161 = vmatprep.subr.mxu1 %v8112_v15  ;;  %12037 = vst [vmem:[#allocation80_spill] sm:$0xff] %v8124_v27  ;;  %12038 = vst [vmem:[#allocation81_spill] sm:$0xff] %v8126_v7  ;;  %v8132_v15 = vld [vmem:[#allocation8 + $0x3c8] sm:$0xff]  ;;  %v8134_v22 = vld [vmem:[#allocation8 + $0x3d8] sm:$0xff] }
 0x20f   :  { %1091 = vmatpush1.msra.mxu0 %v8116_v14  ;;  %1162 = vmatpush1.msra.mxu1 %v8118_v16  ;;  %12040 = vst [vmem:[#allocation83_spill] sm:$0xff] %v8132_v15  ;;  %12041 = vst [vmem:[#allocation84_spill] sm:$0xff] %v8134_v22  ;;  %v8140_v16 = vld [vmem:[#allocation8 + $0x3d0] sm:$0xff]  ;;  %v8142_v14 = vld [vmem:[#allocation8 + $0x3a8] sm:$0xff] }
 0x210   :  { %1092 = vmatprep.subr.mxu0 %v8120_v17  ;;  %1163 = vmatprep.subr.mxu1 %v8124_v27  ;;  %12043 = vst [vmem:[#allocation86_spill] sm:$0xff] %v8140_v16  ;;  %12044 = vst [vmem:[#allocation87_spill] sm:$0xff] %v8142_v14  ;;  %v8148_v27 = vld [vmem:[#allocation8 + $0x3a0] sm:$0xff]  ;;  %v8150_v17 = vld [vmem:[#allocation8 + $0x3b0] sm:$0xff] }
 0x211   :  { %1093 = vmatpush1.msra.mxu0 %v8126_v7  ;;  %1164 = vmatpush1.msra.mxu1 %v8128_v13  ;;  %12046 = vst [vmem:[#allocation89_spill] sm:$0xff] %v8148_v27  ;;  %12047 = vst [vmem:[#allocation90_spill] sm:$0xff] %v8150_v17  ;;  %v8154_v7 = vld [vmem:[#allocation8 + $0x388] sm:$0xff]  ;;  %v8156_v13 = vld [vmem:[#allocation8 + $0x398] sm:$0xff] }
 0x212   :  { %1094 = vmatprep.subr.mxu0 %v8132_v15  ;;  %1165 = vmatprep.subr.mxu1 %v8134_v22  ;;  %12048 = vst [vmem:[#allocation91_spill] sm:$0xff] %v8154_v7  ;;  %12049 = vst [vmem:[#allocation92_spill] sm:$0xff] %v8156_v13  ;;  %v8162_v15 = vld [vmem:[#allocation8 + $0x390] sm:$0xff]  ;;  %v8166_v22 = vld [vmem:[#allocation8 + $0x368] sm:$0xff] }
 0x213   :  { %1095 = vmatpush1.msra.mxu0 %v8136_v11  ;;  %1166 = vmatpush1.msra.mxu1 %v8140_v16  ;;  %12051 = vst [vmem:[#allocation94_spill] sm:$0xff] %v8162_v15  ;;  %12052 = vst [vmem:[#allocation95_spill] sm:$0xff] %v8166_v22  ;;  %v8168_v11 = vld [vmem:[#allocation8 + $0x378] sm:$0xff]  ;;  %v8172_v16 = vld [vmem:[#allocation8 + $0x360] sm:$0xff] }
 0x214   :  { %1096 = vmatprep.subr.mxu0 %v8142_v14  ;;  %1167 = vmatprep.subr.mxu1 %v8144_v10  ;;  %12053 = vst [vmem:[#allocation96_spill] sm:$0xff] %v8168_v11  ;;  %12054 = vst [vmem:[#allocation97_spill] sm:$0xff] %v8172_v16  ;;  %v8174_v14 = vld [vmem:[#allocation8 + $0x370] sm:$0xff]  ;;  %v8178_v10 = vld [vmem:[#allocation8 + $0x348] sm:$0xff] }
 0x215   :  { %1097 = vmatpush1.msra.mxu0 %v8148_v27  ;;  %1168 = vmatpush1.msra.mxu1 %v8150_v17  ;;  %12055 = vst [vmem:[#allocation98_spill] sm:$0xff] %v8174_v14  ;;  %12056 = vst [vmem:[#allocation99_spill] sm:$0xff] %v8178_v10  ;;  %v8180_v27 = vld [vmem:[#allocation8 + $0x358] sm:$0xff]  ;;  %v8184_v17 = vld [vmem:[#allocation8 + $0x340] sm:$0xff] }
 0x216   :  { %1098 = vmatprep.subr.mxu0 %v8154_v7  ;;  %1169 = vmatprep.subr.mxu1 %v8156_v13  ;;  %12057 = vst [vmem:[#allocation100_spill] sm:$0xff] %v8180_v27  ;;  %12058 = vst [vmem:[#allocation101_spill] sm:$0xff] %v8184_v17  ;;  %v8186_v7 = vld [vmem:[#allocation8 + $0x350] sm:$0xff]  ;;  %v8190_v13 = vld [vmem:[#allocation8 + $0x328] sm:$0xff] }
 0x217   :  { %1099 = vmatpush1.msra.mxu0 %v8160_v9  ;;  %1170 = vmatpush1.msra.mxu1 %v8162_v15  ;;  %12059 = vst [vmem:[#allocation102_spill] sm:$0xff] %v8186_v7  ;;  %12060 = vst [vmem:[#allocation103_spill] sm:$0xff] %v8190_v13  ;;  %v8192_v9 = vld [vmem:[#allocation8 + $0x338] sm:$0xff]  ;;  %v8196_v15 = vld [vmem:[#allocation8 + $0x320] sm:$0xff] }
 0x218   :  { %1100 = vmatprep.subr.mxu0 %v8166_v22  ;;  %1171 = vmatprep.subr.mxu1 %v8168_v11  ;;  %12061 = vst [vmem:[#allocation104_spill] sm:$0xff] %v8192_v9  ;;  %12062 = vst [vmem:[#allocation105_spill] sm:$0xff] %v8196_v15  ;;  %v8198_v22 = vld [vmem:[#allocation8 + $0x330] sm:$0xff]  ;;  %v8202_v11 = vld [vmem:[#allocation8 + $0x708] sm:$0xff] }
 0x219   :  { %1101 = vmatpush1.msra.mxu0 %v8172_v16  ;;  %1172 = vmatpush1.msra.mxu1 %v8174_v14  ;;  %12063 = vst [vmem:[#allocation106_spill] sm:$0xff] %v8198_v22  ;;  %12064 = vst [vmem:[#allocation107_spill] sm:$0xff] %v8202_v11  ;;  %v8204_v16 = vld [vmem:[#allocation8 + $0x718] sm:$0xff] }
 0x21a   :  { %1102 = vmatprep.subr.mxu0 %v8178_v10  ;;  %1173 = vmatprep.subr.mxu1 %v8180_v27  ;;  %12065 = vst [vmem:[#allocation108_spill] sm:$0xff] %v8204_v16  ;;  %v11480_v27 = vlaneseq }
 0x21b   :  { %1103 = vmatpush1.msra.mxu0 %v8184_v17  ;;  %1174 = vmatpush1.msra.mxu1 %v8186_v7 }
 0x21c   :  { %1104 = vmatprep.subr.mxu0 %v8190_v13  ;;  %1175 = vmatprep.subr.mxu1 %v8192_v9  ;;  %v8213_v17 = vshrl.u32 %v11480_v27, 7  ;;  %v700_v9 = vld [vmem:[#allocation8 + $0x300] ss:$8 sm:$0xf] }
 0x21d   :  { %1105 = vmatpush1.msra.mxu0 %v8196_v15  ;;  %1176 = vmatpush1.msra.mxu1 %v8198_v22 }
 0x21e   :  { %1216 = vmatprep.subr.mxu0 %v8202_v11  ;;  %1287 = vmatprep.subr.mxu1 %v8204_v16  ;;  %12066 = vst [vmem:[#allocation109_spill] sm:$0xff] %v8213_v17  ;;  %v8216_v14 = vsub.s32 0, %v8213_v17  ;;  %v11493_v13 = vsub.s32 2, %v8213_v17  ;;  %v8220_v22 = vsub.s32 1, %v8213_v17  ;;  %v11500_v11 = vsub.s32 3, %v8213_v17 }
 0x220   :  { %12067 = vst [vmem:[#allocation110_spill] sm:$0xff] %v8216_v14  ;;  %12068 = vst [vmem:[#allocation111_spill] sm:$0xff] %v8220_v22  ;;  %v705_v16 = vrot.slane %v700_v9, %v8216_v14  ;;  %v713_v27 = vrot.slane %v700_v9, %v11493_v13  ;;  %v709_v4 = vrot.slane %v700_v9, %v8220_v22 }
 0x221   :  { %v717_v3 = vrot.slane %v700_v9, %v11500_v11 }
 0x299   :  { %v795_v7 = vpop.f32.mrf.mxu0  ;;  %v872_v10 = vpop.f32.mrf.mxu1 }
 0x29a   :  { %v8237_v14 = vadd.f32 %v795_v7, %v705_v16  ;;  %v8246_v7 = vadd.f32 %v872_v10, %v713_v27 }
 0x29b   :  { %v797_v8 = vpop.f32.mrf.mxu0  ;;  %v874_v15 = vpop.f32.mrf.mxu1 }
 0x29c   :  { %v8239_v58 = vadd.f32 %v797_v8, %v709_v4 }
 0x29f   :  { %v801_v6 = vpop.f32.mrf.mxu0  ;;  %v878_v5 = vpop.f32.mrf.mxu1 }
 0x2a0   :  { %v8229_v2 = vadd.f32 %v801_v6, %v705_v16  ;;  %v8231_v1 = vadd.f32 %v878_v5, %v713_v27 }
 0x2a1   :  { %v803_v0 = vpop.f32.mrf.mxu0  ;;  %v880_v63 = vpop.f32.mrf.mxu1 }
 0x2a2   :  { %12069 = vst [vmem:[#allocation112_spill] sm:$0xff] %v8229_v2  ;;  %12070 = vst [vmem:[#allocation113_spill] sm:$0xff] %v8231_v1  ;;  %v8233_v62 = vadd.f32 %v803_v0, %v709_v4  ;;  %v8235_v59 = vadd.f32 %v880_v63, %v717_v3  ;;  %v8243_v0 = vadd.f32 %v874_v15, %v717_v3  ;;  %v8302_v2 = vld [vmem:[#allocation8 + $0x690] sm:$0xff] }
 0x2a3   :  { %12083 = vst [vmem:[#allocation126_spill] sm:$0xff] %v8302_v2 }
 0x2a4   :  { %12071 = vst [vmem:[#allocation114_spill] sm:$0xff] %v8233_v62  ;;  %12072 = vst [vmem:[#allocation115_spill] sm:$0xff] %v8235_v59  ;;  %v8296_v59 = vld [vmem:[#allocation8 + $0x698] sm:$0xff]  ;;  %v8300_v62 = vld [vmem:[#allocation8 + $0x680] sm:$0xff] }
 0x2a5   :  { %12081 = vst [vmem:[#allocation124_spill] sm:$0xff] %v8296_v59  ;;  %12082 = vst [vmem:[#allocation125_spill] sm:$0xff] %v8300_v62 }
 0x2bc   :  { %v949_v13 = vpop.f32.mrf.mxu0  ;;  %v1020_v5 = vpop.f32.mrf.mxu1 }
 0x2bd   :  { %v1025_v22 = vadd.f32 %v949_v13, %v8237_v14  ;;  %v1027_v8 = vadd.f32 %v1020_v5, %v8246_v7 }
 0x2be   :  { %v951_v57 = vpop.f32.mrf.mxu0  ;;  %v1022_v11 = vpop.f32.mrf.mxu1 }
 0x2bf   :  { %v6517_v17 = vmul.f32 -1.442695, %v1025_v22  ;;  %v1026_v6 = vadd.f32 %v951_v57, %v8239_v58  ;;  %v1028_v63 = vadd.f32 %v1022_v11, %v8243_v0 }
 0x2c1   :  { %6731 = vpow2.f32 %v6517_v17  ;;  %v6518_v9 = vmul.f32 -1.442695, %v1026_v6  ;;  %v6519_v16 = vmul.f32 -1.442695, %v1028_v63 }
 0x2c3   :  { %6733 = vpow2.f32 %v6518_v9 }
 0x2c4   :  { %6735 = vpow2.f32 %v6519_v16  ;;  %v8254_v16 = vld [vmem:[#allocation8 + $0x700] sm:$0xff] }
 0x2ce   :  { %v6732_v4 = vpop.eup %6731 }
 0x2cf   :  { %v1032_v13 = vadd.f32 1.0, %v6732_v4  ;;  %v8258_v4 = vld [vmem:[#allocation8 + $0x6e8] sm:$0xff] }
 0x2d0   :  { %v6734_v1 = vpop.eup %6733 }
 0x2d1   :  { %6737 = vrcp.f32 %v1032_v13  ;;  %v1038_v57 = vadd.f32 1.0, %v6734_v1  ;;  %v6736_v17 = vpop.eup %6735  ;;  %v8256_v1 = vld [vmem:[#allocation8 + $0x710] sm:$0xff]  ;;  %v8264_v13 = vld [vmem:[#allocation8 + $0x6e0] sm:$0xff] }
 0x2d2   :  { %6739 = vtanh.f32 %v1027_v8  ;;  %v1045_v15 = vadd.f32 1.0, %v6736_v17  ;;  %v8260_v8 = vld [vmem:[#allocation8 + $0x6f8] sm:$0xff]  ;;  %v8270_v17 = vld [vmem:[#allocation8 + $0x6c8] sm:$0xff] }
 0x2d3   :  { %6741 = vrcp.f32 %v1038_v57  ;;  %v8266_v57 = vld [vmem:[#allocation8 + $0x6f0] sm:$0xff] }
 0x2d4   :  { %6743 = vrcp.f32 %v1045_v15  ;;  %v8282_v15 = vld [vmem:[#allocation8 + $0x6a8] sm:$0xff] }
 0x2d5   :  { %12076 = vst [vmem:[#allocation119_spill] sm:$0xff] %v8282_v15 }
 0x2de   :  { %v6738_v22 = vpop.eup %6737 }
 0x2df   :  { %v6740_v6 = vpop.eup %6739 }
 0x2e0   :  { %v6742_v3 = vpop.eup %6741  ;;  %v1049_v11 = vmul.f32 %v6740_v6, %v6738_v22  ;;  %v8272_v22 = vld [vmem:[#allocation8 + $0x6d8] sm:$0xff]  ;;  %v8276_v6 = vld [vmem:[#allocation8 + $0x6c0] sm:$0xff] }
 0x2e1   :  { %v1048_v9 = vmul.f32 0.0, %v6742_v3  ;;  %v6744_v27 = vpop.eup %6743  ;;  %12073 = vst [vmem:[#allocation116_spill] sm:$0xff] %v8272_v22  ;;  %12074 = vst [vmem:[#allocation117_spill] sm:$0xff] %v8276_v6  ;;  %v8278_v3 = vld [vmem:[#allocation8 + $0x6d0] sm:$0xff] }
 0x2e2   :  { %12075 = vst [vmem:[#allocation118_spill] sm:$0xff] %v8278_v3 }
 0x2e3   :  { %v8249_v10 = vadd.f32 %v1049_v11, %v1048_v9  ;;  %v8284_v9 = vld [vmem:[#allocation8 + $0x6b8] sm:$0xff]  ;;  %v8288_v11 = vld [vmem:[#allocation8 + $0x6a0] sm:$0xff] }
 0x2e4   :  { %12077 = vst [vmem:[#allocation120_spill] sm:$0xff] %v8284_v9  ;;  %12078 = vst [vmem:[#allocation121_spill] sm:$0xff] %v8288_v11 }
 0x2e5   :  { %6745 = vtanh.f32 %v8249_v10 }
 0x2f2   :  { %v6746_v5 = vpop.eup %6745 }
 0x2f3   :  { %v8252_v63 = vmul.f32 %v6746_v5, %v6744_v27  ;;  %v8290_v27 = vld [vmem:[#allocation8 + $0x6b0] sm:$0xff]  ;;  %v8294_v5 = vld [vmem:[#allocation8 + $0x688] sm:$0xff] }
 0x2f4   :  { %12079 = vst [vmem:[#allocation122_spill] sm:$0xff] %v8290_v27  ;;  %12080 = vst [vmem:[#allocation123_spill] sm:$0xff] %v8294_v5 }
 0x2f5   :  { %1139 = vmatmul.mubr.f32.vlgmr.msra.gmra.mxu0 %v8252_v63  ;;  %1210 = vmatmul.mubr.f32.vlgmr.msra.gmra.mxu1 %v8252_v63 }
 0x2f6   :  { %1217 = vmatpush1.msra.mxu0 %v8254_v16  ;;  %1288 = vmatpush1.msra.mxu1 %v8256_v1 }
 0x2f7   :  { %1218 = vmatprep.subr.mxu0 %v8258_v4  ;;  %1289 = vmatprep.subr.mxu1 %v8260_v8 }
 0x2f8   :  { %1219 = vmatpush1.msra.mxu0 %v8264_v13  ;;  %1290 = vmatpush1.msra.mxu1 %v8266_v57 }
 0x2f9   :  { %1220 = vmatprep.subr.mxu0 %v8270_v17  ;;  %1291 = vmatprep.subr.mxu1 %v8272_v22  ;;  %v8306_v22 = vld [vmem:[#allocation8 + $0x668] sm:$0xff] }
 0x2fa   :  { %1221 = vmatpush1.msra.mxu0 %v8276_v6  ;;  %1292 = vmatpush1.msra.mxu1 %v8278_v3  ;;  %12084 = vst [vmem:[#allocation127_spill] sm:$0xff] %v8306_v22  ;;  %v8308_v6 = vld [vmem:[#allocation8 + $0x678] sm:$0xff]  ;;  %v8312_v3 = vld [vmem:[#allocation8 + $0x660] sm:$0xff] }
 0x2fb   :  { %1222 = vmatprep.subr.mxu0 %v8282_v15  ;;  %1293 = vmatprep.subr.mxu1 %v8284_v9  ;;  %12085 = vst [vmem:[#allocation128_spill] sm:$0xff] %v8308_v6  ;;  %12086 = vst [vmem:[#allocation129_spill] sm:$0xff] %v8312_v3  ;;  %v8314_v15 = vld [vmem:[#allocation8 + $0x670] sm:$0xff]  ;;  %v8318_v9 = vld [vmem:[#allocation8 + $0x648] sm:$0xff] }
 0x2fc   :  { %1223 = vmatpush1.msra.mxu0 %v8288_v11  ;;  %1294 = vmatpush1.msra.mxu1 %v8290_v27  ;;  %12087 = vst [vmem:[#allocation130_spill] sm:$0xff] %v8314_v15  ;;  %12088 = vst [vmem:[#allocation131_spill] sm:$0xff] %v8318_v9  ;;  %v8320_v11 = vld [vmem:[#allocation8 + $0x658] sm:$0xff]  ;;  %v8324_v27 = vld [vmem:[#allocation8 + $0x640] sm:$0xff] }
 0x2fd   :  { %1224 = vmatprep.subr.mxu0 %v8294_v5  ;;  %1295 = vmatprep.subr.mxu1 %v8296_v59  ;;  %12089 = vst [vmem:[#allocation132_spill] sm:$0xff] %v8320_v11  ;;  %12090 = vst [vmem:[#allocation133_spill] sm:$0xff] %v8324_v27  ;;  %v8326_v5 = vld [vmem:[#allocation8 + $0x650] sm:$0xff]  ;;  %v8330_v59 = vld [vmem:[#allocation8 + $0x628] sm:$0xff] }
 0x2fe   :  { %1225 = vmatpush1.msra.mxu0 %v8300_v62  ;;  %1296 = vmatpush1.msra.mxu1 %v8302_v2  ;;  %12091 = vst [vmem:[#allocation134_spill] sm:$0xff] %v8326_v5  ;;  %12092 = vst [vmem:[#allocation135_spill] sm:$0xff] %v8330_v59  ;;  %v8332_v62 = vld [vmem:[#allocation8 + $0x638] sm:$0xff]  ;;  %v8336_v2 = vld [vmem:[#allocation8 + $0x620] sm:$0xff] }
 0x2ff   :  { %1226 = vmatprep.subr.mxu0 %v8306_v22  ;;  %1297 = vmatprep.subr.mxu1 %v8308_v6  ;;  %12093 = vst [vmem:[#allocation136_spill] sm:$0xff] %v8332_v62  ;;  %12094 = vst [vmem:[#allocation137_spill] sm:$0xff] %v8336_v2  ;;  %v8338_v22 = vld [vmem:[#allocation8 + $0x630] sm:$0xff]  ;;  %v8342_v6 = vld [vmem:[#allocation8 + $0x608] sm:$0xff] }
 0x300   :  { %1227 = vmatpush1.msra.mxu0 %v8312_v3  ;;  %1298 = vmatpush1.msra.mxu1 %v8314_v15  ;;  %12095 = vst [vmem:[#allocation138_spill] sm:$0xff] %v8338_v22  ;;  %12096 = vst [vmem:[#allocation139_spill] sm:$0xff] %v8342_v6  ;;  %v8344_v3 = vld [vmem:[#allocation8 + $0x618] sm:$0xff]  ;;  %v8348_v15 = vld [vmem:[#allocation8 + $0x600] sm:$0xff] }
 0x301   :  { %1228 = vmatprep.subr.mxu0 %v8318_v9  ;;  %1299 = vmatprep.subr.mxu1 %v8320_v11  ;;  %12097 = vst [vmem:[#allocation140_spill] sm:$0xff] %v8344_v3  ;;  %12098 = vst [vmem:[#allocation141_spill] sm:$0xff] %v8348_v15  ;;  %v8350_v9 = vld [vmem:[#allocation8 + $0x610] sm:$0xff]  ;;  %v8354_v11 = vld [vmem:[#allocation8 + $0x5e8] sm:$0xff] }
 0x302   :  { %1229 = vmatpush1.msra.mxu0 %v8324_v27  ;;  %1300 = vmatpush1.msra.mxu1 %v8326_v5  ;;  %12099 = vst [vmem:[#allocation142_spill] sm:$0xff] %v8350_v9  ;;  %12100 = vst [vmem:[#allocation143_spill] sm:$0xff] %v8354_v11  ;;  %v8356_v27 = vld [vmem:[#allocation8 + $0x5f8] sm:$0xff]  ;;  %v8360_v5 = vld [vmem:[#allocation8 + $0x5e0] sm:$0xff] }
 0x303   :  { %1230 = vmatprep.subr.mxu0 %v8330_v59  ;;  %1301 = vmatprep.subr.mxu1 %v8332_v62  ;;  %12101 = vst [vmem:[#allocation144_spill] sm:$0xff] %v8356_v27  ;;  %12102 = vst [vmem:[#allocation145_spill] sm:$0xff] %v8360_v5  ;;  %v8362_v59 = vld [vmem:[#allocation8 + $0x5f0] sm:$0xff]  ;;  %v8366_v62 = vld [vmem:[#allocation8 + $0x5c8] sm:$0xff] }
 0x304   :  { %1231 = vmatpush1.msra.mxu0 %v8336_v2  ;;  %1302 = vmatpush1.msra.mxu1 %v8338_v22  ;;  %12103 = vst [vmem:[#allocation146_spill] sm:$0xff] %v8362_v59  ;;  %12104 = vst [vmem:[#allocation147_spill] sm:$0xff] %v8366_v62  ;;  %v8368_v2 = vld [vmem:[#allocation8 + $0x5d8] sm:$0xff]  ;;  %v8372_v22 = vld [vmem:[#allocation8 + $0x5c0] sm:$0xff] }
 0x305   :  { %1232 = vmatprep.subr.mxu0 %v8342_v6  ;;  %1303 = vmatprep.subr.mxu1 %v8344_v3  ;;  %12105 = vst [vmem:[#allocation148_spill] sm:$0xff] %v8368_v2  ;;  %12106 = vst [vmem:[#allocation149_spill] sm:$0xff] %v8372_v22  ;;  %v8374_v6 = vld [vmem:[#allocation8 + $0x5d0] sm:$0xff]  ;;  %v8378_v3 = vld [vmem:[#allocation8 + $0x5a8] sm:$0xff] }
 0x306   :  { %1233 = vmatpush1.msra.mxu0 %v8348_v15  ;;  %1304 = vmatpush1.msra.mxu1 %v8350_v9  ;;  %12107 = vst [vmem:[#allocation150_spill] sm:$0xff] %v8374_v6  ;;  %12108 = vst [vmem:[#allocation151_spill] sm:$0xff] %v8378_v3  ;;  %v8380_v15 = vld [vmem:[#allocation8 + $0x5b8] sm:$0xff]  ;;  %v8384_v9 = vld [vmem:[#allocation8 + $0x5a0] sm:$0xff] }
 0x307   :  { %1234 = vmatprep.subr.mxu0 %v8354_v11  ;;  %1305 = vmatprep.subr.mxu1 %v8356_v27  ;;  %12109 = vst [vmem:[#allocation152_spill] sm:$0xff] %v8380_v15  ;;  %12110 = vst [vmem:[#allocation153_spill] sm:$0xff] %v8384_v9  ;;  %v8386_v11 = vld [vmem:[#allocation8 + $0x5b0] sm:$0xff]  ;;  %v8390_v27 = vld [vmem:[#allocation8 + $0x588] sm:$0xff] }
 0x308   :  { %1235 = vmatpush1.msra.mxu0 %v8360_v5  ;;  %1306 = vmatpush1.msra.mxu1 %v8362_v59  ;;  %12111 = vst [vmem:[#allocation154_spill] sm:$0xff] %v8386_v11  ;;  %12112 = vst [vmem:[#allocation155_spill] sm:$0xff] %v8390_v27  ;;  %v8392_v5 = vld [vmem:[#allocation8 + $0x598] sm:$0xff]  ;;  %v8396_v59 = vld [vmem:[#allocation8 + $0x580] sm:$0xff] }
 0x309   :  { %1236 = vmatprep.subr.mxu0 %v8366_v62  ;;  %1307 = vmatprep.subr.mxu1 %v8368_v2  ;;  %12113 = vst [vmem:[#allocation156_spill] sm:$0xff] %v8392_v5  ;;  %12114 = vst [vmem:[#allocation157_spill] sm:$0xff] %v8396_v59  ;;  %v8398_v62 = vld [vmem:[#allocation8 + $0x590] sm:$0xff]  ;;  %v8402_v2 = vld [vmem:[#allocation8 + $0x568] sm:$0xff] }
 0x30a   :  { %1237 = vmatpush1.msra.mxu0 %v8372_v22  ;;  %1308 = vmatpush1.msra.mxu1 %v8374_v6  ;;  %12115 = vst [vmem:[#allocation158_spill] sm:$0xff] %v8398_v62  ;;  %v8404_v22 = vld [vmem:[#allocation8 + $0x578] sm:$0xff]  ;;  %v8408_v6 = vld [vmem:[#allocation8 + $0x560] sm:$0xff] }
 0x30b   :  { %1238 = vmatprep.subr.mxu0 %v8378_v3  ;;  %1309 = vmatprep.subr.mxu1 %v8380_v15  ;;  %12116 = vst [vmem:[#allocation159_spill] sm:$0xff] %v8404_v22  ;;  %v8410_v3 = vld [vmem:[#allocation8 + $0x570] sm:$0xff]  ;;  %v8414_v15 = vld [vmem:[#allocation8 + $0x548] sm:$0xff] }
 0x30c   :  { %1239 = vmatpush1.msra.mxu0 %v8384_v9  ;;  %1310 = vmatpush1.msra.mxu1 %v8386_v11  ;;  %v8416_v9 = vld [vmem:[#allocation8 + $0x558] sm:$0xff]  ;;  %v8420_v11 = vld [vmem:[#allocation8 + $0x540] sm:$0xff] }
 0x30d   :  { %1240 = vmatprep.subr.mxu0 %v8390_v27  ;;  %1311 = vmatprep.subr.mxu1 %v8392_v5  ;;  %v8422_v27 = vld [vmem:[#allocation8 + $0x550] sm:$0xff]  ;;  %v8426_v5 = vld [vmem:[#allocation8 + $0x528] sm:$0xff] }
 0x30e   :  { %1241 = vmatpush1.msra.mxu0 %v8396_v59  ;;  %1312 = vmatpush1.msra.mxu1 %v8398_v62  ;;  %v8428_v59 = vld [vmem:[#allocation8 + $0x538] sm:$0xff]  ;;  %v8432_v62 = vld [vmem:[#allocation8 + $0x520] sm:$0xff] }
 0x30f   :  { %1242 = vmatprep.subr.mxu0 %v8402_v2  ;;  %1313 = vmatprep.subr.mxu1 %v8404_v22  ;;  %v8436_v22 = vld [vmem:[#allocation8 + $0x530] sm:$0xff] }
 0x310   :  { %1243 = vmatpush1.msra.mxu0 %v8408_v6  ;;  %1314 = vmatpush1.msra.mxu1 %v8410_v3 }
 0x311   :  { %1244 = vmatprep.subr.mxu0 %v8414_v15  ;;  %1315 = vmatprep.subr.mxu1 %v8416_v9 }
 0x312   :  { %1245 = vmatpush1.msra.mxu0 %v8420_v11  ;;  %1316 = vmatpush1.msra.mxu1 %v8422_v27 }
 0x313   :  { %1246 = vmatprep.subr.mxu0 %v8426_v5  ;;  %1317 = vmatprep.subr.mxu1 %v8428_v59 }
 0x314   :  { %1247 = vmatpush1.msra.mxu0 %v8432_v62  ;;  %1280 = vmatprep.mubr.f32.mxu0 %v11999_v12 }
 0x315   :  { %1318 = vmatpush1.msra.mxu1 %v8436_v22  ;;  %1351 = vmatprep.mubr.f32.mxu1 %v11999_v12 }
 0x316   :  { %1281 = vmatmul.mubr.f32.vlgmr.msra.gmra.mxu0 %v11999_v12  ;;  %1352 = vmatmul.mubr.f32.vlgmr.msra.gmra.mxu1 %v11999_v12 }
 0x317   :  { %1387 = vmatprep.subr.mxu0 %v7801_v60  ;;  %1458 = vmatprep.subr.mxu1 %v7803_v61  ;;  %v12117_v60 = vld [vmem:[#allocation18_spill] sm:$0xff]  ;;  %v12118_v61 = vld [vmem:[#allocation19_spill] sm:$0xff] }
 0x318   :  { %1388 = vmatpush1.msra.mxu0 %v7816_v18  ;;  %1459 = vmatpush1.msra.mxu1 %v7818_v19  ;;  %v12119_v18 = vld [vmem:[#allocation20_spill] sm:$0xff]  ;;  %v12120_v19 = vld [vmem:[#allocation21_spill] sm:$0xff] }
 0x319   :  { %1389 = vmatprep.subr.mxu0 %v7820_v20  ;;  %1460 = vmatprep.subr.mxu1 %v7822_v21  ;;  %v12121_v20 = vld [vmem:[#allocation22_spill] sm:$0xff]  ;;  %v12122_v21 = vld [vmem:[#allocation23_spill] sm:$0xff] }
 0x31a   :  { %1390 = vmatpush1.msra.mxu0 %v7826_v23  ;;  %1461 = vmatpush1.msra.mxu1 %v7828_v24  ;;  %v12123_v23 = vld [vmem:[#allocation24_spill] sm:$0xff]  ;;  %v12124_v24 = vld [vmem:[#allocation25_spill] sm:$0xff] }
 0x31b   :  { %1391 = vmatprep.subr.mxu0 %v7834_v25  ;;  %1462 = vmatprep.subr.mxu1 %v7836_v26  ;;  %v12125_v25 = vld [vmem:[#allocation26_spill] sm:$0xff]  ;;  %v12126_v26 = vld [vmem:[#allocation27_spill] sm:$0xff] }
 0x31c   :  { %1392 = vmatpush1.msra.mxu0 %v7842_v28  ;;  %1463 = vmatpush1.msra.mxu1 %v7844_v29  ;;  %v12127_v28 = vld [vmem:[#allocation28_spill] sm:$0xff]  ;;  %v12128_v29 = vld [vmem:[#allocation29_spill] sm:$0xff] }
 0x31d   :  { %1393 = vmatprep.subr.mxu0 %v7848_v30  ;;  %1464 = vmatprep.subr.mxu1 %v7850_v31  ;;  %v12129_v30 = vld [vmem:[#allocation30_spill] sm:$0xff]  ;;  %v12130_v31 = vld [vmem:[#allocation31_spill] sm:$0xff] }
 0x31e   :  { %1394 = vmatpush1.msra.mxu0 %v7854_v32  ;;  %1465 = vmatpush1.msra.mxu1 %v7856_v33  ;;  %v12131_v32 = vld [vmem:[#allocation32_spill] sm:$0xff]  ;;  %v12132_v33 = vld [vmem:[#allocation33_spill] sm:$0xff] }
 0x31f   :  { %1395 = vmatprep.subr.mxu0 %v7860_v34  ;;  %1466 = vmatprep.subr.mxu1 %v7862_v35  ;;  %v12133_v34 = vld [vmem:[#allocation34_spill] sm:$0xff]  ;;  %v12134_v35 = vld [vmem:[#allocation35_spill] sm:$0xff] }
 0x320   :  { %1396 = vmatpush1.msra.mxu0 %v7866_v36  ;;  %1467 = vmatpush1.msra.mxu1 %v7868_v37  ;;  %v12135_v36 = vld [vmem:[#allocation36_spill] sm:$0xff]  ;;  %v12136_v37 = vld [vmem:[#allocation37_spill] sm:$0xff] }
 0x321   :  { %1397 = vmatprep.subr.mxu0 %v7872_v38  ;;  %1468 = vmatprep.subr.mxu1 %v7874_v39  ;;  %v12137_v38 = vld [vmem:[#allocation38_spill] sm:$0xff]  ;;  %v12138_v39 = vld [vmem:[#allocation39_spill] sm:$0xff] }
 0x322   :  { %1398 = vmatpush1.msra.mxu0 %v7878_v40  ;;  %1469 = vmatpush1.msra.mxu1 %v7880_v41  ;;  %v12139_v40 = vld [vmem:[#allocation40_spill] sm:$0xff]  ;;  %v12140_v41 = vld [vmem:[#allocation41_spill] sm:$0xff] }
 0x323   :  { %1399 = vmatprep.subr.mxu0 %v7884_v42  ;;  %1470 = vmatprep.subr.mxu1 %v7886_v43  ;;  %v12141_v42 = vld [vmem:[#allocation42_spill] sm:$0xff]  ;;  %v12142_v43 = vld [vmem:[#allocation43_spill] sm:$0xff] }
 0x324   :  { %1400 = vmatpush1.msra.mxu0 %v7890_v44  ;;  %1471 = vmatpush1.msra.mxu1 %v7892_v45  ;;  %v12143_v44 = vld [vmem:[#allocation44_spill] sm:$0xff]  ;;  %v12144_v45 = vld [vmem:[#allocation45_spill] sm:$0xff] }
 0x325   :  { %1401 = vmatprep.subr.mxu0 %v7896_v46  ;;  %1472 = vmatprep.subr.mxu1 %v7898_v47  ;;  %v12145_v46 = vld [vmem:[#allocation46_spill] sm:$0xff]  ;;  %v12146_v47 = vld [vmem:[#allocation47_spill] sm:$0xff] }
 0x326   :  { %1402 = vmatpush1.msra.mxu0 %v7902_v48  ;;  %1473 = vmatpush1.msra.mxu1 %v7904_v49  ;;  %v12147_v48 = vld [vmem:[#allocation48_spill] sm:$0xff]  ;;  %v12148_v49 = vld [vmem:[#allocation49_spill] sm:$0xff] }
 0x327   :  { %1403 = vmatprep.subr.mxu0 %v7908_v50  ;;  %1474 = vmatprep.subr.mxu1 %v7910_v51  ;;  %v12149_v50 = vld [vmem:[#allocation50_spill] sm:$0xff]  ;;  %v12150_v51 = vld [vmem:[#allocation51_spill] sm:$0xff] }
 0x328   :  { %1404 = vmatpush1.msra.mxu0 %v7914_v52  ;;  %1475 = vmatpush1.msra.mxu1 %v7916_v53  ;;  %v12151_v52 = vld [vmem:[#allocation52_spill] sm:$0xff]  ;;  %v12152_v53 = vld [vmem:[#allocation53_spill] sm:$0xff] }
 0x329   :  { %1405 = vmatprep.subr.mxu0 %v7920_v54  ;;  %1476 = vmatprep.subr.mxu1 %v7922_v55  ;;  %v12153_v54 = vld [vmem:[#allocation54_spill] sm:$0xff]  ;;  %v12154_v55 = vld [vmem:[#allocation55_spill] sm:$0xff] }
 0x32a   :  { %1406 = vmatpush1.msra.mxu0 %v7926_v56  ;;  %1477 = vmatpush1.msra.mxu1 %v12117_v60  ;;  %v12155_v56 = vld [vmem:[#allocation56_spill] sm:$0xff]  ;;  %v12157_v60 = vld [vmem:[#allocation58_spill] sm:$0xff] }
 0x32b   :  { %1407 = vmatprep.subr.mxu0 %v12118_v61  ;;  %1478 = vmatprep.subr.mxu1 %v12119_v18  ;;  %v12158_v61 = vld [vmem:[#allocation59_spill] sm:$0xff]  ;;  %v12159_v18 = vld [vmem:[#allocation60_spill] sm:$0xff] }
 0x32c   :  { %1408 = vmatpush1.msra.mxu0 %v12120_v19  ;;  %1479 = vmatpush1.msra.mxu1 %v12121_v20  ;;  %v12160_v19 = vld [vmem:[#allocation61_spill] sm:$0xff]  ;;  %v12161_v20 = vld [vmem:[#allocation62_spill] sm:$0xff] }
 0x32d   :  { %1409 = vmatprep.subr.mxu0 %v12122_v21  ;;  %1480 = vmatprep.subr.mxu1 %v12123_v23  ;;  %v12162_v21 = vld [vmem:[#allocation63_spill] sm:$0xff]  ;;  %v12163_v23 = vld [vmem:[#allocation64_spill] sm:$0xff] }
 0x32e   :  { %1410 = vmatpush1.msra.mxu0 %v12124_v24  ;;  %1481 = vmatpush1.msra.mxu1 %v12125_v25  ;;  %v12164_v24 = vld [vmem:[#allocation65_spill] sm:$0xff]  ;;  %v12165_v25 = vld [vmem:[#allocation66_spill] sm:$0xff] }
 0x32f   :  { %1411 = vmatprep.subr.mxu0 %v12126_v26  ;;  %1482 = vmatprep.subr.mxu1 %v12127_v28  ;;  %v12166_v26 = vld [vmem:[#allocation67_spill] sm:$0xff]  ;;  %v12167_v28 = vld [vmem:[#allocation68_spill] sm:$0xff] }
 0x330   :  { %1412 = vmatpush1.msra.mxu0 %v12128_v29  ;;  %1483 = vmatpush1.msra.mxu1 %v12129_v30  ;;  %v12168_v29 = vld [vmem:[#allocation69_spill] sm:$0xff]  ;;  %v12169_v30 = vld [vmem:[#allocation70_spill] sm:$0xff] }
 0x331   :  { %1413 = vmatprep.subr.mxu0 %v12130_v31  ;;  %1484 = vmatprep.subr.mxu1 %v12131_v32  ;;  %v12170_v31 = vld [vmem:[#allocation71_spill] sm:$0xff]  ;;  %v12171_v32 = vld [vmem:[#allocation72_spill] sm:$0xff] }
 0x332   :  { %1414 = vmatpush1.msra.mxu0 %v12132_v33  ;;  %1485 = vmatpush1.msra.mxu1 %v12133_v34  ;;  %v12172_v33 = vld [vmem:[#allocation73_spill] sm:$0xff]  ;;  %v12173_v34 = vld [vmem:[#allocation74_spill] sm:$0xff] }
 0x333   :  { %1415 = vmatprep.subr.mxu0 %v12134_v35  ;;  %1486 = vmatprep.subr.mxu1 %v12135_v36  ;;  %v12174_v35 = vld [vmem:[#allocation75_spill] sm:$0xff]  ;;  %v12175_v36 = vld [vmem:[#allocation76_spill] sm:$0xff] }
 0x334   :  { %1416 = vmatpush1.msra.mxu0 %v12136_v37  ;;  %1487 = vmatpush1.msra.mxu1 %v12137_v38  ;;  %v12176_v37 = vld [vmem:[#allocation77_spill] sm:$0xff]  ;;  %v12177_v38 = vld [vmem:[#allocation78_spill] sm:$0xff] }
 0x335   :  { %1417 = vmatprep.subr.mxu0 %v12138_v39  ;;  %1488 = vmatprep.subr.mxu1 %v12139_v40  ;;  %v12178_v39 = vld [vmem:[#allocation79_spill] sm:$0xff]  ;;  %v12179_v40 = vld [vmem:[#allocation80_spill] sm:$0xff] }
 0x336   :  { %1418 = vmatpush1.msra.mxu0 %v12140_v41  ;;  %1451 = vmatprep.mubr.f32.mxu0 %v11999_v12  ;;  %v12180_v41 = vld [vmem:[#allocation81_spill] sm:$0xff] }
 0x337   :  { %1489 = vmatpush1.msra.mxu1 %v12141_v42  ;;  %1522 = vmatprep.mubr.f32.mxu1 %v11999_v12  ;;  %v12181_v42 = vld [vmem:[#allocation82_spill] sm:$0xff] }
 0x338   :  { %1452 = vmatmul.mubr.f32.vlgmr.msra.gmra.mxu0 %v8252_v63  ;;  %1523 = vmatmul.mubr.f32.vlgmr.msra.gmra.mxu1 %v8252_v63  ;;  %v12156_v63 = vld [vmem:[#allocation57_spill] sm:$0xff] }
 0x339   :  { %1575 = vmatprep.subr.mxu0 %v12142_v43  ;;  %1646 = vmatprep.subr.mxu1 %v12143_v44  ;;  %v12182_v43 = vld [vmem:[#allocation83_spill] sm:$0xff]  ;;  %v12183_v44 = vld [vmem:[#allocation84_spill] sm:$0xff] }
 0x33a   :  { %1576 = vmatpush1.msra.mxu0 %v12144_v45  ;;  %1647 = vmatpush1.msra.mxu1 %v12145_v46  ;;  %v12184_v45 = vld [vmem:[#allocation85_spill] sm:$0xff]  ;;  %v12185_v46 = vld [vmem:[#allocation86_spill] sm:$0xff] }
 0x33b   :  { %1577 = vmatprep.subr.mxu0 %v12146_v47  ;;  %1648 = vmatprep.subr.mxu1 %v12147_v48  ;;  %v12186_v47 = vld [vmem:[#allocation87_spill] sm:$0xff]  ;;  %v12187_v48 = vld [vmem:[#allocation88_spill] sm:$0xff] }
 0x33c   :  { %1578 = vmatpush1.msra.mxu0 %v12148_v49  ;;  %1649 = vmatpush1.msra.mxu1 %v12149_v50  ;;  %v12188_v49 = vld [vmem:[#allocation89_spill] sm:$0xff]  ;;  %v12189_v50 = vld [vmem:[#allocation90_spill] sm:$0xff] }
 0x33d   :  { %1579 = vmatprep.subr.mxu0 %v12150_v51  ;;  %1650 = vmatprep.subr.mxu1 %v12151_v52  ;;  %v12190_v51 = vld [vmem:[#allocation91_spill] sm:$0xff]  ;;  %v12191_v52 = vld [vmem:[#allocation92_spill] sm:$0xff] }
 0x33e   :  { %1580 = vmatpush1.msra.mxu0 %v12152_v53  ;;  %1651 = vmatpush1.msra.mxu1 %v12153_v54  ;;  %v12192_v53 = vld [vmem:[#allocation93_spill] sm:$0xff]  ;;  %v12193_v54 = vld [vmem:[#allocation94_spill] sm:$0xff] }
 0x33f   :  { %1581 = vmatprep.subr.mxu0 %v12154_v55  ;;  %1652 = vmatprep.subr.mxu1 %v12155_v56  ;;  %v12194_v55 = vld [vmem:[#allocation95_spill] sm:$0xff]  ;;  %v12195_v56 = vld [vmem:[#allocation96_spill] sm:$0xff] }
 0x340   :  { %1582 = vmatpush1.msra.mxu0 %v12156_v63  ;;  %1653 = vmatpush1.msra.mxu1 %v12157_v60  ;;  %v12196_v63 = vld [vmem:[#allocation97_spill] sm:$0xff]  ;;  %v12197_v60 = vld [vmem:[#allocation98_spill] sm:$0xff] }
 0x341   :  { %1583 = vmatprep.subr.mxu0 %v12158_v61  ;;  %1654 = vmatprep.subr.mxu1 %v12159_v18  ;;  %v12198_v61 = vld [vmem:[#allocation99_spill] sm:$0xff]  ;;  %v12199_v18 = vld [vmem:[#allocation100_spill] sm:$0xff] }
 0x342   :  { %1584 = vmatpush1.msra.mxu0 %v12160_v19  ;;  %1655 = vmatpush1.msra.mxu1 %v12161_v20  ;;  %v12200_v19 = vld [vmem:[#allocation101_spill] sm:$0xff]  ;;  %v12201_v20 = vld [vmem:[#allocation102_spill] sm:$0xff] }
 0x343   :  { %1585 = vmatprep.subr.mxu0 %v12162_v21  ;;  %1656 = vmatprep.subr.mxu1 %v12163_v23  ;;  %v12202_v21 = vld [vmem:[#allocation103_spill] sm:$0xff]  ;;  %v12203_v23 = vld [vmem:[#allocation104_spill] sm:$0xff] }
 0x344   :  { %1586 = vmatpush1.msra.mxu0 %v12164_v24  ;;  %1657 = vmatpush1.msra.mxu1 %v12165_v25  ;;  %v12204_v24 = vld [vmem:[#allocation105_spill] sm:$0xff]  ;;  %v12205_v25 = vld [vmem:[#allocation106_spill] sm:$0xff] }
 0x345   :  { %1587 = vmatprep.subr.mxu0 %v12166_v26  ;;  %1658 = vmatprep.subr.mxu1 %v12167_v28  ;;  %v12206_v26 = vld [vmem:[#allocation107_spill] sm:$0xff]  ;;  %v12207_v28 = vld [vmem:[#allocation108_spill] sm:$0xff] }
 0x346   :  { %1588 = vmatpush1.msra.mxu0 %v12168_v29  ;;  %1659 = vmatpush1.msra.mxu1 %v12169_v30  ;;  %v666_v29 = vld [vmem:[#allocation8 + $0x720] ss:$8 sm:$0xf] }
 0x347   :  { %1589 = vmatprep.subr.mxu0 %v12170_v31  ;;  %1660 = vmatprep.subr.mxu1 %v12171_v32  ;;  %v12208_v31 = vld [vmem:[#allocation110_spill] sm:$0xff] }
 0x348   :  { %1590 = vmatpush1.msra.mxu0 %v12172_v33  ;;  %1661 = vmatpush1.msra.mxu1 %v12173_v34  ;;  %v8583_v32 = vrot.slane %v666_v29, %v12208_v31  ;;  %v12210_v33 = vld [vmem:[#allocation111_spill] sm:$0xff] }
 0x349   :  { %1591 = vmatprep.subr.mxu0 %v12174_v35  ;;  %1662 = vmatprep.subr.mxu1 %v12175_v36  ;;  %v8586_v34 = vrot.slane %v666_v29, %v12210_v33  ;;  %v8831_v33 = vld [vmem:[#allocation8 + $0x178] sm:$0xff]  ;;  %v8834_v31 = vld [vmem:[#allocation8 + $0x160] sm:$0xff] }
 0x34a   :  { %1592 = vmatpush1.msra.mxu0 %v12176_v37  ;;  %1663 = vmatpush1.msra.mxu1 %v12177_v38  ;;  %12209 = vst [vmem:[#allocation18_spill] sm:$0xff] %v8583_v32  ;;  %12273 = vst [vmem:[#allocation34_spill] sm:$0xff] %v8831_v33 }
 0x34b   :  { %1593 = vmatprep.subr.mxu0 %v12178_v39  ;;  %1664 = vmatprep.subr.mxu1 %v12179_v40  ;;  %12274 = vst [vmem:[#allocation35_spill] sm:$0xff] %v8834_v31 }
 0x34c   :  { %1594 = vmatpush1.msra.mxu0 %v12180_v41  ;;  %1665 = vmatpush1.msra.mxu1 %v12181_v42 }
 0x34d   :  { %1595 = vmatprep.subr.mxu0 %v12182_v43  ;;  %1666 = vmatprep.subr.mxu1 %v12183_v44 }
 0x34e   :  { %1596 = vmatpush1.msra.mxu0 %v12184_v45  ;;  %1667 = vmatpush1.msra.mxu1 %v12185_v46 }
 0x34f   :  { %1597 = vmatprep.subr.mxu0 %v12186_v47  ;;  %1668 = vmatprep.subr.mxu1 %v12187_v48  ;;  %v12211_v47 = vld [vmem:[#allocation109_spill] sm:$0xff] }
 0x350   :  { %1598 = vmatpush1.msra.mxu0 %v12188_v49  ;;  %1669 = vmatpush1.msra.mxu1 %v12189_v50  ;;  %v12212_v48 = vsub.s32 3, %v12211_v47 }
 0x351   :  { %1599 = vmatprep.subr.mxu0 %v12190_v51  ;;  %1670 = vmatprep.subr.mxu1 %v12191_v52  ;;  %v12213_v52 = vsub.s32 2, %v12211_v47  ;;  %v8837_v47 = vld [vmem:[#allocation8 + $0x170] sm:$0xff] }
 0x352   :  { %1600 = vmatpush1.msra.mxu0 %v12192_v53  ;;  %1671 = vmatpush1.msra.mxu1 %v12193_v54  ;;  %v8592_v49 = vrot.slane %v666_v29, %v12212_v48  ;;  %12275 = vst [vmem:[#allocation36_spill] sm:$0xff] %v8837_v47 }
 0x353   :  { %1601 = vmatprep.subr.mxu0 %v12194_v55  ;;  %1672 = vmatprep.subr.mxu1 %v12195_v56  ;;  %v8597_v53 = vrot.slane %v666_v29, %v12213_v52 }
 0x354   :  { %1602 = vmatpush1.msra.mxu0 %v12196_v63  ;;  %1673 = vmatpush1.msra.mxu1 %v12197_v60 }
 0x355   :  { %1603 = vmatprep.subr.mxu0 %v12198_v61  ;;  %1674 = vmatprep.subr.mxu1 %v12199_v18 }
 0x356   :  { %1604 = vmatpush1.msra.mxu0 %v12200_v19  ;;  %1675 = vmatpush1.msra.mxu1 %v12201_v20 }
 0x357   :  { %1605 = vmatprep.subr.mxu0 %v12202_v21  ;;  %1676 = vmatprep.subr.mxu1 %v12203_v23 }
 0x358   :  { %1606 = vmatpush1.msra.mxu0 %v12204_v24  ;;  %1677 = vmatpush1.msra.mxu1 %v12205_v25 }
 0x359   :  { %1639 = vmatprep.mubr.f32.mxu0 %v11999_v12  ;;  %1710 = vmatprep.mubr.f32.mxu1 %v11999_v12 }
 0x35a   :  { %1717 = vmatprep.subr.mxu0 %v12206_v26  ;;  %1788 = vmatprep.subr.mxu1 %v12207_v28 }
 0x3b5   :  { %v1140_v30 = vpop.f32.mrf.mxu0  ;;  %v1211_v37 = vpop.f32.mrf.mxu1 }
 0x3b6   :  { %v1141_v36 = vadd.f32 %v1140_v30, %v8583_v32  ;;  %v1212_v55 = vadd.f32 %v1211_v37, %v8597_v53 }
 0x3b7   :  { %v1142_v35 = vpop.f32.mrf.mxu0  ;;  %v1213_v42 = vpop.f32.mrf.mxu1 }
 0x3b8   :  { %v1143_v39 = vadd.f32 %v1142_v35, %v8586_v34  ;;  %v1214_v51 = vadd.f32 %v1213_v42, %v8592_v49 }
 0x3d6   :  { %v1282_v38 = vpop.f32.mrf.mxu0  ;;  %v1353_v45 = vpop.f32.mrf.mxu1 }
 0x3d7   :  { %v1358_v40 = vadd.f32 %v1282_v38, %v1141_v36  ;;  %v1360_v60 = vadd.f32 %v1353_v45, %v1212_v55 }
 0x3d8   :  { %v1284_v41 = vpop.f32.mrf.mxu0  ;;  %v1355_v50 = vpop.f32.mrf.mxu1 }
 0x3d9   :  { %v6520_v43 = vmul.f32 -1.442695, %v1358_v40  ;;  %v1359_v44 = vadd.f32 %v1284_v41, %v1143_v39  ;;  %v1361_v54 = vadd.f32 %v1355_v50, %v1214_v51 }
 0x3db   :  { %6747 = vpow2.f32 %v6520_v43  ;;  %v6521_v46 = vmul.f32 -1.442695, %v1359_v44  ;;  %v6522_v56 = vmul.f32 -1.442695, %v1361_v54 }
 0x3dd   :  { %6749 = vpow2.f32 %v6521_v46 }
 0x3de   :  { %6751 = vpow2.f32 %v6522_v56 }
 0x3e8   :  { %v6748_v63 = vpop.eup %6747 }
 0x3e9   :  { %v1365_v61 = vadd.f32 1.0, %v6748_v63 }
 0x3ea   :  { %v6750_v18 = vpop.eup %6749 }
 0x3eb   :  { %6753 = vrcp.f32 %v1365_v61  ;;  %v1371_v19 = vadd.f32 1.0, %v6750_v18  ;;  %v6752_v20 = vpop.eup %6751 }
 0x3ec   :  { %6755 = vtanh.f32 %v1360_v60  ;;  %v1378_v28 = vadd.f32 1.0, %v6752_v20  ;;  %v1565_v20 = vrot.slane %v8249_v10, 6  ;;  %v12214_v10 = vld [vmem:[#allocation116_spill] sm:$0xff] }
 0x3ed   :  { %6757 = vrcp.f32 %v1371_v19 }
 0x3ee   :  { %6759 = vrcp.f32 %v1378_v28 }
 0x3f8   :  { %v6754_v21 = vpop.eup %6753  ;;  %v1453_v23 = vpop.f32.mrf.mxu0 }
 0x3f9   :  { %v6756_v24 = vpop.eup %6755  ;;  %v1533_v25 = vrot.slane %v1453_v23, 6  ;;  %v1524_v37 = vpop.f32.mrf.mxu1 }
 0x3fa   :  { %v6758_v26 = vpop.eup %6757  ;;  %v1455_v29 = vpop.f32.mrf.mxu0  ;;  %v1382_v35 = vmul.f32 %v6756_v24, %v6754_v21  ;;  %v1535_v46 = vrot.slane %v1524_v37, 6  ;;  %v12216_v37 = vld [vmem:[#allocation118_spill] sm:$0xff] }
 0x3fb   :  { %v1381_v30 = vmul.f32 0.0, %v6758_v26  ;;  %v1541_v36 = vadd.f32 %v1533_v25, %v8237_v14  ;;  %v1534_v38 = vrot.slane %v1455_v29, 6  ;;  %v1526_v43 = vpop.f32.mrf.mxu1  ;;  %v6760_v50 = vpop.eup %6759 }
 0x3fc   :  { %v1536_v44 = vrot.slane %v1526_v43, 6  ;;  %v1543_v51 = vadd.f32 %v1535_v46, %v8246_v7  ;;  %v12228_v43 = vld [vmem:[#allocation130_spill] sm:$0xff]  ;;  %v12231_v46 = vld [vmem:[#allocation133_spill] sm:$0xff] }
 0x3fd   :  { %v8601_v39 = vadd.f32 %v1382_v35, %v1381_v30  ;;  %v6523_v40 = vmul.f32 -1.442695, %v1541_v36  ;;  %v1542_v41 = vadd.f32 %v1534_v38, %v8239_v58  ;;  %v12215_v36 = vld [vmem:[#allocation117_spill] sm:$0xff]  ;;  %v12217_v38 = vld [vmem:[#allocation119_spill] sm:$0xff] }
 0x3fe   :  { %v1544_v45 = vadd.f32 %v1536_v44, %v8243_v0  ;;  %v12229_v44 = vld [vmem:[#allocation131_spill] sm:$0xff] }
 0x3ff   :  { %6761 = vtanh.f32 %v8601_v39  ;;  %v6524_v42 = vmul.f32 -1.442695, %v1542_v41  ;;  %v12226_v41 = vld [vmem:[#allocation128_spill] sm:$0xff] }
 0x400   :  { %6763 = vpow2.f32 %v6523_v40  ;;  %v6525_v48 = vmul.f32 -1.442695, %v1544_v45  ;;  %v12225_v40 = vld [vmem:[#allocation127_spill] sm:$0xff]  ;;  %v12230_v45 = vld [vmem:[#allocation132_spill] sm:$0xff] }
 0x401   :  { %6765 = vpow2.f32 %v6524_v42  ;;  %v12227_v42 = vld [vmem:[#allocation129_spill] sm:$0xff] }
 0x402   :  { %6767 = vpow2.f32 %v6525_v48  ;;  %v12232_v48 = vld [vmem:[#allocation134_spill] sm:$0xff] }
 0x403   :  { %6769 = vtanh.f32 %v1543_v51  ;;  %v12234_v51 = vld [vmem:[#allocation136_spill] sm:$0xff] }
 0x40c   :  { %v6762_v52 = vpop.eup %6761 }
 0x40d   :  { %v6764_v54 = vpop.eup %6763  ;;  %v8607_v55 = vmul.f32 %v6762_v52, %v6760_v50  ;;  %v12233_v50 = vld [vmem:[#allocation135_spill] sm:$0xff]  ;;  %v12235_v52 = vld [vmem:[#allocation137_spill] sm:$0xff] }
 0x40e   :  { %v6766_v56 = vpop.eup %6765  ;;  %v1548_v63 = vadd.f32 1.0, %v6764_v54  ;;  %v12236_v54 = vld [vmem:[#allocation138_spill] sm:$0xff] }
 0x40f   :  { %v1554_v60 = vadd.f32 1.0, %v6766_v56  ;;  %1386 = vst [vmem:[#allocation3] sm:$0x3] %v8607_v55  ;;  %v6768_v61 = vpop.eup %6767  ;;  %v12237_v56 = vld [vmem:[#allocation139_spill] sm:$0xff] }
 0x410   :  { %6771 = vrcp.f32 %v1548_v63  ;;  %v6770_v18 = vpop.eup %6769  ;;  %v1561_v23 = vadd.f32 1.0, %v6768_v61  ;;  %v12238_v63 = vld [vmem:[#allocation140_spill] sm:$0xff]  ;;  %v12240_v61 = vld [vmem:[#allocation142_spill] sm:$0xff] }
 0x411   :  { %6773 = vrcp.f32 %v1554_v60  ;;  %v12239_v60 = vld [vmem:[#allocation141_spill] sm:$0xff] }
 0x412   :  { %6775 = vrcp.f32 %v1561_v23  ;;  %v12245_v23 = vld [vmem:[#allocation147_spill] sm:$0xff] }
 0x41d   :  { %v6772_v19 = vpop.eup %6771 }
 0x41e   :  { %v6774_v21 = vpop.eup %6773  ;;  %v1568_v24 = vmul.f32 %v6772_v19, %v6770_v18  ;;  %v12241_v18 = vld [vmem:[#allocation143_spill] sm:$0xff]  ;;  %v12242_v19 = vld [vmem:[#allocation144_spill] sm:$0xff] }
 0x41f   :  { %v1567_v25 = vmul.f32 %v6774_v21, %v1565_v20  ;;  %v6776_v28 = vpop.eup %6775  ;;  %v12243_v20 = vld [vmem:[#allocation145_spill] sm:$0xff]  ;;  %v12244_v21 = vld [vmem:[#allocation146_spill] sm:$0xff] }
 0x421   :  { %v8611_v26 = vadd.f32 %v1568_v24, %v1567_v25  ;;  %v12246_v24 = vld [vmem:[#allocation148_spill] sm:$0xff]  ;;  %v12247_v25 = vld [vmem:[#allocation149_spill] sm:$0xff] }
 0x423   :  { %6777 = vtanh.f32 %v8611_v26 }
 0x430   :  { %v6778_v29 = vpop.eup %6777 }
 0x431   :  { %v1571_v30 = vmul.f32 %v6778_v29, %v6776_v28  ;;  %v12248_v28 = vld [vmem:[#allocation150_spill] sm:$0xff]  ;;  %v12249_v29 = vld [vmem:[#allocation151_spill] sm:$0xff] }
 0x433   :  { %v8614_v35 = vrot.slane %v1571_v30, 2  ;;  %v12250_v30 = vld [vmem:[#allocation152_spill] sm:$0xff] }
 0x435   :  { %1640 = vmatmul.mubr.f32.vlgmr.msra.gmra.mxu0 %v8614_v35  ;;  %1711 = vmatmul.mubr.f32.vlgmr.msra.gmra.mxu1 %v8614_v35 }
 0x436   :  { %1718 = vmatpush1.msra.mxu0 %v8254_v16  ;;  %1789 = vmatpush1.msra.mxu1 %v8256_v1  ;;  %v12218_v16 = vld [vmem:[#allocation120_spill] sm:$0xff]  ;;  %v12219_v1 = vld [vmem:[#allocation121_spill] sm:$0xff] }
 0x437   :  { %1719 = vmatprep.subr.mxu0 %v8258_v4  ;;  %1790 = vmatprep.subr.mxu1 %v8260_v8  ;;  %v12220_v4 = vld [vmem:[#allocation122_spill] sm:$0xff]  ;;  %v12221_v8 = vld [vmem:[#allocation123_spill] sm:$0xff] }
 0x438   :  { %1720 = vmatpush1.msra.mxu0 %v8264_v13  ;;  %1791 = vmatpush1.msra.mxu1 %v8266_v57  ;;  %v12222_v13 = vld [vmem:[#allocation124_spill] sm:$0xff]  ;;  %v12223_v57 = vld [vmem:[#allocation125_spill] sm:$0xff] }
 0x439   :  { %1721 = vmatprep.subr.mxu0 %v8270_v17  ;;  %1792 = vmatprep.subr.mxu1 %v12214_v10  ;;  %v12224_v17 = vld [vmem:[#allocation126_spill] sm:$0xff]  ;;  %v12251_v10 = vld [vmem:[#allocation153_spill] sm:$0xff] }
 0x43a   :  { %1722 = vmatpush1.msra.mxu0 %v12215_v36  ;;  %1793 = vmatpush1.msra.mxu1 %v12216_v37  ;;  %v12252_v36 = vld [vmem:[#allocation154_spill] sm:$0xff]  ;;  %v12253_v37 = vld [vmem:[#allocation155_spill] sm:$0xff] }
 0x43b   :  { %1723 = vmatprep.subr.mxu0 %v12217_v38  ;;  %1794 = vmatprep.subr.mxu1 %v12218_v16  ;;  %v12254_v38 = vld [vmem:[#allocation156_spill] sm:$0xff]  ;;  %v12255_v16 = vld [vmem:[#allocation157_spill] sm:$0xff] }
 0x43c   :  { %1724 = vmatpush1.msra.mxu0 %v12219_v1  ;;  %1795 = vmatpush1.msra.mxu1 %v12220_v4  ;;  %v12256_v1 = vld [vmem:[#allocation158_spill] sm:$0xff]  ;;  %v12257_v4 = vld [vmem:[#allocation159_spill] sm:$0xff] }
 0x43d   :  { %1725 = vmatprep.subr.mxu0 %v12221_v8  ;;  %1796 = vmatprep.subr.mxu1 %v12222_v13  ;;  %v8720_v8 = vld [vmem:[#allocation8 + $0x288] sm:$0xff]  ;;  %v8723_v13 = vld [vmem:[#allocation8 + $0x298] sm:$0xff] }
 0x43e   :  { %1726 = vmatpush1.msra.mxu0 %v12223_v57  ;;  %1797 = vmatpush1.msra.mxu1 %v12224_v17  ;;  %v8726_v57 = vld [vmem:[#allocation8 + $0x280] sm:$0xff]  ;;  %v8729_v17 = vld [vmem:[#allocation8 + $0x290] sm:$0xff] }
 0x43f   :  { %1727 = vmatprep.subr.mxu0 %v12225_v40  ;;  %1798 = vmatprep.subr.mxu1 %v12226_v41  ;;  %v8732_v40 = vld [vmem:[#allocation8 + $0x268] sm:$0xff]  ;;  %v8735_v41 = vld [vmem:[#allocation8 + $0x278] sm:$0xff] }
 0x440   :  { %1728 = vmatpush1.msra.mxu0 %v12227_v42  ;;  %1799 = vmatpush1.msra.mxu1 %v12228_v43  ;;  %v8738_v42 = vld [vmem:[#allocation8 + $0x260] sm:$0xff]  ;;  %v8741_v43 = vld [vmem:[#allocation8 + $0x270] sm:$0xff] }
 0x441   :  { %1729 = vmatprep.subr.mxu0 %v12229_v44  ;;  %1800 = vmatprep.subr.mxu1 %v12230_v45  ;;  %v8744_v44 = vld [vmem:[#allocation8 + $0x248] sm:$0xff]  ;;  %v8747_v45 = vld [vmem:[#allocation8 + $0x258] sm:$0xff] }
 0x442   :  { %1730 = vmatpush1.msra.mxu0 %v12231_v46  ;;  %1801 = vmatpush1.msra.mxu1 %v12232_v48  ;;  %v8750_v46 = vld [vmem:[#allocation8 + $0x240] sm:$0xff]  ;;  %v8753_v48 = vld [vmem:[#allocation8 + $0x250] sm:$0xff] }
 0x443   :  { %1731 = vmatprep.subr.mxu0 %v12233_v50  ;;  %1802 = vmatprep.subr.mxu1 %v12234_v51  ;;  %v8756_v50 = vld [vmem:[#allocation8 + $0x228] sm:$0xff]  ;;  %v8759_v51 = vld [vmem:[#allocation8 + $0x238] sm:$0xff] }
 0x444   :  { %1732 = vmatpush1.msra.mxu0 %v12235_v52  ;;  %1803 = vmatpush1.msra.mxu1 %v12236_v54  ;;  %v8762_v52 = vld [vmem:[#allocation8 + $0x220] sm:$0xff]  ;;  %v8765_v54 = vld [vmem:[#allocation8 + $0x230] sm:$0xff] }
 0x445   :  { %1733 = vmatprep.subr.mxu0 %v12237_v56  ;;  %1804 = vmatprep.subr.mxu1 %v12238_v63  ;;  %v8768_v56 = vld [vmem:[#allocation8 + $0x208] sm:$0xff]  ;;  %v8771_v63 = vld [vmem:[#allocation8 + $0x218] sm:$0xff] }
 0x446   :  { %1734 = vmatpush1.msra.mxu0 %v12239_v60  ;;  %1805 = vmatpush1.msra.mxu1 %v12240_v61  ;;  %v8774_v60 = vld [vmem:[#allocation8 + $0x200] sm:$0xff]  ;;  %v8777_v61 = vld [vmem:[#allocation8 + $0x210] sm:$0xff] }
 0x447   :  { %1735 = vmatprep.subr.mxu0 %v12241_v18  ;;  %1806 = vmatprep.subr.mxu1 %v12242_v19  ;;  %v8780_v18 = vld [vmem:[#allocation8 + $0x1e8] sm:$0xff]  ;;  %v8783_v19 = vld [vmem:[#allocation8 + $0x1f8] sm:$0xff] }
 0x448   :  { %1736 = vmatpush1.msra.mxu0 %v12243_v20  ;;  %1807 = vmatpush1.msra.mxu1 %v12244_v21  ;;  %v8786_v20 = vld [vmem:[#allocation8 + $0x1e0] sm:$0xff]  ;;  %v8789_v21 = vld [vmem:[#allocation8 + $0x1f0] sm:$0xff] }
 0x449   :  { %1737 = vmatprep.subr.mxu0 %v12245_v23  ;;  %1808 = vmatprep.subr.mxu1 %v12246_v24  ;;  %12258 = vst [vmem:[#allocation19_spill] sm:$0xff] %v8786_v20  ;;  %12259 = vst [vmem:[#allocation20_spill] sm:$0xff] %v8789_v21  ;;  %v8792_v23 = vld [vmem:[#allocation8 + $0x1c8] sm:$0xff]  ;;  %v8795_v24 = vld [vmem:[#allocation8 + $0x1d8] sm:$0xff] }
 0x44a   :  { %1738 = vmatpush1.msra.mxu0 %v12247_v25  ;;  %1809 = vmatpush1.msra.mxu1 %v12248_v28  ;;  %12260 = vst [vmem:[#allocation21_spill] sm:$0xff] %v8792_v23  ;;  %12261 = vst [vmem:[#allocation22_spill] sm:$0xff] %v8795_v24  ;;  %v8798_v25 = vld [vmem:[#allocation8 + $0x1c0] sm:$0xff]  ;;  %v8801_v28 = vld [vmem:[#allocation8 + $0x1d0] sm:$0xff] }
 0x44b   :  { %1739 = vmatprep.subr.mxu0 %v12249_v29  ;;  %1810 = vmatprep.subr.mxu1 %v12250_v30  ;;  %12262 = vst [vmem:[#allocation23_spill] sm:$0xff] %v8798_v25  ;;  %12263 = vst [vmem:[#allocation24_spill] sm:$0xff] %v8801_v28  ;;  %v8804_v29 = vld [vmem:[#allocation8 + $0x1a8] sm:$0xff]  ;;  %v8807_v30 = vld [vmem:[#allocation8 + $0x1b8] sm:$0xff] }
 0x44c   :  { %1740 = vmatpush1.msra.mxu0 %v12251_v10  ;;  %1811 = vmatpush1.msra.mxu1 %v12252_v36  ;;  %12264 = vst [vmem:[#allocation25_spill] sm:$0xff] %v8804_v29  ;;  %12265 = vst [vmem:[#allocation26_spill] sm:$0xff] %v8807_v30  ;;  %v8810_v10 = vld [vmem:[#allocation8 + $0x1a0] sm:$0xff]  ;;  %v8813_v36 = vld [vmem:[#allocation8 + $0x1b0] sm:$0xff] }
 0x44d   :  { %1741 = vmatprep.subr.mxu0 %v12253_v37  ;;  %1812 = vmatprep.subr.mxu1 %v12254_v38  ;;  %12266 = vst [vmem:[#allocation27_spill] sm:$0xff] %v8810_v10  ;;  %12267 = vst [vmem:[#allocation28_spill] sm:$0xff] %v8813_v36  ;;  %v8816_v37 = vld [vmem:[#allocation8 + $0x188] sm:$0xff]  ;;  %v8819_v38 = vld [vmem:[#allocation8 + $0x198] sm:$0xff] }
 0x44e   :  { %1742 = vmatpush1.msra.mxu0 %v12255_v16  ;;  %1813 = vmatpush1.msra.mxu1 %v12256_v1  ;;  %12268 = vst [vmem:[#allocation29_spill] sm:$0xff] %v8816_v37  ;;  %12269 = vst [vmem:[#allocation30_spill] sm:$0xff] %v8819_v38  ;;  %v8822_v16 = vld [vmem:[#allocation8 + $0x180] sm:$0xff]  ;;  %v8825_v1 = vld [vmem:[#allocation8 + $0x190] sm:$0xff] }
 0x44f   :  { %1743 = vmatprep.subr.mxu0 %v8402_v2  ;;  %1814 = vmatprep.subr.mxu1 %v12257_v4  ;;  %v8684_v2 = vld [vmem:[#allocation8 + $0x2e8] sm:$0xff]  ;;  %12270 = vst [vmem:[#allocation31_spill] sm:$0xff] %v8822_v16  ;;  %12271 = vst [vmem:[#allocation32_spill] sm:$0xff] %v8825_v1 }
 0x450   :  { %1744 = vmatpush1.msra.mxu0 %v8408_v6  ;;  %1815 = vmatpush1.msra.mxu1 %v8410_v3  ;;  %v8687_v6 = vld [vmem:[#allocation8 + $0x2f8] sm:$0xff]  ;;  %v8828_v4 = vld [vmem:[#allocation8 + $0x168] sm:$0xff] }
 0x451   :  { %1745 = vmatprep.subr.mxu0 %v8414_v15  ;;  %1816 = vmatprep.subr.mxu1 %v8416_v9  ;;  %v8699_v3 = vld [vmem:[#allocation8 + $0x2d8] sm:$0xff]  ;;  %v8702_v15 = vld [vmem:[#allocation8 + $0x2c0] sm:$0xff]  ;;  %v8705_v9 = vld [vmem:[#allocation8 + $0x2d0] sm:$0xff]  ;;  %12272 = vst [vmem:[#allocation33_spill] sm:$0xff] %v8828_v4 }
 0x452   :  { %1746 = vmatpush1.msra.mxu0 %v8420_v11  ;;  %1817 = vmatpush1.msra.mxu1 %v8422_v27  ;;  %v8708_v11 = vld [vmem:[#allocation8 + $0x2a8] sm:$0xff]  ;;  %v8711_v27 = vld [vmem:[#allocation8 + $0x2b8] sm:$0xff] }
 0x453   :  { %1747 = vmatprep.subr.mxu0 %v8426_v5  ;;  %1818 = vmatprep.subr.mxu1 %v8428_v59  ;;  %v8690_v59 = vld [vmem:[#allocation8 + $0x2e0] sm:$0xff] }
 0x454   :  { %1748 = vmatpush1.msra.mxu0 %v8432_v62  ;;  %1781 = vmatprep.mubr.f32.mxu0 %v11999_v12  ;;  %v8693_v62 = vld [vmem:[#allocation8 + $0x2f0] sm:$0xff]  ;;  %v8714_v5 = vld [vmem:[#allocation8 + $0x2a0] sm:$0xff] }
 0x455   :  { %1819 = vmatpush1.msra.mxu1 %v8436_v22  ;;  %1852 = vmatprep.mubr.f32.mxu1 %v11999_v12  ;;  %v8696_v22 = vld [vmem:[#allocation8 + $0x2c8] sm:$0xff] }
 0x456   :  { %1782 = vmatmul.mubr.f32.vlgmr.msra.gmra.mxu0 %v8607_v55  ;;  %1853 = vmatmul.mubr.f32.vlgmr.msra.gmra.mxu1 %v8607_v55  ;;  %v8717_v55 = vld [vmem:[#allocation8 + $0x2b0] sm:$0xff] }
 0x457   :  { %1888 = vmatprep.subr.mxu0 %v8684_v2  ;;  %1959 = vmatprep.subr.mxu1 %v8687_v6 }
 0x458   :  { %1889 = vmatpush1.msra.mxu0 %v8690_v59  ;;  %1960 = vmatpush1.msra.mxu1 %v8693_v62 }
 0x459   :  { %1890 = vmatprep.subr.mxu0 %v8696_v22  ;;  %1961 = vmatprep.subr.mxu1 %v8699_v3 }
 0x45a   :  { %1891 = vmatpush1.msra.mxu0 %v8702_v15  ;;  %1962 = vmatpush1.msra.mxu1 %v8705_v9 }
 0x45b   :  { %1892 = vmatprep.subr.mxu0 %v8708_v11  ;;  %1963 = vmatprep.subr.mxu1 %v8711_v27 }
 0x45c   :  { %1893 = vmatpush1.msra.mxu0 %v8714_v5  ;;  %1964 = vmatpush1.msra.mxu1 %v8717_v55 }
 0x45d   :  { %1894 = vmatprep.subr.mxu0 %v8720_v8  ;;  %1965 = vmatprep.subr.mxu1 %v8723_v13 }
 0x45e   :  { %1895 = vmatpush1.msra.mxu0 %v8726_v57  ;;  %1966 = vmatpush1.msra.mxu1 %v8729_v17 }
 0x45f   :  { %1896 = vmatprep.subr.mxu0 %v8732_v40  ;;  %1967 = vmatprep.subr.mxu1 %v8735_v41 }
 0x460   :  { %1897 = vmatpush1.msra.mxu0 %v8738_v42  ;;  %1968 = vmatpush1.msra.mxu1 %v8741_v43 }
 0x461   :  { %1898 = vmatprep.subr.mxu0 %v8744_v44  ;;  %1969 = vmatprep.subr.mxu1 %v8747_v45 }
 0x462   :  { %1899 = vmatpush1.msra.mxu0 %v8750_v46  ;;  %1970 = vmatpush1.msra.mxu1 %v8753_v48 }
 0x463   :  { %1900 = vmatprep.subr.mxu0 %v8756_v50  ;;  %1971 = vmatprep.subr.mxu1 %v8759_v51 }
 0x464   :  { %1901 = vmatpush1.msra.mxu0 %v8762_v52  ;;  %1972 = vmatpush1.msra.mxu1 %v8765_v54 }
 0x465   :  { %1902 = vmatprep.subr.mxu0 %v8768_v56  ;;  %1973 = vmatprep.subr.mxu1 %v8771_v63 }
 0x466   :  { %1903 = vmatpush1.msra.mxu0 %v8774_v60  ;;  %1974 = vmatpush1.msra.mxu1 %v8777_v61 }
 0x467   :  { %1904 = vmatprep.subr.mxu0 %v8780_v18  ;;  %1975 = vmatprep.subr.mxu1 %v8783_v19 }
 0x468   :  { %1905 = vmatpush1.msra.mxu0 %v8786_v20  ;;  %1976 = vmatpush1.msra.mxu1 %v8789_v21 }
 0x469   :  { %1906 = vmatprep.subr.mxu0 %v8792_v23  ;;  %1977 = vmatprep.subr.mxu1 %v8795_v24 }
 0x46a   :  { %1907 = vmatpush1.msra.mxu0 %v8798_v25  ;;  %1978 = vmatpush1.msra.mxu1 %v8801_v28 }
 0x46b   :  { %1908 = vmatprep.subr.mxu0 %v8804_v29  ;;  %1979 = vmatprep.subr.mxu1 %v8807_v30 }
 0x46c   :  { %1909 = vmatpush1.msra.mxu0 %v8810_v10  ;;  %1980 = vmatpush1.msra.mxu1 %v8813_v36 }
 0x46d   :  { %1910 = vmatprep.subr.mxu0 %v8816_v37  ;;  %1981 = vmatprep.subr.mxu1 %v8819_v38 }
 0x46e   :  { %1911 = vmatpush1.msra.mxu0 %v8822_v16  ;;  %1982 = vmatpush1.msra.mxu1 %v8825_v1  ;;  %v8840_v16 = vld [vmem:[#allocation8 + $0x148] sm:$0xff]  ;;  %v8843_v1 = vld [vmem:[#allocation8 + $0x158] sm:$0xff] }
 0x46f   :  { %1912 = vmatprep.subr.mxu0 %v8828_v4  ;;  %1983 = vmatprep.subr.mxu1 %v8831_v33  ;;  %12276 = vst [vmem:[#allocation37_spill] sm:$0xff] %v8840_v16  ;;  %12277 = vst [vmem:[#allocation38_spill] sm:$0xff] %v8843_v1  ;;  %v8846_v4 = vld [vmem:[#allocation8 + $0x140] sm:$0xff]  ;;  %v8849_v33 = vld [vmem:[#allocation8 + $0x150] sm:$0xff] }
 0x470   :  { %1913 = vmatpush1.msra.mxu0 %v8834_v31  ;;  %1984 = vmatpush1.msra.mxu1 %v8837_v47  ;;  %12278 = vst [vmem:[#allocation39_spill] sm:$0xff] %v8846_v4  ;;  %12279 = vst [vmem:[#allocation40_spill] sm:$0xff] %v8849_v33  ;;  %v8852_v31 = vld [vmem:[#allocation8 + $0x128] sm:$0xff]  ;;  %v8855_v47 = vld [vmem:[#allocation8 + $0x138] sm:$0xff] }
 0x471   :  { %1914 = vmatprep.subr.mxu0 %v8840_v16  ;;  %1985 = vmatprep.subr.mxu1 %v8843_v1  ;;  %12280 = vst [vmem:[#allocation41_spill] sm:$0xff] %v8852_v31  ;;  %12281 = vst [vmem:[#allocation42_spill] sm:$0xff] %v8855_v47  ;;  %v8858_v16 = vld [vmem:[#allocation8 + $0x120] sm:$0xff]  ;;  %v8861_v1 = vld [vmem:[#allocation8 + $0x130] sm:$0xff] }
 0x472   :  { %1915 = vmatpush1.msra.mxu0 %v8846_v4  ;;  %1986 = vmatpush1.msra.mxu1 %v8849_v33  ;;  %12282 = vst [vmem:[#allocation43_spill] sm:$0xff] %v8858_v16  ;;  %12283 = vst [vmem:[#allocation44_spill] sm:$0xff] %v8861_v1  ;;  %v8864_v4 = vld [vmem:[#allocation8 + $0x108] sm:$0xff]  ;;  %v8867_v33 = vld [vmem:[#allocation8 + $0x118] sm:$0xff] }
 0x473   :  { %1916 = vmatprep.subr.mxu0 %v8852_v31  ;;  %1987 = vmatprep.subr.mxu1 %v8855_v47  ;;  %12284 = vst [vmem:[#allocation45_spill] sm:$0xff] %v8864_v4  ;;  %12285 = vst [vmem:[#allocation46_spill] sm:$0xff] %v8867_v33  ;;  %v8870_v31 = vld [vmem:[#allocation8 + $0x100] sm:$0xff]  ;;  %v8874_v47 = vld [vmem:[#allocation8 + $0x110] sm:$0xff] }
 0x474   :  { %1917 = vmatpush1.msra.mxu0 %v8858_v16  ;;  %1988 = vmatpush1.msra.mxu1 %v8861_v1  ;;  %12286 = vst [vmem:[#allocation47_spill] sm:$0xff] %v8870_v31  ;;  %12287 = vst [vmem:[#allocation48_spill] sm:$0xff] %v8874_v47  ;;  %v8889_v1 = vld [vmem:[#allocation8 + $0x510] sm:$0xff] }
 0x475   :  { %1918 = vmatprep.subr.mxu0 %v8864_v4  ;;  %1989 = vmatprep.subr.mxu1 %v8867_v33  ;;  %v8880_v4 = vld [vmem:[#allocation8 + $0x508] sm:$0xff]  ;;  %v8883_v33 = vld [vmem:[#allocation8 + $0x518] sm:$0xff]  ;;  %12291 = vst [vmem:[#allocation52_spill] sm:$0xff] %v8889_v1 }
 0x476   :  { %1919 = vmatpush1.msra.mxu0 %v8870_v31  ;;  %1952 = vmatprep.mubr.f32.mxu0 %v11999_v12  ;;  %12288 = vst [vmem:[#allocation49_spill] sm:$0xff] %v8880_v4  ;;  %12289 = vst [vmem:[#allocation50_spill] sm:$0xff] %v8883_v33  ;;  %v8886_v31 = vld [vmem:[#allocation8 + $0x500] sm:$0xff] }
 0x477   :  { %1990 = vmatpush1.msra.mxu1 %v8874_v47  ;;  %2023 = vmatprep.mubr.f32.mxu1 %v11999_v12  ;;  %12290 = vst [vmem:[#allocation51_spill] sm:$0xff] %v8886_v31  ;;  %v8892_v47 = vld [vmem:[#allocation8 + $0x4e8] sm:$0xff] }
 0x478   :  { %1953 = vmatmul.mubr.f32.vlgmr.msra.gmra.mxu0 %v8614_v35  ;;  %2024 = vmatmul.mubr.f32.vlgmr.msra.gmra.mxu1 %v8614_v35  ;;  %12292 = vst [vmem:[#allocation53_spill] sm:$0xff] %v8892_v47  ;;  %v8895_v35 = vld [vmem:[#allocation8 + $0x4f8] sm:$0xff] }
 0x479   :  { %2076 = vmatprep.subr.mxu0 %v8880_v4  ;;  %2147 = vmatprep.subr.mxu1 %v8883_v33  ;;  %12293 = vst [vmem:[#allocation54_spill] sm:$0xff] %v8895_v35  ;;  %v8898_v4 = vld [vmem:[#allocation8 + $0x4e0] sm:$0xff]  ;;  %v8901_v33 = vld [vmem:[#allocation8 + $0x4f0] sm:$0xff] }
 0x47a   :  { %2077 = vmatpush1.msra.mxu0 %v8886_v31  ;;  %2148 = vmatpush1.msra.mxu1 %v8889_v1  ;;  %12294 = vst [vmem:[#allocation55_spill] sm:$0xff] %v8898_v4  ;;  %12295 = vst [vmem:[#allocation56_spill] sm:$0xff] %v8901_v33  ;;  %v8904_v31 = vld [vmem:[#allocation8 + $0x4c8] sm:$0xff]  ;;  %v8907_v1 = vld [vmem:[#allocation8 + $0x4d8] sm:$0xff] }
 0x47b   :  { %2078 = vmatprep.subr.mxu0 %v8892_v47  ;;  %2149 = vmatprep.subr.mxu1 %v8895_v35  ;;  %12296 = vst [vmem:[#allocation57_spill] sm:$0xff] %v8904_v31  ;;  %12297 = vst [vmem:[#allocation58_spill] sm:$0xff] %v8907_v1  ;;  %v8910_v47 = vld [vmem:[#allocation8 + $0x4c0] sm:$0xff]  ;;  %v8913_v35 = vld [vmem:[#allocation8 + $0x4d0] sm:$0xff] }
 0x47c   :  { %2079 = vmatpush1.msra.mxu0 %v8898_v4  ;;  %2150 = vmatpush1.msra.mxu1 %v8901_v33  ;;  %12298 = vst [vmem:[#allocation59_spill] sm:$0xff] %v8910_v47  ;;  %12299 = vst [vmem:[#allocation60_spill] sm:$0xff] %v8913_v35  ;;  %v8916_v4 = vld [vmem:[#allocation8 + $0x4a8] sm:$0xff]  ;;  %v8919_v33 = vld [vmem:[#allocation8 + $0x4b8] sm:$0xff] }
 0x47d   :  { %2080 = vmatprep.subr.mxu0 %v8904_v31  ;;  %2151 = vmatprep.subr.mxu1 %v8907_v1  ;;  %12300 = vst [vmem:[#allocation61_spill] sm:$0xff] %v8916_v4  ;;  %12301 = vst [vmem:[#allocation62_spill] sm:$0xff] %v8919_v33  ;;  %v8922_v31 = vld [vmem:[#allocation8 + $0x4a0] sm:$0xff]  ;;  %v8925_v1 = vld [vmem:[#allocation8 + $0x4b0] sm:$0xff] }
 0x47e   :  { %2081 = vmatpush1.msra.mxu0 %v8910_v47  ;;  %2152 = vmatpush1.msra.mxu1 %v8913_v35  ;;  %12302 = vst [vmem:[#allocation63_spill] sm:$0xff] %v8922_v31  ;;  %12303 = vst [vmem:[#allocation64_spill] sm:$0xff] %v8925_v1  ;;  %v8928_v47 = vld [vmem:[#allocation8 + $0x488] sm:$0xff]  ;;  %v8931_v35 = vld [vmem:[#allocation8 + $0x498] sm:$0xff] }
 0x47f   :  { %2082 = vmatprep.subr.mxu0 %v8916_v4  ;;  %2153 = vmatprep.subr.mxu1 %v8919_v33  ;;  %12304 = vst [vmem:[#allocation65_spill] sm:$0xff] %v8928_v47  ;;  %12305 = vst [vmem:[#allocation66_spill] sm:$0xff] %v8931_v35  ;;  %v8934_v4 = vld [vmem:[#allocation8 + $0x480] sm:$0xff]  ;;  %v8937_v33 = vld [vmem:[#allocation8 + $0x490] sm:$0xff] }
 0x480   :  { %2083 = vmatpush1.msra.mxu0 %v8922_v31  ;;  %2154 = vmatpush1.msra.mxu1 %v8925_v1  ;;  %12306 = vst [vmem:[#allocation67_spill] sm:$0xff] %v8934_v4  ;;  %12307 = vst [vmem:[#allocation68_spill] sm:$0xff] %v8937_v33  ;;  %v8940_v31 = vld [vmem:[#allocation8 + $0x468] sm:$0xff]  ;;  %v8943_v1 = vld [vmem:[#allocation8 + $0x478] sm:$0xff] }
 0x481   :  { %2084 = vmatprep.subr.mxu0 %v8928_v47  ;;  %2155 = vmatprep.subr.mxu1 %v8931_v35  ;;  %12308 = vst [vmem:[#allocation69_spill] sm:$0xff] %v8940_v31  ;;  %12309 = vst [vmem:[#allocation70_spill] sm:$0xff] %v8943_v1  ;;  %v8946_v47 = vld [vmem:[#allocation8 + $0x460] sm:$0xff]  ;;  %v8949_v35 = vld [vmem:[#allocation8 + $0x470] sm:$0xff] }
 0x482   :  { %2085 = vmatpush1.msra.mxu0 %v8934_v4  ;;  %2156 = vmatpush1.msra.mxu1 %v8937_v33  ;;  %12310 = vst [vmem:[#allocation71_spill] sm:$0xff] %v8946_v47  ;;  %12311 = vst [vmem:[#allocation72_spill] sm:$0xff] %v8949_v35  ;;  %v8952_v4 = vld [vmem:[#allocation8 + $0x448] sm:$0xff]  ;;  %v8955_v33 = vld [vmem:[#allocation8 + $0x458] sm:$0xff] }
 0x483   :  { %2086 = vmatprep.subr.mxu0 %v8940_v31  ;;  %2157 = vmatprep.subr.mxu1 %v8943_v1  ;;  %12312 = vst [vmem:[#allocation73_spill] sm:$0xff] %v8952_v4  ;;  %12313 = vst [vmem:[#allocation74_spill] sm:$0xff] %v8955_v33  ;;  %v8958_v31 = vld [vmem:[#allocation8 + $0x440] sm:$0xff]  ;;  %v8961_v1 = vld [vmem:[#allocation8 + $0x450] sm:$0xff] }
 0x484   :  { %2087 = vmatpush1.msra.mxu0 %v8946_v47  ;;  %2158 = vmatpush1.msra.mxu1 %v8949_v35  ;;  %12314 = vst [vmem:[#allocation75_spill] sm:$0xff] %v8958_v31  ;;  %12315 = vst [vmem:[#allocation76_spill] sm:$0xff] %v8961_v1  ;;  %v8964_v47 = vld [vmem:[#allocation8 + $0x428] sm:$0xff]  ;;  %v8967_v35 = vld [vmem:[#allocation8 + $0x438] sm:$0xff] }
 0x485   :  { %2088 = vmatprep.subr.mxu0 %v8952_v4  ;;  %2159 = vmatprep.subr.mxu1 %v8955_v33  ;;  %12316 = vst [vmem:[#allocation77_spill] sm:$0xff] %v8964_v47  ;;  %12317 = vst [vmem:[#allocation78_spill] sm:$0xff] %v8967_v35  ;;  %v8970_v4 = vld [vmem:[#allocation8 + $0x420] sm:$0xff]  ;;  %v8973_v33 = vld [vmem:[#allocation8 + $0x430] sm:$0xff] }
 0x486   :  { %2089 = vmatpush1.msra.mxu0 %v8958_v31  ;;  %2160 = vmatpush1.msra.mxu1 %v8961_v1  ;;  %12318 = vst [vmem:[#allocation79_spill] sm:$0xff] %v8970_v4  ;;  %12319 = vst [vmem:[#allocation80_spill] sm:$0xff] %v8973_v33  ;;  %v8976_v31 = vld [vmem:[#allocation8 + $0x408] sm:$0xff]  ;;  %v8979_v1 = vld [vmem:[#allocation8 + $0x418] sm:$0xff] }
 0x487   :  { %2090 = vmatprep.subr.mxu0 %v8964_v47  ;;  %2161 = vmatprep.subr.mxu1 %v8967_v35  ;;  %12320 = vst [vmem:[#allocation81_spill] sm:$0xff] %v8976_v31  ;;  %12321 = vst [vmem:[#allocation82_spill] sm:$0xff] %v8979_v1  ;;  %v8982_v47 = vld [vmem:[#allocation8 + $0x400] sm:$0xff]  ;;  %v8985_v35 = vld [vmem:[#allocation8 + $0x410] sm:$0xff] }
 0x488   :  { %2091 = vmatpush1.msra.mxu0 %v8970_v4  ;;  %2162 = vmatpush1.msra.mxu1 %v8973_v33  ;;  %12322 = vst [vmem:[#allocation83_spill] sm:$0xff] %v8982_v47  ;;  %12323 = vst [vmem:[#allocation84_spill] sm:$0xff] %v8985_v35  ;;  %v8988_v4 = vld [vmem:[#allocation8 + $0x3e8] sm:$0xff]  ;;  %v8991_v33 = vld [vmem:[#allocation8 + $0x3f8] sm:$0xff] }
 0x489   :  { %2092 = vmatprep.subr.mxu0 %v8976_v31  ;;  %2163 = vmatprep.subr.mxu1 %v8979_v1  ;;  %12324 = vst [vmem:[#allocation85_spill] sm:$0xff] %v8988_v4  ;;  %12325 = vst [vmem:[#allocation86_spill] sm:$0xff] %v8991_v33  ;;  %v8994_v31 = vld [vmem:[#allocation8 + $0x3e0] sm:$0xff]  ;;  %v8997_v1 = vld [vmem:[#allocation8 + $0x3f0] sm:$0xff] }
 0x48a   :  { %2093 = vmatpush1.msra.mxu0 %v8982_v47  ;;  %2164 = vmatpush1.msra.mxu1 %v8985_v35  ;;  %12326 = vst [vmem:[#allocation87_spill] sm:$0xff] %v8994_v31  ;;  %12327 = vst [vmem:[#allocation88_spill] sm:$0xff] %v8997_v1  ;;  %v9000_v47 = vld [vmem:[#allocation8 + $0x3c8] sm:$0xff]  ;;  %v9003_v35 = vld [vmem:[#allocation8 + $0x3d8] sm:$0xff] }
 0x48b   :  { %2094 = vmatprep.subr.mxu0 %v8988_v4  ;;  %2165 = vmatprep.subr.mxu1 %v8991_v33  ;;  %12328 = vst [vmem:[#allocation89_spill] sm:$0xff] %v9000_v47  ;;  %12329 = vst [vmem:[#allocation90_spill] sm:$0xff] %v9003_v35  ;;  %v9006_v4 = vld [vmem:[#allocation8 + $0x3c0] sm:$0xff]  ;;  %v9009_v33 = vld [vmem:[#allocation8 + $0x3d0] sm:$0xff] }
 0x48c   :  { %2095 = vmatpush1.msra.mxu0 %v8994_v31  ;;  %2166 = vmatpush1.msra.mxu1 %v8997_v1  ;;  %12330 = vst [vmem:[#allocation91_spill] sm:$0xff] %v9006_v4  ;;  %12331 = vst [vmem:[#allocation92_spill] sm:$0xff] %v9009_v33  ;;  %v9012_v31 = vld [vmem:[#allocation8 + $0x3a8] sm:$0xff]  ;;  %v9015_v1 = vld [vmem:[#allocation8 + $0x3b8] sm:$0xff] }
 0x48d   :  { %2096 = vmatprep.subr.mxu0 %v9000_v47  ;;  %2167 = vmatprep.subr.mxu1 %v9003_v35  ;;  %12332 = vst [vmem:[#allocation93_spill] sm:$0xff] %v9012_v31  ;;  %12333 = vst [vmem:[#allocation94_spill] sm:$0xff] %v9015_v1  ;;  %v9018_v47 = vld [vmem:[#allocation8 + $0x3a0] sm:$0xff]  ;;  %v9021_v35 = vld [vmem:[#allocation8 + $0x3b0] sm:$0xff] }
 0x48e   :  { %2097 = vmatpush1.msra.mxu0 %v9006_v4  ;;  %2168 = vmatpush1.msra.mxu1 %v9009_v33  ;;  %12334 = vst [vmem:[#allocation95_spill] sm:$0xff] %v9018_v47  ;;  %12335 = vst [vmem:[#allocation96_spill] sm:$0xff] %v9021_v35  ;;  %v9024_v4 = vld [vmem:[#allocation8 + $0x388] sm:$0xff]  ;;  %v9027_v33 = vld [vmem:[#allocation8 + $0x398] sm:$0xff] }
 0x48f   :  { %2098 = vmatprep.subr.mxu0 %v9012_v31  ;;  %2169 = vmatprep.subr.mxu1 %v9015_v1  ;;  %12336 = vst [vmem:[#allocation97_spill] sm:$0xff] %v9024_v4  ;;  %12337 = vst [vmem:[#allocation98_spill] sm:$0xff] %v9027_v33  ;;  %v9030_v31 = vld [vmem:[#allocation8 + $0x380] sm:$0xff]  ;;  %v9033_v1 = vld [vmem:[#allocation8 + $0x390] sm:$0xff] }
 0x490   :  { %2099 = vmatpush1.msra.mxu0 %v9018_v47  ;;  %2170 = vmatpush1.msra.mxu1 %v9021_v35  ;;  %12338 = vst [vmem:[#allocation99_spill] sm:$0xff] %v9030_v31  ;;  %12339 = vst [vmem:[#allocation100_spill] sm:$0xff] %v9033_v1  ;;  %v9036_v47 = vld [vmem:[#allocation8 + $0x368] sm:$0xff]  ;;  %v9039_v35 = vld [vmem:[#allocation8 + $0x378] sm:$0xff] }
 0x491   :  { %2100 = vmatprep.subr.mxu0 %v9024_v4  ;;  %2171 = vmatprep.subr.mxu1 %v9027_v33  ;;  %12340 = vst [vmem:[#allocation101_spill] sm:$0xff] %v9036_v47  ;;  %12341 = vst [vmem:[#allocation102_spill] sm:$0xff] %v9039_v35  ;;  %v9042_v4 = vld [vmem:[#allocation8 + $0x360] sm:$0xff]  ;;  %v9045_v33 = vld [vmem:[#allocation8 + $0x370] sm:$0xff] }
 0x492   :  { %2101 = vmatpush1.msra.mxu0 %v9030_v31  ;;  %2172 = vmatpush1.msra.mxu1 %v9033_v1  ;;  %12342 = vst [vmem:[#allocation103_spill] sm:$0xff] %v9042_v4  ;;  %12343 = vst [vmem:[#allocation104_spill] sm:$0xff] %v9045_v33  ;;  %v9048_v31 = vld [vmem:[#allocation8 + $0x348] sm:$0xff]  ;;  %v9051_v1 = vld [vmem:[#allocation8 + $0x358] sm:$0xff] }
 0x493   :  { %2102 = vmatprep.subr.mxu0 %v9036_v47  ;;  %2173 = vmatprep.subr.mxu1 %v9039_v35  ;;  %12344 = vst [vmem:[#allocation105_spill] sm:$0xff] %v9048_v31  ;;  %12345 = vst [vmem:[#allocation106_spill] sm:$0xff] %v9051_v1  ;;  %v9054_v47 = vld [vmem:[#allocation8 + $0x340] sm:$0xff]  ;;  %v9057_v35 = vld [vmem:[#allocation8 + $0x350] sm:$0xff] }
 0x494   :  { %2103 = vmatpush1.msra.mxu0 %v9042_v4  ;;  %2174 = vmatpush1.msra.mxu1 %v9045_v33  ;;  %12346 = vst [vmem:[#allocation107_spill] sm:$0xff] %v9054_v47  ;;  %12347 = vst [vmem:[#allocation108_spill] sm:$0xff] %v9057_v35  ;;  %v9060_v4 = vld [vmem:[#allocation8 + $0x328] sm:$0xff]  ;;  %v9063_v33 = vld [vmem:[#allocation8 + $0x338] sm:$0xff] }
 0x495   :  { %2104 = vmatprep.subr.mxu0 %v9048_v31  ;;  %2175 = vmatprep.subr.mxu1 %v9051_v1  ;;  %12348 = vst [vmem:[#allocation116_spill] sm:$0xff] %v9060_v4  ;;  %12349 = vst [vmem:[#allocation117_spill] sm:$0xff] %v9063_v33  ;;  %v9066_v31 = vld [vmem:[#allocation8 + $0x320] sm:$0xff]  ;;  %v9069_v1 = vld [vmem:[#allocation8 + $0x330] sm:$0xff] }
 0x496   :  { %2105 = vmatpush1.msra.mxu0 %v9054_v47  ;;  %2176 = vmatpush1.msra.mxu1 %v9057_v35  ;;  %12350 = vst [vmem:[#allocation118_spill] sm:$0xff] %v9066_v31  ;;  %12351 = vst [vmem:[#allocation119_spill] sm:$0xff] %v9069_v1  ;;  %v9074_v35 = vld [vmem:[#allocation8 + $0x708] sm:$0xff] }
 0x497   :  { %2106 = vmatprep.subr.mxu0 %v9060_v4  ;;  %2177 = vmatprep.subr.mxu1 %v9063_v33  ;;  %12352 = vst [vmem:[#allocation120_spill] sm:$0xff] %v9074_v35  ;;  %v9077_v4 = vld [vmem:[#allocation8 + $0x718] sm:$0xff] }
 0x498   :  { %2107 = vmatpush1.msra.mxu0 %v9066_v31  ;;  %2178 = vmatpush1.msra.mxu1 %v9069_v1  ;;  %12353 = vst [vmem:[#allocation121_spill] sm:$0xff] %v9077_v4 }
 0x499   :  { %2140 = vmatprep.mubr.f32.mxu0 %v11999_v12  ;;  %2211 = vmatprep.mubr.f32.mxu1 %v11999_v12 }
 0x49a   :  { %2218 = vmatprep.subr.mxu0 %v9074_v35  ;;  %2289 = vmatprep.subr.mxu1 %v9077_v4 }
 0x4f5   :  { %v1641_v33 = vpop.f32.mrf.mxu0  ;;  %v1712_v16 = vpop.f32.mrf.mxu1 }
 0x4f6   :  { %v1642_v31 = vadd.f32 %v1641_v33, %v8583_v32  ;;  %v1713_v23 = vadd.f32 %v1712_v16, %v8597_v53 }
 0x4f7   :  { %v1643_v47 = vpop.f32.mrf.mxu0  ;;  %v1714_v10 = vpop.f32.mrf.mxu1 }
 0x4f8   :  { %v1644_v1 = vadd.f32 %v1643_v47, %v8586_v34  ;;  %v1715_v4 = vadd.f32 %v1714_v10, %v8592_v49 }
 0x516   :  { %v1783_v38 = vpop.f32.mrf.mxu0  ;;  %v1854_v28 = vpop.f32.mrf.mxu1 }
 0x517   :  { %v1859_v37 = vadd.f32 %v1783_v38, %v1642_v31  ;;  %v1861_v21 = vadd.f32 %v1854_v28, %v1713_v23 }
 0x518   :  { %v1785_v36 = vpop.f32.mrf.mxu0  ;;  %v1856_v25 = vpop.f32.mrf.mxu1 }
 0x519   :  { %v6526_v30 = vmul.f32 -1.442695, %v1859_v37  ;;  %v1860_v29 = vadd.f32 %v1785_v36, %v1644_v1  ;;  %v1862_v24 = vadd.f32 %v1856_v25, %v1715_v4 }
 0x51b   :  { %6779 = vpow2.f32 %v6526_v30  ;;  %v6527_v35 = vmul.f32 -1.442695, %v1860_v29  ;;  %v6528_v33 = vmul.f32 -1.442695, %v1862_v24 }
 0x51d   :  { %6781 = vpow2.f32 %v6527_v35 }
 0x51e   :  { %6783 = vpow2.f32 %v6528_v33 }
 0x528   :  { %v6780_v32 = vpop.eup %6779 }
 0x529   :  { %v1866_v20 = vadd.f32 1.0, %v6780_v32 }
 0x52a   :  { %v6782_v47 = vpop.eup %6781 }
 0x52b   :  { %6785 = vrcp.f32 %v1866_v20  ;;  %v1872_v31 = vadd.f32 1.0, %v6782_v47  ;;  %v6784_v30 = vpop.eup %6783 }
 0x52c   :  { %6787 = vtanh.f32 %v1861_v21  ;;  %v1879_v10 = vadd.f32 1.0, %v6784_v30 }
 0x52d   :  { %6789 = vrcp.f32 %v1872_v31 }
 0x52e   :  { %6791 = vrcp.f32 %v1879_v10 }
 0x538   :  { %v6786_v36 = vpop.eup %6785  ;;  %v1954_v29 = vpop.f32.mrf.mxu0 }
 0x539   :  { %v6788_v37 = vpop.eup %6787  ;;  %v2034_v38 = vrot.slane %v1954_v29, 4  ;;  %v2025_v32 = vpop.f32.mrf.mxu1 }
 0x53a   :  { %v6790_v1 = vpop.eup %6789  ;;  %v1956_v25 = vpop.f32.mrf.mxu0  ;;  %v1883_v4 = vmul.f32 %v6788_v37, %v6786_v36 }
 0x53b   :  { %v1882_v24 = vmul.f32 %v6790_v1, %v8601_v39  ;;  %v2042_v23 = vadd.f32 %v2034_v38, %v8237_v14  ;;  %v2035_v28 = vrot.slane %v1956_v25, 4  ;;  %v2027_v33 = vpop.f32.mrf.mxu1  ;;  %v2036_v39 = vrot.slane %v2025_v32, 4  ;;  %v6792_v36 = vpop.eup %6791 }
 0x53c   :  { %v2037_v47 = vrot.slane %v2027_v33, 4 }
 0x53d   :  { %v9086_v16 = vadd.f32 %v1883_v4, %v1882_v24  ;;  %v6529_v20 = vmul.f32 -1.442695, %v2042_v23  ;;  %v2043_v21 = vadd.f32 %v2035_v28, %v8239_v58  ;;  %v2044_v37 = vadd.f32 %v2036_v39, %v8246_v7 }
 0x53e   :  { %v2045_v31 = vadd.f32 %v2037_v47, %v8243_v0  ;;  %v2066_v28 = vrot.slane %v8611_v26, 6  ;;  %v9106_v26 = vld [vmem:[#allocation8 + $0x710] sm:$0xff] }
 0x53f   :  { %6793 = vpow2.f32 %v6529_v20  ;;  %v6530_v35 = vmul.f32 -1.442695, %v2043_v21 }
 0x540   :  { %6795 = vtanh.f32 %v9086_v16  ;;  %v6531_v30 = vmul.f32 -1.442695, %v2045_v31 }
 0x541   :  { %6797 = vpow2.f32 %v6530_v35 }
 0x542   :  { %6799 = vpow2.f32 %v6531_v30 }
 0x54c   :  { %v6794_v29 = vpop.eup %6793 }
 0x54d   :  { %v6796_v38 = vpop.eup %6795  ;;  %v2049_v1 = vadd.f32 1.0, %v6794_v29  ;;  %v9103_v29 = vld [vmem:[#allocation8 + $0x700] sm:$0xff] }
 0x54e   :  { %v6798_v25 = vpop.eup %6797  ;;  %v9092_v10 = vmul.f32 %v6796_v38, %v6792_v36  ;;  %v9112_v38 = vld [vmem:[#allocation8 + $0x6f8] sm:$0xff] }
 0x54f   :  { %6801 = vrcp.f32 %v2049_v1  ;;  %v2055_v4 = vadd.f32 1.0, %v6798_v25  ;;  %v6800_v24 = vpop.eup %6799  ;;  %v9115_v1 = vld [vmem:[#allocation8 + $0x6e0] sm:$0xff]  ;;  %v9118_v25 = vld [vmem:[#allocation8 + $0x6f0] sm:$0xff] }
 0x550   :  { %6803 = vtanh.f32 %v2044_v37  ;;  %1887 = vst [vmem:[#allocation3 + $0x2] sm:$0x3] %v9092_v10  ;;  %v2062_v21 = vadd.f32 1.0, %v6800_v24  ;;  %v9109_v37 = vld [vmem:[#allocation8 + $0x6e8] sm:$0xff]  ;;  %v9124_v24 = vld [vmem:[#allocation8 + $0x6d8] sm:$0xff] }
 0x551   :  { %6805 = vrcp.f32 %v2055_v4  ;;  %v9121_v4 = vld [vmem:[#allocation8 + $0x6c8] sm:$0xff] }
 0x552   :  { %6807 = vrcp.f32 %v2062_v21  ;;  %v9139_v21 = vld [vmem:[#allocation8 + $0x6a0] sm:$0xff] }
 0x553   :  { %12354 = vst [vmem:[#allocation122_spill] sm:$0xff] %v9139_v21 }
 0x55c   :  { %v6802_v23 = vpop.eup %6801 }
 0x55d   :  { %v6804_v32 = vpop.eup %6803 }
 0x55e   :  { %v6806_v20 = vpop.eup %6805  ;;  %v2069_v35 = vmul.f32 %v6804_v32, %v6802_v23  ;;  %v9127_v23 = vld [vmem:[#allocation8 + $0x6c0] sm:$0xff]  ;;  %v9130_v32 = vld [vmem:[#allocation8 + $0x6d0] sm:$0xff] }
 0x55f   :  { %v2068_v33 = vmul.f32 %v6806_v20, %v2066_v28  ;;  %v6808_v31 = vpop.eup %6807  ;;  %v9133_v28 = vld [vmem:[#allocation8 + $0x6a8] sm:$0xff]  ;;  %v9136_v20 = vld [vmem:[#allocation8 + $0x6b8] sm:$0xff] }
 0x561   :  { %v9096_v47 = vadd.f32 %v2069_v35, %v2068_v33  ;;  %v9142_v35 = vld [vmem:[#allocation8 + $0x6b0] sm:$0xff]  ;;  %v9145_v33 = vld [vmem:[#allocation8 + $0x688] sm:$0xff] }
 0x562   :  { %12355 = vst [vmem:[#allocation123_spill] sm:$0xff] %v9142_v35  ;;  %12356 = vst [vmem:[#allocation124_spill] sm:$0xff] %v9145_v33 }
 0x563   :  { %6809 = vtanh.f32 %v9096_v47 }
 0x570   :  { %v6810_v39 = vpop.eup %6809 }
 0x571   :  { %v2072_v30 = vmul.f32 %v6810_v39, %v6808_v31  ;;  %v9148_v31 = vld [vmem:[#allocation8 + $0x698] sm:$0xff]  ;;  %v9151_v39 = vld [vmem:[#allocation8 + $0x680] sm:$0xff] }
 0x572   :  { %12357 = vst [vmem:[#allocation125_spill] sm:$0xff] %v9148_v31  ;;  %12358 = vst [vmem:[#allocation126_spill] sm:$0xff] %v9151_v39 }
 0x573   :  { %v9099_v36 = vrot.slane %v2072_v30, 4  ;;  %v9154_v30 = vld [vmem:[#allocation8 + $0x690] sm:$0xff] }
 0x574   :  { %12359 = vst [vmem:[#allocation127_spill] sm:$0xff] %v9154_v30 }
 0x575   :  { %2141 = vmatmul.mubr.f32.vlgmr.msra.gmra.mxu0 %v9099_v36  ;;  %2212 = vmatmul.mubr.f32.vlgmr.msra.gmra.mxu1 %v9099_v36 }
 0x576   :  { %2219 = vmatpush1.msra.mxu0 %v9103_v29  ;;  %2290 = vmatpush1.msra.mxu1 %v9106_v26 }
 0x577   :  { %2220 = vmatprep.subr.mxu0 %v9109_v37  ;;  %2291 = vmatprep.subr.mxu1 %v9112_v38 }
 0x578   :  { %2221 = vmatpush1.msra.mxu0 %v9115_v1  ;;  %2292 = vmatpush1.msra.mxu1 %v9118_v25 }
 0x579   :  { %2222 = vmatprep.subr.mxu0 %v9121_v4  ;;  %2293 = vmatprep.subr.mxu1 %v9124_v24 }
 0x57a   :  { %2223 = vmatpush1.msra.mxu0 %v9127_v23  ;;  %2294 = vmatpush1.msra.mxu1 %v9130_v32 }
 0x57b   :  { %2224 = vmatprep.subr.mxu0 %v9133_v28  ;;  %2295 = vmatprep.subr.mxu1 %v9136_v20 }
 0x57c   :  { %2225 = vmatpush1.msra.mxu0 %v9139_v21  ;;  %2296 = vmatpush1.msra.mxu1 %v9142_v35  ;;  %v9157_v21 = vld [vmem:[#allocation8 + $0x668] sm:$0xff]  ;;  %v9160_v35 = vld [vmem:[#allocation8 + $0x678] sm:$0xff] }
 0x57d   :  { %2226 = vmatprep.subr.mxu0 %v9145_v33  ;;  %2297 = vmatprep.subr.mxu1 %v9148_v31  ;;  %12360 = vst [vmem:[#allocation128_spill] sm:$0xff] %v9157_v21  ;;  %12361 = vst [vmem:[#allocation129_spill] sm:$0xff] %v9160_v35  ;;  %v9163_v33 = vld [vmem:[#allocation8 + $0x660] sm:$0xff]  ;;  %v9166_v31 = vld [vmem:[#allocation8 + $0x670] sm:$0xff] }
 0x57e   :  { %2227 = vmatpush1.msra.mxu0 %v9151_v39  ;;  %2298 = vmatpush1.msra.mxu1 %v9154_v30  ;;  %12362 = vst [vmem:[#allocation130_spill] sm:$0xff] %v9163_v33  ;;  %12363 = vst [vmem:[#allocation131_spill] sm:$0xff] %v9166_v31  ;;  %v9169_v39 = vld [vmem:[#allocation8 + $0x648] sm:$0xff]  ;;  %v9172_v30 = vld [vmem:[#allocation8 + $0x658] sm:$0xff] }
 0x57f   :  { %2228 = vmatprep.subr.mxu0 %v9157_v21  ;;  %2299 = vmatprep.subr.mxu1 %v9160_v35  ;;  %12364 = vst [vmem:[#allocation132_spill] sm:$0xff] %v9169_v39  ;;  %12365 = vst [vmem:[#allocation133_spill] sm:$0xff] %v9172_v30  ;;  %v9175_v21 = vld [vmem:[#allocation8 + $0x640] sm:$0xff]  ;;  %v9178_v35 = vld [vmem:[#allocation8 + $0x650] sm:$0xff] }
 0x580   :  { %2229 = vmatpush1.msra.mxu0 %v9163_v33  ;;  %2300 = vmatpush1.msra.mxu1 %v9166_v31  ;;  %12366 = vst [vmem:[#allocation134_spill] sm:$0xff] %v9175_v21  ;;  %12367 = vst [vmem:[#allocation135_spill] sm:$0xff] %v9178_v35  ;;  %v9181_v33 = vld [vmem:[#allocation8 + $0x628] sm:$0xff]  ;;  %v9184_v31 = vld [vmem:[#allocation8 + $0x638] sm:$0xff] }
 0x581   :  { %2230 = vmatprep.subr.mxu0 %v9169_v39  ;;  %2301 = vmatprep.subr.mxu1 %v9172_v30  ;;  %12368 = vst [vmem:[#allocation136_spill] sm:$0xff] %v9181_v33  ;;  %12369 = vst [vmem:[#allocation137_spill] sm:$0xff] %v9184_v31  ;;  %v9187_v39 = vld [vmem:[#allocation8 + $0x620] sm:$0xff]  ;;  %v9190_v30 = vld [vmem:[#allocation8 + $0x630] sm:$0xff] }
 0x582   :  { %2231 = vmatpush1.msra.mxu0 %v9175_v21  ;;  %2302 = vmatpush1.msra.mxu1 %v9178_v35  ;;  %12370 = vst [vmem:[#allocation138_spill] sm:$0xff] %v9187_v39  ;;  %12371 = vst [vmem:[#allocation139_spill] sm:$0xff] %v9190_v30  ;;  %v9193_v21 = vld [vmem:[#allocation8 + $0x608] sm:$0xff]  ;;  %v9196_v35 = vld [vmem:[#allocation8 + $0x618] sm:$0xff] }
 0x583   :  { %2232 = vmatprep.subr.mxu0 %v9181_v33  ;;  %2303 = vmatprep.subr.mxu1 %v9184_v31  ;;  %12372 = vst [vmem:[#allocation140_spill] sm:$0xff] %v9193_v21  ;;  %12373 = vst [vmem:[#allocation141_spill] sm:$0xff] %v9196_v35  ;;  %v9199_v33 = vld [vmem:[#allocation8 + $0x600] sm:$0xff]  ;;  %v9202_v31 = vld [vmem:[#allocation8 + $0x610] sm:$0xff] }
 0x584   :  { %2233 = vmatpush1.msra.mxu0 %v9187_v39  ;;  %2304 = vmatpush1.msra.mxu1 %v9190_v30  ;;  %12374 = vst [vmem:[#allocation142_spill] sm:$0xff] %v9199_v33  ;;  %12375 = vst [vmem:[#allocation143_spill] sm:$0xff] %v9202_v31  ;;  %v9205_v39 = vld [vmem:[#allocation8 + $0x5e8] sm:$0xff]  ;;  %v9208_v30 = vld [vmem:[#allocation8 + $0x5f8] sm:$0xff] }
 0x585   :  { %2234 = vmatprep.subr.mxu0 %v9193_v21  ;;  %2305 = vmatprep.subr.mxu1 %v9196_v35  ;;  %12376 = vst [vmem:[#allocation144_spill] sm:$0xff] %v9205_v39  ;;  %12377 = vst [vmem:[#allocation145_spill] sm:$0xff] %v9208_v30  ;;  %v9211_v21 = vld [vmem:[#allocation8 + $0x5e0] sm:$0xff]  ;;  %v9214_v35 = vld [vmem:[#allocation8 + $0x5f0] sm:$0xff] }
 0x586   :  { %2235 = vmatpush1.msra.mxu0 %v9199_v33  ;;  %2306 = vmatpush1.msra.mxu1 %v9202_v31  ;;  %12378 = vst [vmem:[#allocation146_spill] sm:$0xff] %v9211_v21  ;;  %12379 = vst [vmem:[#allocation147_spill] sm:$0xff] %v9214_v35  ;;  %v9217_v33 = vld [vmem:[#allocation8 + $0x5c8] sm:$0xff]  ;;  %v9220_v31 = vld [vmem:[#allocation8 + $0x5d8] sm:$0xff] }
 0x587   :  { %2236 = vmatprep.subr.mxu0 %v9205_v39  ;;  %2307 = vmatprep.subr.mxu1 %v9208_v30  ;;  %12380 = vst [vmem:[#allocation148_spill] sm:$0xff] %v9217_v33  ;;  %12381 = vst [vmem:[#allocation149_spill] sm:$0xff] %v9220_v31  ;;  %v9223_v39 = vld [vmem:[#allocation8 + $0x5c0] sm:$0xff]  ;;  %v9226_v30 = vld [vmem:[#allocation8 + $0x5d0] sm:$0xff] }
 0x588   :  { %2237 = vmatpush1.msra.mxu0 %v9211_v21  ;;  %2308 = vmatpush1.msra.mxu1 %v9214_v35  ;;  %12382 = vst [vmem:[#allocation150_spill] sm:$0xff] %v9223_v39  ;;  %12383 = vst [vmem:[#allocation151_spill] sm:$0xff] %v9226_v30  ;;  %v9229_v21 = vld [vmem:[#allocation8 + $0x5a8] sm:$0xff]  ;;  %v9232_v35 = vld [vmem:[#allocation8 + $0x5b8] sm:$0xff] }
 0x589   :  { %2238 = vmatprep.subr.mxu0 %v9217_v33  ;;  %2309 = vmatprep.subr.mxu1 %v9220_v31  ;;  %12384 = vst [vmem:[#allocation152_spill] sm:$0xff] %v9229_v21  ;;  %12385 = vst [vmem:[#allocation153_spill] sm:$0xff] %v9232_v35  ;;  %v9235_v33 = vld [vmem:[#allocation8 + $0x5a0] sm:$0xff]  ;;  %v9238_v31 = vld [vmem:[#allocation8 + $0x5b0] sm:$0xff] }
 0x58a   :  { %2239 = vmatpush1.msra.mxu0 %v9223_v39  ;;  %2310 = vmatpush1.msra.mxu1 %v9226_v30  ;;  %12386 = vst [vmem:[#allocation154_spill] sm:$0xff] %v9235_v33  ;;  %12387 = vst [vmem:[#allocation155_spill] sm:$0xff] %v9238_v31  ;;  %v9241_v39 = vld [vmem:[#allocation8 + $0x588] sm:$0xff]  ;;  %v9244_v30 = vld [vmem:[#allocation8 + $0x598] sm:$0xff] }
 0x58b   :  { %2240 = vmatprep.subr.mxu0 %v9229_v21  ;;  %2311 = vmatprep.subr.mxu1 %v9232_v35  ;;  %12388 = vst [vmem:[#allocation156_spill] sm:$0xff] %v9241_v39  ;;  %12389 = vst [vmem:[#allocation157_spill] sm:$0xff] %v9244_v30  ;;  %v9247_v21 = vld [vmem:[#allocation8 + $0x580] sm:$0xff]  ;;  %v9250_v35 = vld [vmem:[#allocation8 + $0x590] sm:$0xff] }
 0x58c   :  { %2241 = vmatpush1.msra.mxu0 %v9235_v33  ;;  %2312 = vmatpush1.msra.mxu1 %v9238_v31  ;;  %12390 = vst [vmem:[#allocation158_spill] sm:$0xff] %v9247_v21  ;;  %12391 = vst [vmem:[#allocation159_spill] sm:$0xff] %v9250_v35  ;;  %v9253_v33 = vld [vmem:[#allocation8 + $0x568] sm:$0xff]  ;;  %v9256_v31 = vld [vmem:[#allocation8 + $0x578] sm:$0xff] }
 0x58d   :  { %2242 = vmatprep.subr.mxu0 %v9241_v39  ;;  %2313 = vmatprep.subr.mxu1 %v9244_v30  ;;  %12392 = vst [vmem:[#allocation160_spill] sm:$0xff] %v9253_v33  ;;  %12393 = vst [vmem:[#allocation161_spill] sm:$0xff] %v9256_v31  ;;  %v9259_v39 = vld [vmem:[#allocation8 + $0x560] sm:$0xff]  ;;  %v9262_v30 = vld [vmem:[#allocation8 + $0x570] sm:$0xff] }
 0x58e   :  { %2243 = vmatpush1.msra.mxu0 %v9247_v21  ;;  %2314 = vmatpush1.msra.mxu1 %v9250_v35  ;;  %12394 = vst [vmem:[#allocation162_spill] sm:$0xff] %v9259_v39  ;;  %12395 = vst [vmem:[#allocation163_spill] sm:$0xff] %v9262_v30  ;;  %v9265_v21 = vld [vmem:[#allocation8 + $0x548] sm:$0xff]  ;;  %v9268_v35 = vld [vmem:[#allocation8 + $0x558] sm:$0xff] }
 0x58f   :  { %2244 = vmatprep.subr.mxu0 %v9253_v33  ;;  %2315 = vmatprep.subr.mxu1 %v9256_v31  ;;  %12396 = vst [vmem:[#allocation164_spill] sm:$0xff] %v9265_v21  ;;  %12397 = vst [vmem:[#allocation165_spill] sm:$0xff] %v9268_v35  ;;  %v9271_v33 = vld [vmem:[#allocation8 + $0x540] sm:$0xff]  ;;  %v9274_v31 = vld [vmem:[#allocation8 + $0x550] sm:$0xff] }
 0x590   :  { %2245 = vmatpush1.msra.mxu0 %v9259_v39  ;;  %2316 = vmatpush1.msra.mxu1 %v9262_v30  ;;  %v9277_v39 = vld [vmem:[#allocation8 + $0x528] sm:$0xff]  ;;  %v9280_v30 = vld [vmem:[#allocation8 + $0x538] sm:$0xff] }
 0x591   :  { %2246 = vmatprep.subr.mxu0 %v9265_v21  ;;  %2317 = vmatprep.subr.mxu1 %v9268_v35  ;;  %v9283_v21 = vld [vmem:[#allocation8 + $0x520] sm:$0xff]  ;;  %v9287_v35 = vld [vmem:[#allocation8 + $0x530] sm:$0xff] }
 0x592   :  { %2247 = vmatpush1.msra.mxu0 %v9271_v33  ;;  %2318 = vmatpush1.msra.mxu1 %v9274_v31 }
 0x593   :  { %2248 = vmatprep.subr.mxu0 %v9277_v39  ;;  %2319 = vmatprep.subr.mxu1 %v9280_v30 }
 0x594   :  { %2249 = vmatpush1.msra.mxu0 %v9283_v21  ;;  %2282 = vmatprep.mubr.f32.mxu0 %v11999_v12 }
 0x595   :  { %2320 = vmatpush1.msra.mxu1 %v9287_v35  ;;  %2353 = vmatprep.mubr.f32.mxu1 %v11999_v12 }
 0x596   :  { %2283 = vmatmul.mubr.f32.vlgmr.msra.gmra.mxu0 %v9092_v10  ;;  %2354 = vmatmul.mubr.f32.vlgmr.msra.gmra.mxu1 %v9092_v10  ;;  %v12432_v10 = vld [vmem:[#allocation53_spill] sm:$0xff] }
 0x597   :  { %2389 = vmatprep.subr.mxu0 %v8684_v2  ;;  %2460 = vmatprep.subr.mxu1 %v8687_v6  ;;  %v12398_v2 = vld [vmem:[#allocation19_spill] sm:$0xff]  ;;  %v12399_v6 = vld [vmem:[#allocation20_spill] sm:$0xff] }
 0x598   :  { %2390 = vmatpush1.msra.mxu0 %v8690_v59  ;;  %2461 = vmatpush1.msra.mxu1 %v8693_v62  ;;  %v12400_v59 = vld [vmem:[#allocation21_spill] sm:$0xff]  ;;  %v12401_v62 = vld [vmem:[#allocation22_spill] sm:$0xff] }
 0x599   :  { %2391 = vmatprep.subr.mxu0 %v8696_v22  ;;  %2462 = vmatprep.subr.mxu1 %v8699_v3  ;;  %v12402_v22 = vld [vmem:[#allocation23_spill] sm:$0xff]  ;;  %v12403_v3 = vld [vmem:[#allocation24_spill] sm:$0xff] }
 0x59a   :  { %2392 = vmatpush1.msra.mxu0 %v8702_v15  ;;  %2463 = vmatpush1.msra.mxu1 %v8705_v9  ;;  %v12404_v15 = vld [vmem:[#allocation25_spill] sm:$0xff]  ;;  %v12405_v9 = vld [vmem:[#allocation26_spill] sm:$0xff] }
 0x59b   :  { %2393 = vmatprep.subr.mxu0 %v8708_v11  ;;  %2464 = vmatprep.subr.mxu1 %v8711_v27  ;;  %v12406_v11 = vld [vmem:[#allocation27_spill] sm:$0xff]  ;;  %v12407_v27 = vld [vmem:[#allocation28_spill] sm:$0xff] }
 0x59c   :  { %2394 = vmatpush1.msra.mxu0 %v8714_v5  ;;  %2465 = vmatpush1.msra.mxu1 %v8717_v55  ;;  %v12408_v5 = vld [vmem:[#allocation29_spill] sm:$0xff]  ;;  %v12409_v55 = vld [vmem:[#allocation30_spill] sm:$0xff] }
 0x59d   :  { %2395 = vmatprep.subr.mxu0 %v8720_v8  ;;  %2466 = vmatprep.subr.mxu1 %v8723_v13  ;;  %v12410_v8 = vld [vmem:[#allocation31_spill] sm:$0xff]  ;;  %v12411_v13 = vld [vmem:[#allocation32_spill] sm:$0xff] }
 0x59e   :  { %2396 = vmatpush1.msra.mxu0 %v8726_v57  ;;  %2467 = vmatpush1.msra.mxu1 %v8729_v17  ;;  %v12412_v57 = vld [vmem:[#allocation33_spill] sm:$0xff]  ;;  %v12413_v17 = vld [vmem:[#allocation34_spill] sm:$0xff] }
 0x59f   :  { %2397 = vmatprep.subr.mxu0 %v8732_v40  ;;  %2468 = vmatprep.subr.mxu1 %v8735_v41  ;;  %v12414_v40 = vld [vmem:[#allocation35_spill] sm:$0xff]  ;;  %v12415_v41 = vld [vmem:[#allocation36_spill] sm:$0xff] }
 0x5a0   :  { %2398 = vmatpush1.msra.mxu0 %v8738_v42  ;;  %2469 = vmatpush1.msra.mxu1 %v8741_v43  ;;  %v12416_v42 = vld [vmem:[#allocation37_spill] sm:$0xff]  ;;  %v12417_v43 = vld [vmem:[#allocation38_spill] sm:$0xff] }
 0x5a1   :  { %2399 = vmatprep.subr.mxu0 %v8744_v44  ;;  %2470 = vmatprep.subr.mxu1 %v8747_v45  ;;  %v12418_v44 = vld [vmem:[#allocation39_spill] sm:$0xff]  ;;  %v12419_v45 = vld [vmem:[#allocation40_spill] sm:$0xff] }
 0x5a2   :  { %2400 = vmatpush1.msra.mxu0 %v8750_v46  ;;  %2471 = vmatpush1.msra.mxu1 %v8753_v48  ;;  %v12420_v46 = vld [vmem:[#allocation41_spill] sm:$0xff]  ;;  %v12421_v48 = vld [vmem:[#allocation42_spill] sm:$0xff] }
 0x5a3   :  { %2401 = vmatprep.subr.mxu0 %v8756_v50  ;;  %2472 = vmatprep.subr.mxu1 %v8759_v51  ;;  %v12422_v50 = vld [vmem:[#allocation43_spill] sm:$0xff]  ;;  %v12423_v51 = vld [vmem:[#allocation44_spill] sm:$0xff] }
 0x5a4   :  { %2402 = vmatpush1.msra.mxu0 %v8762_v52  ;;  %2473 = vmatpush1.msra.mxu1 %v8765_v54  ;;  %v12424_v52 = vld [vmem:[#allocation45_spill] sm:$0xff]  ;;  %v12425_v54 = vld [vmem:[#allocation46_spill] sm:$0xff] }
 0x5a5   :  { %2403 = vmatprep.subr.mxu0 %v8768_v56  ;;  %2474 = vmatprep.subr.mxu1 %v8771_v63  ;;  %v12426_v56 = vld [vmem:[#allocation47_spill] sm:$0xff]  ;;  %v12427_v63 = vld [vmem:[#allocation48_spill] sm:$0xff] }
 0x5a6   :  { %2404 = vmatpush1.msra.mxu0 %v8774_v60  ;;  %2475 = vmatpush1.msra.mxu1 %v8777_v61  ;;  %v12428_v60 = vld [vmem:[#allocation49_spill] sm:$0xff]  ;;  %v12429_v61 = vld [vmem:[#allocation50_spill] sm:$0xff] }
 0x5a7   :  { %2405 = vmatprep.subr.mxu0 %v8780_v18  ;;  %2476 = vmatprep.subr.mxu1 %v8783_v19  ;;  %v12430_v18 = vld [vmem:[#allocation51_spill] sm:$0xff]  ;;  %v12431_v19 = vld [vmem:[#allocation52_spill] sm:$0xff] }
 0x5a8   :  { %2406 = vmatpush1.msra.mxu0 %v12398_v2  ;;  %2477 = vmatpush1.msra.mxu1 %v12399_v6  ;;  %v12433_v2 = vld [vmem:[#allocation54_spill] sm:$0xff]  ;;  %v12434_v6 = vld [vmem:[#allocation55_spill] sm:$0xff] }
 0x5a9   :  { %2407 = vmatprep.subr.mxu0 %v12400_v59  ;;  %2478 = vmatprep.subr.mxu1 %v12401_v62  ;;  %v12435_v59 = vld [vmem:[#allocation56_spill] sm:$0xff]  ;;  %v12436_v62 = vld [vmem:[#allocation57_spill] sm:$0xff] }
 0x5aa   :  { %2408 = vmatpush1.msra.mxu0 %v12402_v22  ;;  %2479 = vmatpush1.msra.mxu1 %v12403_v3  ;;  %v12437_v22 = vld [vmem:[#allocation58_spill] sm:$0xff]  ;;  %v12439_v3 = vld [vmem:[#allocation60_spill] sm:$0xff] }
 0x5ab   :  { %2409 = vmatprep.subr.mxu0 %v12404_v15  ;;  %2480 = vmatprep.subr.mxu1 %v12405_v9  ;;  %v12440_v15 = vld [vmem:[#allocation61_spill] sm:$0xff]  ;;  %v12441_v9 = vld [vmem:[#allocation62_spill] sm:$0xff] }
 0x5ac   :  { %2410 = vmatpush1.msra.mxu0 %v12406_v11  ;;  %2481 = vmatpush1.msra.mxu1 %v12407_v27  ;;  %v12442_v11 = vld [vmem:[#allocation63_spill] sm:$0xff]  ;;  %v12443_v27 = vld [vmem:[#allocation64_spill] sm:$0xff] }
 0x5ad   :  { %2411 = vmatprep.subr.mxu0 %v12408_v5  ;;  %2482 = vmatprep.subr.mxu1 %v12409_v55  ;;  %v12444_v5 = vld [vmem:[#allocation65_spill] sm:$0xff]  ;;  %v12445_v55 = vld [vmem:[#allocation66_spill] sm:$0xff] }
 0x5ae   :  { %2412 = vmatpush1.msra.mxu0 %v12410_v8  ;;  %2483 = vmatpush1.msra.mxu1 %v12411_v13  ;;  %v12446_v8 = vld [vmem:[#allocation67_spill] sm:$0xff]  ;;  %v12447_v13 = vld [vmem:[#allocation68_spill] sm:$0xff] }
 0x5af   :  { %2413 = vmatprep.subr.mxu0 %v12412_v57  ;;  %2484 = vmatprep.subr.mxu1 %v12413_v17  ;;  %v12448_v57 = vld [vmem:[#allocation69_spill] sm:$0xff]  ;;  %v12449_v17 = vld [vmem:[#allocation70_spill] sm:$0xff] }
 0x5b0   :  { %2414 = vmatpush1.msra.mxu0 %v12414_v40  ;;  %2485 = vmatpush1.msra.mxu1 %v12415_v41  ;;  %v12450_v40 = vld [vmem:[#allocation71_spill] sm:$0xff]  ;;  %v12451_v41 = vld [vmem:[#allocation72_spill] sm:$0xff] }
 0x5b1   :  { %2415 = vmatprep.subr.mxu0 %v12416_v42  ;;  %2486 = vmatprep.subr.mxu1 %v12417_v43  ;;  %v12452_v42 = vld [vmem:[#allocation73_spill] sm:$0xff]  ;;  %v12453_v43 = vld [vmem:[#allocation74_spill] sm:$0xff] }
 0x5b2   :  { %2416 = vmatpush1.msra.mxu0 %v12418_v44  ;;  %2487 = vmatpush1.msra.mxu1 %v12419_v45  ;;  %v12454_v44 = vld [vmem:[#allocation75_spill] sm:$0xff]  ;;  %v12455_v45 = vld [vmem:[#allocation76_spill] sm:$0xff] }
 0x5b3   :  { %2417 = vmatprep.subr.mxu0 %v12420_v46  ;;  %2488 = vmatprep.subr.mxu1 %v12421_v48  ;;  %v12456_v46 = vld [vmem:[#allocation77_spill] sm:$0xff]  ;;  %v12457_v48 = vld [vmem:[#allocation78_spill] sm:$0xff] }
 0x5b4   :  { %2418 = vmatpush1.msra.mxu0 %v12422_v50  ;;  %2489 = vmatpush1.msra.mxu1 %v12423_v51  ;;  %v12458_v50 = vld [vmem:[#allocation79_spill] sm:$0xff]  ;;  %v12459_v51 = vld [vmem:[#allocation80_spill] sm:$0xff] }
 0x5b5   :  { %2419 = vmatprep.subr.mxu0 %v12424_v52  ;;  %2490 = vmatprep.subr.mxu1 %v12425_v54  ;;  %v12460_v52 = vld [vmem:[#allocation81_spill] sm:$0xff]  ;;  %v12461_v54 = vld [vmem:[#allocation82_spill] sm:$0xff] }
 0x5b6   :  { %2420 = vmatpush1.msra.mxu0 %v12426_v56  ;;  %2453 = vmatprep.mubr.f32.mxu0 %v11999_v12  ;;  %v12462_v56 = vld [vmem:[#allocation83_spill] sm:$0xff] }
 0x5b7   :  { %2491 = vmatpush1.msra.mxu1 %v12427_v63  ;;  %2524 = vmatprep.mubr.f32.mxu1 %v11999_v12  ;;  %v12463_v63 = vld [vmem:[#allocation84_spill] sm:$0xff] }
 0x5b8   :  { %2454 = vmatmul.mubr.f32.vlgmr.msra.gmra.mxu0 %v9099_v36  ;;  %2525 = vmatmul.mubr.f32.vlgmr.msra.gmra.mxu1 %v9099_v36  ;;  %v12438_v36 = vld [vmem:[#allocation59_spill] sm:$0xff] }
 0x5b9   :  { %2577 = vmatprep.subr.mxu0 %v12428_v60  ;;  %2648 = vmatprep.subr.mxu1 %v12429_v61  ;;  %v12464_v60 = vld [vmem:[#allocation85_spill] sm:$0xff]  ;;  %v12465_v61 = vld [vmem:[#allocation86_spill] sm:$0xff] }
 0x5ba   :  { %2578 = vmatpush1.msra.mxu0 %v12430_v18  ;;  %2649 = vmatpush1.msra.mxu1 %v12431_v19  ;;  %v12466_v18 = vld [vmem:[#allocation87_spill] sm:$0xff]  ;;  %v12467_v19 = vld [vmem:[#allocation88_spill] sm:$0xff] }
 0x5bb   :  { %2579 = vmatprep.subr.mxu0 %v12432_v10  ;;  %2650 = vmatprep.subr.mxu1 %v12433_v2  ;;  %v12468_v10 = vld [vmem:[#allocation89_spill] sm:$0xff]  ;;  %v12469_v2 = vld [vmem:[#allocation90_spill] sm:$0xff] }
 0x5bc   :  { %2580 = vmatpush1.msra.mxu0 %v12434_v6  ;;  %2651 = vmatpush1.msra.mxu1 %v12435_v59  ;;  %v12470_v6 = vld [vmem:[#allocation91_spill] sm:$0xff]  ;;  %v12471_v59 = vld [vmem:[#allocation92_spill] sm:$0xff] }
 0x5bd   :  { %2581 = vmatprep.subr.mxu0 %v12436_v62  ;;  %2652 = vmatprep.subr.mxu1 %v12437_v22  ;;  %v12472_v62 = vld [vmem:[#allocation93_spill] sm:$0xff]  ;;  %v12473_v22 = vld [vmem:[#allocation94_spill] sm:$0xff] }
 0x5be   :  { %2582 = vmatpush1.msra.mxu0 %v12438_v36  ;;  %2653 = vmatpush1.msra.mxu1 %v12439_v3  ;;  %v12474_v36 = vld [vmem:[#allocation95_spill] sm:$0xff]  ;;  %v12475_v3 = vld [vmem:[#allocation96_spill] sm:$0xff] }
 0x5bf   :  { %2583 = vmatprep.subr.mxu0 %v12440_v15  ;;  %2654 = vmatprep.subr.mxu1 %v12441_v9  ;;  %v12476_v15 = vld [vmem:[#allocation97_spill] sm:$0xff]  ;;  %v12477_v9 = vld [vmem:[#allocation98_spill] sm:$0xff] }
 0x5c0   :  { %2584 = vmatpush1.msra.mxu0 %v12442_v11  ;;  %2655 = vmatpush1.msra.mxu1 %v12443_v27  ;;  %v12478_v11 = vld [vmem:[#allocation99_spill] sm:$0xff]  ;;  %v12479_v27 = vld [vmem:[#allocation100_spill] sm:$0xff] }
 0x5c1   :  { %2585 = vmatprep.subr.mxu0 %v12444_v5  ;;  %2656 = vmatprep.subr.mxu1 %v12445_v55  ;;  %v12480_v5 = vld [vmem:[#allocation101_spill] sm:$0xff]  ;;  %v12481_v55 = vld [vmem:[#allocation102_spill] sm:$0xff] }
 0x5c2   :  { %2586 = vmatpush1.msra.mxu0 %v12446_v8  ;;  %2657 = vmatpush1.msra.mxu1 %v12447_v13  ;;  %v12482_v8 = vld [vmem:[#allocation103_spill] sm:$0xff]  ;;  %v12483_v13 = vld [vmem:[#allocation104_spill] sm:$0xff] }
 0x5c3   :  { %2587 = vmatprep.subr.mxu0 %v12448_v57  ;;  %2658 = vmatprep.subr.mxu1 %v12449_v17  ;;  %v12484_v57 = vld [vmem:[#allocation105_spill] sm:$0xff]  ;;  %v12485_v17 = vld [vmem:[#allocation106_spill] sm:$0xff] }
 0x5c4   :  { %2588 = vmatpush1.msra.mxu0 %v12450_v40  ;;  %2659 = vmatpush1.msra.mxu1 %v12451_v41  ;;  %v12486_v40 = vld [vmem:[#allocation107_spill] sm:$0xff]  ;;  %v12487_v41 = vld [vmem:[#allocation108_spill] sm:$0xff] }
 0x5c5   :  { %2589 = vmatprep.subr.mxu0 %v12452_v42  ;;  %2660 = vmatprep.subr.mxu1 %v12453_v43  ;;  %v12488_v42 = vld [vmem:[#allocation116_spill] sm:$0xff]  ;;  %v12489_v43 = vld [vmem:[#allocation117_spill] sm:$0xff] }
 0x5c6   :  { %2590 = vmatpush1.msra.mxu0 %v12454_v44  ;;  %2661 = vmatpush1.msra.mxu1 %v12455_v45  ;;  %v12490_v44 = vld [vmem:[#allocation118_spill] sm:$0xff]  ;;  %v12491_v45 = vld [vmem:[#allocation119_spill] sm:$0xff] }
 0x5c7   :  { %2591 = vmatprep.subr.mxu0 %v12456_v46  ;;  %2662 = vmatprep.subr.mxu1 %v12457_v48  ;;  %v12492_v46 = vld [vmem:[#allocation120_spill] sm:$0xff]  ;;  %v12493_v48 = vld [vmem:[#allocation121_spill] sm:$0xff] }
 0x5c8   :  { %2592 = vmatpush1.msra.mxu0 %v12458_v50  ;;  %2663 = vmatpush1.msra.mxu1 %v12459_v51 }
 0x5c9   :  { %2593 = vmatprep.subr.mxu0 %v12460_v52  ;;  %2664 = vmatprep.subr.mxu1 %v12461_v54  ;;  %v12494_v52 = vld [vmem:[#allocation18_spill] sm:$0xff] }
 0x5ca   :  { %2594 = vmatpush1.msra.mxu0 %v12462_v56  ;;  %2665 = vmatpush1.msra.mxu1 %v12463_v63 }
 0x5cb   :  { %2595 = vmatprep.subr.mxu0 %v12464_v60  ;;  %2666 = vmatprep.subr.mxu1 %v12465_v61 }
 0x5cc   :  { %2596 = vmatpush1.msra.mxu0 %v12466_v18  ;;  %2667 = vmatpush1.msra.mxu1 %v12467_v19 }
 0x5cd   :  { %2597 = vmatprep.subr.mxu0 %v12468_v10  ;;  %2668 = vmatprep.subr.mxu1 %v12469_v2 }
 0x5ce   :  { %2598 = vmatpush1.msra.mxu0 %v12470_v6  ;;  %2669 = vmatpush1.msra.mxu1 %v12471_v59 }
 0x5cf   :  { %2599 = vmatprep.subr.mxu0 %v12472_v62  ;;  %2670 = vmatprep.subr.mxu1 %v12473_v22 }
 0x5d0   :  { %2600 = vmatpush1.msra.mxu0 %v12474_v36  ;;  %2671 = vmatpush1.msra.mxu1 %v12475_v3 }
 0x5d1   :  { %2601 = vmatprep.subr.mxu0 %v12476_v15  ;;  %2672 = vmatprep.subr.mxu1 %v12477_v9 }
 0x5d2   :  { %2602 = vmatpush1.msra.mxu0 %v12478_v11  ;;  %2673 = vmatpush1.msra.mxu1 %v12479_v27 }
 0x5d3   :  { %2603 = vmatprep.subr.mxu0 %v12480_v5  ;;  %2674 = vmatprep.subr.mxu1 %v12481_v55 }
 0x5d4   :  { %2604 = vmatpush1.msra.mxu0 %v12482_v8  ;;  %2675 = vmatpush1.msra.mxu1 %v12483_v13 }
 0x5d5   :  { %2605 = vmatprep.subr.mxu0 %v12484_v57  ;;  %2676 = vmatprep.subr.mxu1 %v12485_v17 }
 0x5d6   :  { %2606 = vmatpush1.msra.mxu0 %v12486_v40  ;;  %2677 = vmatpush1.msra.mxu1 %v12487_v41 }
 0x5d7   :  { %2607 = vmatprep.subr.mxu0 %v12488_v42  ;;  %2678 = vmatprep.subr.mxu1 %v12489_v43 }
 0x5d8   :  { %2608 = vmatpush1.msra.mxu0 %v12490_v44  ;;  %2679 = vmatpush1.msra.mxu1 %v12491_v45 }
 0x5d9   :  { %2641 = vmatprep.mubr.f32.mxu0 %v11999_v12  ;;  %2712 = vmatprep.mubr.f32.mxu1 %v11999_v12 }
 0x5da   :  { %2719 = vmatprep.subr.mxu0 %v12492_v46  ;;  %2790 = vmatprep.subr.mxu1 %v12493_v48 }
 0x635   :  { %v2142_v50 = vpop.f32.mrf.mxu0  ;;  %v2213_v56 = vpop.f32.mrf.mxu1 }
 0x636   :  { %v2143_v54 = vadd.f32 %v2142_v50, %v12494_v52  ;;  %v2214_v3 = vadd.f32 %v2213_v56, %v8597_v53 }
 0x637   :  { %v2144_v51 = vpop.f32.mrf.mxu0  ;;  %v2215_v19 = vpop.f32.mrf.mxu1 }
 0x638   :  { %v2145_v60 = vadd.f32 %v2144_v51, %v8586_v34  ;;  %v2216_v22 = vadd.f32 %v2215_v19, %v8592_v49 }
 0x656   :  { %v2284_v63 = vpop.f32.mrf.mxu0  ;;  %v2355_v6 = vpop.f32.mrf.mxu1 }
 0x657   :  { %v2360_v61 = vadd.f32 %v2284_v63, %v2143_v54  ;;  %v2362_v11 = vadd.f32 %v2355_v6, %v2214_v3 }
 0x658   :  { %v2286_v18 = vpop.f32.mrf.mxu0  ;;  %v2357_v62 = vpop.f32.mrf.mxu1 }
 0x659   :  { %v6532_v10 = vmul.f32 -1.442695, %v2360_v61  ;;  %v2361_v2 = vadd.f32 %v2286_v18, %v2145_v60  ;;  %v2363_v36 = vadd.f32 %v2357_v62, %v2216_v22 }
 0x65b   :  { %6811 = vpow2.f32 %v6532_v10  ;;  %v6533_v59 = vmul.f32 -1.442695, %v2361_v2  ;;  %v6534_v15 = vmul.f32 -1.442695, %v2363_v36 }
 0x65d   :  { %6813 = vpow2.f32 %v6533_v59 }
 0x65e   :  { %6815 = vpow2.f32 %v6534_v15  ;;  %v2567_v15 = vrot.slane %v9096_v47, 6  ;;  %v12495_v47 = vld [vmem:[#allocation122_spill] sm:$0xff] }
 0x668   :  { %v6812_v9 = vpop.eup %6811 }
 0x669   :  { %v2367_v27 = vadd.f32 1.0, %v6812_v9 }
 0x66a   :  { %v6814_v5 = vpop.eup %6813 }
 0x66b   :  { %6817 = vrcp.f32 %v2367_v27  ;;  %v2373_v55 = vadd.f32 1.0, %v6814_v5  ;;  %v6816_v8 = vpop.eup %6815 }
 0x66c   :  { %6819 = vtanh.f32 %v2362_v11  ;;  %v2380_v42 = vadd.f32 1.0, %v6816_v8 }
 0x66d   :  { %6821 = vrcp.f32 %v2373_v55 }
 0x66e   :  { %6823 = vrcp.f32 %v2380_v42  ;;  %v12511_v42 = vld [vmem:[#allocation138_spill] sm:$0xff] }
 0x678   :  { %v6818_v13 = vpop.eup %6817  ;;  %v2455_v57 = vpop.f32.mrf.mxu0 }
 0x679   :  { %v6820_v17 = vpop.eup %6819  ;;  %v2535_v40 = vrot.slane %v2455_v57, 2  ;;  %v2526_v48 = vpop.f32.mrf.mxu1 }
 0x67a   :  { %v6822_v41 = vpop.eup %6821  ;;  %v2457_v43 = vpop.f32.mrf.mxu0  ;;  %v2384_v44 = vmul.f32 %v6820_v17, %v6818_v13  ;;  %v12508_v17 = vld [vmem:[#allocation135_spill] sm:$0xff] }
 0x67b   :  { %v2383_v45 = vmul.f32 %v6822_v41, %v9086_v16  ;;  %v2543_v46 = vadd.f32 %v2535_v40, %v8237_v14  ;;  %v2536_v50 = vrot.slane %v2457_v43, 2  ;;  %v2528_v60 = vpop.f32.mrf.mxu1  ;;  %v2537_v16 = vrot.slane %v2526_v48, 2  ;;  %v6824_v14 = vpop.eup %6823  ;;  %v12509_v40 = vld [vmem:[#allocation136_spill] sm:$0xff]  ;;  %v12510_v41 = vld [vmem:[#allocation137_spill] sm:$0xff]  ;;  %v12512_v43 = vld [vmem:[#allocation139_spill] sm:$0xff] }
 0x67c   :  { %v2538_v61 = vrot.slane %v2528_v60, 2  ;;  %v12516_v48 = vld [vmem:[#allocation143_spill] sm:$0xff]  ;;  %v12521_v60 = vld [vmem:[#allocation148_spill] sm:$0xff] }
 0x67d   :  { %v9435_v51 = vadd.f32 %v2384_v44, %v2383_v45  ;;  %v6535_v54 = vmul.f32 -1.442695, %v2543_v46  ;;  %v2544_v56 = vadd.f32 %v2536_v50, %v8239_v58  ;;  %v2545_v2 = vadd.f32 %v2537_v16, %v8246_v7  ;;  %v12513_v44 = vld [vmem:[#allocation140_spill] sm:$0xff]  ;;  %v12514_v45 = vld [vmem:[#allocation141_spill] sm:$0xff]  ;;  %v12515_v46 = vld [vmem:[#allocation142_spill] sm:$0xff] }
 0x67e   :  { %v2546_v18 = vadd.f32 %v2538_v61, %v8243_v0  ;;  %v12517_v50 = vld [vmem:[#allocation144_spill] sm:$0xff]  ;;  %v12522_v61 = vld [vmem:[#allocation149_spill] sm:$0xff]  ;;  %v12524_v16 = vld [vmem:[#allocation151_spill] sm:$0xff] }
 0x67f   :  { %6825 = vpow2.f32 %v6535_v54  ;;  %v6536_v63 = vmul.f32 -1.442695, %v2544_v56  ;;  %v12518_v54 = vld [vmem:[#allocation145_spill] sm:$0xff]  ;;  %v12519_v56 = vld [vmem:[#allocation146_spill] sm:$0xff] }
 0x680   :  { %6827 = vtanh.f32 %v9435_v51  ;;  %v6537_v19 = vmul.f32 -1.442695, %v2546_v18  ;;  %v12523_v18 = vld [vmem:[#allocation150_spill] sm:$0xff] }
 0x681   :  { %6829 = vpow2.f32 %v6536_v63  ;;  %v12520_v63 = vld [vmem:[#allocation147_spill] sm:$0xff] }
 0x682   :  { %6831 = vpow2.f32 %v6537_v19  ;;  %v12525_v19 = vld [vmem:[#allocation152_spill] sm:$0xff] }
 0x68c   :  { %v6826_v10 = vpop.eup %6825 }
 0x68d   :  { %v6828_v6 = vpop.eup %6827  ;;  %v2550_v59 = vadd.f32 1.0, %v6826_v10  ;;  %v12527_v10 = vld [vmem:[#allocation154_spill] sm:$0xff] }
 0x68e   :  { %v6830_v62 = vpop.eup %6829  ;;  %v9441_v58 = vmul.f32 %v6828_v6, %v6824_v14  ;;  %v12526_v14 = vld [vmem:[#allocation153_spill] sm:$0xff]  ;;  %v12529_v6 = vld [vmem:[#allocation156_spill] sm:$0xff] }
 0x68f   :  { %6833 = vrcp.f32 %v2550_v59  ;;  %v2556_v22 = vadd.f32 1.0, %v6830_v62  ;;  %v6832_v36 = vpop.eup %6831  ;;  %v12530_v59 = vld [vmem:[#allocation157_spill] sm:$0xff]  ;;  %v12531_v62 = vld [vmem:[#allocation158_spill] sm:$0xff] }
 0x690   :  { %6835 = vtanh.f32 %v2545_v2  ;;  %2388 = vst [vmem:[#allocation3 + $0x4] sm:$0x3] %v9441_v58  ;;  %v2563_v11 = vadd.f32 1.0, %v6832_v36  ;;  %v12528_v2 = vld [vmem:[#allocation155_spill] sm:$0xff]  ;;  %v12533_v36 = vld [vmem:[#allocation160_spill] sm:$0xff] }
 0x691   :  { %6837 = vrcp.f32 %v2556_v22  ;;  %v12532_v22 = vld [vmem:[#allocation159_spill] sm:$0xff] }
 0x692   :  { %6839 = vrcp.f32 %v2563_v11  ;;  %v12538_v11 = vld [vmem:[#allocation165_spill] sm:$0xff] }
 0x69c   :  { %v6834_v0 = vpop.eup %6833 }
 0x69d   :  { %v6836_v3 = vpop.eup %6835 }
 0x69e   :  { %v6838_v9 = vpop.eup %6837  ;;  %v2570_v7 = vmul.f32 %v6836_v3, %v6834_v0  ;;  %v12534_v0 = vld [vmem:[#allocation161_spill] sm:$0xff]  ;;  %v12535_v3 = vld [vmem:[#allocation162_spill] sm:$0xff] }
 0x69f   :  { %v2569_v27 = vmul.f32 %v6838_v9, %v2567_v15  ;;  %v6840_v55 = vpop.eup %6839  ;;  %v12536_v15 = vld [vmem:[#allocation163_spill] sm:$0xff]  ;;  %v12537_v9 = vld [vmem:[#allocation164_spill] sm:$0xff] }
 0x6a1   :  { %v9445_v5 = vadd.f32 %v2570_v7, %v2569_v27  ;;  %v9518_v7 = vld [vmem:[#allocation8 + $0x2e8] sm:$0xff] }
 0x6a2   :  { %v9542_v27 = vld [vmem:[#allocation8 + $0x2a8] sm:$0xff] }
 0x6a3   :  { %6841 = vtanh.f32 %v9445_v5 }
 0x6b0   :  { %v6842_v8 = vpop.eup %6841 }
 0x6b1   :  { %v2573_v13 = vmul.f32 %v6842_v8, %v6840_v55  ;;  %v9545_v55 = vld [vmem:[#allocation8 + $0x2b8] sm:$0xff]  ;;  %v9548_v8 = vld [vmem:[#allocation8 + $0x2a0] sm:$0xff] }
 0x6b3   :  { %v9448_v57 = vrot.slane %v2573_v13, 6  ;;  %v9551_v13 = vld [vmem:[#allocation8 + $0x2b0] sm:$0xff] }
 0x6b5   :  { %2642 = vmatmul.mubr.f32.vlgmr.msra.gmra.mxu0 %v9448_v57  ;;  %2713 = vmatmul.mubr.f32.vlgmr.msra.gmra.mxu1 %v9448_v57 }
 0x6b6   :  { %2720 = vmatpush1.msra.mxu0 %v9103_v29  ;;  %2791 = vmatpush1.msra.mxu1 %v9106_v26  ;;  %v12496_v29 = vld [vmem:[#allocation123_spill] sm:$0xff]  ;;  %v12497_v26 = vld [vmem:[#allocation124_spill] sm:$0xff] }
 0x6b7   :  { %2721 = vmatprep.subr.mxu0 %v9109_v37  ;;  %2792 = vmatprep.subr.mxu1 %v9112_v38  ;;  %v12498_v37 = vld [vmem:[#allocation125_spill] sm:$0xff]  ;;  %v12499_v38 = vld [vmem:[#allocation126_spill] sm:$0xff] }
 0x6b8   :  { %2722 = vmatpush1.msra.mxu0 %v9115_v1  ;;  %2793 = vmatpush1.msra.mxu1 %v9118_v25  ;;  %v12500_v1 = vld [vmem:[#allocation127_spill] sm:$0xff]  ;;  %v12501_v25 = vld [vmem:[#allocation128_spill] sm:$0xff] }
 0x6b9   :  { %2723 = vmatprep.subr.mxu0 %v9121_v4  ;;  %2794 = vmatprep.subr.mxu1 %v9124_v24  ;;  %v12502_v4 = vld [vmem:[#allocation129_spill] sm:$0xff]  ;;  %v12503_v24 = vld [vmem:[#allocation130_spill] sm:$0xff] }
 0x6ba   :  { %2724 = vmatpush1.msra.mxu0 %v9127_v23  ;;  %2795 = vmatpush1.msra.mxu1 %v9130_v32  ;;  %v12504_v23 = vld [vmem:[#allocation131_spill] sm:$0xff]  ;;  %v12505_v32 = vld [vmem:[#allocation132_spill] sm:$0xff] }
 0x6bb   :  { %2725 = vmatprep.subr.mxu0 %v9133_v28  ;;  %2796 = vmatprep.subr.mxu1 %v9136_v20  ;;  %v12506_v28 = vld [vmem:[#allocation133_spill] sm:$0xff]  ;;  %v12507_v20 = vld [vmem:[#allocation134_spill] sm:$0xff] }
 0x6bc   :  { %2726 = vmatpush1.msra.mxu0 %v12495_v47  ;;  %2797 = vmatpush1.msra.mxu1 %v12496_v29  ;;  %v9554_v47 = vld [vmem:[#allocation8 + $0x288] sm:$0xff]  ;;  %v9557_v29 = vld [vmem:[#allocation8 + $0x298] sm:$0xff] }
 0x6bd   :  { %2727 = vmatprep.subr.mxu0 %v12497_v26  ;;  %2798 = vmatprep.subr.mxu1 %v12498_v37  ;;  %v9560_v26 = vld [vmem:[#allocation8 + $0x280] sm:$0xff]  ;;  %v9563_v37 = vld [vmem:[#allocation8 + $0x290] sm:$0xff] }
 0x6be   :  { %2728 = vmatpush1.msra.mxu0 %v12499_v38  ;;  %2799 = vmatpush1.msra.mxu1 %v12500_v1  ;;  %v9566_v38 = vld [vmem:[#allocation8 + $0x268] sm:$0xff]  ;;  %v9569_v1 = vld [vmem:[#allocation8 + $0x278] sm:$0xff] }
 0x6bf   :  { %2729 = vmatprep.subr.mxu0 %v12501_v25  ;;  %2800 = vmatprep.subr.mxu1 %v12502_v4  ;;  %v9572_v25 = vld [vmem:[#allocation8 + $0x260] sm:$0xff]  ;;  %v9575_v4 = vld [vmem:[#allocation8 + $0x270] sm:$0xff] }
 0x6c0   :  { %2730 = vmatpush1.msra.mxu0 %v12503_v24  ;;  %2801 = vmatpush1.msra.mxu1 %v12504_v23  ;;  %v9578_v24 = vld [vmem:[#allocation8 + $0x248] sm:$0xff]  ;;  %v9581_v23 = vld [vmem:[#allocation8 + $0x258] sm:$0xff] }
 0x6c1   :  { %2731 = vmatprep.subr.mxu0 %v12505_v32  ;;  %2802 = vmatprep.subr.mxu1 %v12506_v28  ;;  %v9584_v32 = vld [vmem:[#allocation8 + $0x240] sm:$0xff]  ;;  %v9587_v28 = vld [vmem:[#allocation8 + $0x250] sm:$0xff] }
 0x6c2   :  { %2732 = vmatpush1.msra.mxu0 %v12507_v20  ;;  %2803 = vmatpush1.msra.mxu1 %v12508_v17  ;;  %v9590_v20 = vld [vmem:[#allocation8 + $0x228] sm:$0xff]  ;;  %v9593_v17 = vld [vmem:[#allocation8 + $0x238] sm:$0xff] }
 0x6c3   :  { %2733 = vmatprep.subr.mxu0 %v12509_v40  ;;  %2804 = vmatprep.subr.mxu1 %v12510_v41  ;;  %v9596_v40 = vld [vmem:[#allocation8 + $0x220] sm:$0xff]  ;;  %v9599_v41 = vld [vmem:[#allocation8 + $0x230] sm:$0xff] }
 0x6c4   :  { %2734 = vmatpush1.msra.mxu0 %v12511_v42  ;;  %2805 = vmatpush1.msra.mxu1 %v12512_v43  ;;  %v9602_v42 = vld [vmem:[#allocation8 + $0x208] sm:$0xff]  ;;  %v9605_v43 = vld [vmem:[#allocation8 + $0x218] sm:$0xff] }
 0x6c5   :  { %2735 = vmatprep.subr.mxu0 %v12513_v44  ;;  %2806 = vmatprep.subr.mxu1 %v12514_v45  ;;  %v9608_v44 = vld [vmem:[#allocation8 + $0x200] sm:$0xff]  ;;  %v9611_v45 = vld [vmem:[#allocation8 + $0x210] sm:$0xff] }
 0x6c6   :  { %2736 = vmatpush1.msra.mxu0 %v12515_v46  ;;  %2807 = vmatpush1.msra.mxu1 %v12516_v48  ;;  %v9614_v46 = vld [vmem:[#allocation8 + $0x1e8] sm:$0xff]  ;;  %v9617_v48 = vld [vmem:[#allocation8 + $0x1f8] sm:$0xff] }
 0x6c7   :  { %2737 = vmatprep.subr.mxu0 %v12517_v50  ;;  %2808 = vmatprep.subr.mxu1 %v12518_v54  ;;  %v9620_v50 = vld [vmem:[#allocation8 + $0x1e0] sm:$0xff]  ;;  %v9623_v54 = vld [vmem:[#allocation8 + $0x1f0] sm:$0xff] }
 0x6c8   :  { %2738 = vmatpush1.msra.mxu0 %v12519_v56  ;;  %2809 = vmatpush1.msra.mxu1 %v12520_v63  ;;  %v9626_v56 = vld [vmem:[#allocation8 + $0x1c8] sm:$0xff]  ;;  %v9629_v63 = vld [vmem:[#allocation8 + $0x1d8] sm:$0xff] }
 0x6c9   :  { %2739 = vmatprep.subr.mxu0 %v12521_v60  ;;  %2810 = vmatprep.subr.mxu1 %v12522_v61  ;;  %v9632_v60 = vld [vmem:[#allocation8 + $0x1c0] sm:$0xff]  ;;  %v9635_v61 = vld [vmem:[#allocation8 + $0x1d0] sm:$0xff] }
 0x6ca   :  { %2740 = vmatpush1.msra.mxu0 %v12523_v18  ;;  %2811 = vmatpush1.msra.mxu1 %v12524_v16  ;;  %12539 = vst [vmem:[#allocation19_spill] sm:$0xff] %v9632_v60  ;;  %12540 = vst [vmem:[#allocation20_spill] sm:$0xff] %v9635_v61  ;;  %v9638_v18 = vld [vmem:[#allocation8 + $0x1a8] sm:$0xff]  ;;  %v9641_v16 = vld [vmem:[#allocation8 + $0x1b8] sm:$0xff] }
 0x6cb   :  { %2741 = vmatprep.subr.mxu0 %v12525_v19  ;;  %2812 = vmatprep.subr.mxu1 %v12526_v14  ;;  %12541 = vst [vmem:[#allocation21_spill] sm:$0xff] %v9638_v18  ;;  %12542 = vst [vmem:[#allocation22_spill] sm:$0xff] %v9641_v16  ;;  %v9644_v19 = vld [vmem:[#allocation8 + $0x1a0] sm:$0xff]  ;;  %v9647_v14 = vld [vmem:[#allocation8 + $0x1b0] sm:$0xff] }
 0x6cc   :  { %2742 = vmatpush1.msra.mxu0 %v12527_v10  ;;  %2813 = vmatpush1.msra.mxu1 %v12528_v2  ;;  %12543 = vst [vmem:[#allocation23_spill] sm:$0xff] %v9644_v19  ;;  %12544 = vst [vmem:[#allocation24_spill] sm:$0xff] %v9647_v14  ;;  %v9650_v10 = vld [vmem:[#allocation8 + $0x188] sm:$0xff]  ;;  %v9653_v2 = vld [vmem:[#allocation8 + $0x198] sm:$0xff] }
 0x6cd   :  { %2743 = vmatprep.subr.mxu0 %v12529_v6  ;;  %2814 = vmatprep.subr.mxu1 %v12530_v59  ;;  %12545 = vst [vmem:[#allocation25_spill] sm:$0xff] %v9650_v10  ;;  %12546 = vst [vmem:[#allocation26_spill] sm:$0xff] %v9653_v2  ;;  %v9656_v6 = vld [vmem:[#allocation8 + $0x180] sm:$0xff]  ;;  %v9659_v59 = vld [vmem:[#allocation8 + $0x190] sm:$0xff] }
 0x6ce   :  { %2744 = vmatpush1.msra.mxu0 %v12531_v62  ;;  %2815 = vmatpush1.msra.mxu1 %v12532_v22  ;;  %12547 = vst [vmem:[#allocation27_spill] sm:$0xff] %v9656_v6  ;;  %12548 = vst [vmem:[#allocation28_spill] sm:$0xff] %v9659_v59  ;;  %v9662_v62 = vld [vmem:[#allocation8 + $0x168] sm:$0xff]  ;;  %v9665_v22 = vld [vmem:[#allocation8 + $0x178] sm:$0xff] }
 0x6cf   :  { %2745 = vmatprep.subr.mxu0 %v12533_v36  ;;  %2816 = vmatprep.subr.mxu1 %v12534_v0  ;;  %12549 = vst [vmem:[#allocation29_spill] sm:$0xff] %v9662_v62  ;;  %12550 = vst [vmem:[#allocation30_spill] sm:$0xff] %v9665_v22  ;;  %v9668_v36 = vld [vmem:[#allocation8 + $0x160] sm:$0xff]  ;;  %v9671_v0 = vld [vmem:[#allocation8 + $0x170] sm:$0xff] }
 0x6d0   :  { %2746 = vmatpush1.msra.mxu0 %v12535_v3  ;;  %2817 = vmatpush1.msra.mxu1 %v12536_v15  ;;  %12551 = vst [vmem:[#allocation31_spill] sm:$0xff] %v9668_v36  ;;  %12552 = vst [vmem:[#allocation32_spill] sm:$0xff] %v9671_v0  ;;  %v9674_v3 = vld [vmem:[#allocation8 + $0x148] sm:$0xff]  ;;  %v9677_v15 = vld [vmem:[#allocation8 + $0x158] sm:$0xff] }
 0x6d1   :  { %2747 = vmatprep.subr.mxu0 %v12537_v9  ;;  %2818 = vmatprep.subr.mxu1 %v12538_v11  ;;  %12553 = vst [vmem:[#allocation33_spill] sm:$0xff] %v9674_v3  ;;  %12554 = vst [vmem:[#allocation34_spill] sm:$0xff] %v9677_v15  ;;  %v9680_v9 = vld [vmem:[#allocation8 + $0x140] sm:$0xff]  ;;  %v9683_v11 = vld [vmem:[#allocation8 + $0x150] sm:$0xff] }
 0x6d2   :  { %2748 = vmatpush1.msra.mxu0 %v9271_v33  ;;  %2819 = vmatpush1.msra.mxu1 %v9274_v31  ;;  %v9521_v33 = vld [vmem:[#allocation8 + $0x2f8] sm:$0xff]  ;;  %v9524_v31 = vld [vmem:[#allocation8 + $0x2e0] sm:$0xff]  ;;  %12555 = vst [vmem:[#allocation35_spill] sm:$0xff] %v9680_v9  ;;  %12556 = vst [vmem:[#allocation36_spill] sm:$0xff] %v9683_v11 }
 0x6d3   :  { %2749 = vmatprep.subr.mxu0 %v9277_v39  ;;  %2820 = vmatprep.subr.mxu1 %v9280_v30  ;;  %v9533_v39 = vld [vmem:[#allocation8 + $0x2d8] sm:$0xff]  ;;  %v9536_v30 = vld [vmem:[#allocation8 + $0x2c0] sm:$0xff] }
 0x6d4   :  { %2750 = vmatpush1.msra.mxu0 %v9283_v21  ;;  %2783 = vmatprep.mubr.f32.mxu0 %v11999_v12  ;;  %v9527_v21 = vld [vmem:[#allocation8 + $0x2f0] sm:$0xff] }
 0x6d5   :  { %2821 = vmatpush1.msra.mxu1 %v9287_v35  ;;  %2854 = vmatprep.mubr.f32.mxu1 %v11999_v12  ;;  %v9530_v35 = vld [vmem:[#allocation8 + $0x2c8] sm:$0xff] }
 0x6d6   :  { %2784 = vmatmul.mubr.f32.vlgmr.msra.gmra.mxu0 %v9441_v58  ;;  %2855 = vmatmul.mubr.f32.vlgmr.msra.gmra.mxu1 %v9441_v58  ;;  %v9539_v58 = vld [vmem:[#allocation8 + $0x2d0] sm:$0xff] }
 0x6d7   :  { %2890 = vmatprep.subr.mxu0 %v9518_v7  ;;  %2961 = vmatprep.subr.mxu1 %v9521_v33 }
 0x6d8   :  { %2891 = vmatpush1.msra.mxu0 %v9524_v31  ;;  %2962 = vmatpush1.msra.mxu1 %v9527_v21 }
 0x6d9   :  { %2892 = vmatprep.subr.mxu0 %v9530_v35  ;;  %2963 = vmatprep.subr.mxu1 %v9533_v39 }
 0x6da   :  { %2893 = vmatpush1.msra.mxu0 %v9536_v30  ;;  %2964 = vmatpush1.msra.mxu1 %v9539_v58 }
 0x6db   :  { %2894 = vmatprep.subr.mxu0 %v9542_v27  ;;  %2965 = vmatprep.subr.mxu1 %v9545_v55 }
 0x6dc   :  { %2895 = vmatpush1.msra.mxu0 %v9548_v8  ;;  %2966 = vmatpush1.msra.mxu1 %v9551_v13 }
 0x6dd   :  { %2896 = vmatprep.subr.mxu0 %v9554_v47  ;;  %2967 = vmatprep.subr.mxu1 %v9557_v29 }
 0x6de   :  { %2897 = vmatpush1.msra.mxu0 %v9560_v26  ;;  %2968 = vmatpush1.msra.mxu1 %v9563_v37 }
 0x6df   :  { %2898 = vmatprep.subr.mxu0 %v9566_v38  ;;  %2969 = vmatprep.subr.mxu1 %v9569_v1 }
 0x6e0   :  { %2899 = vmatpush1.msra.mxu0 %v9572_v25  ;;  %2970 = vmatpush1.msra.mxu1 %v9575_v4 }
 0x6e1   :  { %2900 = vmatprep.subr.mxu0 %v9578_v24  ;;  %2971 = vmatprep.subr.mxu1 %v9581_v23 }
 0x6e2   :  { %2901 = vmatpush1.msra.mxu0 %v9584_v32  ;;  %2972 = vmatpush1.msra.mxu1 %v9587_v28 }
 0x6e3   :  { %2902 = vmatprep.subr.mxu0 %v9590_v20  ;;  %2973 = vmatprep.subr.mxu1 %v9593_v17 }
 0x6e4   :  { %2903 = vmatpush1.msra.mxu0 %v9596_v40  ;;  %2974 = vmatpush1.msra.mxu1 %v9599_v41 }
 0x6e5   :  { %2904 = vmatprep.subr.mxu0 %v9602_v42  ;;  %2975 = vmatprep.subr.mxu1 %v9605_v43 }
 0x6e6   :  { %2905 = vmatpush1.msra.mxu0 %v9608_v44  ;;  %2976 = vmatpush1.msra.mxu1 %v9611_v45 }
 0x6e7   :  { %2906 = vmatprep.subr.mxu0 %v9614_v46  ;;  %2977 = vmatprep.subr.mxu1 %v9617_v48 }
 0x6e8   :  { %2907 = vmatpush1.msra.mxu0 %v9620_v50  ;;  %2978 = vmatpush1.msra.mxu1 %v9623_v54 }
 0x6e9   :  { %2908 = vmatprep.subr.mxu0 %v9626_v56  ;;  %2979 = vmatprep.subr.mxu1 %v9629_v63 }
 0x6ea   :  { %2909 = vmatpush1.msra.mxu0 %v9632_v60  ;;  %2980 = vmatpush1.msra.mxu1 %v9635_v61 }
 0x6eb   :  { %2910 = vmatprep.subr.mxu0 %v9638_v18  ;;  %2981 = vmatprep.subr.mxu1 %v9641_v16 }
 0x6ec   :  { %2911 = vmatpush1.msra.mxu0 %v9644_v19  ;;  %2982 = vmatpush1.msra.mxu1 %v9647_v14 }
 0x6ed   :  { %2912 = vmatprep.subr.mxu0 %v9650_v10  ;;  %2983 = vmatprep.subr.mxu1 %v9653_v2 }
 0x6ee   :  { %2913 = vmatpush1.msra.mxu0 %v9656_v6  ;;  %2984 = vmatpush1.msra.mxu1 %v9659_v59 }
 0x6ef   :  { %2914 = vmatprep.subr.mxu0 %v9662_v62  ;;  %2985 = vmatprep.subr.mxu1 %v9665_v22 }
 0x6f0   :  { %2915 = vmatpush1.msra.mxu0 %v9668_v36  ;;  %2986 = vmatpush1.msra.mxu1 %v9671_v0  ;;  %v9686_v36 = vld [vmem:[#allocation8 + $0x128] sm:$0xff]  ;;  %v9689_v0 = vld [vmem:[#allocation8 + $0x138] sm:$0xff] }
 0x6f1   :  { %2916 = vmatprep.subr.mxu0 %v9674_v3  ;;  %2987 = vmatprep.subr.mxu1 %v9677_v15  ;;  %12557 = vst [vmem:[#allocation37_spill] sm:$0xff] %v9686_v36  ;;  %12558 = vst [vmem:[#allocation38_spill] sm:$0xff] %v9689_v0  ;;  %v9692_v3 = vld [vmem:[#allocation8 + $0x120] sm:$0xff]  ;;  %v9695_v15 = vld [vmem:[#allocation8 + $0x130] sm:$0xff] }
 0x6f2   :  { %2917 = vmatpush1.msra.mxu0 %v9680_v9  ;;  %2988 = vmatpush1.msra.mxu1 %v9683_v11  ;;  %12559 = vst [vmem:[#allocation39_spill] sm:$0xff] %v9692_v3  ;;  %12560 = vst [vmem:[#allocation40_spill] sm:$0xff] %v9695_v15  ;;  %v9698_v9 = vld [vmem:[#allocation8 + $0x108] sm:$0xff]  ;;  %v9701_v11 = vld [vmem:[#allocation8 + $0x118] sm:$0xff] }
 0x6f3   :  { %2918 = vmatprep.subr.mxu0 %v9686_v36  ;;  %2989 = vmatprep.subr.mxu1 %v9689_v0  ;;  %12561 = vst [vmem:[#allocation41_spill] sm:$0xff] %v9698_v9  ;;  %12562 = vst [vmem:[#allocation42_spill] sm:$0xff] %v9701_v11  ;;  %v9704_v36 = vld [vmem:[#allocation8 + $0x100] sm:$0xff]  ;;  %v9708_v0 = vld [vmem:[#allocation8 + $0x110] sm:$0xff] }
 0x6f4   :  { %2919 = vmatpush1.msra.mxu0 %v9692_v3  ;;  %2990 = vmatpush1.msra.mxu1 %v9695_v15  ;;  %12563 = vst [vmem:[#allocation43_spill] sm:$0xff] %v9704_v36  ;;  %12564 = vst [vmem:[#allocation44_spill] sm:$0xff] %v9708_v0  ;;  %v9723_v15 = vld [vmem:[#allocation8 + $0x510] sm:$0xff] }
 0x6f5   :  { %2920 = vmatprep.subr.mxu0 %v9698_v9  ;;  %2991 = vmatprep.subr.mxu1 %v9701_v11  ;;  %v9714_v9 = vld [vmem:[#allocation8 + $0x508] sm:$0xff]  ;;  %v9717_v11 = vld [vmem:[#allocation8 + $0x518] sm:$0xff]  ;;  %12568 = vst [vmem:[#allocation48_spill] sm:$0xff] %v9723_v15 }
 0x6f6   :  { %2921 = vmatpush1.msra.mxu0 %v9704_v36  ;;  %2954 = vmatprep.mubr.f32.mxu0 %v11999_v12  ;;  %12565 = vst [vmem:[#allocation45_spill] sm:$0xff] %v9714_v9  ;;  %12566 = vst [vmem:[#allocation46_spill] sm:$0xff] %v9717_v11  ;;  %v9720_v36 = vld [vmem:[#allocation8 + $0x500] sm:$0xff] }
 0x6f7   :  { %2992 = vmatpush1.msra.mxu1 %v9708_v0  ;;  %3025 = vmatprep.mubr.f32.mxu1 %v11999_v12  ;;  %12567 = vst [vmem:[#allocation47_spill] sm:$0xff] %v9720_v36  ;;  %v9726_v0 = vld [vmem:[#allocation8 + $0x4e8] sm:$0xff] }
 0x6f8   :  { %2955 = vmatmul.mubr.f32.vlgmr.msra.gmra.mxu0 %v9448_v57  ;;  %3026 = vmatmul.mubr.f32.vlgmr.msra.gmra.mxu1 %v9448_v57  ;;  %12569 = vst [vmem:[#allocation49_spill] sm:$0xff] %v9726_v0  ;;  %v9729_v57 = vld [vmem:[#allocation8 + $0x4f8] sm:$0xff] }
 0x6f9   :  { %3063 = vmatprep.subr.mxu0 %v9714_v9  ;;  %3134 = vmatprep.subr.mxu1 %v9717_v11  ;;  %12570 = vst [vmem:[#allocation50_spill] sm:$0xff] %v9729_v57  ;;  %v9732_v9 = vld [vmem:[#allocation8 + $0x4e0] sm:$0xff]  ;;  %v9735_v11 = vld [vmem:[#allocation8 + $0x4f0] sm:$0xff] }
 0x6fa   :  { %3064 = vmatpush1.msra.mxu0 %v9720_v36  ;;  %3135 = vmatpush1.msra.mxu1 %v9723_v15  ;;  %12571 = vst [vmem:[#allocation51_spill] sm:$0xff] %v9732_v9  ;;  %12572 = vst [vmem:[#allocation52_spill] sm:$0xff] %v9735_v11  ;;  %v9738_v36 = vld [vmem:[#allocation8 + $0x4c8] sm:$0xff]  ;;  %v9741_v15 = vld [vmem:[#allocation8 + $0x4d8] sm:$0xff] }
 0x6fb   :  { %3065 = vmatprep.subr.mxu0 %v9726_v0  ;;  %3136 = vmatprep.subr.mxu1 %v9729_v57  ;;  %12573 = vst [vmem:[#allocation53_spill] sm:$0xff] %v9738_v36  ;;  %12574 = vst [vmem:[#allocation54_spill] sm:$0xff] %v9741_v15  ;;  %v9744_v0 = vld [vmem:[#allocation8 + $0x4c0] sm:$0xff]  ;;  %v9747_v57 = vld [vmem:[#allocation8 + $0x4d0] sm:$0xff] }
 0x6fc   :  { %3066 = vmatpush1.msra.mxu0 %v9732_v9  ;;  %3137 = vmatpush1.msra.mxu1 %v9735_v11  ;;  %12575 = vst [vmem:[#allocation55_spill] sm:$0xff] %v9744_v0  ;;  %12576 = vst [vmem:[#allocation56_spill] sm:$0xff] %v9747_v57  ;;  %v9750_v9 = vld [vmem:[#allocation8 + $0x4a8] sm:$0xff]  ;;  %v9753_v11 = vld [vmem:[#allocation8 + $0x4b8] sm:$0xff] }
 0x6fd   :  { %3067 = vmatprep.subr.mxu0 %v9738_v36  ;;  %3138 = vmatprep.subr.mxu1 %v9741_v15  ;;  %12577 = vst [vmem:[#allocation57_spill] sm:$0xff] %v9750_v9  ;;  %12578 = vst [vmem:[#allocation58_spill] sm:$0xff] %v9753_v11  ;;  %v9756_v36 = vld [vmem:[#allocation8 + $0x4a0] sm:$0xff]  ;;  %v9759_v15 = vld [vmem:[#allocation8 + $0x4b0] sm:$0xff] }
 0x6fe   :  { %3068 = vmatpush1.msra.mxu0 %v9744_v0  ;;  %3139 = vmatpush1.msra.mxu1 %v9747_v57  ;;  %12579 = vst [vmem:[#allocation59_spill] sm:$0xff] %v9756_v36  ;;  %12580 = vst [vmem:[#allocation60_spill] sm:$0xff] %v9759_v15  ;;  %v9762_v0 = vld [vmem:[#allocation8 + $0x488] sm:$0xff]  ;;  %v9765_v57 = vld [vmem:[#allocation8 + $0x498] sm:$0xff] }
 0x6ff   :  { %3069 = vmatprep.subr.mxu0 %v9750_v9  ;;  %3140 = vmatprep.subr.mxu1 %v9753_v11  ;;  %12581 = vst [vmem:[#allocation61_spill] sm:$0xff] %v9762_v0  ;;  %12582 = vst [vmem:[#allocation62_spill] sm:$0xff] %v9765_v57  ;;  %v9768_v9 = vld [vmem:[#allocation8 + $0x480] sm:$0xff]  ;;  %v9771_v11 = vld [vmem:[#allocation8 + $0x490] sm:$0xff] }
 0x700   :  { %3070 = vmatpush1.msra.mxu0 %v9756_v36  ;;  %3141 = vmatpush1.msra.mxu1 %v9759_v15  ;;  %12583 = vst [vmem:[#allocation63_spill] sm:$0xff] %v9768_v9  ;;  %12584 = vst [vmem:[#allocation64_spill] sm:$0xff] %v9771_v11  ;;  %v9774_v36 = vld [vmem:[#allocation8 + $0x468] sm:$0xff]  ;;  %v9777_v15 = vld [vmem:[#allocation8 + $0x478] sm:$0xff] }
 0x701   :  { %3071 = vmatprep.subr.mxu0 %v9762_v0  ;;  %3142 = vmatprep.subr.mxu1 %v9765_v57  ;;  %12585 = vst [vmem:[#allocation65_spill] sm:$0xff] %v9774_v36  ;;  %12586 = vst [vmem:[#allocation66_spill] sm:$0xff] %v9777_v15  ;;  %v9780_v0 = vld [vmem:[#allocation8 + $0x460] sm:$0xff]  ;;  %v9783_v57 = vld [vmem:[#allocation8 + $0x470] sm:$0xff] }
 0x702   :  { %3072 = vmatpush1.msra.mxu0 %v9768_v9  ;;  %3143 = vmatpush1.msra.mxu1 %v9771_v11  ;;  %12587 = vst [vmem:[#allocation67_spill] sm:$0xff] %v9780_v0  ;;  %12588 = vst [vmem:[#allocation68_spill] sm:$0xff] %v9783_v57  ;;  %v9786_v9 = vld [vmem:[#allocation8 + $0x448] sm:$0xff]  ;;  %v9789_v11 = vld [vmem:[#allocation8 + $0x458] sm:$0xff] }
 0x703   :  { %3073 = vmatprep.subr.mxu0 %v9774_v36  ;;  %3144 = vmatprep.subr.mxu1 %v9777_v15  ;;  %12589 = vst [vmem:[#allocation69_spill] sm:$0xff] %v9786_v9  ;;  %12590 = vst [vmem:[#allocation70_spill] sm:$0xff] %v9789_v11  ;;  %v9792_v36 = vld [vmem:[#allocation8 + $0x440] sm:$0xff]  ;;  %v9795_v15 = vld [vmem:[#allocation8 + $0x450] sm:$0xff] }
 0x704   :  { %3074 = vmatpush1.msra.mxu0 %v9780_v0  ;;  %3145 = vmatpush1.msra.mxu1 %v9783_v57  ;;  %12591 = vst [vmem:[#allocation71_spill] sm:$0xff] %v9792_v36  ;;  %12592 = vst [vmem:[#allocation72_spill] sm:$0xff] %v9795_v15  ;;  %v9798_v0 = vld [vmem:[#allocation8 + $0x428] sm:$0xff]  ;;  %v9801_v57 = vld [vmem:[#allocation8 + $0x438] sm:$0xff] }
 0x705   :  { %3075 = vmatprep.subr.mxu0 %v9786_v9  ;;  %3146 = vmatprep.subr.mxu1 %v9789_v11  ;;  %12593 = vst [vmem:[#allocation73_spill] sm:$0xff] %v9798_v0  ;;  %12594 = vst [vmem:[#allocation74_spill] sm:$0xff] %v9801_v57  ;;  %v9804_v9 = vld [vmem:[#allocation8 + $0x420] sm:$0xff]  ;;  %v9807_v11 = vld [vmem:[#allocation8 + $0x430] sm:$0xff] }
 0x706   :  { %3076 = vmatpush1.msra.mxu0 %v9792_v36  ;;  %3147 = vmatpush1.msra.mxu1 %v9795_v15  ;;  %12595 = vst [vmem:[#allocation75_spill] sm:$0xff] %v9804_v9  ;;  %12596 = vst [vmem:[#allocation76_spill] sm:$0xff] %v9807_v11  ;;  %v9810_v36 = vld [vmem:[#allocation8 + $0x408] sm:$0xff]  ;;  %v9813_v15 = vld [vmem:[#allocation8 + $0x418] sm:$0xff] }
 0x707   :  { %3077 = vmatprep.subr.mxu0 %v9798_v0  ;;  %3148 = vmatprep.subr.mxu1 %v9801_v57  ;;  %12597 = vst [vmem:[#allocation77_spill] sm:$0xff] %v9810_v36  ;;  %12598 = vst [vmem:[#allocation78_spill] sm:$0xff] %v9813_v15  ;;  %v9816_v0 = vld [vmem:[#allocation8 + $0x400] sm:$0xff]  ;;  %v9819_v57 = vld [vmem:[#allocation8 + $0x410] sm:$0xff] }
 0x708   :  { %3078 = vmatpush1.msra.mxu0 %v9804_v9  ;;  %3149 = vmatpush1.msra.mxu1 %v9807_v11  ;;  %12599 = vst [vmem:[#allocation79_spill] sm:$0xff] %v9816_v0  ;;  %12600 = vst [vmem:[#allocation80_spill] sm:$0xff] %v9819_v57  ;;  %v9822_v9 = vld [vmem:[#allocation8 + $0x3e8] sm:$0xff]  ;;  %v9825_v11 = vld [vmem:[#allocation8 + $0x3f8] sm:$0xff] }
 0x709   :  { %3079 = vmatprep.subr.mxu0 %v9810_v36  ;;  %3150 = vmatprep.subr.mxu1 %v9813_v15  ;;  %12601 = vst [vmem:[#allocation81_spill] sm:$0xff] %v9822_v9  ;;  %12602 = vst [vmem:[#allocation82_spill] sm:$0xff] %v9825_v11  ;;  %v9828_v36 = vld [vmem:[#allocation8 + $0x3e0] sm:$0xff]  ;;  %v9831_v15 = vld [vmem:[#allocation8 + $0x3f0] sm:$0xff] }
 0x70a   :  { %3080 = vmatpush1.msra.mxu0 %v9816_v0  ;;  %3151 = vmatpush1.msra.mxu1 %v9819_v57  ;;  %12603 = vst [vmem:[#allocation83_spill] sm:$0xff] %v9828_v36  ;;  %12604 = vst [vmem:[#allocation84_spill] sm:$0xff] %v9831_v15  ;;  %v9834_v0 = vld [vmem:[#allocation8 + $0x3c8] sm:$0xff]  ;;  %v9837_v57 = vld [vmem:[#allocation8 + $0x3d8] sm:$0xff] }
 0x70b   :  { %3081 = vmatprep.subr.mxu0 %v9822_v9  ;;  %3152 = vmatprep.subr.mxu1 %v9825_v11  ;;  %12605 = vst [vmem:[#allocation85_spill] sm:$0xff] %v9834_v0  ;;  %12606 = vst [vmem:[#allocation86_spill] sm:$0xff] %v9837_v57  ;;  %v9840_v9 = vld [vmem:[#allocation8 + $0x3c0] sm:$0xff]  ;;  %v9843_v11 = vld [vmem:[#allocation8 + $0x3d0] sm:$0xff] }
 0x70c   :  { %3082 = vmatpush1.msra.mxu0 %v9828_v36  ;;  %3153 = vmatpush1.msra.mxu1 %v9831_v15  ;;  %12607 = vst [vmem:[#allocation87_spill] sm:$0xff] %v9840_v9  ;;  %12608 = vst [vmem:[#allocation88_spill] sm:$0xff] %v9843_v11  ;;  %v9846_v36 = vld [vmem:[#allocation8 + $0x3a8] sm:$0xff]  ;;  %v9849_v15 = vld [vmem:[#allocation8 + $0x3b8] sm:$0xff] }
 0x70d   :  { %3083 = vmatprep.subr.mxu0 %v9834_v0  ;;  %3154 = vmatprep.subr.mxu1 %v9837_v57  ;;  %12609 = vst [vmem:[#allocation89_spill] sm:$0xff] %v9846_v36  ;;  %12610 = vst [vmem:[#allocation90_spill] sm:$0xff] %v9849_v15  ;;  %v9852_v0 = vld [vmem:[#allocation8 + $0x3a0] sm:$0xff]  ;;  %v9855_v57 = vld [vmem:[#allocation8 + $0x3b0] sm:$0xff] }
 0x70e   :  { %3084 = vmatpush1.msra.mxu0 %v9840_v9  ;;  %3155 = vmatpush1.msra.mxu1 %v9843_v11  ;;  %12611 = vst [vmem:[#allocation91_spill] sm:$0xff] %v9852_v0  ;;  %12612 = vst [vmem:[#allocation92_spill] sm:$0xff] %v9855_v57  ;;  %v9858_v9 = vld [vmem:[#allocation8 + $0x388] sm:$0xff]  ;;  %v9861_v11 = vld [vmem:[#allocation8 + $0x398] sm:$0xff] }
 0x70f   :  { %3085 = vmatprep.subr.mxu0 %v9846_v36  ;;  %3156 = vmatprep.subr.mxu1 %v9849_v15  ;;  %12613 = vst [vmem:[#allocation93_spill] sm:$0xff] %v9858_v9  ;;  %12614 = vst [vmem:[#allocation94_spill] sm:$0xff] %v9861_v11  ;;  %v9864_v36 = vld [vmem:[#allocation8 + $0x380] sm:$0xff]  ;;  %v9867_v15 = vld [vmem:[#allocation8 + $0x390] sm:$0xff] }
 0x710   :  { %3086 = vmatpush1.msra.mxu0 %v9852_v0  ;;  %3157 = vmatpush1.msra.mxu1 %v9855_v57  ;;  %12615 = vst [vmem:[#allocation95_spill] sm:$0xff] %v9864_v36  ;;  %12616 = vst [vmem:[#allocation96_spill] sm:$0xff] %v9867_v15  ;;  %v9870_v0 = vld [vmem:[#allocation8 + $0x368] sm:$0xff]  ;;  %v9873_v57 = vld [vmem:[#allocation8 + $0x378] sm:$0xff] }
 0x711   :  { %3087 = vmatprep.subr.mxu0 %v9858_v9  ;;  %3158 = vmatprep.subr.mxu1 %v9861_v11  ;;  %12617 = vst [vmem:[#allocation97_spill] sm:$0xff] %v9870_v0  ;;  %12618 = vst [vmem:[#allocation98_spill] sm:$0xff] %v9873_v57  ;;  %v9876_v9 = vld [vmem:[#allocation8 + $0x360] sm:$0xff]  ;;  %v9879_v11 = vld [vmem:[#allocation8 + $0x370] sm:$0xff] }
 0x712   :  { %3088 = vmatpush1.msra.mxu0 %v9864_v36  ;;  %3159 = vmatpush1.msra.mxu1 %v9867_v15  ;;  %12619 = vst [vmem:[#allocation99_spill] sm:$0xff] %v9876_v9  ;;  %12620 = vst [vmem:[#allocation100_spill] sm:$0xff] %v9879_v11  ;;  %v9882_v36 = vld [vmem:[#allocation8 + $0x348] sm:$0xff]  ;;  %v9885_v15 = vld [vmem:[#allocation8 + $0x358] sm:$0xff] }
 0x713   :  { %3089 = vmatprep.subr.mxu0 %v9870_v0  ;;  %3160 = vmatprep.subr.mxu1 %v9873_v57  ;;  %12621 = vst [vmem:[#allocation101_spill] sm:$0xff] %v9882_v36  ;;  %12622 = vst [vmem:[#allocation102_spill] sm:$0xff] %v9885_v15  ;;  %v9888_v0 = vld [vmem:[#allocation8 + $0x340] sm:$0xff]  ;;  %v9891_v57 = vld [vmem:[#allocation8 + $0x350] sm:$0xff] }
 0x714   :  { %3090 = vmatpush1.msra.mxu0 %v9876_v9  ;;  %3161 = vmatpush1.msra.mxu1 %v9879_v11  ;;  %12623 = vst [vmem:[#allocation103_spill] sm:$0xff] %v9888_v0  ;;  %12624 = vst [vmem:[#allocation104_spill] sm:$0xff] %v9891_v57  ;;  %v9894_v9 = vld [vmem:[#allocation8 + $0x328] sm:$0xff]  ;;  %v9897_v11 = vld [vmem:[#allocation8 + $0x338] sm:$0xff] }
 0x715   :  { %3091 = vmatprep.subr.mxu0 %v9882_v36  ;;  %3162 = vmatprep.subr.mxu1 %v9885_v15  ;;  %12625 = vst [vmem:[#allocation105_spill] sm:$0xff] %v9894_v9  ;;  %12626 = vst [vmem:[#allocation106_spill] sm:$0xff] %v9897_v11  ;;  %v9900_v36 = vld [vmem:[#allocation8 + $0x320] sm:$0xff]  ;;  %v9903_v15 = vld [vmem:[#allocation8 + $0x330] sm:$0xff] }
 0x716   :  { %3092 = vmatpush1.msra.mxu0 %v9888_v0  ;;  %3163 = vmatpush1.msra.mxu1 %v9891_v57  ;;  %12627 = vst [vmem:[#allocation107_spill] sm:$0xff] %v9900_v36  ;;  %12628 = vst [vmem:[#allocation108_spill] sm:$0xff] %v9903_v15  ;;  %v9908_v57 = vld [vmem:[#allocation8 + $0x708] sm:$0xff] }
 0x717   :  { %3093 = vmatprep.subr.mxu0 %v9894_v9  ;;  %3164 = vmatprep.subr.mxu1 %v9897_v11  ;;  %12629 = vst [vmem:[#allocation116_spill] sm:$0xff] %v9908_v57  ;;  %v9911_v9 = vld [vmem:[#allocation8 + $0x718] sm:$0xff] }
 0x718   :  { %3094 = vmatpush1.msra.mxu0 %v9900_v36  ;;  %3165 = vmatpush1.msra.mxu1 %v9903_v15  ;;  %12630 = vst [vmem:[#allocation117_spill] sm:$0xff] %v9911_v9 }
 0x719   :  { %3127 = vmatprep.mubr.f32.mxu0 %v11999_v12  ;;  %3198 = vmatprep.mubr.f32.mxu1 %v11999_v12 }
 0x71a   :  { %3205 = vmatprep.subr.mxu0 %v9908_v57  ;;  %3276 = vmatprep.subr.mxu1 %v9911_v9 }
 0x775   :  { %v2643_v11 = vpop.f32.mrf.mxu0  ;;  %v2714_v22 = vpop.f32.mrf.mxu1 }
 0x776   :  { %v2644_v36 = vadd.f32 %v2643_v11, %v12494_v52  ;;  %v2715_v16 = vadd.f32 %v2714_v22, %v8597_v53 }
 0x777   :  { %v2645_v0 = vpop.f32.mrf.mxu0  ;;  %v2716_v10 = vpop.f32.mrf.mxu1 }
 0x778   :  { %v2646_v15 = vadd.f32 %v2645_v0, %v8586_v34  ;;  %v2717_v9 = vadd.f32 %v2716_v10, %v8592_v49 }
 0x796   :  { %v2785_v3 = vpop.f32.mrf.mxu0  ;;  %v2856_v57 = vpop.f32.mrf.mxu1 }
 0x797   :  { %v2861_v62 = vadd.f32 %v2785_v3, %v2644_v36  ;;  %v2863_v11 = vadd.f32 %v2856_v57, %v2715_v16  ;;  %v12631_v36 = vld [vmem:[#allocation112_spill] sm:$0xff] }
 0x798   :  { %v2787_v59 = vpop.f32.mrf.mxu0  ;;  %v2858_v19 = vpop.f32.mrf.mxu1 }
 0x799   :  { %v6538_v6 = vmul.f32 -1.442695, %v2861_v62  ;;  %v2862_v2 = vadd.f32 %v2787_v59, %v2646_v15  ;;  %v2864_v18 = vadd.f32 %v2858_v19, %v2717_v9 }
 0x79b   :  { %6843 = vpow2.f32 %v6538_v6  ;;  %v6539_v14 = vmul.f32 -1.442695, %v2862_v2  ;;  %v6540_v61 = vmul.f32 -1.442695, %v2864_v18  ;;  %v12632_v18 = vld [vmem:[#allocation114_spill] sm:$0xff] }
 0x79d   :  { %6845 = vpow2.f32 %v6539_v14 }
 0x79e   :  { %6847 = vtanh.f32 %v2863_v11 }
 0x7a8   :  { %v6844_v52 = vpop.eup %6843 }
 0x7a9   :  { %v2868_v60 = vadd.f32 1.0, %v6844_v52 }
 0x7aa   :  { %v6846_v0 = vpop.eup %6845 }
 0x7ab   :  { %6849 = vrcp.f32 %v2868_v60  ;;  %v2874_v62 = vadd.f32 1.0, %v6846_v0  ;;  %v6848_v6 = vpop.eup %6847  ;;  %v12633_v0 = vld [vmem:[#allocation115_spill] sm:$0xff] }
 0x7ac   :  { %6851 = vpow2.f32 %v6540_v61 }
 0x7ad   :  { %6853 = vrcp.f32 %v2874_v62 }
 0x7b8   :  { %v6850_v2 = vpop.eup %6849  ;;  %v2956_v59 = vpop.f32.mrf.mxu0 }
 0x7b9   :  { %v6852_v14 = vpop.eup %6851  ;;  %v3032_v3 = vadd.f32 %v2956_v59, %v12631_v36  ;;  %v2885_v22 = vmul.f32 %v6850_v2, %v6848_v6  ;;  %v3027_v60 = vpop.f32.mrf.mxu1  ;;  %v12634_v2 = vld [vmem:[#allocation113_spill] sm:$0xff] }
 0x7ba   :  { %v6854_v10 = vpop.eup %6853  ;;  %v2958_v15 = vpop.f32.mrf.mxu0  ;;  %v2881_v9 = vadd.f32 1.0, %v6852_v14 }
 0x7bb   :  { %v2884_v16 = vmul.f32 %v6854_v10, %v9435_v51  ;;  %v6541_v19 = vmul.f32 -1.442695, %v3032_v3  ;;  %v3033_v52 = vadd.f32 %v2958_v15, %v12632_v18  ;;  %v3029_v11 = vpop.f32.mrf.mxu1  ;;  %v3034_v51 = vadd.f32 %v3027_v60, %v12634_v2 }
 0x7bc   :  { %v3035_v62 = vadd.f32 %v3029_v11, %v12633_v0 }
 0x7bd   :  { %v9921_v57 = vadd.f32 %v2885_v22, %v2884_v16  ;;  %6855 = vpow2.f32 %v6541_v19  ;;  %v6542_v61 = vmul.f32 -1.442695, %v3033_v52 }
 0x7be   :  { %v6543_v59 = vmul.f32 -1.442695, %v3035_v62 }
 0x7bf   :  { %6857 = vpow2.f32 %v6542_v61  ;;  %v3056_v61 = vrot.slane %v9445_v5, 6  ;;  %v9940_v5 = vld [vmem:[#allocation8 + $0x710] sm:$0xff] }
 0x7c0   :  { %6859 = vrcp.f32 %v2881_v9 }
 0x7c1   :  { %6861 = vtanh.f32 %v9921_v57 }
 0x7c2   :  { %6863 = vpow2.f32 %v6543_v59 }
 0x7ca   :  { %v6856_v6 = vpop.eup %6855 }
 0x7cb   :  { %v3039_v3 = vadd.f32 1.0, %v6856_v6 }
 0x7cc   :  { %v6858_v10 = vpop.eup %6857 }
 0x7cd   :  { %v6860_v14 = vpop.eup %6859  ;;  %6865 = vrcp.f32 %v3039_v3  ;;  %v3045_v15 = vadd.f32 1.0, %v6858_v10 }
 0x7ce   :  { %v6862_v22 = vpop.eup %6861  ;;  %6867 = vtanh.f32 %v3034_v51 }
 0x7cf   :  { %6869 = vrcp.f32 %v3045_v15  ;;  %v9926_v16 = vmul.f32 %v6862_v22, %v6860_v14  ;;  %v6864_v19 = vpop.eup %6863  ;;  %v9937_v14 = vld [vmem:[#allocation8 + $0x700] sm:$0xff]  ;;  %v9943_v15 = vld [vmem:[#allocation8 + $0x6e8] sm:$0xff]  ;;  %v9946_v22 = vld [vmem:[#allocation8 + $0x6f8] sm:$0xff] }
 0x7d0   :  { %v3052_v60 = vadd.f32 1.0, %v6864_v19  ;;  %v9949_v19 = vld [vmem:[#allocation8 + $0x6e0] sm:$0xff] }
 0x7d1   :  { %2889 = vst [vmem:[#allocation3 + $0x6] sm:$0x3] %v9926_v16 }
 0x7d2   :  { %6871 = vrcp.f32 %v3052_v60  ;;  %v9964_v60 = vld [vmem:[#allocation8 + $0x6d0] sm:$0xff] }
 0x7d3   :  { %12636 = vst [vmem:[#allocation119_spill] sm:$0xff] %v9964_v60 }
 0x7da   :  { %v6866_v52 = vpop.eup %6865 }
 0x7db   :  { %v6868_v9 = vpop.eup %6867 }
 0x7dc   :  { %v6870_v11 = vpop.eup %6869  ;;  %v3059_v62 = vmul.f32 %v6868_v9, %v6866_v52  ;;  %v9952_v52 = vld [vmem:[#allocation8 + $0x6f0] sm:$0xff]  ;;  %v9955_v9 = vld [vmem:[#allocation8 + $0x6c8] sm:$0xff] }
 0x7dd   :  { %v3058_v6 = vmul.f32 %v6870_v11, %v3056_v61  ;;  %v9958_v61 = vld [vmem:[#allocation8 + $0x6d8] sm:$0xff]  ;;  %v9961_v11 = vld [vmem:[#allocation8 + $0x6c0] sm:$0xff] }
 0x7de   :  { %12635 = vst [vmem:[#allocation118_spill] sm:$0xff] %v9961_v11 }
 0x7df   :  { %v9930_v59 = vadd.f32 %v3059_v62, %v3058_v6  ;;  %v6872_v51 = vpop.eup %6871  ;;  %v9967_v62 = vld [vmem:[#allocation8 + $0x6a8] sm:$0xff]  ;;  %v9970_v6 = vld [vmem:[#allocation8 + $0x6b8] sm:$0xff] }
 0x7e0   :  { %12637 = vst [vmem:[#allocation120_spill] sm:$0xff] %v9967_v62  ;;  %12638 = vst [vmem:[#allocation121_spill] sm:$0xff] %v9970_v6 }
 0x7e1   :  { %6873 = vtanh.f32 %v9930_v59 }
 0x7ee   :  { %v6874_v3 = vpop.eup %6873 }
 0x7ef   :  { %v9933_v10 = vmul.f32 %v6874_v3, %v6872_v51  ;;  %v9973_v51 = vld [vmem:[#allocation8 + $0x6a0] sm:$0xff]  ;;  %v9976_v3 = vld [vmem:[#allocation8 + $0x6b0] sm:$0xff] }
 0x7f0   :  { %12639 = vst [vmem:[#allocation122_spill] sm:$0xff] %v9973_v51  ;;  %12640 = vst [vmem:[#allocation123_spill] sm:$0xff] %v9976_v3 }
 0x7f1   :  { %3128 = vmatmul.mubr.f32.vlgmr.msra.gmra.mxu0 %v9933_v10  ;;  %3199 = vmatmul.mubr.f32.vlgmr.msra.gmra.mxu1 %v9933_v10 }
 0x7f2   :  { %3206 = vmatpush1.msra.mxu0 %v9937_v14  ;;  %3277 = vmatpush1.msra.mxu1 %v9940_v5 }
 0x7f3   :  { %3207 = vmatprep.subr.mxu0 %v9943_v15  ;;  %3278 = vmatprep.subr.mxu1 %v9946_v22 }
 0x7f4   :  { %3208 = vmatpush1.msra.mxu0 %v9949_v19  ;;  %3279 = vmatpush1.msra.mxu1 %v9952_v52 }
 0x7f5   :  { %3209 = vmatprep.subr.mxu0 %v9955_v9  ;;  %3280 = vmatprep.subr.mxu1 %v9958_v61 }
 0x7f6   :  { %3210 = vmatpush1.msra.mxu0 %v9961_v11  ;;  %3281 = vmatpush1.msra.mxu1 %v9964_v60  ;;  %v9979_v11 = vld [vmem:[#allocation8 + $0x688] sm:$0xff]  ;;  %v9982_v60 = vld [vmem:[#allocation8 + $0x698] sm:$0xff] }
 0x7f7   :  { %3211 = vmatprep.subr.mxu0 %v9967_v62  ;;  %3282 = vmatprep.subr.mxu1 %v9970_v6  ;;  %12641 = vst [vmem:[#allocation124_spill] sm:$0xff] %v9979_v11  ;;  %12642 = vst [vmem:[#allocation125_spill] sm:$0xff] %v9982_v60  ;;  %v9985_v62 = vld [vmem:[#allocation8 + $0x680] sm:$0xff]  ;;  %v9988_v6 = vld [vmem:[#allocation8 + $0x690] sm:$0xff] }
 0x7f8   :  { %3212 = vmatpush1.msra.mxu0 %v9973_v51  ;;  %3283 = vmatpush1.msra.mxu1 %v9976_v3  ;;  %12643 = vst [vmem:[#allocation126_spill] sm:$0xff] %v9985_v62  ;;  %12644 = vst [vmem:[#allocation127_spill] sm:$0xff] %v9988_v6  ;;  %v9991_v51 = vld [vmem:[#allocation8 + $0x668] sm:$0xff]  ;;  %v9994_v3 = vld [vmem:[#allocation8 + $0x678] sm:$0xff] }
 0x7f9   :  { %3213 = vmatprep.subr.mxu0 %v9979_v11  ;;  %3284 = vmatprep.subr.mxu1 %v9982_v60  ;;  %12645 = vst [vmem:[#allocation128_spill] sm:$0xff] %v9991_v51  ;;  %12646 = vst [vmem:[#allocation129_spill] sm:$0xff] %v9994_v3  ;;  %v9997_v11 = vld [vmem:[#allocation8 + $0x660] sm:$0xff]  ;;  %v10000_v60 = vld [vmem:[#allocation8 + $0x670] sm:$0xff] }
 0x7fa   :  { %3214 = vmatpush1.msra.mxu0 %v9985_v62  ;;  %3285 = vmatpush1.msra.mxu1 %v9988_v6  ;;  %12647 = vst [vmem:[#allocation130_spill] sm:$0xff] %v9997_v11  ;;  %12648 = vst [vmem:[#allocation131_spill] sm:$0xff] %v10000_v60  ;;  %v10003_v62 = vld [vmem:[#allocation8 + $0x648] sm:$0xff]  ;;  %v10006_v6 = vld [vmem:[#allocation8 + $0x658] sm:$0xff] }
 0x7fb   :  { %3215 = vmatprep.subr.mxu0 %v9991_v51  ;;  %3286 = vmatprep.subr.mxu1 %v9994_v3  ;;  %12649 = vst [vmem:[#allocation132_spill] sm:$0xff] %v10003_v62  ;;  %12650 = vst [vmem:[#allocation133_spill] sm:$0xff] %v10006_v6  ;;  %v10009_v51 = vld [vmem:[#allocation8 + $0x640] sm:$0xff]  ;;  %v10012_v3 = vld [vmem:[#allocation8 + $0x650] sm:$0xff] }
 0x7fc   :  { %3216 = vmatpush1.msra.mxu0 %v9997_v11  ;;  %3287 = vmatpush1.msra.mxu1 %v10000_v60  ;;  %12651 = vst [vmem:[#allocation134_spill] sm:$0xff] %v10009_v51  ;;  %12652 = vst [vmem:[#allocation135_spill] sm:$0xff] %v10012_v3  ;;  %v10015_v11 = vld [vmem:[#allocation8 + $0x628] sm:$0xff]  ;;  %v10018_v60 = vld [vmem:[#allocation8 + $0x638] sm:$0xff] }
 0x7fd   :  { %3217 = vmatprep.subr.mxu0 %v10003_v62  ;;  %3288 = vmatprep.subr.mxu1 %v10006_v6  ;;  %12653 = vst [vmem:[#allocation136_spill] sm:$0xff] %v10015_v11  ;;  %12654 = vst [vmem:[#allocation137_spill] sm:$0xff] %v10018_v60  ;;  %v10021_v62 = vld [vmem:[#allocation8 + $0x620] sm:$0xff]  ;;  %v10024_v6 = vld [vmem:[#allocation8 + $0x630] sm:$0xff] }
 0x7fe   :  { %3218 = vmatpush1.msra.mxu0 %v10009_v51  ;;  %3289 = vmatpush1.msra.mxu1 %v10012_v3  ;;  %12655 = vst [vmem:[#allocation138_spill] sm:$0xff] %v10021_v62  ;;  %12656 = vst [vmem:[#allocation139_spill] sm:$0xff] %v10024_v6  ;;  %v10027_v51 = vld [vmem:[#allocation8 + $0x608] sm:$0xff]  ;;  %v10030_v3 = vld [vmem:[#allocation8 + $0x618] sm:$0xff] }
 0x7ff   :  { %3219 = vmatprep.subr.mxu0 %v10015_v11  ;;  %3290 = vmatprep.subr.mxu1 %v10018_v60  ;;  %12657 = vst [vmem:[#allocation140_spill] sm:$0xff] %v10027_v51  ;;  %12658 = vst [vmem:[#allocation141_spill] sm:$0xff] %v10030_v3  ;;  %v10033_v11 = vld [vmem:[#allocation8 + $0x600] sm:$0xff]  ;;  %v10036_v60 = vld [vmem:[#allocation8 + $0x610] sm:$0xff] }
 0x800   :  { %3220 = vmatpush1.msra.mxu0 %v10021_v62  ;;  %3291 = vmatpush1.msra.mxu1 %v10024_v6  ;;  %12659 = vst [vmem:[#allocation142_spill] sm:$0xff] %v10033_v11  ;;  %12660 = vst [vmem:[#allocation143_spill] sm:$0xff] %v10036_v60  ;;  %v10039_v62 = vld [vmem:[#allocation8 + $0x5e8] sm:$0xff]  ;;  %v10042_v6 = vld [vmem:[#allocation8 + $0x5f8] sm:$0xff] }
 0x801   :  { %3221 = vmatprep.subr.mxu0 %v10027_v51  ;;  %3292 = vmatprep.subr.mxu1 %v10030_v3  ;;  %12661 = vst [vmem:[#allocation144_spill] sm:$0xff] %v10039_v62  ;;  %12662 = vst [vmem:[#allocation145_spill] sm:$0xff] %v10042_v6  ;;  %v10045_v51 = vld [vmem:[#allocation8 + $0x5e0] sm:$0xff]  ;;  %v10048_v3 = vld [vmem:[#allocation8 + $0x5f0] sm:$0xff] }
 0x802   :  { %3222 = vmatpush1.msra.mxu0 %v10033_v11  ;;  %3293 = vmatpush1.msra.mxu1 %v10036_v60  ;;  %12663 = vst [vmem:[#allocation146_spill] sm:$0xff] %v10045_v51  ;;  %12664 = vst [vmem:[#allocation147_spill] sm:$0xff] %v10048_v3  ;;  %v10051_v11 = vld [vmem:[#allocation8 + $0x5c8] sm:$0xff]  ;;  %v10054_v60 = vld [vmem:[#allocation8 + $0x5d8] sm:$0xff] }
 0x803   :  { %3223 = vmatprep.subr.mxu0 %v10039_v62  ;;  %3294 = vmatprep.subr.mxu1 %v10042_v6  ;;  %12665 = vst [vmem:[#allocation148_spill] sm:$0xff] %v10051_v11  ;;  %12666 = vst [vmem:[#allocation149_spill] sm:$0xff] %v10054_v60  ;;  %v10057_v62 = vld [vmem:[#allocation8 + $0x5c0] sm:$0xff]  ;;  %v10060_v6 = vld [vmem:[#allocation8 + $0x5d0] sm:$0xff] }
 0x804   :  { %3224 = vmatpush1.msra.mxu0 %v10045_v51  ;;  %3295 = vmatpush1.msra.mxu1 %v10048_v3  ;;  %12667 = vst [vmem:[#allocation150_spill] sm:$0xff] %v10057_v62  ;;  %12668 = vst [vmem:[#allocation151_spill] sm:$0xff] %v10060_v6  ;;  %v10063_v51 = vld [vmem:[#allocation8 + $0x5a8] sm:$0xff]  ;;  %v10066_v3 = vld [vmem:[#allocation8 + $0x5b8] sm:$0xff] }
 0x805   :  { %3225 = vmatprep.subr.mxu0 %v10051_v11  ;;  %3296 = vmatprep.subr.mxu1 %v10054_v60  ;;  %12669 = vst [vmem:[#allocation152_spill] sm:$0xff] %v10063_v51  ;;  %12670 = vst [vmem:[#allocation153_spill] sm:$0xff] %v10066_v3  ;;  %v10069_v11 = vld [vmem:[#allocation8 + $0x5a0] sm:$0xff]  ;;  %v10072_v60 = vld [vmem:[#allocation8 + $0x5b0] sm:$0xff] }
 0x806   :  { %3226 = vmatpush1.msra.mxu0 %v10057_v62  ;;  %3297 = vmatpush1.msra.mxu1 %v10060_v6  ;;  %12671 = vst [vmem:[#allocation154_spill] sm:$0xff] %v10069_v11  ;;  %12672 = vst [vmem:[#allocation155_spill] sm:$0xff] %v10072_v60  ;;  %v10075_v62 = vld [vmem:[#allocation8 + $0x588] sm:$0xff]  ;;  %v10078_v6 = vld [vmem:[#allocation8 + $0x598] sm:$0xff] }
 0x807   :  { %3227 = vmatprep.subr.mxu0 %v10063_v51  ;;  %3298 = vmatprep.subr.mxu1 %v10066_v3  ;;  %12673 = vst [vmem:[#allocation156_spill] sm:$0xff] %v10075_v62  ;;  %12674 = vst [vmem:[#allocation157_spill] sm:$0xff] %v10078_v6  ;;  %v10081_v51 = vld [vmem:[#allocation8 + $0x580] sm:$0xff]  ;;  %v10084_v3 = vld [vmem:[#allocation8 + $0x590] sm:$0xff] }
 0x808   :  { %3228 = vmatpush1.msra.mxu0 %v10069_v11  ;;  %3299 = vmatpush1.msra.mxu1 %v10072_v60  ;;  %12675 = vst [vmem:[#allocation158_spill] sm:$0xff] %v10081_v51  ;;  %12676 = vst [vmem:[#allocation159_spill] sm:$0xff] %v10084_v3  ;;  %v10087_v11 = vld [vmem:[#allocation8 + $0x568] sm:$0xff]  ;;  %v10090_v60 = vld [vmem:[#allocation8 + $0x578] sm:$0xff] }
 0x809   :  { %3229 = vmatprep.subr.mxu0 %v10075_v62  ;;  %3300 = vmatprep.subr.mxu1 %v10078_v6  ;;  %12677 = vst [vmem:[#allocation160_spill] sm:$0xff] %v10087_v11  ;;  %12678 = vst [vmem:[#allocation161_spill] sm:$0xff] %v10090_v60  ;;  %v10093_v62 = vld [vmem:[#allocation8 + $0x560] sm:$0xff]  ;;  %v10096_v6 = vld [vmem:[#allocation8 + $0x570] sm:$0xff] }
 0x80a   :  { %3230 = vmatpush1.msra.mxu0 %v10081_v51  ;;  %3301 = vmatpush1.msra.mxu1 %v10084_v3  ;;  %12679 = vst [vmem:[#allocation162_spill] sm:$0xff] %v10093_v62  ;;  %12680 = vst [vmem:[#allocation163_spill] sm:$0xff] %v10096_v6  ;;  %v10099_v51 = vld [vmem:[#allocation8 + $0x548] sm:$0xff]  ;;  %v10102_v3 = vld [vmem:[#allocation8 + $0x558] sm:$0xff] }
 0x80b   :  { %3231 = vmatprep.subr.mxu0 %v10087_v11  ;;  %3302 = vmatprep.subr.mxu1 %v10090_v60  ;;  %12681 = vst [vmem:[#allocation164_spill] sm:$0xff] %v10099_v51  ;;  %12682 = vst [vmem:[#allocation165_spill] sm:$0xff] %v10102_v3  ;;  %v10105_v11 = vld [vmem:[#allocation8 + $0x540] sm:$0xff]  ;;  %v10108_v60 = vld [vmem:[#allocation8 + $0x550] sm:$0xff] }
 0x80c   :  { %3232 = vmatpush1.msra.mxu0 %v10093_v62  ;;  %3303 = vmatpush1.msra.mxu1 %v10096_v6  ;;  %v10111_v62 = vld [vmem:[#allocation8 + $0x528] sm:$0xff]  ;;  %v10114_v6 = vld [vmem:[#allocation8 + $0x538] sm:$0xff] }
 0x80d   :  { %3233 = vmatprep.subr.mxu0 %v10099_v51  ;;  %3304 = vmatprep.subr.mxu1 %v10102_v3  ;;  %v10117_v51 = vld [vmem:[#allocation8 + $0x520] sm:$0xff]  ;;  %v10121_v3 = vld [vmem:[#allocation8 + $0x530] sm:$0xff] }
 0x80e   :  { %3234 = vmatpush1.msra.mxu0 %v10105_v11  ;;  %3305 = vmatpush1.msra.mxu1 %v10108_v60 }
 0x80f   :  { %3235 = vmatprep.subr.mxu0 %v10111_v62  ;;  %3306 = vmatprep.subr.mxu1 %v10114_v6 }
 0x810   :  { %3236 = vmatpush1.msra.mxu0 %v10117_v51  ;;  %3269 = vmatprep.mubr.f32.mxu0 %v11999_v12 }
 0x811   :  { %3307 = vmatpush1.msra.mxu1 %v10121_v3  ;;  %3340 = vmatprep.mubr.f32.mxu1 %v11999_v12 }
 0x812   :  { %3270 = vmatmul.mubr.f32.vlgmr.msra.gmra.mxu0 %v9926_v16  ;;  %3341 = vmatmul.mubr.f32.vlgmr.msra.gmra.mxu1 %v9926_v16  ;;  %v12721_v16 = vld [vmem:[#allocation57_spill] sm:$0xff] }
 0x813   :  { %3376 = vmatprep.subr.mxu0 %v9518_v7  ;;  %3447 = vmatprep.subr.mxu1 %v9521_v33  ;;  %v12683_v7 = vld [vmem:[#allocation19_spill] sm:$0xff]  ;;  %v12684_v33 = vld [vmem:[#allocation20_spill] sm:$0xff] }
 0x814   :  { %3377 = vmatpush1.msra.mxu0 %v9524_v31  ;;  %3448 = vmatpush1.msra.mxu1 %v9527_v21  ;;  %v12685_v31 = vld [vmem:[#allocation21_spill] sm:$0xff]  ;;  %v12686_v21 = vld [vmem:[#allocation22_spill] sm:$0xff] }
 0x815   :  { %3378 = vmatprep.subr.mxu0 %v9530_v35  ;;  %3449 = vmatprep.subr.mxu1 %v9533_v39  ;;  %v12687_v35 = vld [vmem:[#allocation23_spill] sm:$0xff]  ;;  %v12688_v39 = vld [vmem:[#allocation24_spill] sm:$0xff] }
 0x816   :  { %3379 = vmatpush1.msra.mxu0 %v9536_v30  ;;  %3450 = vmatpush1.msra.mxu1 %v9539_v58  ;;  %v12689_v30 = vld [vmem:[#allocation25_spill] sm:$0xff]  ;;  %v12690_v58 = vld [vmem:[#allocation26_spill] sm:$0xff] }
 0x817   :  { %3380 = vmatprep.subr.mxu0 %v9542_v27  ;;  %3451 = vmatprep.subr.mxu1 %v9545_v55  ;;  %v12691_v27 = vld [vmem:[#allocation27_spill] sm:$0xff]  ;;  %v12692_v55 = vld [vmem:[#allocation28_spill] sm:$0xff] }
 0x818   :  { %3381 = vmatpush1.msra.mxu0 %v9548_v8  ;;  %3452 = vmatpush1.msra.mxu1 %v9551_v13  ;;  %v12693_v8 = vld [vmem:[#allocation29_spill] sm:$0xff]  ;;  %v12694_v13 = vld [vmem:[#allocation30_spill] sm:$0xff] }
 0x819   :  { %3382 = vmatprep.subr.mxu0 %v9554_v47  ;;  %3453 = vmatprep.subr.mxu1 %v9557_v29  ;;  %v12695_v47 = vld [vmem:[#allocation31_spill] sm:$0xff]  ;;  %v12696_v29 = vld [vmem:[#allocation32_spill] sm:$0xff] }
 0x81a   :  { %3383 = vmatpush1.msra.mxu0 %v9560_v26  ;;  %3454 = vmatpush1.msra.mxu1 %v9563_v37  ;;  %v12697_v26 = vld [vmem:[#allocation33_spill] sm:$0xff]  ;;  %v12698_v37 = vld [vmem:[#allocation34_spill] sm:$0xff] }
 0x81b   :  { %3384 = vmatprep.subr.mxu0 %v9566_v38  ;;  %3455 = vmatprep.subr.mxu1 %v9569_v1  ;;  %v12699_v38 = vld [vmem:[#allocation35_spill] sm:$0xff]  ;;  %v12700_v1 = vld [vmem:[#allocation36_spill] sm:$0xff] }
 0x81c   :  { %3385 = vmatpush1.msra.mxu0 %v9572_v25  ;;  %3456 = vmatpush1.msra.mxu1 %v9575_v4  ;;  %v12701_v25 = vld [vmem:[#allocation37_spill] sm:$0xff]  ;;  %v12702_v4 = vld [vmem:[#allocation38_spill] sm:$0xff] }
 0x81d   :  { %3386 = vmatprep.subr.mxu0 %v9578_v24  ;;  %3457 = vmatprep.subr.mxu1 %v9581_v23  ;;  %v12703_v24 = vld [vmem:[#allocation39_spill] sm:$0xff]  ;;  %v12704_v23 = vld [vmem:[#allocation40_spill] sm:$0xff] }
 0x81e   :  { %3387 = vmatpush1.msra.mxu0 %v9584_v32  ;;  %3458 = vmatpush1.msra.mxu1 %v9587_v28  ;;  %v12705_v32 = vld [vmem:[#allocation41_spill] sm:$0xff]  ;;  %v12706_v28 = vld [vmem:[#allocation42_spill] sm:$0xff] }
 0x81f   :  { %3388 = vmatprep.subr.mxu0 %v9590_v20  ;;  %3459 = vmatprep.subr.mxu1 %v9593_v17  ;;  %v12707_v20 = vld [vmem:[#allocation43_spill] sm:$0xff]  ;;  %v12708_v17 = vld [vmem:[#allocation44_spill] sm:$0xff] }
 0x820   :  { %3389 = vmatpush1.msra.mxu0 %v9596_v40  ;;  %3460 = vmatpush1.msra.mxu1 %v9599_v41  ;;  %v12709_v40 = vld [vmem:[#allocation45_spill] sm:$0xff]  ;;  %v12710_v41 = vld [vmem:[#allocation46_spill] sm:$0xff] }
 0x821   :  { %3390 = vmatprep.subr.mxu0 %v9602_v42  ;;  %3461 = vmatprep.subr.mxu1 %v9605_v43  ;;  %v12711_v42 = vld [vmem:[#allocation47_spill] sm:$0xff]  ;;  %v12712_v43 = vld [vmem:[#allocation48_spill] sm:$0xff] }
 0x822   :  { %3391 = vmatpush1.msra.mxu0 %v9608_v44  ;;  %3462 = vmatpush1.msra.mxu1 %v9611_v45  ;;  %v12713_v44 = vld [vmem:[#allocation49_spill] sm:$0xff]  ;;  %v12714_v45 = vld [vmem:[#allocation50_spill] sm:$0xff] }
 0x823   :  { %3392 = vmatprep.subr.mxu0 %v9614_v46  ;;  %3463 = vmatprep.subr.mxu1 %v9617_v48  ;;  %v12715_v46 = vld [vmem:[#allocation51_spill] sm:$0xff]  ;;  %v12716_v48 = vld [vmem:[#allocation52_spill] sm:$0xff] }
 0x824   :  { %3393 = vmatpush1.msra.mxu0 %v9620_v50  ;;  %3464 = vmatpush1.msra.mxu1 %v9623_v54  ;;  %v12717_v50 = vld [vmem:[#allocation53_spill] sm:$0xff]  ;;  %v12718_v54 = vld [vmem:[#allocation54_spill] sm:$0xff] }
 0x825   :  { %3394 = vmatprep.subr.mxu0 %v9626_v56  ;;  %3465 = vmatprep.subr.mxu1 %v9629_v63  ;;  %v12719_v56 = vld [vmem:[#allocation55_spill] sm:$0xff]  ;;  %v12720_v63 = vld [vmem:[#allocation56_spill] sm:$0xff] }
 0x826   :  { %3395 = vmatpush1.msra.mxu0 %v12683_v7  ;;  %3466 = vmatpush1.msra.mxu1 %v12684_v33  ;;  %v12723_v7 = vld [vmem:[#allocation59_spill] sm:$0xff]  ;;  %v12724_v33 = vld [vmem:[#allocation60_spill] sm:$0xff] }
 0x827   :  { %3396 = vmatprep.subr.mxu0 %v12685_v31  ;;  %3467 = vmatprep.subr.mxu1 %v12686_v21  ;;  %v12725_v31 = vld [vmem:[#allocation61_spill] sm:$0xff]  ;;  %v12726_v21 = vld [vmem:[#allocation62_spill] sm:$0xff] }
 0x828   :  { %3397 = vmatpush1.msra.mxu0 %v12687_v35  ;;  %3468 = vmatpush1.msra.mxu1 %v12688_v39  ;;  %v12727_v35 = vld [vmem:[#allocation63_spill] sm:$0xff]  ;;  %v12728_v39 = vld [vmem:[#allocation64_spill] sm:$0xff] }
 0x829   :  { %3398 = vmatprep.subr.mxu0 %v12689_v30  ;;  %3469 = vmatprep.subr.mxu1 %v12690_v58  ;;  %v12729_v30 = vld [vmem:[#allocation65_spill] sm:$0xff]  ;;  %v12730_v58 = vld [vmem:[#allocation66_spill] sm:$0xff] }
 0x82a   :  { %3399 = vmatpush1.msra.mxu0 %v12691_v27  ;;  %3470 = vmatpush1.msra.mxu1 %v12692_v55  ;;  %v12731_v27 = vld [vmem:[#allocation67_spill] sm:$0xff]  ;;  %v12732_v55 = vld [vmem:[#allocation68_spill] sm:$0xff] }
 0x82b   :  { %3400 = vmatprep.subr.mxu0 %v12693_v8  ;;  %3471 = vmatprep.subr.mxu1 %v12694_v13  ;;  %v12733_v8 = vld [vmem:[#allocation69_spill] sm:$0xff]  ;;  %v12734_v13 = vld [vmem:[#allocation70_spill] sm:$0xff] }
 0x82c   :  { %3401 = vmatpush1.msra.mxu0 %v12695_v47  ;;  %3472 = vmatpush1.msra.mxu1 %v12696_v29  ;;  %v12735_v47 = vld [vmem:[#allocation71_spill] sm:$0xff]  ;;  %v12736_v29 = vld [vmem:[#allocation72_spill] sm:$0xff] }
 0x82d   :  { %3402 = vmatprep.subr.mxu0 %v12697_v26  ;;  %3473 = vmatprep.subr.mxu1 %v12698_v37  ;;  %v12737_v26 = vld [vmem:[#allocation73_spill] sm:$0xff]  ;;  %v12738_v37 = vld [vmem:[#allocation74_spill] sm:$0xff] }
 0x82e   :  { %3403 = vmatpush1.msra.mxu0 %v12699_v38  ;;  %3474 = vmatpush1.msra.mxu1 %v12700_v1  ;;  %v12739_v38 = vld [vmem:[#allocation75_spill] sm:$0xff]  ;;  %v12740_v1 = vld [vmem:[#allocation76_spill] sm:$0xff] }
 0x82f   :  { %3404 = vmatprep.subr.mxu0 %v12701_v25  ;;  %3475 = vmatprep.subr.mxu1 %v12702_v4  ;;  %v12741_v25 = vld [vmem:[#allocation77_spill] sm:$0xff]  ;;  %v12742_v4 = vld [vmem:[#allocation78_spill] sm:$0xff] }
 0x830   :  { %3405 = vmatpush1.msra.mxu0 %v12703_v24  ;;  %3476 = vmatpush1.msra.mxu1 %v12704_v23  ;;  %v12743_v24 = vld [vmem:[#allocation79_spill] sm:$0xff]  ;;  %v12744_v23 = vld [vmem:[#allocation80_spill] sm:$0xff] }
 0x831   :  { %3406 = vmatprep.subr.mxu0 %v12705_v32  ;;  %3477 = vmatprep.subr.mxu1 %v12706_v28  ;;  %v12745_v32 = vld [vmem:[#allocation81_spill] sm:$0xff]  ;;  %v12746_v28 = vld [vmem:[#allocation82_spill] sm:$0xff] }
 0x832   :  { %3407 = vmatpush1.msra.mxu0 %v12707_v20  ;;  %3440 = vmatprep.mubr.f32.mxu0 %v11999_v12  ;;  %v12747_v20 = vld [vmem:[#allocation83_spill] sm:$0xff] }
 0x833   :  { %3478 = vmatpush1.msra.mxu1 %v12708_v17  ;;  %3511 = vmatprep.mubr.f32.mxu1 %v11999_v12  ;;  %v12748_v17 = vld [vmem:[#allocation84_spill] sm:$0xff] }
 0x834   :  { %3441 = vmatmul.mubr.f32.vlgmr.msra.gmra.mxu0 %v9933_v10  ;;  %3512 = vmatmul.mubr.f32.vlgmr.msra.gmra.mxu1 %v9933_v10  ;;  %v12722_v10 = vld [vmem:[#allocation58_spill] sm:$0xff] }
 0x835   :  { %3564 = vmatprep.subr.mxu0 %v12709_v40  ;;  %3635 = vmatprep.subr.mxu1 %v12710_v41  ;;  %v12749_v40 = vld [vmem:[#allocation85_spill] sm:$0xff]  ;;  %v12750_v41 = vld [vmem:[#allocation86_spill] sm:$0xff] }
 0x836   :  { %3565 = vmatpush1.msra.mxu0 %v12711_v42  ;;  %3636 = vmatpush1.msra.mxu1 %v12712_v43  ;;  %v12751_v42 = vld [vmem:[#allocation87_spill] sm:$0xff]  ;;  %v12752_v43 = vld [vmem:[#allocation88_spill] sm:$0xff] }
 0x837   :  { %3566 = vmatprep.subr.mxu0 %v12713_v44  ;;  %3637 = vmatprep.subr.mxu1 %v12714_v45  ;;  %v12753_v44 = vld [vmem:[#allocation89_spill] sm:$0xff]  ;;  %v12754_v45 = vld [vmem:[#allocation90_spill] sm:$0xff] }
 0x838   :  { %3567 = vmatpush1.msra.mxu0 %v12715_v46  ;;  %3638 = vmatpush1.msra.mxu1 %v12716_v48  ;;  %v12755_v46 = vld [vmem:[#allocation91_spill] sm:$0xff]  ;;  %v12756_v48 = vld [vmem:[#allocation92_spill] sm:$0xff] }
 0x839   :  { %3568 = vmatprep.subr.mxu0 %v12717_v50  ;;  %3639 = vmatprep.subr.mxu1 %v12718_v54  ;;  %v12757_v50 = vld [vmem:[#allocation93_spill] sm:$0xff]  ;;  %v12758_v54 = vld [vmem:[#allocation94_spill] sm:$0xff] }
 0x83a   :  { %3569 = vmatpush1.msra.mxu0 %v12719_v56  ;;  %3640 = vmatpush1.msra.mxu1 %v12720_v63  ;;  %v12759_v56 = vld [vmem:[#allocation95_spill] sm:$0xff]  ;;  %v12760_v63 = vld [vmem:[#allocation96_spill] sm:$0xff] }
 0x83b   :  { %3570 = vmatprep.subr.mxu0 %v12721_v16  ;;  %3641 = vmatprep.subr.mxu1 %v12722_v10  ;;  %v12761_v16 = vld [vmem:[#allocation97_spill] sm:$0xff]  ;;  %v12762_v10 = vld [vmem:[#allocation98_spill] sm:$0xff] }
 0x83c   :  { %3571 = vmatpush1.msra.mxu0 %v12723_v7  ;;  %3642 = vmatpush1.msra.mxu1 %v12724_v33  ;;  %v12763_v7 = vld [vmem:[#allocation99_spill] sm:$0xff]  ;;  %v12764_v33 = vld [vmem:[#allocation100_spill] sm:$0xff] }
 0x83d   :  { %3572 = vmatprep.subr.mxu0 %v12725_v31  ;;  %3643 = vmatprep.subr.mxu1 %v12726_v21  ;;  %v12765_v31 = vld [vmem:[#allocation101_spill] sm:$0xff]  ;;  %v12766_v21 = vld [vmem:[#allocation102_spill] sm:$0xff] }
 0x83e   :  { %3573 = vmatpush1.msra.mxu0 %v12727_v35  ;;  %3644 = vmatpush1.msra.mxu1 %v12728_v39  ;;  %v12767_v35 = vld [vmem:[#allocation103_spill] sm:$0xff]  ;;  %v12768_v39 = vld [vmem:[#allocation104_spill] sm:$0xff] }
 0x83f   :  { %3574 = vmatprep.subr.mxu0 %v12729_v30  ;;  %3645 = vmatprep.subr.mxu1 %v12730_v58  ;;  %v12769_v30 = vld [vmem:[#allocation105_spill] sm:$0xff]  ;;  %v12770_v58 = vld [vmem:[#allocation106_spill] sm:$0xff] }
 0x840   :  { %3575 = vmatpush1.msra.mxu0 %v12731_v27  ;;  %3646 = vmatpush1.msra.mxu1 %v12732_v55  ;;  %v12771_v27 = vld [vmem:[#allocation107_spill] sm:$0xff]  ;;  %v12772_v55 = vld [vmem:[#allocation108_spill] sm:$0xff] }
 0x841   :  { %3576 = vmatprep.subr.mxu0 %v12733_v8  ;;  %3647 = vmatprep.subr.mxu1 %v12734_v13  ;;  %v12773_v8 = vld [vmem:[#allocation116_spill] sm:$0xff]  ;;  %v12774_v13 = vld [vmem:[#allocation117_spill] sm:$0xff] }
 0x842   :  { %3577 = vmatpush1.msra.mxu0 %v12735_v47  ;;  %3648 = vmatpush1.msra.mxu1 %v12736_v29 }
 0x843   :  { %3578 = vmatprep.subr.mxu0 %v12737_v26  ;;  %3649 = vmatprep.subr.mxu1 %v12738_v37  ;;  %v12775_v26 = vld [vmem:[#allocation18_spill] sm:$0xff] }
 0x844   :  { %3579 = vmatpush1.msra.mxu0 %v12739_v38  ;;  %3650 = vmatpush1.msra.mxu1 %v12740_v1 }
 0x845   :  { %3580 = vmatprep.subr.mxu0 %v12741_v25  ;;  %3651 = vmatprep.subr.mxu1 %v12742_v4 }
 0x846   :  { %3581 = vmatpush1.msra.mxu0 %v12743_v24  ;;  %3652 = vmatpush1.msra.mxu1 %v12744_v23 }
 0x847   :  { %3582 = vmatprep.subr.mxu0 %v12745_v32  ;;  %3653 = vmatprep.subr.mxu1 %v12746_v28 }
 0x848   :  { %3583 = vmatpush1.msra.mxu0 %v12747_v20  ;;  %3654 = vmatpush1.msra.mxu1 %v12748_v17 }
 0x849   :  { %3584 = vmatprep.subr.mxu0 %v12749_v40  ;;  %3655 = vmatprep.subr.mxu1 %v12750_v41 }
 0x84a   :  { %3585 = vmatpush1.msra.mxu0 %v12751_v42  ;;  %3656 = vmatpush1.msra.mxu1 %v12752_v43 }
 0x84b   :  { %3586 = vmatprep.subr.mxu0 %v12753_v44  ;;  %3657 = vmatprep.subr.mxu1 %v12754_v45 }
 0x84c   :  { %3587 = vmatpush1.msra.mxu0 %v12755_v46  ;;  %3658 = vmatpush1.msra.mxu1 %v12756_v48 }
 0x84d   :  { %3588 = vmatprep.subr.mxu0 %v12757_v50  ;;  %3659 = vmatprep.subr.mxu1 %v12758_v54 }
 0x84e   :  { %3589 = vmatpush1.msra.mxu0 %v12759_v56  ;;  %3660 = vmatpush1.msra.mxu1 %v12760_v63 }
 0x84f   :  { %3590 = vmatprep.subr.mxu0 %v12761_v16  ;;  %3661 = vmatprep.subr.mxu1 %v12762_v10 }
 0x850   :  { %3591 = vmatpush1.msra.mxu0 %v12763_v7  ;;  %3662 = vmatpush1.msra.mxu1 %v12764_v33 }
 0x851   :  { %3592 = vmatprep.subr.mxu0 %v12765_v31  ;;  %3663 = vmatprep.subr.mxu1 %v12766_v21 }
 0x852   :  { %3593 = vmatpush1.msra.mxu0 %v12767_v35  ;;  %3664 = vmatpush1.msra.mxu1 %v12768_v39 }
 0x853   :  { %3594 = vmatprep.subr.mxu0 %v12769_v30  ;;  %3665 = vmatprep.subr.mxu1 %v12770_v58 }
 0x854   :  { %3595 = vmatpush1.msra.mxu0 %v12771_v27  ;;  %3666 = vmatpush1.msra.mxu1 %v12772_v55 }
 0x855   :  { %3628 = vmatprep.mubr.f32.mxu0 %v11999_v12  ;;  %3699 = vmatprep.mubr.f32.mxu1 %v11999_v12 }
 0x856   :  { %3706 = vmatprep.subr.mxu0 %v12773_v8  ;;  %3777 = vmatprep.subr.mxu1 %v12774_v13 }
 0x8b1   :  { %v3129_v47 = vpop.f32.mrf.mxu0  ;;  %v3200_v38 = vpop.f32.mrf.mxu1 }
 0x8b2   :  { %v3130_v37 = vadd.f32 %v3129_v47, %v12775_v26  ;;  %v3201_v43 = vadd.f32 %v3200_v38, %v8597_v53 }
 0x8b3   :  { %v3131_v29 = vpop.f32.mrf.mxu0  ;;  %v3202_v23 = vpop.f32.mrf.mxu1 }
 0x8b4   :  { %v3132_v25 = vadd.f32 %v3131_v29, %v8586_v34  ;;  %v3203_v41 = vadd.f32 %v3202_v23, %v8592_v49 }
 0x8d2   :  { %v3271_v1 = vpop.f32.mrf.mxu0  ;;  %v3342_v20 = vpop.f32.mrf.mxu1 }
 0x8d3   :  { %v3347_v4 = vadd.f32 %v3271_v1, %v3130_v37  ;;  %v3349_v46 = vadd.f32 %v3342_v20, %v3201_v43  ;;  %v3554_v43 = vrot.slane %v9930_v59, 6  ;;  %v12776_v59 = vld [vmem:[#allocation118_spill] sm:$0xff] }
 0x8d4   :  { %v3273_v24 = vpop.f32.mrf.mxu0  ;;  %v3344_v40 = vpop.f32.mrf.mxu1 }
 0x8d5   :  { %v6544_v32 = vmul.f32 -1.442695, %v3347_v4  ;;  %v3348_v28 = vadd.f32 %v3273_v24, %v3132_v25  ;;  %v3350_v42 = vadd.f32 %v3344_v40, %v3203_v41 }
 0x8d7   :  { %6875 = vpow2.f32 %v6544_v32  ;;  %v6545_v17 = vmul.f32 -1.442695, %v3348_v28  ;;  %v6546_v44 = vmul.f32 -1.442695, %v3350_v42 }
 0x8d9   :  { %6877 = vpow2.f32 %v6545_v17 }
 0x8da   :  { %6879 = vpow2.f32 %v6546_v44 }
 0x8e4   :  { %v6876_v45 = vpop.eup %6875 }
 0x8e5   :  { %v3354_v48 = vadd.f32 1.0, %v6876_v45 }
 0x8e6   :  { %v6878_v50 = vpop.eup %6877 }
 0x8e7   :  { %6881 = vrcp.f32 %v3354_v48  ;;  %v3360_v54 = vadd.f32 1.0, %v6878_v50  ;;  %v6880_v56 = vpop.eup %6879 }
 0x8e8   :  { %6883 = vtanh.f32 %v3349_v46  ;;  %v3367_v31 = vadd.f32 1.0, %v6880_v56 }
 0x8e9   :  { %6885 = vrcp.f32 %v3360_v54 }
 0x8ea   :  { %6887 = vrcp.f32 %v3367_v31  ;;  %v12788_v31 = vld [vmem:[#allocation130_spill] sm:$0xff] }
 0x8f4   :  { %v6882_v63 = vpop.eup %6881  ;;  %v3442_v16 = vpop.f32.mrf.mxu0 }
 0x8f5   :  { %v6884_v10 = vpop.eup %6883  ;;  %v3522_v7 = vrot.slane %v3442_v16, 6  ;;  %v3513_v58 = vpop.f32.mrf.mxu1 }
 0x8f6   :  { %v6886_v33 = vpop.eup %6885  ;;  %v3444_v21 = vpop.f32.mrf.mxu0  ;;  %v3371_v35 = vmul.f32 %v6884_v10, %v6882_v63  ;;  %v12777_v10 = vld [vmem:[#allocation119_spill] sm:$0xff] }
 0x8f7   :  { %v3370_v39 = vmul.f32 %v6886_v33, %v9921_v57  ;;  %v3530_v30 = vadd.f32 %v3522_v7, %v12631_v36  ;;  %v3523_v27 = vrot.slane %v3444_v21, 6  ;;  %v3515_v29 = vpop.f32.mrf.mxu1  ;;  %v3524_v57 = vrot.slane %v3513_v58, 6  ;;  %v6888_v25 = vpop.eup %6887  ;;  %v12778_v7 = vld [vmem:[#allocation120_spill] sm:$0xff]  ;;  %v12787_v33 = vld [vmem:[#allocation129_spill] sm:$0xff]  ;;  %v12789_v21 = vld [vmem:[#allocation131_spill] sm:$0xff] }
 0x8f8   :  { %v3525_v37 = vrot.slane %v3515_v29, 6  ;;  %v12793_v58 = vld [vmem:[#allocation135_spill] sm:$0xff]  ;;  %v12798_v29 = vld [vmem:[#allocation140_spill] sm:$0xff] }
 0x8f9   :  { %v10269_v55 = vadd.f32 %v3371_v35, %v3370_v39  ;;  %v6547_v8 = vmul.f32 -1.442695, %v3530_v30  ;;  %v3531_v13 = vadd.f32 %v3523_v27, %v12632_v18  ;;  %v3532_v24 = vadd.f32 %v3524_v57, %v12634_v2  ;;  %v12790_v35 = vld [vmem:[#allocation132_spill] sm:$0xff]  ;;  %v12791_v39 = vld [vmem:[#allocation133_spill] sm:$0xff]  ;;  %v12792_v30 = vld [vmem:[#allocation134_spill] sm:$0xff] }
 0x8fa   :  { %v3533_v38 = vadd.f32 %v3525_v37, %v12633_v0  ;;  %v12794_v27 = vld [vmem:[#allocation136_spill] sm:$0xff]  ;;  %v12799_v37 = vld [vmem:[#allocation141_spill] sm:$0xff]  ;;  %v12801_v57 = vld [vmem:[#allocation143_spill] sm:$0xff] }
 0x8fb   :  { %6889 = vpow2.f32 %v6547_v8  ;;  %v6548_v47 = vmul.f32 -1.442695, %v3531_v13  ;;  %v12795_v8 = vld [vmem:[#allocation137_spill] sm:$0xff]  ;;  %v12796_v13 = vld [vmem:[#allocation138_spill] sm:$0xff] }
 0x8fc   :  { %6891 = vtanh.f32 %v10269_v55  ;;  %v6549_v1 = vmul.f32 -1.442695, %v3533_v38  ;;  %v12800_v38 = vld [vmem:[#allocation142_spill] sm:$0xff] }
 0x8fd   :  { %6893 = vpow2.f32 %v6548_v47  ;;  %v12797_v47 = vld [vmem:[#allocation139_spill] sm:$0xff] }
 0x8fe   :  { %6895 = vpow2.f32 %v6549_v1  ;;  %v12802_v1 = vld [vmem:[#allocation144_spill] sm:$0xff] }
 0x908   :  { %v6890_v4 = vpop.eup %6889 }
 0x909   :  { %v6892_v23 = vpop.eup %6891  ;;  %v3537_v32 = vadd.f32 1.0, %v6890_v4  ;;  %v12804_v4 = vld [vmem:[#allocation146_spill] sm:$0xff] }
 0x90a   :  { %v6894_v28 = vpop.eup %6893  ;;  %v10275_v20 = vmul.f32 %v6892_v23, %v6888_v25  ;;  %v12803_v25 = vld [vmem:[#allocation145_spill] sm:$0xff]  ;;  %v12806_v23 = vld [vmem:[#allocation148_spill] sm:$0xff] }
 0x90b   :  { %6897 = vrcp.f32 %v3537_v32  ;;  %v3543_v17 = vadd.f32 1.0, %v6894_v28  ;;  %v6896_v40 = vpop.eup %6895  ;;  %v12807_v32 = vld [vmem:[#allocation149_spill] sm:$0xff]  ;;  %v12808_v28 = vld [vmem:[#allocation150_spill] sm:$0xff] }
 0x90c   :  { %6899 = vtanh.f32 %v3532_v24  ;;  %3375 = vst [vmem:[#allocation3 + $0x8] sm:$0x3] %v10275_v20  ;;  %v3550_v45 = vadd.f32 1.0, %v6896_v40  ;;  %v12805_v24 = vld [vmem:[#allocation147_spill] sm:$0xff]  ;;  %v12810_v40 = vld [vmem:[#allocation152_spill] sm:$0xff] }
 0x90d   :  { %6901 = vrcp.f32 %v3543_v17  ;;  %v12809_v17 = vld [vmem:[#allocation151_spill] sm:$0xff] }
 0x90e   :  { %6903 = vrcp.f32 %v3550_v45  ;;  %v12815_v45 = vld [vmem:[#allocation157_spill] sm:$0xff] }
 0x918   :  { %v6898_v41 = vpop.eup %6897 }
 0x919   :  { %v6900_v42 = vpop.eup %6899 }
 0x91a   :  { %v6902_v44 = vpop.eup %6901  ;;  %v3557_v46 = vmul.f32 %v6900_v42, %v6898_v41  ;;  %v12811_v41 = vld [vmem:[#allocation153_spill] sm:$0xff]  ;;  %v12812_v42 = vld [vmem:[#allocation154_spill] sm:$0xff] }
 0x91b   :  { %v3556_v48 = vmul.f32 %v6902_v44, %v3554_v43  ;;  %v6904_v54 = vpop.eup %6903  ;;  %v12813_v43 = vld [vmem:[#allocation155_spill] sm:$0xff]  ;;  %v12814_v44 = vld [vmem:[#allocation156_spill] sm:$0xff] }
 0x91d   :  { %v10279_v50 = vadd.f32 %v3557_v46, %v3556_v48  ;;  %v12816_v46 = vld [vmem:[#allocation158_spill] sm:$0xff]  ;;  %v12817_v48 = vld [vmem:[#allocation159_spill] sm:$0xff] }
 0x91f   :  { %6905 = vtanh.f32 %v10279_v50 }
 0x92c   :  { %v6906_v56 = vpop.eup %6905 }
 0x92d   :  { %v3560_v63 = vmul.f32 %v6906_v56, %v6904_v54  ;;  %v12818_v54 = vld [vmem:[#allocation160_spill] sm:$0xff]  ;;  %v12819_v56 = vld [vmem:[#allocation161_spill] sm:$0xff] }
 0x92f   :  { %v10282_v16 = vrot.slane %v3560_v63, 2  ;;  %v12820_v63 = vld [vmem:[#allocation162_spill] sm:$0xff] }
 0x931   :  { %3629 = vmatmul.mubr.f32.vlgmr.msra.gmra.mxu0 %v10282_v16  ;;  %3700 = vmatmul.mubr.f32.vlgmr.msra.gmra.mxu1 %v10282_v16 }
 0x932   :  { %3707 = vmatpush1.msra.mxu0 %v9937_v14  ;;  %3778 = vmatpush1.msra.mxu1 %v9940_v5  ;;  %v12779_v14 = vld [vmem:[#allocation121_spill] sm:$0xff]  ;;  %v12780_v5 = vld [vmem:[#allocation122_spill] sm:$0xff] }
 0x933   :  { %3708 = vmatprep.subr.mxu0 %v9943_v15  ;;  %3779 = vmatprep.subr.mxu1 %v9946_v22  ;;  %v12781_v15 = vld [vmem:[#allocation123_spill] sm:$0xff]  ;;  %v12782_v22 = vld [vmem:[#allocation124_spill] sm:$0xff] }
 0x934   :  { %3709 = vmatpush1.msra.mxu0 %v9949_v19  ;;  %3780 = vmatpush1.msra.mxu1 %v9952_v52  ;;  %v12783_v19 = vld [vmem:[#allocation125_spill] sm:$0xff]  ;;  %v12784_v52 = vld [vmem:[#allocation126_spill] sm:$0xff] }
 0x935   :  { %3710 = vmatprep.subr.mxu0 %v9955_v9  ;;  %3781 = vmatprep.subr.mxu1 %v9958_v61  ;;  %v12785_v9 = vld [vmem:[#allocation127_spill] sm:$0xff]  ;;  %v12786_v61 = vld [vmem:[#allocation128_spill] sm:$0xff] }
 0x936   :  { %3711 = vmatpush1.msra.mxu0 %v12776_v59  ;;  %3782 = vmatpush1.msra.mxu1 %v12777_v10  ;;  %v12821_v59 = vld [vmem:[#allocation163_spill] sm:$0xff]  ;;  %v12822_v10 = vld [vmem:[#allocation164_spill] sm:$0xff] }
 0x937   :  { %3712 = vmatprep.subr.mxu0 %v12778_v7  ;;  %3783 = vmatprep.subr.mxu1 %v12779_v14  ;;  %v12823_v7 = vld [vmem:[#allocation165_spill] sm:$0xff] }
 0x938   :  { %3713 = vmatpush1.msra.mxu0 %v12780_v5  ;;  %3784 = vmatpush1.msra.mxu1 %v12781_v15  ;;  %v10352_v14 = vld [vmem:[#allocation8 + $0x2e8] sm:$0xff]  ;;  %v10379_v15 = vld [vmem:[#allocation8 + $0x2b8] sm:$0xff] }
 0x939   :  { %3714 = vmatprep.subr.mxu0 %v12782_v22  ;;  %3785 = vmatprep.subr.mxu1 %v12783_v19  ;;  %v10376_v5 = vld [vmem:[#allocation8 + $0x2a8] sm:$0xff]  ;;  %v10382_v22 = vld [vmem:[#allocation8 + $0x2a0] sm:$0xff]  ;;  %v10385_v19 = vld [vmem:[#allocation8 + $0x2b0] sm:$0xff] }
 0x93a   :  { %3715 = vmatpush1.msra.mxu0 %v12784_v52  ;;  %3786 = vmatpush1.msra.mxu1 %v12785_v9  ;;  %v10388_v52 = vld [vmem:[#allocation8 + $0x288] sm:$0xff]  ;;  %v10391_v9 = vld [vmem:[#allocation8 + $0x298] sm:$0xff] }
 0x93b   :  { %3716 = vmatprep.subr.mxu0 %v12786_v61  ;;  %3787 = vmatprep.subr.mxu1 %v12787_v33  ;;  %v10394_v61 = vld [vmem:[#allocation8 + $0x280] sm:$0xff]  ;;  %v10397_v33 = vld [vmem:[#allocation8 + $0x290] sm:$0xff] }
 0x93c   :  { %3717 = vmatpush1.msra.mxu0 %v12788_v31  ;;  %3788 = vmatpush1.msra.mxu1 %v12789_v21  ;;  %v10400_v31 = vld [vmem:[#allocation8 + $0x268] sm:$0xff]  ;;  %v10403_v21 = vld [vmem:[#allocation8 + $0x278] sm:$0xff] }
 0x93d   :  { %3718 = vmatprep.subr.mxu0 %v12790_v35  ;;  %3789 = vmatprep.subr.mxu1 %v12791_v39  ;;  %v10406_v35 = vld [vmem:[#allocation8 + $0x260] sm:$0xff]  ;;  %v10409_v39 = vld [vmem:[#allocation8 + $0x270] sm:$0xff] }
 0x93e   :  { %3719 = vmatpush1.msra.mxu0 %v12792_v30  ;;  %3790 = vmatpush1.msra.mxu1 %v12793_v58  ;;  %v10412_v30 = vld [vmem:[#allocation8 + $0x248] sm:$0xff]  ;;  %v10415_v58 = vld [vmem:[#allocation8 + $0x258] sm:$0xff] }
 0x93f   :  { %3720 = vmatprep.subr.mxu0 %v12794_v27  ;;  %3791 = vmatprep.subr.mxu1 %v12795_v8  ;;  %v10418_v27 = vld [vmem:[#allocation8 + $0x240] sm:$0xff]  ;;  %v10421_v8 = vld [vmem:[#allocation8 + $0x250] sm:$0xff] }
 0x940   :  { %3721 = vmatpush1.msra.mxu0 %v12796_v13  ;;  %3792 = vmatpush1.msra.mxu1 %v12797_v47  ;;  %v10424_v13 = vld [vmem:[#allocation8 + $0x228] sm:$0xff]  ;;  %v10427_v47 = vld [vmem:[#allocation8 + $0x238] sm:$0xff] }
 0x941   :  { %3722 = vmatprep.subr.mxu0 %v12798_v29  ;;  %3793 = vmatprep.subr.mxu1 %v12799_v37  ;;  %v10430_v29 = vld [vmem:[#allocation8 + $0x220] sm:$0xff]  ;;  %v10433_v37 = vld [vmem:[#allocation8 + $0x230] sm:$0xff] }
 0x942   :  { %3723 = vmatpush1.msra.mxu0 %v12800_v38  ;;  %3794 = vmatpush1.msra.mxu1 %v12801_v57  ;;  %v10436_v38 = vld [vmem:[#allocation8 + $0x208] sm:$0xff]  ;;  %v10439_v57 = vld [vmem:[#allocation8 + $0x218] sm:$0xff] }
 0x943   :  { %3724 = vmatprep.subr.mxu0 %v12802_v1  ;;  %3795 = vmatprep.subr.mxu1 %v12803_v25  ;;  %v10442_v1 = vld [vmem:[#allocation8 + $0x200] sm:$0xff]  ;;  %v10445_v25 = vld [vmem:[#allocation8 + $0x210] sm:$0xff] }
 0x944   :  { %3725 = vmatpush1.msra.mxu0 %v12804_v4  ;;  %3796 = vmatpush1.msra.mxu1 %v12805_v24  ;;  %v10448_v4 = vld [vmem:[#allocation8 + $0x1e8] sm:$0xff]  ;;  %v10451_v24 = vld [vmem:[#allocation8 + $0x1f8] sm:$0xff] }
 0x945   :  { %3726 = vmatprep.subr.mxu0 %v12806_v23  ;;  %3797 = vmatprep.subr.mxu1 %v12807_v32  ;;  %v10454_v23 = vld [vmem:[#allocation8 + $0x1e0] sm:$0xff]  ;;  %v10457_v32 = vld [vmem:[#allocation8 + $0x1f0] sm:$0xff] }
 0x946   :  { %3727 = vmatpush1.msra.mxu0 %v12808_v28  ;;  %3798 = vmatpush1.msra.mxu1 %v12809_v17  ;;  %12824 = vst [vmem:[#allocation112_spill] sm:$0xff] %v10454_v23  ;;  %12825 = vst [vmem:[#allocation114_spill] sm:$0xff] %v10457_v32  ;;  %v10460_v28 = vld [vmem:[#allocation8 + $0x1c8] sm:$0xff]  ;;  %v10463_v17 = vld [vmem:[#allocation8 + $0x1d8] sm:$0xff] }
 0x947   :  { %3728 = vmatprep.subr.mxu0 %v12810_v40  ;;  %3799 = vmatprep.subr.mxu1 %v12811_v41  ;;  %12826 = vst [vmem:[#allocation115_spill] sm:$0xff] %v10460_v28  ;;  %12827 = vst [vmem:[#allocation113_spill] sm:$0xff] %v10463_v17  ;;  %v10466_v40 = vld [vmem:[#allocation8 + $0x1c0] sm:$0xff]  ;;  %v10469_v41 = vld [vmem:[#allocation8 + $0x1d0] sm:$0xff] }
 0x948   :  { %3729 = vmatpush1.msra.mxu0 %v12812_v42  ;;  %3800 = vmatpush1.msra.mxu1 %v12813_v43  ;;  %12828 = vst [vmem:[#allocation19_spill] sm:$0xff] %v10466_v40  ;;  %12829 = vst [vmem:[#allocation20_spill] sm:$0xff] %v10469_v41  ;;  %v10472_v42 = vld [vmem:[#allocation8 + $0x1a8] sm:$0xff]  ;;  %v10475_v43 = vld [vmem:[#allocation8 + $0x1b8] sm:$0xff] }
 0x949   :  { %3730 = vmatprep.subr.mxu0 %v12814_v44  ;;  %3801 = vmatprep.subr.mxu1 %v12815_v45  ;;  %12830 = vst [vmem:[#allocation21_spill] sm:$0xff] %v10472_v42  ;;  %12831 = vst [vmem:[#allocation22_spill] sm:$0xff] %v10475_v43  ;;  %v10478_v44 = vld [vmem:[#allocation8 + $0x1a0] sm:$0xff]  ;;  %v10481_v45 = vld [vmem:[#allocation8 + $0x1b0] sm:$0xff] }
 0x94a   :  { %3731 = vmatpush1.msra.mxu0 %v12816_v46  ;;  %3802 = vmatpush1.msra.mxu1 %v12817_v48  ;;  %12832 = vst [vmem:[#allocation23_spill] sm:$0xff] %v10478_v44  ;;  %12833 = vst [vmem:[#allocation24_spill] sm:$0xff] %v10481_v45  ;;  %v10484_v46 = vld [vmem:[#allocation8 + $0x188] sm:$0xff]  ;;  %v10487_v48 = vld [vmem:[#allocation8 + $0x198] sm:$0xff] }
 0x94b   :  { %3732 = vmatprep.subr.mxu0 %v12818_v54  ;;  %3803 = vmatprep.subr.mxu1 %v12819_v56  ;;  %12834 = vst [vmem:[#allocation25_spill] sm:$0xff] %v10484_v46  ;;  %12835 = vst [vmem:[#allocation26_spill] sm:$0xff] %v10487_v48  ;;  %v10490_v54 = vld [vmem:[#allocation8 + $0x180] sm:$0xff]  ;;  %v10493_v56 = vld [vmem:[#allocation8 + $0x190] sm:$0xff] }
 0x94c   :  { %3733 = vmatpush1.msra.mxu0 %v12820_v63  ;;  %3804 = vmatpush1.msra.mxu1 %v12821_v59  ;;  %12836 = vst [vmem:[#allocation27_spill] sm:$0xff] %v10490_v54  ;;  %12837 = vst [vmem:[#allocation28_spill] sm:$0xff] %v10493_v56  ;;  %v10496_v63 = vld [vmem:[#allocation8 + $0x168] sm:$0xff]  ;;  %v10499_v59 = vld [vmem:[#allocation8 + $0x178] sm:$0xff] }
 0x94d   :  { %3734 = vmatprep.subr.mxu0 %v12822_v10  ;;  %3805 = vmatprep.subr.mxu1 %v12823_v7  ;;  %12838 = vst [vmem:[#allocation29_spill] sm:$0xff] %v10496_v63  ;;  %12839 = vst [vmem:[#allocation30_spill] sm:$0xff] %v10499_v59  ;;  %v10502_v10 = vld [vmem:[#allocation8 + $0x160] sm:$0xff]  ;;  %v10505_v7 = vld [vmem:[#allocation8 + $0x170] sm:$0xff] }
 0x94e   :  { %3735 = vmatpush1.msra.mxu0 %v10105_v11  ;;  %3806 = vmatpush1.msra.mxu1 %v10108_v60  ;;  %v10355_v11 = vld [vmem:[#allocation8 + $0x2f8] sm:$0xff]  ;;  %v10358_v60 = vld [vmem:[#allocation8 + $0x2e0] sm:$0xff]  ;;  %12840 = vst [vmem:[#allocation31_spill] sm:$0xff] %v10502_v10  ;;  %12841 = vst [vmem:[#allocation32_spill] sm:$0xff] %v10505_v7 }
 0x94f   :  { %3736 = vmatprep.subr.mxu0 %v10111_v62  ;;  %3807 = vmatprep.subr.mxu1 %v10114_v6  ;;  %v10361_v62 = vld [vmem:[#allocation8 + $0x2f0] sm:$0xff]  ;;  %v10364_v6 = vld [vmem:[#allocation8 + $0x2c8] sm:$0xff] }
 0x950   :  { %3737 = vmatpush1.msra.mxu0 %v10117_v51  ;;  %3770 = vmatprep.mubr.f32.mxu0 %v11999_v12  ;;  %v10367_v51 = vld [vmem:[#allocation8 + $0x2d8] sm:$0xff] }
 0x951   :  { %3808 = vmatpush1.msra.mxu1 %v10121_v3  ;;  %3841 = vmatprep.mubr.f32.mxu1 %v11999_v12  ;;  %v10370_v3 = vld [vmem:[#allocation8 + $0x2c0] sm:$0xff] }
 0x952   :  { %3771 = vmatmul.mubr.f32.vlgmr.msra.gmra.mxu0 %v10275_v20  ;;  %3842 = vmatmul.mubr.f32.vlgmr.msra.gmra.mxu1 %v10275_v20  ;;  %v10373_v20 = vld [vmem:[#allocation8 + $0x2d0] sm:$0xff] }
 0x953   :  { %3877 = vmatprep.subr.mxu0 %v10352_v14  ;;  %3948 = vmatprep.subr.mxu1 %v10355_v11 }
 0x954   :  { %3878 = vmatpush1.msra.mxu0 %v10358_v60  ;;  %3949 = vmatpush1.msra.mxu1 %v10361_v62 }
 0x955   :  { %3879 = vmatprep.subr.mxu0 %v10364_v6  ;;  %3950 = vmatprep.subr.mxu1 %v10367_v51 }
 0x956   :  { %3880 = vmatpush1.msra.mxu0 %v10370_v3  ;;  %3951 = vmatpush1.msra.mxu1 %v10373_v20 }
 0x957   :  { %3881 = vmatprep.subr.mxu0 %v10376_v5  ;;  %3952 = vmatprep.subr.mxu1 %v10379_v15 }
 0x958   :  { %3882 = vmatpush1.msra.mxu0 %v10382_v22  ;;  %3953 = vmatpush1.msra.mxu1 %v10385_v19 }
 0x959   :  { %3883 = vmatprep.subr.mxu0 %v10388_v52  ;;  %3954 = vmatprep.subr.mxu1 %v10391_v9 }
 0x95a   :  { %3884 = vmatpush1.msra.mxu0 %v10394_v61  ;;  %3955 = vmatpush1.msra.mxu1 %v10397_v33 }
 0x95b   :  { %3885 = vmatprep.subr.mxu0 %v10400_v31  ;;  %3956 = vmatprep.subr.mxu1 %v10403_v21 }
 0x95c   :  { %3886 = vmatpush1.msra.mxu0 %v10406_v35  ;;  %3957 = vmatpush1.msra.mxu1 %v10409_v39 }
 0x95d   :  { %3887 = vmatprep.subr.mxu0 %v10412_v30  ;;  %3958 = vmatprep.subr.mxu1 %v10415_v58 }
 0x95e   :  { %3888 = vmatpush1.msra.mxu0 %v10418_v27  ;;  %3959 = vmatpush1.msra.mxu1 %v10421_v8 }
 0x95f   :  { %3889 = vmatprep.subr.mxu0 %v10424_v13  ;;  %3960 = vmatprep.subr.mxu1 %v10427_v47 }
 0x960   :  { %3890 = vmatpush1.msra.mxu0 %v10430_v29  ;;  %3961 = vmatpush1.msra.mxu1 %v10433_v37 }
 0x961   :  { %3891 = vmatprep.subr.mxu0 %v10436_v38  ;;  %3962 = vmatprep.subr.mxu1 %v10439_v57 }
 0x962   :  { %3892 = vmatpush1.msra.mxu0 %v10442_v1  ;;  %3963 = vmatpush1.msra.mxu1 %v10445_v25 }
 0x963   :  { %3893 = vmatprep.subr.mxu0 %v10448_v4  ;;  %3964 = vmatprep.subr.mxu1 %v10451_v24 }
 0x964   :  { %3894 = vmatpush1.msra.mxu0 %v10454_v23  ;;  %3965 = vmatpush1.msra.mxu1 %v10457_v32 }
 0x965   :  { %3895 = vmatprep.subr.mxu0 %v10460_v28  ;;  %3966 = vmatprep.subr.mxu1 %v10463_v17 }
 0x966   :  { %3896 = vmatpush1.msra.mxu0 %v10466_v40  ;;  %3967 = vmatpush1.msra.mxu1 %v10469_v41 }
 0x967   :  { %3897 = vmatprep.subr.mxu0 %v10472_v42  ;;  %3968 = vmatprep.subr.mxu1 %v10475_v43 }
 0x968   :  { %3898 = vmatpush1.msra.mxu0 %v10478_v44  ;;  %3969 = vmatpush1.msra.mxu1 %v10481_v45 }
 0x969   :  { %3899 = vmatprep.subr.mxu0 %v10484_v46  ;;  %3970 = vmatprep.subr.mxu1 %v10487_v48 }
 0x96a   :  { %3900 = vmatpush1.msra.mxu0 %v10490_v54  ;;  %3971 = vmatpush1.msra.mxu1 %v10493_v56  ;;  %v10508_v54 = vld [vmem:[#allocation8 + $0x148] sm:$0xff]  ;;  %v10511_v56 = vld [vmem:[#allocation8 + $0x158] sm:$0xff] }
 0x96b   :  { %3901 = vmatprep.subr.mxu0 %v10496_v63  ;;  %3972 = vmatprep.subr.mxu1 %v10499_v59  ;;  %12842 = vst [vmem:[#allocation33_spill] sm:$0xff] %v10508_v54  ;;  %12843 = vst [vmem:[#allocation34_spill] sm:$0xff] %v10511_v56  ;;  %v10514_v63 = vld [vmem:[#allocation8 + $0x140] sm:$0xff]  ;;  %v10517_v59 = vld [vmem:[#allocation8 + $0x150] sm:$0xff] }
 0x96c   :  { %3902 = vmatpush1.msra.mxu0 %v10502_v10  ;;  %3973 = vmatpush1.msra.mxu1 %v10505_v7  ;;  %12844 = vst [vmem:[#allocation35_spill] sm:$0xff] %v10514_v63  ;;  %12845 = vst [vmem:[#allocation36_spill] sm:$0xff] %v10517_v59  ;;  %v10520_v10 = vld [vmem:[#allocation8 + $0x128] sm:$0xff]  ;;  %v10523_v7 = vld [vmem:[#allocation8 + $0x138] sm:$0xff] }
 0x96d   :  { %3903 = vmatprep.subr.mxu0 %v10508_v54  ;;  %3974 = vmatprep.subr.mxu1 %v10511_v56  ;;  %12846 = vst [vmem:[#allocation37_spill] sm:$0xff] %v10520_v10  ;;  %12847 = vst [vmem:[#allocation38_spill] sm:$0xff] %v10523_v7  ;;  %v10526_v54 = vld [vmem:[#allocation8 + $0x120] sm:$0xff]  ;;  %v10529_v56 = vld [vmem:[#allocation8 + $0x130] sm:$0xff] }
 0x96e   :  { %3904 = vmatpush1.msra.mxu0 %v10514_v63  ;;  %3975 = vmatpush1.msra.mxu1 %v10517_v59  ;;  %12848 = vst [vmem:[#allocation39_spill] sm:$0xff] %v10526_v54  ;;  %12849 = vst [vmem:[#allocation40_spill] sm:$0xff] %v10529_v56  ;;  %v10532_v63 = vld [vmem:[#allocation8 + $0x108] sm:$0xff]  ;;  %v10535_v59 = vld [vmem:[#allocation8 + $0x118] sm:$0xff] }
 0x96f   :  { %3905 = vmatprep.subr.mxu0 %v10520_v10  ;;  %3976 = vmatprep.subr.mxu1 %v10523_v7  ;;  %12850 = vst [vmem:[#allocation41_spill] sm:$0xff] %v10532_v63  ;;  %12851 = vst [vmem:[#allocation42_spill] sm:$0xff] %v10535_v59  ;;  %v10538_v10 = vld [vmem:[#allocation8 + $0x100] sm:$0xff]  ;;  %v10542_v7 = vld [vmem:[#allocation8 + $0x110] sm:$0xff] }
 0x970   :  { %3906 = vmatpush1.msra.mxu0 %v10526_v54  ;;  %3977 = vmatpush1.msra.mxu1 %v10529_v56  ;;  %12852 = vst [vmem:[#allocation43_spill] sm:$0xff] %v10538_v10  ;;  %12853 = vst [vmem:[#allocation44_spill] sm:$0xff] %v10542_v7  ;;  %v10557_v56 = vld [vmem:[#allocation8 + $0x510] sm:$0xff] }
 0x971   :  { %3907 = vmatprep.subr.mxu0 %v10532_v63  ;;  %3978 = vmatprep.subr.mxu1 %v10535_v59  ;;  %v10548_v63 = vld [vmem:[#allocation8 + $0x508] sm:$0xff]  ;;  %v10551_v59 = vld [vmem:[#allocation8 + $0x518] sm:$0xff]  ;;  %12857 = vst [vmem:[#allocation48_spill] sm:$0xff] %v10557_v56 }
 0x972   :  { %3908 = vmatpush1.msra.mxu0 %v10538_v10  ;;  %3941 = vmatprep.mubr.f32.mxu0 %v11999_v12  ;;  %12854 = vst [vmem:[#allocation45_spill] sm:$0xff] %v10548_v63  ;;  %12855 = vst [vmem:[#allocation46_spill] sm:$0xff] %v10551_v59  ;;  %v10554_v10 = vld [vmem:[#allocation8 + $0x500] sm:$0xff] }
 0x973   :  { %3979 = vmatpush1.msra.mxu1 %v10542_v7  ;;  %4012 = vmatprep.mubr.f32.mxu1 %v11999_v12  ;;  %12856 = vst [vmem:[#allocation47_spill] sm:$0xff] %v10554_v10  ;;  %v10560_v7 = vld [vmem:[#allocation8 + $0x4e8] sm:$0xff] }
 0x974   :  { %3942 = vmatmul.mubr.f32.vlgmr.msra.gmra.mxu0 %v10282_v16  ;;  %4013 = vmatmul.mubr.f32.vlgmr.msra.gmra.mxu1 %v10282_v16  ;;  %12858 = vst [vmem:[#allocation49_spill] sm:$0xff] %v10560_v7  ;;  %v10563_v16 = vld [vmem:[#allocation8 + $0x4f8] sm:$0xff] }
 0x975   :  { %4065 = vmatprep.subr.mxu0 %v10548_v63  ;;  %4136 = vmatprep.subr.mxu1 %v10551_v59  ;;  %12859 = vst [vmem:[#allocation50_spill] sm:$0xff] %v10563_v16  ;;  %v10566_v63 = vld [vmem:[#allocation8 + $0x4e0] sm:$0xff]  ;;  %v10569_v59 = vld [vmem:[#allocation8 + $0x4f0] sm:$0xff] }
 0x976   :  { %4066 = vmatpush1.msra.mxu0 %v10554_v10  ;;  %4137 = vmatpush1.msra.mxu1 %v10557_v56  ;;  %12860 = vst [vmem:[#allocation51_spill] sm:$0xff] %v10566_v63  ;;  %12861 = vst [vmem:[#allocation52_spill] sm:$0xff] %v10569_v59  ;;  %v10572_v10 = vld [vmem:[#allocation8 + $0x4c8] sm:$0xff]  ;;  %v10575_v56 = vld [vmem:[#allocation8 + $0x4d8] sm:$0xff] }
 0x977   :  { %4067 = vmatprep.subr.mxu0 %v10560_v7  ;;  %4138 = vmatprep.subr.mxu1 %v10563_v16  ;;  %12862 = vst [vmem:[#allocation53_spill] sm:$0xff] %v10572_v10  ;;  %12863 = vst [vmem:[#allocation54_spill] sm:$0xff] %v10575_v56  ;;  %v10578_v7 = vld [vmem:[#allocation8 + $0x4c0] sm:$0xff]  ;;  %v10581_v16 = vld [vmem:[#allocation8 + $0x4d0] sm:$0xff] }
 0x978   :  { %4068 = vmatpush1.msra.mxu0 %v10566_v63  ;;  %4139 = vmatpush1.msra.mxu1 %v10569_v59  ;;  %12864 = vst [vmem:[#allocation55_spill] sm:$0xff] %v10578_v7  ;;  %12865 = vst [vmem:[#allocation56_spill] sm:$0xff] %v10581_v16  ;;  %v10584_v63 = vld [vmem:[#allocation8 + $0x4a8] sm:$0xff]  ;;  %v10587_v59 = vld [vmem:[#allocation8 + $0x4b8] sm:$0xff] }
 0x979   :  { %4069 = vmatprep.subr.mxu0 %v10572_v10  ;;  %4140 = vmatprep.subr.mxu1 %v10575_v56  ;;  %12866 = vst [vmem:[#allocation57_spill] sm:$0xff] %v10584_v63  ;;  %12867 = vst [vmem:[#allocation58_spill] sm:$0xff] %v10587_v59  ;;  %v10590_v10 = vld [vmem:[#allocation8 + $0x4a0] sm:$0xff]  ;;  %v10593_v56 = vld [vmem:[#allocation8 + $0x4b0] sm:$0xff] }
 0x97a   :  { %4070 = vmatpush1.msra.mxu0 %v10578_v7  ;;  %4141 = vmatpush1.msra.mxu1 %v10581_v16  ;;  %12868 = vst [vmem:[#allocation59_spill] sm:$0xff] %v10590_v10  ;;  %12869 = vst [vmem:[#allocation60_spill] sm:$0xff] %v10593_v56  ;;  %v10596_v7 = vld [vmem:[#allocation8 + $0x488] sm:$0xff]  ;;  %v10599_v16 = vld [vmem:[#allocation8 + $0x498] sm:$0xff] }
 0x97b   :  { %4071 = vmatprep.subr.mxu0 %v10584_v63  ;;  %4142 = vmatprep.subr.mxu1 %v10587_v59  ;;  %12870 = vst [vmem:[#allocation61_spill] sm:$0xff] %v10596_v7  ;;  %12871 = vst [vmem:[#allocation62_spill] sm:$0xff] %v10599_v16  ;;  %v10602_v63 = vld [vmem:[#allocation8 + $0x480] sm:$0xff]  ;;  %v10605_v59 = vld [vmem:[#allocation8 + $0x490] sm:$0xff] }
 0x97c   :  { %4072 = vmatpush1.msra.mxu0 %v10590_v10  ;;  %4143 = vmatpush1.msra.mxu1 %v10593_v56  ;;  %12872 = vst [vmem:[#allocation63_spill] sm:$0xff] %v10602_v63  ;;  %12873 = vst [vmem:[#allocation64_spill] sm:$0xff] %v10605_v59  ;;  %v10608_v10 = vld [vmem:[#allocation8 + $0x468] sm:$0xff]  ;;  %v10611_v56 = vld [vmem:[#allocation8 + $0x478] sm:$0xff] }
 0x97d   :  { %4073 = vmatprep.subr.mxu0 %v10596_v7  ;;  %4144 = vmatprep.subr.mxu1 %v10599_v16  ;;  %12874 = vst [vmem:[#allocation65_spill] sm:$0xff] %v10608_v10  ;;  %12875 = vst [vmem:[#allocation66_spill] sm:$0xff] %v10611_v56  ;;  %v10614_v7 = vld [vmem:[#allocation8 + $0x460] sm:$0xff]  ;;  %v10617_v16 = vld [vmem:[#allocation8 + $0x470] sm:$0xff] }
 0x97e   :  { %4074 = vmatpush1.msra.mxu0 %v10602_v63  ;;  %4145 = vmatpush1.msra.mxu1 %v10605_v59  ;;  %12876 = vst [vmem:[#allocation67_spill] sm:$0xff] %v10614_v7  ;;  %12877 = vst [vmem:[#allocation68_spill] sm:$0xff] %v10617_v16  ;;  %v10620_v63 = vld [vmem:[#allocation8 + $0x448] sm:$0xff]  ;;  %v10623_v59 = vld [vmem:[#allocation8 + $0x458] sm:$0xff] }
 0x97f   :  { %4075 = vmatprep.subr.mxu0 %v10608_v10  ;;  %4146 = vmatprep.subr.mxu1 %v10611_v56  ;;  %12878 = vst [vmem:[#allocation69_spill] sm:$0xff] %v10620_v63  ;;  %12879 = vst [vmem:[#allocation70_spill] sm:$0xff] %v10623_v59  ;;  %v10626_v10 = vld [vmem:[#allocation8 + $0x440] sm:$0xff]  ;;  %v10629_v56 = vld [vmem:[#allocation8 + $0x450] sm:$0xff] }
 0x980   :  { %4076 = vmatpush1.msra.mxu0 %v10614_v7  ;;  %4147 = vmatpush1.msra.mxu1 %v10617_v16  ;;  %12880 = vst [vmem:[#allocation71_spill] sm:$0xff] %v10626_v10  ;;  %12881 = vst [vmem:[#allocation72_spill] sm:$0xff] %v10629_v56  ;;  %v10632_v7 = vld [vmem:[#allocation8 + $0x428] sm:$0xff]  ;;  %v10635_v16 = vld [vmem:[#allocation8 + $0x438] sm:$0xff] }
 0x981   :  { %4077 = vmatprep.subr.mxu0 %v10620_v63  ;;  %4148 = vmatprep.subr.mxu1 %v10623_v59  ;;  %12882 = vst [vmem:[#allocation73_spill] sm:$0xff] %v10632_v7  ;;  %12883 = vst [vmem:[#allocation74_spill] sm:$0xff] %v10635_v16  ;;  %v10638_v63 = vld [vmem:[#allocation8 + $0x420] sm:$0xff]  ;;  %v10641_v59 = vld [vmem:[#allocation8 + $0x430] sm:$0xff] }
 0x982   :  { %4078 = vmatpush1.msra.mxu0 %v10626_v10  ;;  %4149 = vmatpush1.msra.mxu1 %v10629_v56  ;;  %12884 = vst [vmem:[#allocation75_spill] sm:$0xff] %v10638_v63  ;;  %12885 = vst [vmem:[#allocation76_spill] sm:$0xff] %v10641_v59  ;;  %v10644_v10 = vld [vmem:[#allocation8 + $0x408] sm:$0xff]  ;;  %v10647_v56 = vld [vmem:[#allocation8 + $0x418] sm:$0xff] }
 0x983   :  { %4079 = vmatprep.subr.mxu0 %v10632_v7  ;;  %4150 = vmatprep.subr.mxu1 %v10635_v16  ;;  %12886 = vst [vmem:[#allocation77_spill] sm:$0xff] %v10644_v10  ;;  %12887 = vst [vmem:[#allocation78_spill] sm:$0xff] %v10647_v56  ;;  %v10650_v7 = vld [vmem:[#allocation8 + $0x400] sm:$0xff]  ;;  %v10653_v16 = vld [vmem:[#allocation8 + $0x410] sm:$0xff] }
 0x984   :  { %4080 = vmatpush1.msra.mxu0 %v10638_v63  ;;  %4151 = vmatpush1.msra.mxu1 %v10641_v59  ;;  %12888 = vst [vmem:[#allocation79_spill] sm:$0xff] %v10650_v7  ;;  %12889 = vst [vmem:[#allocation80_spill] sm:$0xff] %v10653_v16  ;;  %v10656_v63 = vld [vmem:[#allocation8 + $0x3e8] sm:$0xff]  ;;  %v10659_v59 = vld [vmem:[#allocation8 + $0x3f8] sm:$0xff] }
 0x985   :  { %4081 = vmatprep.subr.mxu0 %v10644_v10  ;;  %4152 = vmatprep.subr.mxu1 %v10647_v56  ;;  %12890 = vst [vmem:[#allocation81_spill] sm:$0xff] %v10656_v63  ;;  %12891 = vst [vmem:[#allocation82_spill] sm:$0xff] %v10659_v59  ;;  %v10662_v10 = vld [vmem:[#allocation8 + $0x3e0] sm:$0xff]  ;;  %v10665_v56 = vld [vmem:[#allocation8 + $0x3f0] sm:$0xff] }
 0x986   :  { %4082 = vmatpush1.msra.mxu0 %v10650_v7  ;;  %4153 = vmatpush1.msra.mxu1 %v10653_v16  ;;  %12892 = vst [vmem:[#allocation83_spill] sm:$0xff] %v10662_v10  ;;  %12893 = vst [vmem:[#allocation84_spill] sm:$0xff] %v10665_v56  ;;  %v10668_v7 = vld [vmem:[#allocation8 + $0x3c8] sm:$0xff]  ;;  %v10671_v16 = vld [vmem:[#allocation8 + $0x3d8] sm:$0xff] }
 0x987   :  { %4083 = vmatprep.subr.mxu0 %v10656_v63  ;;  %4154 = vmatprep.subr.mxu1 %v10659_v59  ;;  %12894 = vst [vmem:[#allocation85_spill] sm:$0xff] %v10668_v7  ;;  %12895 = vst [vmem:[#allocation86_spill] sm:$0xff] %v10671_v16  ;;  %v10674_v63 = vld [vmem:[#allocation8 + $0x3c0] sm:$0xff]  ;;  %v10677_v59 = vld [vmem:[#allocation8 + $0x3d0] sm:$0xff] }
 0x988   :  { %4084 = vmatpush1.msra.mxu0 %v10662_v10  ;;  %4155 = vmatpush1.msra.mxu1 %v10665_v56  ;;  %12896 = vst [vmem:[#allocation87_spill] sm:$0xff] %v10674_v63  ;;  %12897 = vst [vmem:[#allocation88_spill] sm:$0xff] %v10677_v59  ;;  %v10680_v10 = vld [vmem:[#allocation8 + $0x3a8] sm:$0xff]  ;;  %v10683_v56 = vld [vmem:[#allocation8 + $0x3b8] sm:$0xff] }
 0x989   :  { %4085 = vmatprep.subr.mxu0 %v10668_v7  ;;  %4156 = vmatprep.subr.mxu1 %v10671_v16  ;;  %12898 = vst [vmem:[#allocation89_spill] sm:$0xff] %v10680_v10  ;;  %12899 = vst [vmem:[#allocation90_spill] sm:$0xff] %v10683_v56  ;;  %v10686_v7 = vld [vmem:[#allocation8 + $0x3a0] sm:$0xff]  ;;  %v10689_v16 = vld [vmem:[#allocation8 + $0x3b0] sm:$0xff] }
 0x98a   :  { %4086 = vmatpush1.msra.mxu0 %v10674_v63  ;;  %4157 = vmatpush1.msra.mxu1 %v10677_v59  ;;  %12900 = vst [vmem:[#allocation91_spill] sm:$0xff] %v10686_v7  ;;  %12901 = vst [vmem:[#allocation92_spill] sm:$0xff] %v10689_v16  ;;  %v10692_v63 = vld [vmem:[#allocation8 + $0x388] sm:$0xff]  ;;  %v10695_v59 = vld [vmem:[#allocation8 + $0x398] sm:$0xff] }
 0x98b   :  { %4087 = vmatprep.subr.mxu0 %v10680_v10  ;;  %4158 = vmatprep.subr.mxu1 %v10683_v56  ;;  %12902 = vst [vmem:[#allocation93_spill] sm:$0xff] %v10692_v63  ;;  %12903 = vst [vmem:[#allocation94_spill] sm:$0xff] %v10695_v59  ;;  %v10698_v10 = vld [vmem:[#allocation8 + $0x380] sm:$0xff]  ;;  %v10701_v56 = vld [vmem:[#allocation8 + $0x390] sm:$0xff] }
 0x98c   :  { %4088 = vmatpush1.msra.mxu0 %v10686_v7  ;;  %4159 = vmatpush1.msra.mxu1 %v10689_v16  ;;  %12904 = vst [vmem:[#allocation95_spill] sm:$0xff] %v10698_v10  ;;  %12905 = vst [vmem:[#allocation96_spill] sm:$0xff] %v10701_v56  ;;  %v10704_v7 = vld [vmem:[#allocation8 + $0x368] sm:$0xff]  ;;  %v10707_v16 = vld [vmem:[#allocation8 + $0x378] sm:$0xff] }
 0x98d   :  { %4089 = vmatprep.subr.mxu0 %v10692_v63  ;;  %4160 = vmatprep.subr.mxu1 %v10695_v59  ;;  %12906 = vst [vmem:[#allocation97_spill] sm:$0xff] %v10704_v7  ;;  %12907 = vst [vmem:[#allocation98_spill] sm:$0xff] %v10707_v16  ;;  %v10710_v63 = vld [vmem:[#allocation8 + $0x360] sm:$0xff]  ;;  %v10713_v59 = vld [vmem:[#allocation8 + $0x370] sm:$0xff] }
 0x98e   :  { %4090 = vmatpush1.msra.mxu0 %v10698_v10  ;;  %4161 = vmatpush1.msra.mxu1 %v10701_v56  ;;  %12908 = vst [vmem:[#allocation99_spill] sm:$0xff] %v10710_v63  ;;  %12909 = vst [vmem:[#allocation100_spill] sm:$0xff] %v10713_v59  ;;  %v10716_v10 = vld [vmem:[#allocation8 + $0x348] sm:$0xff]  ;;  %v10719_v56 = vld [vmem:[#allocation8 + $0x358] sm:$0xff] }
 0x98f   :  { %4091 = vmatprep.subr.mxu0 %v10704_v7  ;;  %4162 = vmatprep.subr.mxu1 %v10707_v16  ;;  %12910 = vst [vmem:[#allocation101_spill] sm:$0xff] %v10716_v10  ;;  %12911 = vst [vmem:[#allocation102_spill] sm:$0xff] %v10719_v56  ;;  %v10722_v7 = vld [vmem:[#allocation8 + $0x340] sm:$0xff]  ;;  %v10725_v16 = vld [vmem:[#allocation8 + $0x350] sm:$0xff] }
 0x990   :  { %4092 = vmatpush1.msra.mxu0 %v10710_v63  ;;  %4163 = vmatpush1.msra.mxu1 %v10713_v59  ;;  %12912 = vst [vmem:[#allocation103_spill] sm:$0xff] %v10722_v7  ;;  %12913 = vst [vmem:[#allocation104_spill] sm:$0xff] %v10725_v16  ;;  %v10728_v63 = vld [vmem:[#allocation8 + $0x328] sm:$0xff]  ;;  %v10731_v59 = vld [vmem:[#allocation8 + $0x338] sm:$0xff] }
 0x991   :  { %4093 = vmatprep.subr.mxu0 %v10716_v10  ;;  %4164 = vmatprep.subr.mxu1 %v10719_v56  ;;  %12914 = vst [vmem:[#allocation105_spill] sm:$0xff] %v10728_v63  ;;  %12915 = vst [vmem:[#allocation106_spill] sm:$0xff] %v10731_v59  ;;  %v10734_v10 = vld [vmem:[#allocation8 + $0x320] sm:$0xff]  ;;  %v10737_v56 = vld [vmem:[#allocation8 + $0x330] sm:$0xff] }
 0x992   :  { %4094 = vmatpush1.msra.mxu0 %v10722_v7  ;;  %4165 = vmatpush1.msra.mxu1 %v10725_v16  ;;  %12916 = vst [vmem:[#allocation107_spill] sm:$0xff] %v10734_v10  ;;  %12917 = vst [vmem:[#allocation108_spill] sm:$0xff] %v10737_v56  ;;  %v10742_v16 = vld [vmem:[#allocation8 + $0x708] sm:$0xff] }
 0x993   :  { %4095 = vmatprep.subr.mxu0 %v10728_v63  ;;  %4166 = vmatprep.subr.mxu1 %v10731_v59  ;;  %12918 = vst [vmem:[#allocation116_spill] sm:$0xff] %v10742_v16  ;;  %v10745_v63 = vld [vmem:[#allocation8 + $0x718] sm:$0xff] }
 0x994   :  { %4096 = vmatpush1.msra.mxu0 %v10734_v10  ;;  %4167 = vmatpush1.msra.mxu1 %v10737_v56  ;;  %12919 = vst [vmem:[#allocation117_spill] sm:$0xff] %v10745_v63 }
 0x995   :  { %4129 = vmatprep.mubr.f32.mxu0 %v11999_v12  ;;  %4200 = vmatprep.mubr.f32.mxu1 %v11999_v12 }
 0x996   :  { %4207 = vmatprep.subr.mxu0 %v10742_v16  ;;  %4278 = vmatprep.subr.mxu1 %v10745_v63 }
 0x9f1   :  { %v3630_v59 = vpop.f32.mrf.mxu0  ;;  %v3701_v54 = vpop.f32.mrf.mxu1 }
 0x9f2   :  { %v3631_v10 = vadd.f32 %v3630_v59, %v12775_v26  ;;  %v3702_v28 = vadd.f32 %v3701_v54, %v8597_v53 }
 0x9f3   :  { %v3632_v7 = vpop.f32.mrf.mxu0  ;;  %v3703_v44 = vpop.f32.mrf.mxu1 }
 0x9f4   :  { %v3633_v56 = vadd.f32 %v3632_v7, %v8586_v34  ;;  %v3704_v63 = vadd.f32 %v3703_v44, %v8592_v49 }
 0xa12   :  { %v3772_v48 = vpop.f32.mrf.mxu0  ;;  %v3843_v41 = vpop.f32.mrf.mxu1 }
 0xa13   :  { %v3848_v46 = vadd.f32 %v3772_v48, %v3631_v10  ;;  %v3850_v32 = vadd.f32 %v3843_v41, %v3702_v28 }
 0xa14   :  { %v3774_v45 = vpop.f32.mrf.mxu0  ;;  %v3845_v40 = vpop.f32.mrf.mxu1 }
 0xa15   :  { %v6550_v43 = vmul.f32 -1.442695, %v3848_v46  ;;  %v3849_v42 = vadd.f32 %v3774_v45, %v3633_v56  ;;  %v3851_v17 = vadd.f32 %v3845_v40, %v3704_v63 }
 0xa17   :  { %6907 = vpow2.f32 %v6550_v43  ;;  %v6551_v16 = vmul.f32 -1.442695, %v3849_v42  ;;  %v6552_v59 = vmul.f32 -1.442695, %v3851_v17 }
 0xa19   :  { %6909 = vpow2.f32 %v6551_v16 }
 0xa1a   :  { %6911 = vpow2.f32 %v6552_v59 }
 0xa24   :  { %v6908_v26 = vpop.eup %6907 }
 0xa25   :  { %v3855_v23 = vadd.f32 1.0, %v6908_v26 }
 0xa26   :  { %v6910_v7 = vpop.eup %6909 }
 0xa27   :  { %6913 = vrcp.f32 %v3855_v23  ;;  %v3861_v48 = vadd.f32 1.0, %v6910_v7  ;;  %v6912_v43 = vpop.eup %6911 }
 0xa28   :  { %6915 = vtanh.f32 %v3850_v32  ;;  %v3868_v44 = vadd.f32 1.0, %v6912_v43 }
 0xa29   :  { %6917 = vrcp.f32 %v3861_v48 }
 0xa2a   :  { %6919 = vrcp.f32 %v3868_v44 }
 0xa34   :  { %v6914_v45 = vpop.eup %6913  ;;  %v3943_v42 = vpop.f32.mrf.mxu0 }
 0xa35   :  { %v6916_v46 = vpop.eup %6915  ;;  %v4023_v56 = vrot.slane %v3943_v42, 4  ;;  %v4014_v26 = vpop.f32.mrf.mxu1 }
 0xa36   :  { %v6918_v10 = vpop.eup %6917  ;;  %v3945_v40 = vpop.f32.mrf.mxu0  ;;  %v3872_v63 = vmul.f32 %v6916_v46, %v6914_v45 }
 0xa37   :  { %v3871_v17 = vmul.f32 %v6918_v10, %v10269_v55  ;;  %v4031_v28 = vadd.f32 %v4023_v56, %v12631_v36  ;;  %v4024_v41 = vrot.slane %v3945_v40, 4  ;;  %v4016_v59 = vpop.f32.mrf.mxu1  ;;  %v4025_v55 = vrot.slane %v4014_v26, 4  ;;  %v6920_v45 = vpop.eup %6919 }
 0xa38   :  { %v4026_v7 = vrot.slane %v4016_v59, 4 }
 0xa39   :  { %v10754_v54 = vadd.f32 %v3872_v63, %v3871_v17  ;;  %v6553_v23 = vmul.f32 -1.442695, %v4031_v28  ;;  %v4032_v32 = vadd.f32 %v4024_v41, %v12632_v18  ;;  %v4033_v46 = vadd.f32 %v4025_v55, %v12634_v2 }
 0xa3a   :  { %v4034_v48 = vadd.f32 %v4026_v7, %v12633_v0  ;;  %v4055_v41 = vrot.slane %v10279_v50, 6  ;;  %v10774_v50 = vld [vmem:[#allocation8 + $0x710] sm:$0xff] }
 0xa3b   :  { %6921 = vpow2.f32 %v6553_v23  ;;  %v6554_v16 = vmul.f32 -1.442695, %v4032_v32 }
 0xa3c   :  { %6923 = vtanh.f32 %v10754_v54  ;;  %v6555_v43 = vmul.f32 -1.442695, %v4034_v48 }
 0xa3d   :  { %6925 = vpow2.f32 %v6554_v16 }
 0xa3e   :  { %6927 = vpow2.f32 %v6555_v43 }
 0xa48   :  { %v6922_v42 = vpop.eup %6921 }
 0xa49   :  { %v6924_v56 = vpop.eup %6923  ;;  %v4038_v10 = vadd.f32 1.0, %v6922_v42  ;;  %v10771_v42 = vld [vmem:[#allocation8 + $0x700] sm:$0xff] }
 0xa4a   :  { %v6926_v40 = vpop.eup %6925  ;;  %v10760_v44 = vmul.f32 %v6924_v56, %v6920_v45  ;;  %v10780_v56 = vld [vmem:[#allocation8 + $0x6f8] sm:$0xff] }
 0xa4b   :  { %6929 = vrcp.f32 %v4038_v10  ;;  %v4044_v63 = vadd.f32 1.0, %v6926_v40  ;;  %v6928_v17 = vpop.eup %6927  ;;  %v10783_v10 = vld [vmem:[#allocation8 + $0x6e0] sm:$0xff]  ;;  %v10786_v40 = vld [vmem:[#allocation8 + $0x6f0] sm:$0xff] }
 0xa4c   :  { %6931 = vtanh.f32 %v4033_v46  ;;  %3876 = vst [vmem:[#allocation3 + $0xa] sm:$0x3] %v10760_v44  ;;  %v4051_v32 = vadd.f32 1.0, %v6928_v17  ;;  %v10777_v46 = vld [vmem:[#allocation8 + $0x6e8] sm:$0xff]  ;;  %v10792_v17 = vld [vmem:[#allocation8 + $0x6d8] sm:$0xff] }
 0xa4d   :  { %6933 = vrcp.f32 %v4044_v63  ;;  %v10789_v63 = vld [vmem:[#allocation8 + $0x6c8] sm:$0xff] }
 0xa4e   :  { %6935 = vrcp.f32 %v4051_v32  ;;  %v10807_v32 = vld [vmem:[#allocation8 + $0x6a0] sm:$0xff] }
 0xa4f   :  { %12920 = vst [vmem:[#allocation118_spill] sm:$0xff] %v10807_v32 }
 0xa58   :  { %v6930_v28 = vpop.eup %6929 }
 0xa59   :  { %v6932_v26 = vpop.eup %6931 }
 0xa5a   :  { %v6934_v23 = vpop.eup %6933  ;;  %v4058_v16 = vmul.f32 %v6932_v26, %v6930_v28  ;;  %v10795_v28 = vld [vmem:[#allocation8 + $0x6c0] sm:$0xff]  ;;  %v10798_v26 = vld [vmem:[#allocation8 + $0x6d0] sm:$0xff] }
 0xa5b   :  { %v4057_v59 = vmul.f32 %v6934_v23, %v4055_v41  ;;  %v6936_v48 = vpop.eup %6935  ;;  %v10801_v41 = vld [vmem:[#allocation8 + $0x6a8] sm:$0xff]  ;;  %v10804_v23 = vld [vmem:[#allocation8 + $0x6b8] sm:$0xff] }
 0xa5d   :  { %v10764_v7 = vadd.f32 %v4058_v16, %v4057_v59  ;;  %v10810_v16 = vld [vmem:[#allocation8 + $0x6b0] sm:$0xff]  ;;  %v10813_v59 = vld [vmem:[#allocation8 + $0x688] sm:$0xff] }
 0xa5e   :  { %12921 = vst [vmem:[#allocation119_spill] sm:$0xff] %v10810_v16  ;;  %12922 = vst [vmem:[#allocation120_spill] sm:$0xff] %v10813_v59 }
 0xa5f   :  { %6937 = vtanh.f32 %v10764_v7 }
 0xa6c   :  { %v6938_v55 = vpop.eup %6937 }
 0xa6d   :  { %v4061_v43 = vmul.f32 %v6938_v55, %v6936_v48  ;;  %v10816_v48 = vld [vmem:[#allocation8 + $0x698] sm:$0xff]  ;;  %v10819_v55 = vld [vmem:[#allocation8 + $0x680] sm:$0xff] }
 0xa6e   :  { %12923 = vst [vmem:[#allocation121_spill] sm:$0xff] %v10816_v48  ;;  %12924 = vst [vmem:[#allocation122_spill] sm:$0xff] %v10819_v55 }
 0xa6f   :  { %v10767_v45 = vrot.slane %v4061_v43, 4  ;;  %v10822_v43 = vld [vmem:[#allocation8 + $0x690] sm:$0xff] }
 0xa70   :  { %12925 = vst [vmem:[#allocation123_spill] sm:$0xff] %v10822_v43 }
 0xa71   :  { %4130 = vmatmul.mubr.f32.vlgmr.msra.gmra.mxu0 %v10767_v45  ;;  %4201 = vmatmul.mubr.f32.vlgmr.msra.gmra.mxu1 %v10767_v45 }
 0xa72   :  { %4208 = vmatpush1.msra.mxu0 %v10771_v42  ;;  %4279 = vmatpush1.msra.mxu1 %v10774_v50 }
 0xa73   :  { %4209 = vmatprep.subr.mxu0 %v10777_v46  ;;  %4280 = vmatprep.subr.mxu1 %v10780_v56 }
 0xa74   :  { %4210 = vmatpush1.msra.mxu0 %v10783_v10  ;;  %4281 = vmatpush1.msra.mxu1 %v10786_v40 }
 0xa75   :  { %4211 = vmatprep.subr.mxu0 %v10789_v63  ;;  %4282 = vmatprep.subr.mxu1 %v10792_v17 }
 0xa76   :  { %4212 = vmatpush1.msra.mxu0 %v10795_v28  ;;  %4283 = vmatpush1.msra.mxu1 %v10798_v26 }
 0xa77   :  { %4213 = vmatprep.subr.mxu0 %v10801_v41  ;;  %4284 = vmatprep.subr.mxu1 %v10804_v23 }
 0xa78   :  { %4214 = vmatpush1.msra.mxu0 %v10807_v32  ;;  %4285 = vmatpush1.msra.mxu1 %v10810_v16  ;;  %v10825_v32 = vld [vmem:[#allocation8 + $0x668] sm:$0xff]  ;;  %v10828_v16 = vld [vmem:[#allocation8 + $0x678] sm:$0xff] }
 0xa79   :  { %4215 = vmatprep.subr.mxu0 %v10813_v59  ;;  %4286 = vmatprep.subr.mxu1 %v10816_v48  ;;  %12926 = vst [vmem:[#allocation124_spill] sm:$0xff] %v10825_v32  ;;  %12927 = vst [vmem:[#allocation125_spill] sm:$0xff] %v10828_v16  ;;  %v10831_v59 = vld [vmem:[#allocation8 + $0x660] sm:$0xff]  ;;  %v10834_v48 = vld [vmem:[#allocation8 + $0x670] sm:$0xff] }
 0xa7a   :  { %4216 = vmatpush1.msra.mxu0 %v10819_v55  ;;  %4287 = vmatpush1.msra.mxu1 %v10822_v43  ;;  %12928 = vst [vmem:[#allocation126_spill] sm:$0xff] %v10831_v59  ;;  %12929 = vst [vmem:[#allocation127_spill] sm:$0xff] %v10834_v48  ;;  %v10837_v55 = vld [vmem:[#allocation8 + $0x648] sm:$0xff]  ;;  %v10840_v43 = vld [vmem:[#allocation8 + $0x658] sm:$0xff] }
 0xa7b   :  { %4217 = vmatprep.subr.mxu0 %v10825_v32  ;;  %4288 = vmatprep.subr.mxu1 %v10828_v16  ;;  %12930 = vst [vmem:[#allocation128_spill] sm:$0xff] %v10837_v55  ;;  %12931 = vst [vmem:[#allocation129_spill] sm:$0xff] %v10840_v43  ;;  %v10843_v32 = vld [vmem:[#allocation8 + $0x640] sm:$0xff]  ;;  %v10846_v16 = vld [vmem:[#allocation8 + $0x650] sm:$0xff] }
 0xa7c   :  { %4218 = vmatpush1.msra.mxu0 %v10831_v59  ;;  %4289 = vmatpush1.msra.mxu1 %v10834_v48  ;;  %12932 = vst [vmem:[#allocation130_spill] sm:$0xff] %v10843_v32  ;;  %12933 = vst [vmem:[#allocation131_spill] sm:$0xff] %v10846_v16  ;;  %v10849_v59 = vld [vmem:[#allocation8 + $0x628] sm:$0xff]  ;;  %v10852_v48 = vld [vmem:[#allocation8 + $0x638] sm:$0xff] }
 0xa7d   :  { %4219 = vmatprep.subr.mxu0 %v10837_v55  ;;  %4290 = vmatprep.subr.mxu1 %v10840_v43  ;;  %12934 = vst [vmem:[#allocation132_spill] sm:$0xff] %v10849_v59  ;;  %12935 = vst [vmem:[#allocation133_spill] sm:$0xff] %v10852_v48  ;;  %v10855_v55 = vld [vmem:[#allocation8 + $0x620] sm:$0xff]  ;;  %v10858_v43 = vld [vmem:[#allocation8 + $0x630] sm:$0xff] }
 0xa7e   :  { %4220 = vmatpush1.msra.mxu0 %v10843_v32  ;;  %4291 = vmatpush1.msra.mxu1 %v10846_v16  ;;  %12936 = vst [vmem:[#allocation134_spill] sm:$0xff] %v10855_v55  ;;  %12937 = vst [vmem:[#allocation135_spill] sm:$0xff] %v10858_v43  ;;  %v10861_v32 = vld [vmem:[#allocation8 + $0x608] sm:$0xff]  ;;  %v10864_v16 = vld [vmem:[#allocation8 + $0x618] sm:$0xff] }
 0xa7f   :  { %4221 = vmatprep.subr.mxu0 %v10849_v59  ;;  %4292 = vmatprep.subr.mxu1 %v10852_v48  ;;  %12938 = vst [vmem:[#allocation136_spill] sm:$0xff] %v10861_v32  ;;  %12939 = vst [vmem:[#allocation137_spill] sm:$0xff] %v10864_v16  ;;  %v10867_v59 = vld [vmem:[#allocation8 + $0x600] sm:$0xff]  ;;  %v10870_v48 = vld [vmem:[#allocation8 + $0x610] sm:$0xff] }
 0xa80   :  { %4222 = vmatpush1.msra.mxu0 %v10855_v55  ;;  %4293 = vmatpush1.msra.mxu1 %v10858_v43  ;;  %12940 = vst [vmem:[#allocation138_spill] sm:$0xff] %v10867_v59  ;;  %12941 = vst [vmem:[#allocation139_spill] sm:$0xff] %v10870_v48  ;;  %v10873_v55 = vld [vmem:[#allocation8 + $0x5e8] sm:$0xff]  ;;  %v10876_v43 = vld [vmem:[#allocation8 + $0x5f8] sm:$0xff] }
 0xa81   :  { %4223 = vmatprep.subr.mxu0 %v10861_v32  ;;  %4294 = vmatprep.subr.mxu1 %v10864_v16  ;;  %12942 = vst [vmem:[#allocation140_spill] sm:$0xff] %v10873_v55  ;;  %12943 = vst [vmem:[#allocation141_spill] sm:$0xff] %v10876_v43  ;;  %v10879_v32 = vld [vmem:[#allocation8 + $0x5e0] sm:$0xff]  ;;  %v10882_v16 = vld [vmem:[#allocation8 + $0x5f0] sm:$0xff] }
 0xa82   :  { %4224 = vmatpush1.msra.mxu0 %v10867_v59  ;;  %4295 = vmatpush1.msra.mxu1 %v10870_v48  ;;  %12944 = vst [vmem:[#allocation142_spill] sm:$0xff] %v10879_v32  ;;  %12945 = vst [vmem:[#allocation143_spill] sm:$0xff] %v10882_v16  ;;  %v10885_v59 = vld [vmem:[#allocation8 + $0x5c8] sm:$0xff]  ;;  %v10888_v48 = vld [vmem:[#allocation8 + $0x5d8] sm:$0xff] }
 0xa83   :  { %4225 = vmatprep.subr.mxu0 %v10873_v55  ;;  %4296 = vmatprep.subr.mxu1 %v10876_v43  ;;  %12946 = vst [vmem:[#allocation144_spill] sm:$0xff] %v10885_v59  ;;  %12947 = vst [vmem:[#allocation145_spill] sm:$0xff] %v10888_v48  ;;  %v10891_v55 = vld [vmem:[#allocation8 + $0x5c0] sm:$0xff]  ;;  %v10894_v43 = vld [vmem:[#allocation8 + $0x5d0] sm:$0xff] }
 0xa84   :  { %4226 = vmatpush1.msra.mxu0 %v10879_v32  ;;  %4297 = vmatpush1.msra.mxu1 %v10882_v16  ;;  %12948 = vst [vmem:[#allocation146_spill] sm:$0xff] %v10891_v55  ;;  %12949 = vst [vmem:[#allocation147_spill] sm:$0xff] %v10894_v43  ;;  %v10897_v32 = vld [vmem:[#allocation8 + $0x5a8] sm:$0xff]  ;;  %v10900_v16 = vld [vmem:[#allocation8 + $0x5b8] sm:$0xff] }
 0xa85   :  { %4227 = vmatprep.subr.mxu0 %v10885_v59  ;;  %4298 = vmatprep.subr.mxu1 %v10888_v48  ;;  %12950 = vst [vmem:[#allocation148_spill] sm:$0xff] %v10897_v32  ;;  %12951 = vst [vmem:[#allocation149_spill] sm:$0xff] %v10900_v16  ;;  %v10903_v59 = vld [vmem:[#allocation8 + $0x5a0] sm:$0xff]  ;;  %v10906_v48 = vld [vmem:[#allocation8 + $0x5b0] sm:$0xff] }
 0xa86   :  { %4228 = vmatpush1.msra.mxu0 %v10891_v55  ;;  %4299 = vmatpush1.msra.mxu1 %v10894_v43  ;;  %12952 = vst [vmem:[#allocation150_spill] sm:$0xff] %v10903_v59  ;;  %12953 = vst [vmem:[#allocation151_spill] sm:$0xff] %v10906_v48  ;;  %v10909_v55 = vld [vmem:[#allocation8 + $0x588] sm:$0xff]  ;;  %v10912_v43 = vld [vmem:[#allocation8 + $0x598] sm:$0xff] }
 0xa87   :  { %4229 = vmatprep.subr.mxu0 %v10897_v32  ;;  %4300 = vmatprep.subr.mxu1 %v10900_v16  ;;  %12954 = vst [vmem:[#allocation152_spill] sm:$0xff] %v10909_v55  ;;  %12955 = vst [vmem:[#allocation153_spill] sm:$0xff] %v10912_v43  ;;  %v10915_v32 = vld [vmem:[#allocation8 + $0x580] sm:$0xff]  ;;  %v10918_v16 = vld [vmem:[#allocation8 + $0x590] sm:$0xff] }
 0xa88   :  { %4230 = vmatpush1.msra.mxu0 %v10903_v59  ;;  %4301 = vmatpush1.msra.mxu1 %v10906_v48  ;;  %12956 = vst [vmem:[#allocation154_spill] sm:$0xff] %v10915_v32  ;;  %12957 = vst [vmem:[#allocation155_spill] sm:$0xff] %v10918_v16  ;;  %v10921_v59 = vld [vmem:[#allocation8 + $0x568] sm:$0xff]  ;;  %v10924_v48 = vld [vmem:[#allocation8 + $0x578] sm:$0xff] }
 0xa89   :  { %4231 = vmatprep.subr.mxu0 %v10909_v55  ;;  %4302 = vmatprep.subr.mxu1 %v10912_v43  ;;  %12958 = vst [vmem:[#allocation156_spill] sm:$0xff] %v10921_v59  ;;  %12959 = vst [vmem:[#allocation157_spill] sm:$0xff] %v10924_v48  ;;  %v10927_v55 = vld [vmem:[#allocation8 + $0x560] sm:$0xff]  ;;  %v10930_v43 = vld [vmem:[#allocation8 + $0x570] sm:$0xff] }
 0xa8a   :  { %4232 = vmatpush1.msra.mxu0 %v10915_v32  ;;  %4303 = vmatpush1.msra.mxu1 %v10918_v16  ;;  %12960 = vst [vmem:[#allocation158_spill] sm:$0xff] %v10927_v55  ;;  %12961 = vst [vmem:[#allocation159_spill] sm:$0xff] %v10930_v43  ;;  %v10933_v32 = vld [vmem:[#allocation8 + $0x548] sm:$0xff]  ;;  %v10936_v16 = vld [vmem:[#allocation8 + $0x558] sm:$0xff] }
 0xa8b   :  { %4233 = vmatprep.subr.mxu0 %v10921_v59  ;;  %4304 = vmatprep.subr.mxu1 %v10924_v48  ;;  %12962 = vst [vmem:[#allocation160_spill] sm:$0xff] %v10933_v32  ;;  %12963 = vst [vmem:[#allocation161_spill] sm:$0xff] %v10936_v16  ;;  %v10939_v59 = vld [vmem:[#allocation8 + $0x540] sm:$0xff]  ;;  %v10942_v48 = vld [vmem:[#allocation8 + $0x550] sm:$0xff] }
 0xa8c   :  { %4234 = vmatpush1.msra.mxu0 %v10927_v55  ;;  %4305 = vmatpush1.msra.mxu1 %v10930_v43  ;;  %v10945_v55 = vld [vmem:[#allocation8 + $0x528] sm:$0xff]  ;;  %v10948_v43 = vld [vmem:[#allocation8 + $0x538] sm:$0xff] }
 0xa8d   :  { %4235 = vmatprep.subr.mxu0 %v10933_v32  ;;  %4306 = vmatprep.subr.mxu1 %v10936_v16  ;;  %v10951_v32 = vld [vmem:[#allocation8 + $0x520] sm:$0xff]  ;;  %v10955_v16 = vld [vmem:[#allocation8 + $0x530] sm:$0xff] }
 0xa8e   :  { %4236 = vmatpush1.msra.mxu0 %v10939_v59  ;;  %4307 = vmatpush1.msra.mxu1 %v10942_v48 }
 0xa8f   :  { %4237 = vmatprep.subr.mxu0 %v10945_v55  ;;  %4308 = vmatprep.subr.mxu1 %v10948_v43 }
 0xa90   :  { %4238 = vmatpush1.msra.mxu0 %v10951_v32  ;;  %4271 = vmatprep.mubr.f32.mxu0 %v11999_v12 }
 0xa91   :  { %4309 = vmatpush1.msra.mxu1 %v10955_v16  ;;  %4342 = vmatprep.mubr.f32.mxu1 %v11999_v12 }
 0xa92   :  { %4272 = vmatmul.mubr.f32.vlgmr.msra.gmra.mxu0 %v10760_v44  ;;  %4343 = vmatmul.mubr.f32.vlgmr.msra.gmra.mxu1 %v10760_v44  ;;  %v12998_v44 = vld [vmem:[#allocation49_spill] sm:$0xff] }
 0xa93   :  { %4378 = vmatprep.subr.mxu0 %v10352_v14  ;;  %4449 = vmatprep.subr.mxu1 %v10355_v11  ;;  %v12964_v14 = vld [vmem:[#allocation112_spill] sm:$0xff]  ;;  %v12965_v11 = vld [vmem:[#allocation114_spill] sm:$0xff] }
 0xa94   :  { %4379 = vmatpush1.msra.mxu0 %v10358_v60  ;;  %4450 = vmatpush1.msra.mxu1 %v10361_v62  ;;  %v12966_v60 = vld [vmem:[#allocation115_spill] sm:$0xff]  ;;  %v12967_v62 = vld [vmem:[#allocation113_spill] sm:$0xff] }
 0xa95   :  { %4380 = vmatprep.subr.mxu0 %v10364_v6  ;;  %4451 = vmatprep.subr.mxu1 %v10367_v51  ;;  %v12968_v6 = vld [vmem:[#allocation19_spill] sm:$0xff]  ;;  %v12969_v51 = vld [vmem:[#allocation20_spill] sm:$0xff] }
 0xa96   :  { %4381 = vmatpush1.msra.mxu0 %v10370_v3  ;;  %4452 = vmatpush1.msra.mxu1 %v10373_v20  ;;  %v12970_v3 = vld [vmem:[#allocation21_spill] sm:$0xff]  ;;  %v12971_v20 = vld [vmem:[#allocation22_spill] sm:$0xff] }
 0xa97   :  { %4382 = vmatprep.subr.mxu0 %v10376_v5  ;;  %4453 = vmatprep.subr.mxu1 %v10379_v15  ;;  %v12972_v5 = vld [vmem:[#allocation23_spill] sm:$0xff]  ;;  %v12973_v15 = vld [vmem:[#allocation24_spill] sm:$0xff] }
 0xa98   :  { %4383 = vmatpush1.msra.mxu0 %v10382_v22  ;;  %4454 = vmatpush1.msra.mxu1 %v10385_v19  ;;  %v12974_v22 = vld [vmem:[#allocation25_spill] sm:$0xff]  ;;  %v12975_v19 = vld [vmem:[#allocation26_spill] sm:$0xff] }
 0xa99   :  { %4384 = vmatprep.subr.mxu0 %v10388_v52  ;;  %4455 = vmatprep.subr.mxu1 %v10391_v9  ;;  %v12976_v52 = vld [vmem:[#allocation27_spill] sm:$0xff]  ;;  %v12977_v9 = vld [vmem:[#allocation28_spill] sm:$0xff] }
 0xa9a   :  { %4385 = vmatpush1.msra.mxu0 %v10394_v61  ;;  %4456 = vmatpush1.msra.mxu1 %v10397_v33  ;;  %v12978_v61 = vld [vmem:[#allocation29_spill] sm:$0xff]  ;;  %v12979_v33 = vld [vmem:[#allocation30_spill] sm:$0xff] }
 0xa9b   :  { %4386 = vmatprep.subr.mxu0 %v10400_v31  ;;  %4457 = vmatprep.subr.mxu1 %v10403_v21  ;;  %v12980_v31 = vld [vmem:[#allocation31_spill] sm:$0xff]  ;;  %v12981_v21 = vld [vmem:[#allocation32_spill] sm:$0xff] }
 0xa9c   :  { %4387 = vmatpush1.msra.mxu0 %v10406_v35  ;;  %4458 = vmatpush1.msra.mxu1 %v10409_v39  ;;  %v12982_v35 = vld [vmem:[#allocation33_spill] sm:$0xff]  ;;  %v12983_v39 = vld [vmem:[#allocation34_spill] sm:$0xff] }
 0xa9d   :  { %4388 = vmatprep.subr.mxu0 %v10412_v30  ;;  %4459 = vmatprep.subr.mxu1 %v10415_v58  ;;  %v12984_v30 = vld [vmem:[#allocation35_spill] sm:$0xff]  ;;  %v12985_v58 = vld [vmem:[#allocation36_spill] sm:$0xff] }
 0xa9e   :  { %4389 = vmatpush1.msra.mxu0 %v10418_v27  ;;  %4460 = vmatpush1.msra.mxu1 %v10421_v8  ;;  %v12986_v27 = vld [vmem:[#allocation37_spill] sm:$0xff]  ;;  %v12987_v8 = vld [vmem:[#allocation38_spill] sm:$0xff] }
 0xa9f   :  { %4390 = vmatprep.subr.mxu0 %v10424_v13  ;;  %4461 = vmatprep.subr.mxu1 %v10427_v47  ;;  %v12988_v13 = vld [vmem:[#allocation39_spill] sm:$0xff]  ;;  %v12989_v47 = vld [vmem:[#allocation40_spill] sm:$0xff] }
 0xaa0   :  { %4391 = vmatpush1.msra.mxu0 %v10430_v29  ;;  %4462 = vmatpush1.msra.mxu1 %v10433_v37  ;;  %v12990_v29 = vld [vmem:[#allocation41_spill] sm:$0xff]  ;;  %v12991_v37 = vld [vmem:[#allocation42_spill] sm:$0xff] }
 0xaa1   :  { %4392 = vmatprep.subr.mxu0 %v10436_v38  ;;  %4463 = vmatprep.subr.mxu1 %v10439_v57  ;;  %v12992_v38 = vld [vmem:[#allocation43_spill] sm:$0xff]  ;;  %v12993_v57 = vld [vmem:[#allocation44_spill] sm:$0xff] }
 0xaa2   :  { %4393 = vmatpush1.msra.mxu0 %v10442_v1  ;;  %4464 = vmatpush1.msra.mxu1 %v10445_v25  ;;  %v12994_v1 = vld [vmem:[#allocation45_spill] sm:$0xff]  ;;  %v12995_v25 = vld [vmem:[#allocation46_spill] sm:$0xff] }
 0xaa3   :  { %4394 = vmatprep.subr.mxu0 %v10448_v4  ;;  %4465 = vmatprep.subr.mxu1 %v10451_v24  ;;  %v12996_v4 = vld [vmem:[#allocation47_spill] sm:$0xff]  ;;  %v12997_v24 = vld [vmem:[#allocation48_spill] sm:$0xff] }
 0xaa4   :  { %4395 = vmatpush1.msra.mxu0 %v12964_v14  ;;  %4466 = vmatpush1.msra.mxu1 %v12965_v11  ;;  %v12999_v14 = vld [vmem:[#allocation50_spill] sm:$0xff]  ;;  %v13000_v11 = vld [vmem:[#allocation51_spill] sm:$0xff] }
 0xaa5   :  { %4396 = vmatprep.subr.mxu0 %v12966_v60  ;;  %4467 = vmatprep.subr.mxu1 %v12967_v62  ;;  %v13001_v60 = vld [vmem:[#allocation52_spill] sm:$0xff]  ;;  %v13002_v62 = vld [vmem:[#allocation53_spill] sm:$0xff] }
 0xaa6   :  { %4397 = vmatpush1.msra.mxu0 %v12968_v6  ;;  %4468 = vmatpush1.msra.mxu1 %v12969_v51  ;;  %v13003_v6 = vld [vmem:[#allocation54_spill] sm:$0xff]  ;;  %v13005_v51 = vld [vmem:[#allocation56_spill] sm:$0xff] }
 0xaa7   :  { %4398 = vmatprep.subr.mxu0 %v12970_v3  ;;  %4469 = vmatprep.subr.mxu1 %v12971_v20  ;;  %v13006_v3 = vld [vmem:[#allocation57_spill] sm:$0xff]  ;;  %v13007_v20 = vld [vmem:[#allocation58_spill] sm:$0xff] }
 0xaa8   :  { %4399 = vmatpush1.msra.mxu0 %v12972_v5  ;;  %4470 = vmatpush1.msra.mxu1 %v12973_v15  ;;  %v13008_v5 = vld [vmem:[#allocation59_spill] sm:$0xff]  ;;  %v13009_v15 = vld [vmem:[#allocation60_spill] sm:$0xff] }
 0xaa9   :  { %4400 = vmatprep.subr.mxu0 %v12974_v22  ;;  %4471 = vmatprep.subr.mxu1 %v12975_v19  ;;  %v13010_v22 = vld [vmem:[#allocation61_spill] sm:$0xff]  ;;  %v13011_v19 = vld [vmem:[#allocation62_spill] sm:$0xff] }
 0xaaa   :  { %4401 = vmatpush1.msra.mxu0 %v12976_v52  ;;  %4472 = vmatpush1.msra.mxu1 %v12977_v9  ;;  %v13012_v52 = vld [vmem:[#allocation63_spill] sm:$0xff]  ;;  %v13013_v9 = vld [vmem:[#allocation64_spill] sm:$0xff] }
 0xaab   :  { %4402 = vmatprep.subr.mxu0 %v12978_v61  ;;  %4473 = vmatprep.subr.mxu1 %v12979_v33  ;;  %v13014_v61 = vld [vmem:[#allocation65_spill] sm:$0xff]  ;;  %v13015_v33 = vld [vmem:[#allocation66_spill] sm:$0xff] }
 0xaac   :  { %4403 = vmatpush1.msra.mxu0 %v12980_v31  ;;  %4474 = vmatpush1.msra.mxu1 %v12981_v21  ;;  %v13016_v31 = vld [vmem:[#allocation67_spill] sm:$0xff]  ;;  %v13017_v21 = vld [vmem:[#allocation68_spill] sm:$0xff] }
 0xaad   :  { %4404 = vmatprep.subr.mxu0 %v12982_v35  ;;  %4475 = vmatprep.subr.mxu1 %v12983_v39  ;;  %v13018_v35 = vld [vmem:[#allocation69_spill] sm:$0xff]  ;;  %v13019_v39 = vld [vmem:[#allocation70_spill] sm:$0xff] }
 0xaae   :  { %4405 = vmatpush1.msra.mxu0 %v12984_v30  ;;  %4476 = vmatpush1.msra.mxu1 %v12985_v58  ;;  %v13020_v30 = vld [vmem:[#allocation71_spill] sm:$0xff]  ;;  %v13021_v58 = vld [vmem:[#allocation72_spill] sm:$0xff] }
 0xaaf   :  { %4406 = vmatprep.subr.mxu0 %v12986_v27  ;;  %4477 = vmatprep.subr.mxu1 %v12987_v8  ;;  %v13022_v27 = vld [vmem:[#allocation73_spill] sm:$0xff]  ;;  %v13023_v8 = vld [vmem:[#allocation74_spill] sm:$0xff] }
 0xab0   :  { %4407 = vmatpush1.msra.mxu0 %v12988_v13  ;;  %4478 = vmatpush1.msra.mxu1 %v12989_v47  ;;  %v13024_v13 = vld [vmem:[#allocation75_spill] sm:$0xff]  ;;  %v13025_v47 = vld [vmem:[#allocation76_spill] sm:$0xff] }
 0xab1   :  { %4408 = vmatprep.subr.mxu0 %v12990_v29  ;;  %4479 = vmatprep.subr.mxu1 %v12991_v37  ;;  %v13026_v29 = vld [vmem:[#allocation77_spill] sm:$0xff]  ;;  %v13027_v37 = vld [vmem:[#allocation78_spill] sm:$0xff] }
 0xab2   :  { %4409 = vmatpush1.msra.mxu0 %v12992_v38  ;;  %4442 = vmatprep.mubr.f32.mxu0 %v11999_v12  ;;  %v13028_v38 = vld [vmem:[#allocation79_spill] sm:$0xff] }
 0xab3   :  { %4480 = vmatpush1.msra.mxu1 %v12993_v57  ;;  %4513 = vmatprep.mubr.f32.mxu1 %v11999_v12  ;;  %v13029_v57 = vld [vmem:[#allocation80_spill] sm:$0xff] }
 0xab4   :  { %4443 = vmatmul.mubr.f32.vlgmr.msra.gmra.mxu0 %v10767_v45  ;;  %4514 = vmatmul.mubr.f32.vlgmr.msra.gmra.mxu1 %v10767_v45  ;;  %v13004_v45 = vld [vmem:[#allocation55_spill] sm:$0xff] }
 0xab5   :  { %4566 = vmatprep.subr.mxu0 %v12994_v1  ;;  %4637 = vmatprep.subr.mxu1 %v12995_v25  ;;  %v13030_v1 = vld [vmem:[#allocation81_spill] sm:$0xff]  ;;  %v13031_v25 = vld [vmem:[#allocation82_spill] sm:$0xff] }
 0xab6   :  { %4567 = vmatpush1.msra.mxu0 %v12996_v4  ;;  %4638 = vmatpush1.msra.mxu1 %v12997_v24  ;;  %v13032_v4 = vld [vmem:[#allocation83_spill] sm:$0xff]  ;;  %v13033_v24 = vld [vmem:[#allocation84_spill] sm:$0xff] }
 0xab7   :  { %4568 = vmatprep.subr.mxu0 %v12998_v44  ;;  %4639 = vmatprep.subr.mxu1 %v12999_v14  ;;  %v13034_v44 = vld [vmem:[#allocation85_spill] sm:$0xff]  ;;  %v13035_v14 = vld [vmem:[#allocation86_spill] sm:$0xff] }
 0xab8   :  { %4569 = vmatpush1.msra.mxu0 %v13000_v11  ;;  %4640 = vmatpush1.msra.mxu1 %v13001_v60  ;;  %v13036_v11 = vld [vmem:[#allocation87_spill] sm:$0xff]  ;;  %v13037_v60 = vld [vmem:[#allocation88_spill] sm:$0xff] }
 0xab9   :  { %4570 = vmatprep.subr.mxu0 %v13002_v62  ;;  %4641 = vmatprep.subr.mxu1 %v13003_v6  ;;  %v13038_v62 = vld [vmem:[#allocation89_spill] sm:$0xff]  ;;  %v13039_v6 = vld [vmem:[#allocation90_spill] sm:$0xff] }
 0xaba   :  { %4571 = vmatpush1.msra.mxu0 %v13004_v45  ;;  %4642 = vmatpush1.msra.mxu1 %v13005_v51  ;;  %v13040_v45 = vld [vmem:[#allocation91_spill] sm:$0xff]  ;;  %v13041_v51 = vld [vmem:[#allocation92_spill] sm:$0xff] }
 0xabb   :  { %4572 = vmatprep.subr.mxu0 %v13006_v3  ;;  %4643 = vmatprep.subr.mxu1 %v13007_v20  ;;  %v13042_v3 = vld [vmem:[#allocation93_spill] sm:$0xff]  ;;  %v13043_v20 = vld [vmem:[#allocation94_spill] sm:$0xff] }
 0xabc   :  { %4573 = vmatpush1.msra.mxu0 %v13008_v5  ;;  %4644 = vmatpush1.msra.mxu1 %v13009_v15  ;;  %v13044_v5 = vld [vmem:[#allocation95_spill] sm:$0xff]  ;;  %v13045_v15 = vld [vmem:[#allocation96_spill] sm:$0xff] }
 0xabd   :  { %4574 = vmatprep.subr.mxu0 %v13010_v22  ;;  %4645 = vmatprep.subr.mxu1 %v13011_v19  ;;  %v13046_v22 = vld [vmem:[#allocation97_spill] sm:$0xff]  ;;  %v13047_v19 = vld [vmem:[#allocation98_spill] sm:$0xff] }
 0xabe   :  { %4575 = vmatpush1.msra.mxu0 %v13012_v52  ;;  %4646 = vmatpush1.msra.mxu1 %v13013_v9  ;;  %v13048_v52 = vld [vmem:[#allocation99_spill] sm:$0xff]  ;;  %v13049_v9 = vld [vmem:[#allocation100_spill] sm:$0xff] }
 0xabf   :  { %4576 = vmatprep.subr.mxu0 %v13014_v61  ;;  %4647 = vmatprep.subr.mxu1 %v13015_v33  ;;  %v13050_v61 = vld [vmem:[#allocation101_spill] sm:$0xff]  ;;  %v13051_v33 = vld [vmem:[#allocation102_spill] sm:$0xff] }
 0xac0   :  { %4577 = vmatpush1.msra.mxu0 %v13016_v31  ;;  %4648 = vmatpush1.msra.mxu1 %v13017_v21  ;;  %v13052_v31 = vld [vmem:[#allocation103_spill] sm:$0xff]  ;;  %v13053_v21 = vld [vmem:[#allocation104_spill] sm:$0xff] }
 0xac1   :  { %4578 = vmatprep.subr.mxu0 %v13018_v35  ;;  %4649 = vmatprep.subr.mxu1 %v13019_v39  ;;  %v13054_v35 = vld [vmem:[#allocation105_spill] sm:$0xff]  ;;  %v13055_v39 = vld [vmem:[#allocation106_spill] sm:$0xff] }
 0xac2   :  { %4579 = vmatpush1.msra.mxu0 %v13020_v30  ;;  %4650 = vmatpush1.msra.mxu1 %v13021_v58  ;;  %v13056_v30 = vld [vmem:[#allocation107_spill] sm:$0xff]  ;;  %v13057_v58 = vld [vmem:[#allocation108_spill] sm:$0xff] }
 0xac3   :  { %4580 = vmatprep.subr.mxu0 %v13022_v27  ;;  %4651 = vmatprep.subr.mxu1 %v13023_v8  ;;  %v13058_v27 = vld [vmem:[#allocation116_spill] sm:$0xff]  ;;  %v13059_v8 = vld [vmem:[#allocation117_spill] sm:$0xff] }
 0xac4   :  { %4581 = vmatpush1.msra.mxu0 %v13024_v13  ;;  %4652 = vmatpush1.msra.mxu1 %v13025_v47 }
 0xac5   :  { %4582 = vmatprep.subr.mxu0 %v13026_v29  ;;  %4653 = vmatprep.subr.mxu1 %v13027_v37  ;;  %v13060_v29 = vld [vmem:[#allocation18_spill] sm:$0xff] }
 0xac6   :  { %4583 = vmatpush1.msra.mxu0 %v13028_v38  ;;  %4654 = vmatpush1.msra.mxu1 %v13029_v57 }
 0xac7   :  { %4584 = vmatprep.subr.mxu0 %v13030_v1  ;;  %4655 = vmatprep.subr.mxu1 %v13031_v25 }
 0xac8   :  { %4585 = vmatpush1.msra.mxu0 %v13032_v4  ;;  %4656 = vmatpush1.msra.mxu1 %v13033_v24 }
 0xac9   :  { %4586 = vmatprep.subr.mxu0 %v13034_v44  ;;  %4657 = vmatprep.subr.mxu1 %v13035_v14 }
 0xaca   :  { %4587 = vmatpush1.msra.mxu0 %v13036_v11  ;;  %4658 = vmatpush1.msra.mxu1 %v13037_v60 }
 0xacb   :  { %4588 = vmatprep.subr.mxu0 %v13038_v62  ;;  %4659 = vmatprep.subr.mxu1 %v13039_v6 }
 0xacc   :  { %4589 = vmatpush1.msra.mxu0 %v13040_v45  ;;  %4660 = vmatpush1.msra.mxu1 %v13041_v51 }
 0xacd   :  { %4590 = vmatprep.subr.mxu0 %v13042_v3  ;;  %4661 = vmatprep.subr.mxu1 %v13043_v20 }
 0xace   :  { %4591 = vmatpush1.msra.mxu0 %v13044_v5  ;;  %4662 = vmatpush1.msra.mxu1 %v13045_v15 }
 0xacf   :  { %4592 = vmatprep.subr.mxu0 %v13046_v22  ;;  %4663 = vmatprep.subr.mxu1 %v13047_v19 }
 0xad0   :  { %4593 = vmatpush1.msra.mxu0 %v13048_v52  ;;  %4664 = vmatpush1.msra.mxu1 %v13049_v9 }
 0xad1   :  { %4594 = vmatprep.subr.mxu0 %v13050_v61  ;;  %4665 = vmatprep.subr.mxu1 %v13051_v33 }
 0xad2   :  { %4595 = vmatpush1.msra.mxu0 %v13052_v31  ;;  %4666 = vmatpush1.msra.mxu1 %v13053_v21 }
 0xad3   :  { %4596 = vmatprep.subr.mxu0 %v13054_v35  ;;  %4667 = vmatprep.subr.mxu1 %v13055_v39 }
 0xad4   :  { %4597 = vmatpush1.msra.mxu0 %v13056_v30  ;;  %4668 = vmatpush1.msra.mxu1 %v13057_v58 }
 0xad5   :  { %4630 = vmatprep.mubr.f32.mxu0 %v11999_v12  ;;  %4701 = vmatprep.mubr.f32.mxu1 %v11999_v12 }
 0xad6   :  { %4708 = vmatprep.subr.mxu0 %v13058_v27  ;;  %4779 = vmatprep.subr.mxu1 %v13059_v8 }
 0xb31   :  { %v4131_v13 = vpop.f32.mrf.mxu0  ;;  %v4202_v38 = vpop.f32.mrf.mxu1 }
 0xb32   :  { %v4132_v37 = vadd.f32 %v4131_v13, %v13060_v29  ;;  %v4203_v51 = vadd.f32 %v4202_v38, %v8597_v53 }
 0xb33   :  { %v4133_v47 = vpop.f32.mrf.mxu0  ;;  %v4204_v24 = vpop.f32.mrf.mxu1 }
 0xb34   :  { %v4134_v1 = vadd.f32 %v4133_v47, %v8586_v34  ;;  %v4205_v6 = vadd.f32 %v4204_v24, %v8592_v49 }
 0xb52   :  { %v4273_v57 = vpop.f32.mrf.mxu0  ;;  %v4344_v11 = vpop.f32.mrf.mxu1 }
 0xb53   :  { %v4349_v25 = vadd.f32 %v4273_v57, %v4132_v37  ;;  %v4351_v5 = vadd.f32 %v4344_v11, %v4203_v51 }
 0xb54   :  { %v4275_v4 = vpop.f32.mrf.mxu0  ;;  %v4346_v62 = vpop.f32.mrf.mxu1 }
 0xb55   :  { %v6556_v44 = vmul.f32 -1.442695, %v4349_v25  ;;  %v4350_v14 = vadd.f32 %v4275_v4, %v4134_v1  ;;  %v4352_v45 = vadd.f32 %v4346_v62, %v4205_v6 }
 0xb57   :  { %6939 = vpow2.f32 %v6556_v44  ;;  %v6557_v60 = vmul.f32 -1.442695, %v4350_v14  ;;  %v6558_v3 = vmul.f32 -1.442695, %v4352_v45 }
 0xb59   :  { %6941 = vpow2.f32 %v6557_v60 }
 0xb5a   :  { %6943 = vpow2.f32 %v6558_v3  ;;  %v4556_v3 = vrot.slane %v10764_v7, 6  ;;  %v13061_v7 = vld [vmem:[#allocation118_spill] sm:$0xff] }
 0xb64   :  { %v6940_v20 = vpop.eup %6939 }
 0xb65   :  { %v4356_v15 = vadd.f32 1.0, %v6940_v20 }
 0xb66   :  { %v6942_v22 = vpop.eup %6941 }
 0xb67   :  { %6945 = vrcp.f32 %v4356_v15  ;;  %v4362_v19 = vadd.f32 1.0, %v6942_v22  ;;  %v6944_v52 = vpop.eup %6943 }
 0xb68   :  { %6947 = vtanh.f32 %v4351_v5  ;;  %v4369_v35 = vadd.f32 1.0, %v6944_v52 }
 0xb69   :  { %6949 = vrcp.f32 %v4362_v19 }
 0xb6a   :  { %6951 = vrcp.f32 %v4369_v35  ;;  %v13077_v35 = vld [vmem:[#allocation134_spill] sm:$0xff] }
 0xb74   :  { %v6946_v9 = vpop.eup %6945  ;;  %v4444_v61 = vpop.f32.mrf.mxu0 }
 0xb75   :  { %v6948_v33 = vpop.eup %6947  ;;  %v4524_v31 = vrot.slane %v4444_v61, 2  ;;  %v4515_v8 = vpop.f32.mrf.mxu1 }
 0xb76   :  { %v6950_v21 = vpop.eup %6949  ;;  %v4446_v39 = vpop.f32.mrf.mxu0  ;;  %v4373_v30 = vmul.f32 %v6948_v33, %v6946_v9  ;;  %v13074_v33 = vld [vmem:[#allocation131_spill] sm:$0xff] }
 0xb77   :  { %v4372_v58 = vmul.f32 %v6950_v21, %v10754_v54  ;;  %v4532_v27 = vadd.f32 %v4524_v31, %v12631_v36  ;;  %v4525_v13 = vrot.slane %v4446_v39, 2  ;;  %v4517_v1 = vpop.f32.mrf.mxu1  ;;  %v4526_v54 = vrot.slane %v4515_v8, 2  ;;  %v6952_v36 = vpop.eup %6951  ;;  %v13075_v31 = vld [vmem:[#allocation132_spill] sm:$0xff]  ;;  %v13076_v21 = vld [vmem:[#allocation133_spill] sm:$0xff]  ;;  %v13078_v39 = vld [vmem:[#allocation135_spill] sm:$0xff] }
 0xb78   :  { %v4527_v25 = vrot.slane %v4517_v1, 2  ;;  %v13082_v8 = vld [vmem:[#allocation139_spill] sm:$0xff]  ;;  %v13087_v1 = vld [vmem:[#allocation144_spill] sm:$0xff] }
 0xb79   :  { %v11103_v47 = vadd.f32 %v4373_v30, %v4372_v58  ;;  %v6559_v37 = vmul.f32 -1.442695, %v4532_v27  ;;  %v4533_v38 = vadd.f32 %v4525_v13, %v12632_v18  ;;  %v4534_v14 = vadd.f32 %v4526_v54, %v12634_v2  ;;  %v13079_v30 = vld [vmem:[#allocation136_spill] sm:$0xff]  ;;  %v13080_v58 = vld [vmem:[#allocation137_spill] sm:$0xff]  ;;  %v13081_v27 = vld [vmem:[#allocation138_spill] sm:$0xff] }
 0xb7a   :  { %v4535_v4 = vadd.f32 %v4527_v25, %v12633_v0  ;;  %v13083_v13 = vld [vmem:[#allocation140_spill] sm:$0xff]  ;;  %v13088_v25 = vld [vmem:[#allocation145_spill] sm:$0xff]  ;;  %v13090_v54 = vld [vmem:[#allocation147_spill] sm:$0xff] }
 0xb7b   :  { %6953 = vpow2.f32 %v6559_v37  ;;  %v6560_v57 = vmul.f32 -1.442695, %v4533_v38  ;;  %v13084_v37 = vld [vmem:[#allocation141_spill] sm:$0xff]  ;;  %v13085_v38 = vld [vmem:[#allocation142_spill] sm:$0xff] }
 0xb7c   :  { %6955 = vtanh.f32 %v11103_v47  ;;  %v6561_v24 = vmul.f32 -1.442695, %v4535_v4  ;;  %v13089_v4 = vld [vmem:[#allocation146_spill] sm:$0xff] }
 0xb7d   :  { %6957 = vpow2.f32 %v6560_v57  ;;  %v13086_v57 = vld [vmem:[#allocation143_spill] sm:$0xff] }
 0xb7e   :  { %6959 = vpow2.f32 %v6561_v24  ;;  %v13091_v24 = vld [vmem:[#allocation148_spill] sm:$0xff] }
 0xb88   :  { %v6954_v44 = vpop.eup %6953 }
 0xb89   :  { %v6956_v11 = vpop.eup %6955  ;;  %v4539_v60 = vadd.f32 1.0, %v6954_v44  ;;  %v13093_v44 = vld [vmem:[#allocation150_spill] sm:$0xff] }
 0xb8a   :  { %v6958_v62 = vpop.eup %6957  ;;  %v11109_v18 = vmul.f32 %v6956_v11, %v6952_v36  ;;  %v13092_v36 = vld [vmem:[#allocation149_spill] sm:$0xff]  ;;  %v13095_v11 = vld [vmem:[#allocation152_spill] sm:$0xff] }
 0xb8b   :  { %6961 = vrcp.f32 %v4539_v60  ;;  %v4545_v6 = vadd.f32 1.0, %v6958_v62  ;;  %v6960_v45 = vpop.eup %6959  ;;  %v13096_v60 = vld [vmem:[#allocation153_spill] sm:$0xff]  ;;  %v13097_v62 = vld [vmem:[#allocation154_spill] sm:$0xff] }
 0xb8c   :  { %6963 = vtanh.f32 %v4534_v14  ;;  %4377 = vst [vmem:[#allocation3 + $0xc] sm:$0x3] %v11109_v18  ;;  %v4552_v5 = vadd.f32 1.0, %v6960_v45  ;;  %v13094_v14 = vld [vmem:[#allocation151_spill] sm:$0xff]  ;;  %v13099_v45 = vld [vmem:[#allocation156_spill] sm:$0xff] }
 0xb8d   :  { %6965 = vrcp.f32 %v4545_v6  ;;  %v13098_v6 = vld [vmem:[#allocation155_spill] sm:$0xff] }
 0xb8e   :  { %6967 = vrcp.f32 %v4552_v5  ;;  %v13104_v5 = vld [vmem:[#allocation161_spill] sm:$0xff] }
 0xb98   :  { %v6962_v0 = vpop.eup %6961 }
 0xb99   :  { %v6964_v51 = vpop.eup %6963 }
 0xb9a   :  { %v6966_v20 = vpop.eup %6965  ;;  %v4559_v2 = vmul.f32 %v6964_v51, %v6962_v0  ;;  %v13100_v0 = vld [vmem:[#allocation157_spill] sm:$0xff]  ;;  %v13101_v51 = vld [vmem:[#allocation158_spill] sm:$0xff] }
 0xb9b   :  { %v4558_v15 = vmul.f32 %v6966_v20, %v4556_v3  ;;  %v6968_v19 = vpop.eup %6967  ;;  %v13102_v3 = vld [vmem:[#allocation159_spill] sm:$0xff]  ;;  %v13103_v20 = vld [vmem:[#allocation160_spill] sm:$0xff] }
 0xb9d   :  { %v4560_v22 = vadd.f32 %v4559_v2, %v4558_v15 }
 0xb9f   :  { %6969 = vtanh.f32 %v4560_v22 }
 0xbac   :  { %v6970_v52 = vpop.eup %6969 }
 0xbad   :  { %v4562_v9 = vmul.f32 %v6970_v52, %v6968_v19 }
 0xbaf   :  { %v4564_v61 = vrot.slane %v4562_v9, 6 }
 0xbb1   :  { %4631 = vmatmul.mubr.f32.vlgmr.msra.gmra.mxu0 %v4564_v61  ;;  %4702 = vmatmul.mubr.f32.vlgmr.msra.gmra.mxu1 %v4564_v61 }
 0xbb2   :  { %4709 = vmatpush1.msra.mxu0 %v10771_v42  ;;  %4780 = vmatpush1.msra.mxu1 %v10774_v50  ;;  %v13062_v42 = vld [vmem:[#allocation119_spill] sm:$0xff]  ;;  %v13063_v50 = vld [vmem:[#allocation120_spill] sm:$0xff] }
 0xbb3   :  { %4710 = vmatprep.subr.mxu0 %v10777_v46  ;;  %4781 = vmatprep.subr.mxu1 %v10780_v56  ;;  %v13064_v46 = vld [vmem:[#allocation121_spill] sm:$0xff]  ;;  %v13065_v56 = vld [vmem:[#allocation122_spill] sm:$0xff] }
 0xbb4   :  { %4711 = vmatpush1.msra.mxu0 %v10783_v10  ;;  %4782 = vmatpush1.msra.mxu1 %v10786_v40  ;;  %v13066_v10 = vld [vmem:[#allocation123_spill] sm:$0xff]  ;;  %v13067_v40 = vld [vmem:[#allocation124_spill] sm:$0xff] }
 0xbb5   :  { %4712 = vmatprep.subr.mxu0 %v10789_v63  ;;  %4783 = vmatprep.subr.mxu1 %v10792_v17  ;;  %v13068_v63 = vld [vmem:[#allocation125_spill] sm:$0xff]  ;;  %v13069_v17 = vld [vmem:[#allocation126_spill] sm:$0xff] }
 0xbb6   :  { %4713 = vmatpush1.msra.mxu0 %v10795_v28  ;;  %4784 = vmatpush1.msra.mxu1 %v10798_v26  ;;  %v13070_v28 = vld [vmem:[#allocation127_spill] sm:$0xff]  ;;  %v13071_v26 = vld [vmem:[#allocation128_spill] sm:$0xff] }
 0xbb7   :  { %4714 = vmatprep.subr.mxu0 %v10801_v41  ;;  %4785 = vmatprep.subr.mxu1 %v10804_v23  ;;  %v13072_v41 = vld [vmem:[#allocation129_spill] sm:$0xff]  ;;  %v13073_v23 = vld [vmem:[#allocation130_spill] sm:$0xff] }
 0xbb8   :  { %4715 = vmatpush1.msra.mxu0 %v13061_v7  ;;  %4786 = vmatpush1.msra.mxu1 %v13062_v42 }
 0xbb9   :  { %4716 = vmatprep.subr.mxu0 %v13063_v50  ;;  %4787 = vmatprep.subr.mxu1 %v13064_v46 }
 0xbba   :  { %4717 = vmatpush1.msra.mxu0 %v13065_v56  ;;  %4788 = vmatpush1.msra.mxu1 %v13066_v10 }
 0xbbb   :  { %4718 = vmatprep.subr.mxu0 %v13067_v40  ;;  %4789 = vmatprep.subr.mxu1 %v13068_v63 }
 0xbbc   :  { %4719 = vmatpush1.msra.mxu0 %v13069_v17  ;;  %4790 = vmatpush1.msra.mxu1 %v13070_v28 }
 0xbbd   :  { %4720 = vmatprep.subr.mxu0 %v13071_v26  ;;  %4791 = vmatprep.subr.mxu1 %v13072_v41 }
 0xbbe   :  { %4721 = vmatpush1.msra.mxu0 %v13073_v23  ;;  %4792 = vmatpush1.msra.mxu1 %v13074_v33 }
 0xbbf   :  { %4722 = vmatprep.subr.mxu0 %v13075_v31  ;;  %4793 = vmatprep.subr.mxu1 %v13076_v21 }
 0xbc0   :  { %4723 = vmatpush1.msra.mxu0 %v13077_v35  ;;  %4794 = vmatpush1.msra.mxu1 %v13078_v39  ;;  %v4897_v35 = vld [vmem:[#allocation10] sm:$0xff] }
 0xbc1   :  { %4724 = vmatprep.subr.mxu0 %v13079_v30  ;;  %4795 = vmatprep.subr.mxu1 %v13080_v58  ;;  %v4901_v39 = vld [vmem:[%s11395_s5] sm:$0xff]  ;;  %v7684_v58 = vmov 0  }
 0xbc2   :  { %4725 = vmatpush1.msra.mxu0 %v13081_v27  ;;  %4796 = vmatpush1.msra.mxu1 %v13082_v8  ;;  %v5027_v30 = vld [vmem:[%s11395_s5 + $0x20] sm:$0xff]  ;;  %v4902_v27 = vld [vmem:[%s11395_s5 + $0x8] sm:$0xff] }
 0xbc3   :  { %4726 = vmatprep.subr.mxu0 %v13083_v13  ;;  %4797 = vmatprep.subr.mxu1 %v13084_v37  ;;  %v5055_v8 = vld [vmem:[%s11395_s5 + $0x40] sm:$0xff]  ;;  %v5222_v13 = vld [vmem:[#allocation11 + $0xf8] sm:$0xff]  ;;  %v5221_v37 = vld [vmem:[#allocation11 + $0xf0] sm:$0xff] }
 0xbc4   :  { %4727 = vmatpush1.msra.mxu0 %v13085_v38  ;;  %4798 = vmatpush1.msra.mxu1 %v13086_v57  ;;  %v5220_v38 = vld [vmem:[#allocation11 + $0xe8] sm:$0xff]  ;;  %v5219_v57 = vld [vmem:[#allocation11 + $0xe0] sm:$0xff] }
 0xbc5   :  { %4728 = vmatprep.subr.mxu0 %v13087_v1  ;;  %4799 = vmatprep.subr.mxu1 %v13088_v25  ;;  %v5218_v1 = vld [vmem:[#allocation11 + $0xd8] sm:$0xff]  ;;  %v5056_v25 = vld [vmem:[%s11395_s5 + $0x48] sm:$0xff] }
 0xbc6   :  { %4729 = vmatpush1.msra.mxu0 %v13089_v4  ;;  %4800 = vmatpush1.msra.mxu1 %v13090_v54  ;;  %v5028_v4 = vld [vmem:[%s11395_s5 + $0x28] sm:$0xff]  ;;  %v5217_v54 = vld [vmem:[#allocation11 + $0xd0] sm:$0xff] }
 0xbc7   :  { %4730 = vmatprep.subr.mxu0 %v13091_v24  ;;  %4801 = vmatprep.subr.mxu1 %v13092_v36  ;;  %v5216_v24 = vld [vmem:[#allocation11 + $0xc8] sm:$0xff]  ;;  %v5215_v36 = vld [vmem:[#allocation11 + $0xc0] sm:$0xff] }
 0xbc8   :  { %4731 = vmatpush1.msra.mxu0 %v13093_v44  ;;  %4802 = vmatpush1.msra.mxu1 %v13094_v14  ;;  %v5029_v44 = vld [vmem:[%s11395_s5 + $0x30] sm:$0xff] }
 0xbc9   :  { %4732 = vmatprep.subr.mxu0 %v13095_v11  ;;  %4803 = vmatprep.subr.mxu1 %v13096_v60  ;;  %v4903_v14 = vld [vmem:[%s11395_s5 + $0x10] sm:$0xff]  ;;  %v5214_v11 = vld [vmem:[#allocation11 + $0xb8] sm:$0xff] }
 0xbca   :  { %4733 = vmatpush1.msra.mxu0 %v13097_v62  ;;  %4804 = vmatpush1.msra.mxu1 %v13098_v6  ;;  %v5213_v60 = vld [vmem:[#allocation11 + $0xb0] sm:$0xff]  ;;  %v5212_v62 = vld [vmem:[#allocation11 + $0xa8] sm:$0xff]  ;;  %v4904_v6 = vld [vmem:[%s11395_s5 + $0x18] sm:$0xff] }
 0xbcb   :  { %4734 = vmatprep.subr.mxu0 %v13099_v45  ;;  %4805 = vmatprep.subr.mxu1 %v13100_v0  ;;  %v5057_v45 = vld [vmem:[%s11395_s5 + $0x50] sm:$0xff]  ;;  %v5211_v0 = vld [vmem:[#allocation11 + $0xa0] sm:$0xff] }
 0xbcc   :  { %4735 = vmatpush1.msra.mxu0 %v13101_v51  ;;  %4806 = vmatpush1.msra.mxu1 %v13102_v3  ;;  %v5210_v51 = vld [vmem:[#allocation11 + $0x98] sm:$0xff]  ;;  %v5209_v3 = vld [vmem:[#allocation11 + $0x90] sm:$0xff] }
 0xbcd   :  { %4736 = vmatprep.subr.mxu0 %v13103_v20  ;;  %4807 = vmatprep.subr.mxu1 %v13104_v5  ;;  %v5058_v20 = vld [vmem:[%s11395_s5 + $0x58] sm:$0xff] }
 0xbce   :  { %4737 = vmatpush1.msra.mxu0 %v10939_v59  ;;  %4808 = vmatpush1.msra.mxu1 %v10942_v48  ;;  %v5030_v5 = vld [vmem:[%s11395_s5 + $0x38] sm:$0xff] }
 0xbcf   :  { %4738 = vmatprep.subr.mxu0 %v10945_v55  ;;  %4809 = vmatprep.subr.mxu1 %v10948_v43 }
 0xbd0   :  { %4739 = vmatpush1.msra.mxu0 %v10951_v32  ;;  %4772 = vmatprep.mubr.f32.mxu0 %v11999_v12 }
 0xbd1   :  { %4810 = vmatpush1.msra.mxu1 %v10955_v16  ;;  %4843 = vmatprep.mubr.f32.mxu1 %v11999_v12 }
 0xbd2   :  { %4773 = vmatmul.mubr.f32.vlgmr.msra.gmra.mxu0 %v11109_v18  ;;  %4844 = vmatmul.mubr.f32.vlgmr.msra.gmra.mxu1 %v11109_v18 }
 0xbd3   :  { %6703 = vmatprep.mubr.msk.f32.mxu0 %vm4925_vm5, %v4897_v35  ;;  %6725 = vset.pattern.permute.xlu0 %v7684_v58  ;;  %v5280_v35 = vld [vmem:[#allocation11 + $0x2c8] sm:$0xff] }
 0xbd4   :  { %6726 = vset.pattern.permute.xlu1 %v7684_v58  ;;  %5804 = vmatprep.subr.mxu1 %v5222_v13  ;;  %v5276_v58 = vld [vmem:[#allocation11 + $0x2a8] sm:$0xff]  ;;  %v5273_v13 = vld [vmem:[#allocation11 + $0x290] sm:$0xff] }
 0xbd5   :  { %5805 = vmatpush1.msra.mxu1 %v5221_v37  ;;  %v5272_v37 = vld [vmem:[#allocation11 + $0x288] sm:$0xff] }
 0xbd6   :  { %5806 = vmatprep.subr.mxu1 %v5220_v38  ;;  %v5271_v38 = vld [vmem:[#allocation11 + $0x280] sm:$0xff] }
 0xbd7   :  { %5807 = vmatpush1.msra.mxu1 %v5219_v57  ;;  %v5270_v57 = vld [vmem:[#allocation11 + $0x278] sm:$0xff] }
 0xbd8   :  { %5808 = vmatprep.subr.mxu1 %v5218_v1  ;;  %v5269_v1 = vld [vmem:[#allocation11 + $0x270] sm:$0xff] }
 0xbd9   :  { %5809 = vmatpush1.msra.mxu1 %v5217_v54  ;;  %v5266_v54 = vld [vmem:[#allocation11 + $0x258] sm:$0xff] }
 0xbda   :  { %5810 = vmatprep.subr.mxu1 %v5216_v24  ;;  %v5265_v24 = vld [vmem:[#allocation11 + $0x250] sm:$0xff] }
 0xbdb   :  { %5811 = vmatpush1.msra.mxu1 %v5215_v36  ;;  %v5264_v36 = vld [vmem:[#allocation11 + $0x248] sm:$0xff] }
 0xbdc   :  { %5812 = vmatprep.subr.mxu1 %v5214_v11  ;;  %v5261_v11 = vld [vmem:[#allocation11 + $0x230] sm:$0xff] }
 0xbdd   :  { %5813 = vmatpush1.msra.mxu1 %v5213_v60  ;;  %v5260_v60 = vld [vmem:[#allocation11 + $0x228] sm:$0xff] }
 0xbde   :  { %5814 = vmatprep.subr.mxu1 %v5212_v62  ;;  %v5259_v62 = vld [vmem:[#allocation11 + $0x220] sm:$0xff] }
 0xbdf   :  { %5815 = vmatpush1.msra.mxu1 %v5211_v0  ;;  %v5256_v0 = vld [vmem:[#allocation11 + $0x208] sm:$0xff] }
 0xbe0   :  { %5816 = vmatprep.subr.mxu1 %v5210_v51  ;;  %v5255_v51 = vld [vmem:[#allocation11 + $0x200] sm:$0xff] }
 0xbe1   :  { %5817 = vmatpush1.msra.mxu1 %v5209_v3  ;;  %v5252_v3 = vld [vmem:[#allocation11 + $0x1e8] sm:$0xff] }
 0xc71   :  { %v4632_v2 = vpop.f32.mrf.mxu0  ;;  %v4703_v15 = vpop.f32.mrf.mxu1 }
 0xc72   :  { %v4633_v48 = vadd.f32 %v4632_v2, %v13060_v29  ;;  %v4704_v42 = vadd.f32 %v4703_v15, %v8597_v53  ;;  %v5208_v2 = vld [vmem:[#allocation11 + $0x88] sm:$0xff]  ;;  %v5205_v15 = vld [vmem:[#allocation11 + $0x70] sm:$0xff] }
 0xc73   :  { %v4634_v59 = vpop.f32.mrf.mxu0  ;;  %v4705_v19 = vpop.f32.mrf.mxu1  ;;  %5818 = vmatprep.subr.mxu1 %v5208_v2  ;;  %v5317_v2 = vld [vmem:[#allocation11 + $0x3f0] sm:$0xff] }
 0xc74   :  { %v4635_v43 = vadd.f32 %v4634_v59, %v8586_v34  ;;  %v4706_v18 = vadd.f32 %v4705_v19, %v8592_v49  ;;  %v5207_v59 = vld [vmem:[#allocation11 + $0x80] sm:$0xff]  ;;  %v5200_v19 = vld [vmem:[#allocation11 + $0x48] sm:$0xff] }
 0xc75   :  { %5819 = vmatpush1.msra.mxu1 %v5207_v59  ;;  %v5250_v59 = vld [vmem:[#allocation11 + $0x1d8] sm:$0xff] }
 0xc92   :  { %v4774_v55 = vpop.f32.mrf.mxu0  ;;  %v4845_v16 = vpop.f32.mrf.mxu1 }
 0xc93   :  { %v4850_v22 = vadd.f32 %v4774_v55, %v4633_v48  ;;  %v4852_v46 = vadd.f32 %v4845_v16, %v4704_v42  ;;  %v5206_v48 = vld [vmem:[#allocation11 + $0x78] sm:$0xff]  ;;  %v5204_v55 = vld [vmem:[#allocation11 + $0x68] sm:$0xff]  ;;  %v5197_v16 = vld [vmem:[#allocation11 + $0x30] sm:$0xff] }
 0xc94   :  { %v4776_v32 = vpop.f32.mrf.mxu0  ;;  %v4847_v61 = vpop.f32.mrf.mxu1  ;;  %5820 = vmatprep.subr.mxu1 %v5206_v48  ;;  %v5192_v42 = vld [vmem:[#allocation11 + $0x8] sm:$0xff] }
 0xc95   :  { %v6562_v52 = vmul.f32 -1.442695, %v4850_v22  ;;  %v4851_v9 = vadd.f32 %v4776_v32, %v4635_v43  ;;  %v4853_v7 = vadd.f32 %v4847_v61, %v4706_v18  ;;  %v5203_v43 = vld [vmem:[#allocation11 + $0x60] sm:$0xff]  ;;  %5821 = vmatpush1.msra.mxu1 %v5205_v15  ;;  %v5202_v22 = vld [vmem:[#allocation11 + $0x58] sm:$0xff]  ;;  %v5201_v32 = vld [vmem:[#allocation11 + $0x50] sm:$0xff] }
 0xc96   :  { %5822 = vmatprep.subr.mxu1 %v5204_v55  ;;  %v5195_v61 = vld [vmem:[#allocation11 + $0x20] sm:$0xff]  ;;  %v5194_v18 = vld [vmem:[#allocation11 + $0x18] sm:$0xff]  ;;  %v5316_v48 = vld [vmem:[#allocation11 + $0x3e8] sm:$0xff] }
 0xc97   :  { %6971 = vpow2.f32 %v6562_v52  ;;  %v6563_v12 = vmul.f32 -1.442695, %v4851_v9  ;;  %v6564_v29 = vmul.f32 -1.442695, %v4853_v7  ;;  %5823 = vmatpush1.msra.mxu1 %v5203_v43  ;;  %v5199_v52 = vld [vmem:[#allocation11 + $0x40] sm:$0xff]  ;;  %v5198_v9 = vld [vmem:[#allocation11 + $0x38] sm:$0xff] }
 0xc98   :  { %5824 = vmatprep.subr.mxu1 %v5202_v22  ;;  %v5193_v7 = vld [vmem:[#allocation11 + $0x10] sm:$0xff]  ;;  %v5315_v55 = vld [vmem:[#allocation11 + $0x3e0] sm:$0xff]  ;;  %v5248_v43 = vld [vmem:[#allocation11 + $0x1c8] sm:$0xff] }
 0xc99   :  { %6973 = vpow2.f32 %v6563_v12  ;;  %5825 = vmatpush1.msra.mxu1 %v5201_v32  ;;  %v5196_v12 = vld [vmem:[#allocation11 + $0x28] sm:$0xff]  ;;  %v5249_v15 = vld [vmem:[#allocation11 + $0x1d0] sm:$0xff]  ;;  %v5314_v22 = vld [vmem:[#allocation11 + $0x3d8] sm:$0xff] }
 0xc9a   :  { %6975 = vpow2.f32 %v6564_v29  ;;  %5826 = vmatprep.subr.mxu1 %v5200_v19  ;;  %v5191_v29 = vld [vmem:[#allocation11] sm:$0xff]  ;;  %v5313_v19 = vld [vmem:[#allocation11 + $0x3d0] sm:$0xff] }
 0xc9b   :  { %5827 = vmatpush1.msra.mxu1 %v5199_v52  ;;  %v5247_v32 = vld [vmem:[#allocation11 + $0x1c0] sm:$0xff]  ;;  %v5246_v52 = vld [vmem:[#allocation11 + $0x1b8] sm:$0xff] }
 0xc9c   :  { %5828 = vmatprep.subr.mxu1 %v5198_v9  ;;  %v5312_v9 = vld [vmem:[#allocation11 + $0x3c8] sm:$0xff] }
 0xc9d   :  { %5829 = vmatpush1.msra.mxu1 %v5197_v16  ;;  %v5245_v16 = vld [vmem:[#allocation11 + $0x1b0] sm:$0xff] }
 0xc9e   :  { %5830 = vmatprep.subr.mxu1 %v5196_v12  ;;  %v5311_v12 = vld [vmem:[#allocation11 + $0x3c0] sm:$0xff] }
 0xc9f   :  { %5831 = vmatpush1.msra.mxu1 %v5195_v61  ;;  %v5244_v61 = vld [vmem:[#allocation11 + $0x1a8] sm:$0xff] }
 0xca0   :  { %5832 = vmatprep.subr.mxu1 %v5194_v18  ;;  %v5310_v18 = vld [vmem:[#allocation11 + $0x3b8] sm:$0xff] }
 0xca1   :  { %5833 = vmatpush1.msra.mxu1 %v5193_v7  ;;  %v5243_v7 = vld [vmem:[#allocation11 + $0x1a0] sm:$0xff] }
 0xca2   :  { %5834 = vmatprep.subr.mxu1 %v5192_v42  ;;  %v5309_v42 = vld [vmem:[#allocation11 + $0x3b0] sm:$0xff] }
 0xca3   :  { %5835 = vmatpush1.msra.mxu1 %v5191_v29  ;;  %v5242_v29 = vld [vmem:[#allocation11 + $0x198] sm:$0xff] }
 0xca4   :  { %v6972_v50 = vpop.eup %6971 }
 0xca5   :  { %v4857_v56 = vadd.f32 1.0, %v6972_v50  ;;  %v5254_v50 = vld [vmem:[#allocation11 + $0x1f8] sm:$0xff] }
 0xca6   :  { %v6974_v34 = vpop.eup %6973  ;;  %5836 = vmatprep.subr.mxu1 %v5254_v50  ;;  %v5308_v50 = vld [vmem:[#allocation11 + $0x3a8] sm:$0xff] }
 0xca7   :  { %6977 = vrcp.f32 %v4857_v56  ;;  %v4863_v10 = vadd.f32 1.0, %v6974_v34  ;;  %v6976_v40 = vpop.eup %6975  ;;  %v13105_v56 = vlaneseq }
 0xca8   :  { %6979 = vtanh.f32 %v4852_v46  ;;  %v4870_v26 = vadd.f32 1.0, %v6976_v40  ;;  %v5253_v46 = vld [vmem:[#allocation11 + $0x1f0] sm:$0xff] }
 0xca9   :  { %6981 = vrcp.f32 %v4863_v10  ;;  %5837 = vmatpush2.msra.mxu1 %v5253_v46  ;;  %v4882_v34 = vand.u32 127, %v13105_v56  ;;  %v5241_v46 = vld [vmem:[#allocation11 + $0x190] sm:$0xff]  ;;  %v5307_v56 = vld [vmem:[#allocation11 + $0x3a0] sm:$0xff] }
 0xcaa   :  { %6983 = vrcp.f32 %v4870_v26  ;;  %v5286_v26 = vld [vmem:[#allocation11 + $0x2f8] sm:$0xff]  ;;  %5838 = vmatprep.subr.mxu1 %v5252_v3 }
 0xcab   :  { %vm6582_vm6 = vcmp.ne.s32.totalorder %v4882_v34, 127  ;;  %vm6583_vm7 = vcmp.ne.s32.totalorder %v4882_v34, 0  ;;  %v5240_v34 = vld [vmem:[#allocation11 + $0x188] sm:$0xff] }
 0xcb4   :  { %v6978_v63 = vpop.eup %6977 }
 0xcb5   :  { %v6980_v17 = vpop.eup %6979 }
 0xcb6   :  { %v6982_v28 = vpop.eup %6981  ;;  %v4874_v41 = vmul.f32 %v6980_v17, %v6978_v63 }
 0xcb7   :  { %v4873_v49 = vmul.f32 %v6982_v28, %v11103_v47  ;;  %v6984_v53 = vpop.eup %6983  ;;  %v11189_v47 = vld [vmem:[#allocation3] sm:$0xff]  ;;  %v4898_v28 = vld [vmem:[#allocation10 + $0x8] sm:$0xff] }
 0xcb9   :  { %v4875_v23 = vadd.f32 %v4874_v41, %v4873_v49  ;;  %v4899_v41 = vld [vmem:[#allocation10 + $0x10] sm:$0xff] }
 0xcba   :  { %v5285_v49 = vld [vmem:[#allocation11 + $0x2f0] sm:$0xff] }
 0xcbb   :  { %6985 = vtanh.f32 %v4875_v23  ;;  %v5284_v23 = vld [vmem:[#allocation11 + $0x2e8] sm:$0xff] }
 0xcc8   :  { %v6986_v33 = vpop.eup %6985 }
 0xcc9   :  { %v4877_v31 = vmul.f32 %v6986_v33, %v6984_v53  ;;  %v5283_v53 = vld [vmem:[#allocation11 + $0x2e0] sm:$0xff]  ;;  %v4900_v33 = vld [vmem:[#allocation10 + $0x18] sm:$0xff] }
 0xccb   :  { %4878 = vst [vmem:[#allocation3 + $0xe] sm:$0x3] %v4877_v31  ;;  %v5282_v31 = vld [vmem:[#allocation11 + $0x2d8] sm:$0xff] }
 0xcd2   :  { %v11184_v21 = vld [vmem:[#allocation3 + $0x8] sm:$0xff] }
 0xcd3   :  { %4886 = vrot.lane.b32.xlu1 %v11184_v21, %s7682_s2  ;;  %4893 = vrot.lane.b32.xlu0 %v11184_v21, %s7683_s12 }
 0xcd7   :  { %4884 = vrot.lane.b32.xlu1 %v11189_v47, %s7682_s2  ;;  %4891 = vrot.lane.b32.xlu0 %v11189_v47, %s7683_s12 }
 0xcdb   :  { %4907 = vperm.xlu0 %6725, %v4901_v39   ;;  %5033 = vperm.xlu1 %6726, %v5027_v30   ;;  %v5278_v39 = vld [vmem:[#allocation11 + $0x2b8] sm:$0xff]  ;;  %v5277_v30 = vld [vmem:[#allocation11 + $0x2b0] sm:$0xff] }
 0xcdf   :  { %4912 = vperm.xlu0 %6725, %v4902_v27   ;;  %5061 = vperm.xlu1 %6726, %v5055_v8   ;;  %v5275_v27 = vld [vmem:[#allocation11 + $0x2a0] sm:$0xff]  ;;  %v5274_v8 = vld [vmem:[#allocation11 + $0x298] sm:$0xff] }
 0xce3   :  { %5066 = vperm.xlu0 %6725, %v5056_v25   ;;  %5038 = vperm.xlu1 %6726, %v5028_v4   ;;  %v5268_v25 = vld [vmem:[#allocation11 + $0x268] sm:$0xff]  ;;  %v5267_v4 = vld [vmem:[#allocation11 + $0x260] sm:$0xff] }
 0xce7   :  { %5043 = vperm.xlu0 %6725, %v5029_v44   ;;  %4917 = vperm.xlu1 %6726, %v4903_v14   ;;  %v5263_v44 = vld [vmem:[#allocation11 + $0x240] sm:$0xff]  ;;  %v5262_v14 = vld [vmem:[#allocation11 + $0x238] sm:$0xff] }
 0xceb   :  { %4922 = vperm.xlu0 %6725, %v4904_v6   ;;  %5071 = vperm.xlu1 %6726, %v5057_v45   ;;  %v5258_v6 = vld [vmem:[#allocation11 + $0x218] sm:$0xff]  ;;  %v5257_v45 = vld [vmem:[#allocation11 + $0x210] sm:$0xff] }
 0xcef   :  { %5076 = vperm.xlu0 %6725, %v5058_v20   ;;  %5048 = vperm.xlu1 %6726, %v5030_v5   ;;  %v5318_v20 = vld [vmem:[#allocation11 + $0x3f8] sm:$0xff]  ;;  %v5251_v5 = vld [vmem:[#allocation11 + $0x1e0] sm:$0xff] }
 0xcf0   :  { %5839 = vmatpush2.msra.mxu1 %v5251_v5 }
 0xcf1   :  { %5840 = vmatprep.subr.mxu1 %v5250_v59 }
 0xcf2   :  { %5841 = vmatpush2.msra.mxu1 %v5249_v15 }
 0xcf3   :  { %5842 = vmatprep.subr.mxu1 %v5248_v43 }
 0xcf4   :  { %5843 = vmatpush2.msra.mxu1 %v5247_v32 }
 0xcf5   :  { %5844 = vmatprep.subr.mxu1 %v5246_v52 }
 0xcf6   :  { %5845 = vmatpush2.msra.mxu1 %v5245_v16 }
 0xcf7   :  { %5846 = vmatprep.subr.mxu1 %v5244_v61 }
 0xcf8   :  { %5847 = vmatpush2.msra.mxu1 %v5243_v7 }
 0xcf9   :  { %5848 = vmatprep.subr.mxu1 %v5242_v29 }
 0xcfa   :  { %5849 = vmatpush2.msra.mxu1 %v5241_v46  ;;  %v13106_v46 = vld [vmem:[#allocation109_spill] sm:$0xff] }
 0xcfb   :  { %5850 = vmatprep.subr.mxu1 %v5240_v34 }
 0xd45   :  { %v4894_v10 = vpop.permute.xlu0 %4893  ;;  %v4887_v63 = vpop.permute.xlu1 %4886 }
 0xd46   :  { %6691 = vmatprep.subr.msk.mxu0 %vm6582_vm6, %v4894_v10 }
 0xd47   :  { %6692 = vmatpush3.msk.msra.mxu0 %vm6582_vm6, %v4894_v10  ;;  %v5306_v10 = vld [vmem:[#allocation11 + $0x398] sm:$0xff] }
 0xd49   :  { %v4892_v40 = vpop.permute.xlu0 %4891  ;;  %v4885_v17 = vpop.permute.xlu1 %4884 }
 0xd4a   :  { %6693 = vmatprep.subr.msk.mxu0 %vm6582_vm6, %v4892_v40 }
 0xd4b   :  { %6694 = vmatpush3.msk.msra.mxu0 %vm6582_vm6, %v4892_v40  ;;  %v5239_v40 = vld [vmem:[#allocation11 + $0x180] sm:$0xff] }
 0xd4c   :  { %6695 = vmatprep.subr.mxu0 %v11184_v21  ;;  %5851 = vmatpush2.msra.mxu1 %v5239_v40 }
 0xd4d   :  { %6696 = vmatpush3.msra.mxu0 %v11184_v21  ;;  %v5281_v21 = vld [vmem:[#allocation11 + $0x2d0] sm:$0xff] }
 0xd4e   :  { %6697 = vmatprep.subr.mxu0 %v11189_v47 }
 0xd4f   :  { %6698 = vmatpush3.msra.mxu0 %v11189_v47  ;;  %v5279_v47 = vld [vmem:[#allocation11 + $0x2c0] sm:$0xff] }
 0xd50   :  { %6699 = vmatprep.subr.msk.mxu0 %vm6583_vm7, %v4887_v63 }
 0xd51   :  { %6700 = vmatpush3.msk.msra.mxu0 %vm6583_vm7, %v4887_v63  ;;  %v5305_v63 = vld [vmem:[#allocation11 + $0x390] sm:$0xff] }
 0xd52   :  { %6701 = vmatprep.subr.msk.mxu0 %vm6583_vm7, %v4885_v17 }
 0xd53   :  { %6702 = vmatpush3.msk.msra.mxu0 %vm6583_vm7, %v4885_v17  ;;  %v5238_v17 = vld [vmem:[#allocation11 + $0x178] sm:$0xff] }
 0xd54   :  { %6704 = vmatmul.mubr.msk.f32.vlgmr.msra.gmra.mxu0 %vm4925_vm5, %v4898_v28  ;;  %5875 = vmatprep.subr.mxu0 %v5286_v26  ;;  %v5304_v28 = vld [vmem:[#allocation11 + $0x388] sm:$0xff]  ;;  %v5237_v26 = vld [vmem:[#allocation11 + $0x170] sm:$0xff] }
 0xd55   :  { %6706 = vmatprep.mubr.msk.f32.mxu0 %vm4925_vm5, %v4899_v41  ;;  %5876 = vmatpush1.msra.mxu0 %v5285_v49  ;;  %v5303_v41 = vld [vmem:[#allocation11 + $0x380] sm:$0xff]  ;;  %v5236_v49 = vld [vmem:[#allocation11 + $0x168] sm:$0xff] }
 0xd56   :  { %5877 = vmatprep.subr.mxu0 %v5284_v23  ;;  %5852 = vmatprep.subr.mxu1 %v5238_v17  ;;  %v5302_v23 = vld [vmem:[#allocation11 + $0x378] sm:$0xff]  ;;  %v5034_v3 = vpop.permute.xlu1 %5033 }
 0xd57   :  { %5878 = vmatpush1.msra.mxu0 %v5283_v53  ;;  %5853 = vmatpush2.msra.mxu1 %v5237_v26  ;;  %v5235_v53 = vld [vmem:[#allocation11 + $0x160] sm:$0xff] }
 0xd58   :  { %6707 = vmatmul.mubr.msk.f32.gmra.mxu0 %vm4925_vm5, %v4900_v33  ;;  %5879 = vmatprep.subr.mxu0 %v5282_v31  ;;  %v5301_v33 = vld [vmem:[#allocation11 + $0x370] sm:$0xff]  ;;  %v5234_v31 = vld [vmem:[#allocation11 + $0x158] sm:$0xff] }
 0xd59   :  { %5880 = vmatpush1.msra.mxu0 %v5281_v21  ;;  %5854 = vmatprep.subr.mxu1 %v5236_v49  ;;  %v5300_v21 = vld [vmem:[#allocation11 + $0x368] sm:$0xff] }
 0xd5a   :  { %5881 = vmatprep.subr.mxu0 %v5280_v35  ;;  %5855 = vmatpush2.msra.mxu1 %v5235_v53  ;;  %v5233_v35 = vld [vmem:[#allocation11 + $0x150] sm:$0xff]  ;;  %v5062_v5 = vpop.permute.xlu1 %5061 }
 0xd5b   :  { %5882 = vmatpush1.msra.mxu0 %v5279_v47  ;;  %5856 = vmatprep.subr.mxu1 %v5234_v31  ;;  %v5299_v47 = vld [vmem:[#allocation11 + $0x360] sm:$0xff] }
 0xd5c   :  { %5883 = vmatprep.subr.mxu0 %v5278_v39  ;;  %5857 = vmatpush2.msra.mxu1 %v5233_v35  ;;  %v5232_v39 = vld [vmem:[#allocation11 + $0x148] sm:$0xff] }
 0xd5d   :  { %5884 = vmatpush1.msra.mxu0 %v5277_v30  ;;  %v5298_v30 = vld [vmem:[#allocation11 + $0x358] sm:$0xff]  ;;  %5858 = vmatprep.subr.mxu1 %v5232_v39 }
 0xd5e   :  { %5885 = vmatprep.subr.mxu0 %v5276_v58  ;;  %v5231_v58 = vld [vmem:[#allocation11 + $0x140] sm:$0xff]  ;;  %v5039_v59 = vpop.permute.xlu1 %5038 }
 0xd5f   :  { %5886 = vmatpush1.msra.mxu0 %v5275_v27  ;;  %v5297_v27 = vld [vmem:[#allocation11 + $0x350] sm:$0xff]  ;;  %5859 = vmatpush2.msra.mxu1 %v5231_v58 }
 0xd60   :  { %5887 = vmatprep.subr.mxu0 %v5274_v8  ;;  %v5230_v8 = vld [vmem:[#allocation11 + $0x138] sm:$0xff] }
 0xd61   :  { %5888 = vmatpush1.msra.mxu0 %v5273_v13  ;;  %v5296_v13 = vld [vmem:[#allocation11 + $0x348] sm:$0xff]  ;;  %5860 = vmatprep.subr.mxu1 %v5230_v8 }
 0xd62   :  { %5889 = vmatprep.subr.mxu0 %v5272_v37  ;;  %v5229_v37 = vld [vmem:[#allocation11 + $0x130] sm:$0xff]  ;;  %v4918_v15 = vpop.permute.xlu1 %4917 }
 0xd63   :  { %5890 = vmatpush1.msra.mxu0 %v5271_v38  ;;  %v5295_v38 = vld [vmem:[#allocation11 + $0x340] sm:$0xff]  ;;  %5861 = vmatpush2.msra.mxu1 %v5229_v37 }
 0xd64   :  { %5891 = vmatprep.subr.mxu0 %v5270_v57  ;;  %v5228_v57 = vld [vmem:[#allocation11 + $0x128] sm:$0xff] }
 0xd65   :  { %5892 = vmatpush1.msra.mxu0 %v5269_v1  ;;  %v5294_v1 = vld [vmem:[#allocation11 + $0x338] sm:$0xff]  ;;  %5862 = vmatprep.subr.mxu1 %v5228_v57 }
 0xd66   :  { %5893 = vmatprep.subr.mxu0 %v5268_v25  ;;  %v5227_v25 = vld [vmem:[#allocation11 + $0x120] sm:$0xff] }
 0xd67   :  { %5894 = vmatpush1.msra.mxu0 %v5267_v4  ;;  %v5293_v4 = vld [vmem:[#allocation11 + $0x330] sm:$0xff]  ;;  %5863 = vmatpush2.msra.mxu1 %v5227_v25 }
 0xd68   :  { %5895 = vmatprep.subr.mxu0 %v5266_v54  ;;  %v5226_v54 = vld [vmem:[#allocation11 + $0x118] sm:$0xff] }
 0xd69   :  { %5896 = vmatpush1.msra.mxu0 %v5265_v24  ;;  %v5292_v24 = vld [vmem:[#allocation11 + $0x328] sm:$0xff]  ;;  %5864 = vmatprep.subr.mxu1 %v5226_v54 }
 0xd6a   :  { %5897 = vmatprep.subr.mxu0 %v5264_v36  ;;  %v5225_v36 = vld [vmem:[#allocation11 + $0x110] sm:$0xff] }
 0xd6b   :  { %5898 = vmatpush1.msra.mxu0 %v5263_v44  ;;  %v5291_v44 = vld [vmem:[#allocation11 + $0x320] sm:$0xff]  ;;  %5865 = vmatpush2.msra.mxu1 %v5225_v36 }
 0xd6c   :  { %5899 = vmatprep.subr.mxu0 %v5262_v14  ;;  %v5224_v14 = vld [vmem:[#allocation11 + $0x108] sm:$0xff] }
 0xd6d   :  { %5900 = vmatpush1.msra.mxu0 %v5261_v11  ;;  %v5290_v11 = vld [vmem:[#allocation11 + $0x318] sm:$0xff]  ;;  %5866 = vmatprep.subr.mxu1 %v5224_v14 }
 0xd6e   :  { %5901 = vmatprep.subr.mxu0 %v5260_v60  ;;  %v5223_v60 = vld [vmem:[#allocation11 + $0x100] sm:$0xff] }
 0xd6f   :  { %5902 = vmatpush1.msra.mxu0 %v5259_v62  ;;  %v5289_v62 = vld [vmem:[#allocation11 + $0x310] sm:$0xff]  ;;  %5867 = vmatpush2.msra.mxu1 %v5223_v60 }
 0xd70   :  { %5903 = vmatprep.subr.mxu0 %v5258_v6  ;;  %v5288_v6 = vld [vmem:[#allocation11 + $0x308] sm:$0xff] }
 0xd71   :  { %5904 = vmatpush1.msra.mxu0 %v5257_v45  ;;  %v5350_v45 = vld [vmem:[#allocation11 + $0x4f8] sm:$0xff] }
 0xd72   :  { %5905 = vmatprep.subr.mxu0 %v5256_v0  ;;  %5946 = vmatprep.subr.mxu1 %v5350_v45  ;;  %v5287_v0 = vld [vmem:[#allocation11 + $0x300] sm:$0xff] }
 0xd73   :  { %5906 = vmatpush1.msra.mxu0 %v5255_v51  ;;  %v5414_v51 = vld [vmem:[#allocation11 + $0x6f8] sm:$0xff] }
 0xd74   :  { %5907 = vmatprep.subr.mxu0 %v5318_v20  ;;  %v4908_v20 = vpop.permute.xlu0 %4907 }
 0xd75   :  { %5908 = vmatpush2.msra.mxu0 %v5317_v2 }
 0xd76   :  { %5909 = vmatprep.subr.mxu0 %v5316_v48 }
 0xd77   :  { %5910 = vmatpush2.msra.mxu0 %v5315_v55  ;;  %v7685_v55 = vmov 1983009808  }
 0xd78   :  { %5911 = vmatprep.subr.mxu0 %v5314_v22  ;;  %v4913_v2 = vpop.permute.xlu0 %4912  ;;  %v5090_v43 = vunpack.c.l.s4 %v7685_v55  ;;  %v5348_v55 = vld [vmem:[#allocation11 + $0x4e8] sm:$0xff] }
 0xd79   :  { %5912 = vmatpush2.msra.mxu0 %v5313_v19 }
 0xd7a   :  { %5913 = vmatprep.subr.mxu0 %v5312_v9  ;;  %v5091_v52 = vunpack.c.0.s8 %v5090_v43  ;;  %v5072_v9 = vpop.permute.xlu1 %5071 }
 0xd7b   :  { %5914 = vmatpush2.msra.mxu0 %v5311_v12 }
 0xd7c   :  { %5915 = vmatprep.subr.mxu0 %v5310_v18  ;;  %v5067_v48 = vpop.permute.xlu0 %5066 }
 0xd7d   :  { %5916 = vmatpush2.msra.mxu0 %v5309_v42 }
 0xd7e   :  { %5917 = vmatprep.subr.mxu0 %v5308_v50 }
 0xd7f   :  { %5918 = vmatpush2.msra.mxu0 %v5307_v56  ;;  %v11238_v56 = vsub.s32 %v5091_v52, %v13106_v46  ;;  %v5346_v52 = vld [vmem:[#allocation11 + $0x4d8] sm:$0xff]  ;;  %v5408_v46 = vld [vmem:[#allocation11 + $0x6c8] sm:$0xff] }
 0xd80   :  { %5919 = vmatprep.subr.mxu0 %v5306_v10  ;;  %v5044_v22 = vpop.permute.xlu0 %5043 }
 0xd81   :  { %5920 = vmatpush2.msra.mxu0 %v5305_v63 }
 0xd82   :  { %5921 = vmatprep.subr.mxu0 %v5304_v28  ;;  %v5049_v28 = vpop.permute.xlu1 %5048 }
 0xd83   :  { %5922 = vmatpush2.msra.mxu0 %v5303_v41 }
 0xd84   :  { %5923 = vmatprep.subr.mxu0 %v5302_v23  ;;  %v4923_v18 = vpop.permute.xlu0 %4922 }
 0xd85   :  { %5924 = vmatpush2.msra.mxu0 %v5301_v33 }
 0xd86   :  { %5925 = vmatprep.subr.mxu0 %v5300_v21 }
 0xd87   :  { %5926 = vmatpush2.msra.mxu0 %v5299_v47 }
 0xd88   :  { %5927 = vmatprep.subr.mxu0 %v5298_v30  ;;  %v5077_v53 = vpop.permute.xlu0 %5076 }
 0xd89   :  { %5928 = vmatpush2.msra.mxu0 %v5297_v27 }
 0xd8a   :  { %5929 = vmatprep.subr.mxu0 %v5296_v13 }
 0xd8b   :  { %5930 = vmatpush2.msra.mxu0 %v5295_v38 }
 0xd8c   :  { %5931 = vmatprep.subr.mxu0 %v5294_v1 }
 0xd8d   :  { %5932 = vmatpush2.msra.mxu0 %v5293_v4 }
 0xd8e   :  { %5933 = vmatprep.subr.mxu0 %v5292_v24 }
 0xd8f   :  { %5934 = vmatpush2.msra.mxu0 %v5291_v44 }
 0xd90   :  { %5935 = vmatprep.subr.mxu0 %v5290_v11 }
 0xd91   :  { %5936 = vmatpush2.msra.mxu0 %v5289_v62 }
 0xd92   :  { %5937 = vmatprep.subr.mxu0 %v5288_v6 }
 0xd93   :  { %5938 = vmatpush2.msra.mxu0 %v5287_v0 }
 0xd94   :  { %6017 = vmatprep.subr.mxu0 %v5414_v51 }
 0xe14   :  { %v6705_v32 = vpop.f32.mrf.mxu0 }
 0xe15   :  { %v5010_v19 = vadd.f32 %v6705_v32, %v4913_v2  ;;  %v5347_v32 = vld [vmem:[#allocation11 + $0x4e0] sm:$0xff] }
 0xe16   :  { %v5004_v16 = vpop.f32.mrf.mxu0 }
 0xe17   :  { %v5024_v12 = vmax.f32 %v5010_v19, 0.0  ;;  %v5005_v61 = vadd.f32 %v5004_v16, %v4908_v20  ;;  %v5413_v19 = vld [vmem:[#allocation11 + $0x6f0] sm:$0xff] }
 0xe18   :  { %v6708_v7 = vpop.f32.mrf.mxu0 }
 0xe19   :  { %v5052_v42 = vmul.f32 %v5039_v59, %v5024_v12  ;;  %v5023_v29 = vmax.f32 %v5005_v61, 0.0  ;;  %v5020_v50 = vadd.f32 %v6708_v7, %v4923_v18  ;;  %v5345_v12 = vld [vmem:[#allocation11 + $0x4d0] sm:$0xff]  ;;  %v5411_v61 = vld [vmem:[#allocation11 + $0x6e0] sm:$0xff]  ;;  %v5344_v18 = vld [vmem:[#allocation11 + $0x4c8] sm:$0xff] }
 0xe1a   :  { %v5014_v34 = vpop.f32.mrf.mxu0  ;;  %v5410_v7 = vld [vmem:[#allocation11 + $0x6d8] sm:$0xff] }
 0xe1b   :  { %v5080_v10 = vadd.f32 %v5067_v48, %v5052_v42  ;;  %v5051_v40 = vmul.f32 %v5034_v3, %v5023_v29  ;;  %v5026_v63 = vmax.f32 %v5020_v50, 0.0  ;;  %v5015_v17 = vadd.f32 %v5014_v34, %v4918_v15  ;;  %v5349_v48 = vld [vmem:[#allocation11 + $0x4f0] sm:$0xff]  ;;  %v5343_v42 = vld [vmem:[#allocation11 + $0x4c0] sm:$0xff]  ;;  %v5342_v50 = vld [vmem:[#allocation11 + $0x4b8] sm:$0xff] }
 0xe1c   :  { %v5409_v29 = vld [vmem:[#allocation11 + $0x6d0] sm:$0xff] }
 0xe1d   :  { %v5084_v26 = vmax.f32 %v5080_v10, 0.0  ;;  %v5079_v41 = vadd.f32 %v5062_v5, %v5051_v40  ;;  %v5054_v49 = vmul.f32 %v5049_v28, %v5026_v63  ;;  %v5025_v23 = vmax.f32 %v5015_v17, 0.0  ;;  %v5341_v34 = vld [vmem:[#allocation11 + $0x4b0] sm:$0xff]  ;;  %v5407_v10 = vld [vmem:[#allocation11 + $0x6c0] sm:$0xff]  ;;  %v5340_v40 = vld [vmem:[#allocation11 + $0x4a8] sm:$0xff] }
 0xe1e   :  { %v5406_v63 = vld [vmem:[#allocation11 + $0x6b8] sm:$0xff]  ;;  %v5339_v17 = vld [vmem:[#allocation11 + $0x4a0] sm:$0xff]  ;;  %v5405_v28 = vld [vmem:[#allocation11 + $0x6b0] sm:$0xff] }
 0xe1f   :  { %5112 = vst [vmem:[#allocation4 + $0x8] sm:$0x3] %v5084_v26  ;;  %v5120_v33 = vrot.slane %v5084_v26, %v11238_v56  ;;  %v5124_v31 = vcombine.high %v5084_v26, %v5084_v26  ;;  %v5083_v21 = vmax.f32 %v5079_v41, 0.0  ;;  %v5082_v35 = vadd.f32 %v5077_v53, %v5054_v49  ;;  %v5338_v26 = vld [vmem:[#allocation11 + $0x498] sm:$0xff]  ;;  %v5404_v41 = vld [vmem:[#allocation11 + $0x6a8] sm:$0xff]  ;;  %v5337_v49 = vld [vmem:[#allocation11 + $0x490] sm:$0xff] }
 0xe20   :  { %v5053_v47 = vmul.f32 %v5044_v22, %v5025_v23  ;;  %v5403_v23 = vld [vmem:[#allocation11 + $0x6a0] sm:$0xff]  ;;  %v5336_v53 = vld [vmem:[#allocation11 + $0x488] sm:$0xff] }
 0xe21   :  { %v5121_v39 = vcombine.high %v5120_v33, %v5120_v33  ;;  %v5131_v30 = vrot.slane %v5124_v31, %v11238_v56  ;;  %6578 = vst.sshfl [vmem:[#allocation4 + $0xc] sm:$0x3 pattern:$0x76325410] %v5124_v31  ;;  %5087 = vst [vmem:[#allocation4] sm:$0x3] %v5083_v21  ;;  %v5095_v58 = vrot.slane %v5083_v21, %v11238_v56 }
 0xe22   :  { %v5099_v27 = vcombine.high %v5083_v21, %v5083_v21  ;;  %v5086_v8 = vmax.f32 %v5082_v35, 0.0  ;;  %v5081_v13 = vadd.f32 %v5072_v9, %v5053_v47  ;;  %v5412_v9 = vld [vmem:[#allocation11 + $0x6e8] sm:$0xff]  ;;  %v5402_v33 = vld [vmem:[#allocation11 + $0x698] sm:$0xff]  ;;  %v5335_v31 = vld [vmem:[#allocation11 + $0x480] sm:$0xff] }
 0xe23   :  { %5123 = vst [vmem:[#allocation4 + $0xa] sm:$0x3] %v5121_v39  ;;  %v5134_v37 = vcombine.high %v5131_v30, %v5131_v30  ;;  %v5096_v38 = vcombine.high %v5095_v58, %v5095_v58  ;;  %v5401_v21 = vld [vmem:[#allocation11 + $0x690] sm:$0xff]  ;;  %v5334_v35 = vld [vmem:[#allocation11 + $0x478] sm:$0xff]  ;;  %v5400_v47 = vld [vmem:[#allocation11 + $0x688] sm:$0xff] }
 0xe24   :  { %v5106_v57 = vrot.slane %v5099_v27, %v11238_v56  ;;  %6577 = vst.sshfl [vmem:[#allocation4 + $0x4] sm:$0x3 pattern:$0x76325410] %v5099_v27  ;;  %5162 = vst [vmem:[#allocation4 + $0x18] sm:$0x3] %v5086_v8  ;;  %v5170_v1 = vrot.slane %v5086_v8, %v11238_v56  ;;  %v5174_v25 = vcombine.high %v5086_v8, %v5086_v8 }
 0xe25   :  { %v5085_v4 = vmax.f32 %v5081_v13, 0.0  ;;  %5136 = vst [vmem:[#allocation4 + $0xe] sm:$0x3] %v5134_v37  ;;  %5098 = vst [vmem:[#allocation4 + $0x2] sm:$0x3] %v5096_v38  ;;  %v5333_v39 = vld [vmem:[#allocation11 + $0x470] sm:$0xff] }
 0xe26   :  { %v5109_v54 = vcombine.high %v5106_v57, %v5106_v57  ;;  %v5171_v24 = vcombine.high %v5170_v1, %v5170_v1  ;;  %v5181_v36 = vrot.slane %v5174_v25, %v11238_v56  ;;  %6580 = vst.sshfl [vmem:[#allocation4 + $0x1c] sm:$0x3 pattern:$0x76325410] %v5174_v25  ;;  %v5399_v30 = vld [vmem:[#allocation11 + $0x680] sm:$0xff]  ;;  %v5332_v58 = vld [vmem:[#allocation11 + $0x468] sm:$0xff] }
 0xe27   :  { %5137 = vst [vmem:[#allocation4 + $0x10] sm:$0x3] %v5085_v4  ;;  %v5145_v44 = vrot.slane %v5085_v4, %v11238_v56  ;;  %v5149_v14 = vcombine.high %v5085_v4, %v5085_v4  ;;  %v5398_v27 = vld [vmem:[#allocation11 + $0x678] sm:$0xff]  ;;  %v5331_v8 = vld [vmem:[#allocation11 + $0x460] sm:$0xff]  ;;  %v5397_v13 = vld [vmem:[#allocation11 + $0x670] sm:$0xff] }
 0xe28   :  { %5111 = vst [vmem:[#allocation4 + $0x6] sm:$0x3] %v5109_v54  ;;  %5173 = vst [vmem:[#allocation4 + $0x1a] sm:$0x3] %v5171_v24  ;;  %v5184_v11 = vcombine.high %v5181_v36, %v5181_v36  ;;  %v5330_v37 = vld [vmem:[#allocation11 + $0x458] sm:$0xff]  ;;  %v5396_v38 = vld [vmem:[#allocation11 + $0x668] sm:$0xff] }
 0xe29   :  { %v5146_v60 = vcombine.high %v5145_v44, %v5145_v44  ;;  %v5156_v62 = vrot.slane %v5149_v14, %v11238_v56  ;;  %6579 = vst.sshfl [vmem:[#allocation4 + $0x14] sm:$0x3 pattern:$0x76325410] %v5149_v14  ;;  %v5329_v57 = vld [vmem:[#allocation11 + $0x450] sm:$0xff]  ;;  %v5395_v1 = vld [vmem:[#allocation11 + $0x660] sm:$0xff] }
 0xe2a   :  { %5186 = vst [vmem:[#allocation4 + $0x1e] sm:$0x3] %v5184_v11  ;;  %v5328_v25 = vld [vmem:[#allocation11 + $0x448] sm:$0xff]  ;;  %v5394_v4 = vld [vmem:[#allocation11 + $0x658] sm:$0xff]  ;;  %v5327_v54 = vld [vmem:[#allocation11 + $0x440] sm:$0xff] }
 0xe2b   :  { %5148 = vst [vmem:[#allocation4 + $0x12] sm:$0x3] %v5146_v60  ;;  %v5159_v6 = vcombine.high %v5156_v62, %v5156_v62  ;;  %v5393_v24 = vld [vmem:[#allocation11 + $0x650] sm:$0xff]  ;;  %v5326_v36 = vld [vmem:[#allocation11 + $0x438] sm:$0xff]  ;;  %v5392_v44 = vld [vmem:[#allocation11 + $0x648] sm:$0xff] }
 0xe2c   :  { %v5188_v45 = vld [vmem:[#allocation4 + $0x8] sm:$0xff]  ;;  %v5391_v11 = vld [vmem:[#allocation11 + $0x640] sm:$0xff]  ;;  %v5324_v60 = vld [vmem:[#allocation11 + $0x428] sm:$0xff] }
 0xe2d   :  { %5161 = vst [vmem:[#allocation4 + $0x16] sm:$0x3] %v5159_v6  ;;  %v5737_v20 = vcombine.high %v5188_v45, %v5188_v45  ;;  %v11250_v5 = vrot.slane %v5188_v45, %v11238_v56  ;;  %v5325_v14 = vld [vmem:[#allocation11 + $0x430] sm:$0xff]  ;;  %v5390_v62 = vld [vmem:[#allocation11 + $0x638] sm:$0xff]  ;;  %v5323_v6 = vld [vmem:[#allocation11 + $0x420] sm:$0xff] }
 0xe2e   :  { %v5389_v45 = vld [vmem:[#allocation11 + $0x630] sm:$0xff] }
 0xe2f   :  { %v5187_v0 = vld [vmem:[#allocation4] sm:$0xff]  ;;  %v11254_v43 = vrot.slane %v5737_v20, %v11238_v56  ;;  %v5752_v22 = vcombine.high %v11250_v5, %v11250_v5  ;;  %v5387_v20 = vld [vmem:[#allocation11 + $0x620] sm:$0xff] }
 0xe30   :  { %v5727_v51 = vrot.slane %v5187_v0, %v11238_v56  ;;  %v5720_v3 = vcombine.high %v5187_v0, %v5187_v0  ;;  %v5322_v0 = vld [vmem:[#allocation11 + $0x418] sm:$0xff] }
 0xe31   :  { %v5753_v16 = vcombine.high %v11254_v43, %v11254_v43 }
 0xe32   :  { %v5735_v2 = vcombine.high %v5727_v51, %v5727_v51  ;;  %v5734_v59 = vrot.slane %v5720_v3, %v11238_v56  ;;  %v5321_v3 = vld [vmem:[#allocation11 + $0x410] sm:$0xff] }
 0xe34   :  { %5868 = vmatprep.mubr.f32.mxu1 %v5735_v2  ;;  %v5736_v15 = vcombine.high %v5734_v59, %v5734_v59  ;;  %v5320_v2 = vld [vmem:[#allocation11 + $0x408] sm:$0xff] }
 0xe35   :  { %5869 = vmatmul.mubr.f32.vlgmr.msra.gmra.mxu1 %v5727_v51  ;;  %v5388_v51 = vld [vmem:[#allocation11 + $0x628] sm:$0xff] }
 0xe36   :  { %5947 = vmatpush1.msra.mxu1 %v5349_v48  ;;  %5939 = vmatprep.mubr.f32.mxu0 %v5736_v15  ;;  %v5319_v48 = vld [vmem:[#allocation11 + $0x400] sm:$0xff]  ;;  %v5385_v15 = vld [vmem:[#allocation11 + $0x610] sm:$0xff] }
 0xe37   :  { %5948 = vmatprep.subr.mxu1 %v5348_v55  ;;  %6010 = vmatprep.mubr.f32.mxu1 %v5752_v22  ;;  %v5382_v55 = vld [vmem:[#allocation11 + $0x5f8] sm:$0xff]  ;;  %v5384_v22 = vld [vmem:[#allocation11 + $0x608] sm:$0xff] }
 0xe38   :  { %5940 = vmatmul.mubr.f32.vlgmr.msra.gmra.mxu0 %v5734_v59  ;;  %5949 = vmatpush1.msra.mxu1 %v5347_v32  ;;  %v5386_v59 = vld [vmem:[#allocation11 + $0x618] sm:$0xff]  ;;  %v5381_v32 = vld [vmem:[#allocation11 + $0x5f0] sm:$0xff] }
 0xe39   :  { %6018 = vmatpush1.msra.mxu0 %v5413_v19  ;;  %5950 = vmatprep.subr.mxu1 %v5346_v52  ;;  %v5383_v19 = vld [vmem:[#allocation11 + $0x600] sm:$0xff]  ;;  %v5380_v52 = vld [vmem:[#allocation11 + $0x5e8] sm:$0xff] }
 0xe3a   :  { %6019 = vmatprep.subr.mxu0 %v5412_v9  ;;  %6081 = vmatprep.mubr.f32.mxu0 %v5753_v16  ;;  %v5446_v9 = vld [vmem:[#allocation11 + $0x7f8] sm:$0xff]  ;;  %v5379_v16 = vld [vmem:[#allocation11 + $0x5e0] sm:$0xff] }
 0xe3b   :  { %5951 = vmatpush1.msra.mxu1 %v5345_v12  ;;  %6020 = vmatpush1.msra.mxu0 %v5411_v61  ;;  %v5445_v12 = vld [vmem:[#allocation11 + $0x7f0] sm:$0xff]  ;;  %v5378_v61 = vld [vmem:[#allocation11 + $0x5d8] sm:$0xff] }
 0xe3c   :  { %5952 = vmatprep.subr.mxu1 %v5344_v18  ;;  %6021 = vmatprep.subr.mxu0 %v5410_v7  ;;  %v5444_v18 = vld [vmem:[#allocation11 + $0x7e8] sm:$0xff]  ;;  %v5377_v7 = vld [vmem:[#allocation11 + $0x5d0] sm:$0xff] }
 0xe3d   :  { %5953 = vmatpush1.msra.mxu1 %v5343_v42  ;;  %6022 = vmatpush1.msra.mxu0 %v5409_v29  ;;  %v5443_v42 = vld [vmem:[#allocation11 + $0x7e0] sm:$0xff]  ;;  %v5376_v29 = vld [vmem:[#allocation11 + $0x5c8] sm:$0xff] }
 0xe3e   :  { %5954 = vmatprep.subr.mxu1 %v5342_v50  ;;  %6023 = vmatprep.subr.mxu0 %v5408_v46  ;;  %v5442_v50 = vld [vmem:[#allocation11 + $0x7d8] sm:$0xff]  ;;  %v5375_v46 = vld [vmem:[#allocation11 + $0x5c0] sm:$0xff] }
 0xe3f   :  { %5955 = vmatpush1.msra.mxu1 %v5341_v34  ;;  %6024 = vmatpush1.msra.mxu0 %v5407_v10  ;;  %v5441_v34 = vld [vmem:[#allocation11 + $0x7d0] sm:$0xff]  ;;  %v5374_v10 = vld [vmem:[#allocation11 + $0x5b8] sm:$0xff] }
 0xe40   :  { %5956 = vmatprep.subr.mxu1 %v5340_v40  ;;  %6025 = vmatprep.subr.mxu0 %v5406_v63  ;;  %v5440_v40 = vld [vmem:[#allocation11 + $0x7c8] sm:$0xff]  ;;  %v5373_v63 = vld [vmem:[#allocation11 + $0x5b0] sm:$0xff] }
 0xe41   :  { %5957 = vmatpush1.msra.mxu1 %v5339_v17  ;;  %6026 = vmatpush1.msra.mxu0 %v5405_v28  ;;  %v5439_v17 = vld [vmem:[#allocation11 + $0x7c0] sm:$0xff]  ;;  %v5372_v28 = vld [vmem:[#allocation11 + $0x5a8] sm:$0xff] }
 0xe42   :  { %5958 = vmatprep.subr.mxu1 %v5338_v26  ;;  %6027 = vmatprep.subr.mxu0 %v5404_v41  ;;  %v5438_v26 = vld [vmem:[#allocation11 + $0x7b8] sm:$0xff]  ;;  %v5371_v41 = vld [vmem:[#allocation11 + $0x5a0] sm:$0xff] }
 0xe43   :  { %5959 = vmatpush1.msra.mxu1 %v5337_v49  ;;  %6028 = vmatpush1.msra.mxu0 %v5403_v23  ;;  %v5437_v49 = vld [vmem:[#allocation11 + $0x7b0] sm:$0xff]  ;;  %v5370_v23 = vld [vmem:[#allocation11 + $0x598] sm:$0xff] }
 0xe44   :  { %5960 = vmatprep.subr.mxu1 %v5336_v53  ;;  %6029 = vmatprep.subr.mxu0 %v5402_v33  ;;  %v5436_v53 = vld [vmem:[#allocation11 + $0x7a8] sm:$0xff]  ;;  %v5369_v33 = vld [vmem:[#allocation11 + $0x590] sm:$0xff] }
 0xe45   :  { %5961 = vmatpush1.msra.mxu1 %v5335_v31  ;;  %6030 = vmatpush1.msra.mxu0 %v5401_v21  ;;  %v5435_v31 = vld [vmem:[#allocation11 + $0x7a0] sm:$0xff]  ;;  %v5368_v21 = vld [vmem:[#allocation11 + $0x588] sm:$0xff] }
 0xe46   :  { %5962 = vmatprep.subr.mxu1 %v5334_v35  ;;  %6031 = vmatprep.subr.mxu0 %v5400_v47  ;;  %v5434_v35 = vld [vmem:[#allocation11 + $0x798] sm:$0xff]  ;;  %v5367_v47 = vld [vmem:[#allocation11 + $0x580] sm:$0xff] }
 0xe47   :  { %5963 = vmatpush1.msra.mxu1 %v5333_v39  ;;  %6032 = vmatpush1.msra.mxu0 %v5399_v30  ;;  %v5433_v39 = vld [vmem:[#allocation11 + $0x790] sm:$0xff]  ;;  %v5366_v30 = vld [vmem:[#allocation11 + $0x578] sm:$0xff] }
 0xe48   :  { %5964 = vmatprep.subr.mxu1 %v5332_v58  ;;  %6033 = vmatprep.subr.mxu0 %v5398_v27  ;;  %v5432_v58 = vld [vmem:[#allocation11 + $0x788] sm:$0xff]  ;;  %v5365_v27 = vld [vmem:[#allocation11 + $0x570] sm:$0xff] }
 0xe49   :  { %5965 = vmatpush1.msra.mxu1 %v5331_v8  ;;  %6034 = vmatpush1.msra.mxu0 %v5397_v13  ;;  %v5431_v8 = vld [vmem:[#allocation11 + $0x780] sm:$0xff]  ;;  %v5364_v13 = vld [vmem:[#allocation11 + $0x568] sm:$0xff] }
 0xe4a   :  { %5966 = vmatprep.subr.mxu1 %v5330_v37  ;;  %6035 = vmatprep.subr.mxu0 %v5396_v38  ;;  %v5430_v37 = vld [vmem:[#allocation11 + $0x778] sm:$0xff]  ;;  %v5363_v38 = vld [vmem:[#allocation11 + $0x560] sm:$0xff] }
 0xe4b   :  { %5967 = vmatpush1.msra.mxu1 %v5329_v57  ;;  %6036 = vmatpush1.msra.mxu0 %v5395_v1  ;;  %v5429_v57 = vld [vmem:[#allocation11 + $0x770] sm:$0xff]  ;;  %v5362_v1 = vld [vmem:[#allocation11 + $0x558] sm:$0xff] }
 0xe4c   :  { %5968 = vmatprep.subr.mxu1 %v5328_v25  ;;  %6037 = vmatprep.subr.mxu0 %v5394_v4  ;;  %v5428_v25 = vld [vmem:[#allocation11 + $0x768] sm:$0xff]  ;;  %v5361_v4 = vld [vmem:[#allocation11 + $0x550] sm:$0xff] }
 0xe4d   :  { %5969 = vmatpush1.msra.mxu1 %v5327_v54  ;;  %6038 = vmatpush1.msra.mxu0 %v5393_v24  ;;  %v5427_v54 = vld [vmem:[#allocation11 + $0x760] sm:$0xff]  ;;  %v5360_v24 = vld [vmem:[#allocation11 + $0x548] sm:$0xff] }
 0xe4e   :  { %5970 = vmatprep.subr.mxu1 %v5326_v36  ;;  %6039 = vmatprep.subr.mxu0 %v5392_v44  ;;  %v5426_v36 = vld [vmem:[#allocation11 + $0x758] sm:$0xff]  ;;  %v5359_v44 = vld [vmem:[#allocation11 + $0x540] sm:$0xff] }
 0xe4f   :  { %5971 = vmatpush1.msra.mxu1 %v5325_v14  ;;  %6040 = vmatpush1.msra.mxu0 %v5391_v11  ;;  %v5425_v14 = vld [vmem:[#allocation11 + $0x750] sm:$0xff]  ;;  %v5358_v11 = vld [vmem:[#allocation11 + $0x538] sm:$0xff] }
 0xe50   :  { %5972 = vmatprep.subr.mxu1 %v5324_v60  ;;  %6041 = vmatprep.subr.mxu0 %v5390_v62  ;;  %v5424_v60 = vld [vmem:[#allocation11 + $0x748] sm:$0xff]  ;;  %v5357_v62 = vld [vmem:[#allocation11 + $0x530] sm:$0xff] }
 0xe51   :  { %5973 = vmatpush1.msra.mxu1 %v5323_v6  ;;  %6042 = vmatpush1.msra.mxu0 %v5389_v45  ;;  %v5423_v6 = vld [vmem:[#allocation11 + $0x740] sm:$0xff]  ;;  %v5356_v45 = vld [vmem:[#allocation11 + $0x528] sm:$0xff] }
 0xe52   :  { %5974 = vmatprep.subr.mxu1 %v5322_v0  ;;  %6043 = vmatprep.subr.mxu0 %v5388_v51  ;;  %v5422_v0 = vld [vmem:[#allocation11 + $0x738] sm:$0xff]  ;;  %v5355_v51 = vld [vmem:[#allocation11 + $0x520] sm:$0xff] }
 0xe53   :  { %5975 = vmatpush1.msra.mxu1 %v5321_v3  ;;  %6044 = vmatpush1.msra.mxu0 %v5387_v20  ;;  %v5421_v3 = vld [vmem:[#allocation11 + $0x730] sm:$0xff]  ;;  %v5189_v20 = vld [vmem:[#allocation4 + $0x10] sm:$0xff] }
 0xe54   :  { %5976 = vmatprep.subr.mxu1 %v5320_v2  ;;  %6045 = vmatprep.subr.mxu0 %v5386_v59  ;;  %v5354_v2 = vld [vmem:[#allocation11 + $0x518] sm:$0xff]  ;;  %v5420_v59 = vld [vmem:[#allocation11 + $0x728] sm:$0xff] }
 0xe55   :  { %5977 = vmatpush1.msra.mxu1 %v5319_v48  ;;  %6046 = vmatpush1.msra.mxu0 %v5385_v15  ;;  %v5353_v48 = vld [vmem:[#allocation11 + $0x510] sm:$0xff]  ;;  %v5419_v15 = vld [vmem:[#allocation11 + $0x720] sm:$0xff] }
 0xe56   :  { %5978 = vmatprep.subr.mxu1 %v5382_v55  ;;  %6047 = vmatprep.subr.mxu0 %v5384_v22  ;;  %v5352_v55 = vld [vmem:[#allocation11 + $0x508] sm:$0xff]  ;;  %v5418_v22 = vld [vmem:[#allocation11 + $0x718] sm:$0xff] }
 0xe57   :  { %5979 = vmatpush2.msra.mxu1 %v5381_v32  ;;  %6048 = vmatpush1.msra.mxu0 %v5383_v19  ;;  %v5754_v32 = vcombine.high %v5189_v20, %v5189_v20  ;;  %v5351_v19 = vld [vmem:[#allocation11 + $0x500] sm:$0xff] }
 0xe58   :  { %5980 = vmatprep.subr.mxu1 %v5380_v52  ;;  %6049 = vmatprep.subr.mxu0 %v5446_v9  ;;  %v5417_v52 = vld [vmem:[#allocation11 + $0x710] sm:$0xff]  ;;  %v11261_v9 = vrot.slane %v5189_v20, %v11238_v56  ;;  %v5520_v20 = vld [vmem:[#allocation11 + $0xa48] sm:$0xff] }
 0xe59   :  { %5981 = vmatpush2.msra.mxu1 %v5379_v16  ;;  %6050 = vmatpush2.msra.mxu0 %v5445_v12  ;;  %v5416_v16 = vld [vmem:[#allocation11 + $0x708] sm:$0xff]  ;;  %v5478_v12 = vld [vmem:[#allocation11 + $0x8f8] sm:$0xff] }
 0xe5a   :  { %5982 = vmatprep.subr.mxu1 %v5378_v61  ;;  %6051 = vmatprep.subr.mxu0 %v5444_v18  ;;  %v5415_v61 = vld [vmem:[#allocation11 + $0x700] sm:$0xff]  ;;  %v5477_v18 = vld [vmem:[#allocation11 + $0x8f0] sm:$0xff] }
 0xe5b   :  { %5983 = vmatpush2.msra.mxu1 %v5377_v7  ;;  %6052 = vmatpush2.msra.mxu0 %v5443_v42  ;;  %v11264_v7 = vrot.slane %v5754_v32, %v11238_v56  ;;  %v5769_v42 = vcombine.high %v11261_v9, %v11261_v9  ;;  %v5450_v32 = vld [vmem:[#allocation11 + $0x818] sm:$0xff] }
 0xe5c   :  { %5984 = vmatprep.subr.mxu1 %v5376_v29  ;;  %6053 = vmatprep.subr.mxu0 %v5442_v50  ;;  %v5476_v29 = vld [vmem:[#allocation11 + $0x8e8] sm:$0xff]  ;;  %v5542_v50 = vld [vmem:[#allocation11 + $0xaf8] sm:$0xff] }
 0xe5d   :  { %5985 = vmatpush2.msra.mxu1 %v5375_v46  ;;  %6054 = vmatpush2.msra.mxu0 %v5441_v34  ;;  %v5475_v46 = vld [vmem:[#allocation11 + $0x8e0] sm:$0xff]  ;;  %v5541_v34 = vld [vmem:[#allocation11 + $0xaf0] sm:$0xff] }
 0xe5e   :  { %5986 = vmatprep.subr.mxu1 %v5374_v10  ;;  %6055 = vmatprep.subr.mxu0 %v5440_v40  ;;  %v5770_v10 = vcombine.high %v11264_v7, %v11264_v7  ;;  %v5474_v40 = vld [vmem:[#allocation11 + $0x8d8] sm:$0xff] }
 0xe5f   :  { %5987 = vmatpush2.msra.mxu1 %v5373_v63  ;;  %6056 = vmatpush2.msra.mxu0 %v5439_v17  ;;  %v5473_v63 = vld [vmem:[#allocation11 + $0x8d0] sm:$0xff]  ;;  %v5539_v17 = vld [vmem:[#allocation11 + $0xae0] sm:$0xff] }
 0xe60   :  { %5988 = vmatprep.subr.mxu1 %v5372_v28  ;;  %6057 = vmatprep.subr.mxu0 %v5438_v26  ;;  %v5472_v28 = vld [vmem:[#allocation11 + $0x8c8] sm:$0xff]  ;;  %v5538_v26 = vld [vmem:[#allocation11 + $0xad8] sm:$0xff] }
 0xe61   :  { %5989 = vmatpush2.msra.mxu1 %v5371_v41  ;;  %6058 = vmatpush2.msra.mxu0 %v5437_v49  ;;  %v5471_v41 = vld [vmem:[#allocation11 + $0x8c0] sm:$0xff]  ;;  %v5537_v49 = vld [vmem:[#allocation11 + $0xad0] sm:$0xff] }
 0xe62   :  { %5990 = vmatprep.subr.mxu1 %v5370_v23  ;;  %6059 = vmatprep.subr.mxu0 %v5436_v53  ;;  %v5536_v23 = vld [vmem:[#allocation11 + $0xac8] sm:$0xff]  ;;  %v5469_v53 = vld [vmem:[#allocation11 + $0x8b0] sm:$0xff] }
 0xe63   :  { %5991 = vmatpush2.msra.mxu1 %v5369_v33  ;;  %6060 = vmatpush2.msra.mxu0 %v5435_v31  ;;  %v5535_v33 = vld [vmem:[#allocation11 + $0xac0] sm:$0xff]  ;;  %v5468_v31 = vld [vmem:[#allocation11 + $0x8a8] sm:$0xff] }
 0xe64   :  { %5992 = vmatprep.subr.mxu1 %v5368_v21  ;;  %6061 = vmatprep.subr.mxu0 %v5434_v35  ;;  %v5534_v21 = vld [vmem:[#allocation11 + $0xab8] sm:$0xff]  ;;  %v5467_v35 = vld [vmem:[#allocation11 + $0x8a0] sm:$0xff] }
 0xe65   :  { %5993 = vmatpush2.msra.mxu1 %v5367_v47  ;;  %6062 = vmatpush2.msra.mxu0 %v5433_v39  ;;  %v5533_v47 = vld [vmem:[#allocation11 + $0xab0] sm:$0xff]  ;;  %v5466_v39 = vld [vmem:[#allocation11 + $0x898] sm:$0xff] }
 0xe66   :  { %5994 = vmatprep.subr.mxu1 %v5366_v30  ;;  %6063 = vmatprep.subr.mxu0 %v5432_v58  ;;  %v5532_v30 = vld [vmem:[#allocation11 + $0xaa8] sm:$0xff]  ;;  %v5465_v58 = vld [vmem:[#allocation11 + $0x890] sm:$0xff] }
 0xe67   :  { %5995 = vmatpush2.msra.mxu1 %v5365_v27  ;;  %6064 = vmatpush2.msra.mxu0 %v5431_v8  ;;  %v5531_v27 = vld [vmem:[#allocation11 + $0xaa0] sm:$0xff]  ;;  %v5464_v8 = vld [vmem:[#allocation11 + $0x888] sm:$0xff] }
 0xe68   :  { %5996 = vmatprep.subr.mxu1 %v5364_v13  ;;  %6065 = vmatprep.subr.mxu0 %v5430_v37  ;;  %v5530_v13 = vld [vmem:[#allocation11 + $0xa98] sm:$0xff]  ;;  %v5463_v37 = vld [vmem:[#allocation11 + $0x880] sm:$0xff] }
 0xe69   :  { %5997 = vmatpush2.msra.mxu1 %v5363_v38  ;;  %6066 = vmatpush2.msra.mxu0 %v5429_v57  ;;  %v5529_v38 = vld [vmem:[#allocation11 + $0xa90] sm:$0xff]  ;;  %v5462_v57 = vld [vmem:[#allocation11 + $0x878] sm:$0xff] }
 0xe6a   :  { %5998 = vmatprep.subr.mxu1 %v5362_v1  ;;  %6067 = vmatprep.subr.mxu0 %v5428_v25  ;;  %v5528_v1 = vld [vmem:[#allocation11 + $0xa88] sm:$0xff]  ;;  %v5461_v25 = vld [vmem:[#allocation11 + $0x870] sm:$0xff] }
 0xe6b   :  { %5999 = vmatpush2.msra.mxu1 %v5361_v4  ;;  %6068 = vmatpush2.msra.mxu0 %v5427_v54  ;;  %v5527_v4 = vld [vmem:[#allocation11 + $0xa80] sm:$0xff]  ;;  %v5460_v54 = vld [vmem:[#allocation11 + $0x868] sm:$0xff] }
 0xe6c   :  { %6000 = vmatprep.subr.mxu1 %v5360_v24  ;;  %6069 = vmatprep.subr.mxu0 %v5426_v36  ;;  %v5526_v24 = vld [vmem:[#allocation11 + $0xa78] sm:$0xff]  ;;  %v5459_v36 = vld [vmem:[#allocation11 + $0x860] sm:$0xff] }
 0xe6d   :  { %6001 = vmatpush2.msra.mxu1 %v5359_v44  ;;  %6070 = vmatpush2.msra.mxu0 %v5425_v14  ;;  %v5525_v44 = vld [vmem:[#allocation11 + $0xa70] sm:$0xff]  ;;  %v5458_v14 = vld [vmem:[#allocation11 + $0x858] sm:$0xff] }
 0xe6e   :  { %6002 = vmatprep.subr.mxu1 %v5358_v11  ;;  %6071 = vmatprep.subr.mxu0 %v5424_v60  ;;  %v5524_v11 = vld [vmem:[#allocation11 + $0xa68] sm:$0xff]  ;;  %v5457_v60 = vld [vmem:[#allocation11 + $0x850] sm:$0xff] }
 0xe6f   :  { %6003 = vmatpush2.msra.mxu1 %v5357_v62  ;;  %6072 = vmatpush2.msra.mxu0 %v5423_v6  ;;  %v5523_v62 = vld [vmem:[#allocation11 + $0xa60] sm:$0xff]  ;;  %v5456_v6 = vld [vmem:[#allocation11 + $0x848] sm:$0xff] }
 0xe70   :  { %6004 = vmatprep.subr.mxu1 %v5356_v45  ;;  %6073 = vmatprep.subr.mxu0 %v5422_v0  ;;  %v5522_v45 = vld [vmem:[#allocation11 + $0xa58] sm:$0xff]  ;;  %v5455_v0 = vld [vmem:[#allocation11 + $0x840] sm:$0xff] }
 0xe71   :  { %6005 = vmatpush2.msra.mxu1 %v5355_v51  ;;  %6074 = vmatpush2.msra.mxu0 %v5421_v3  ;;  %v5521_v51 = vld [vmem:[#allocation11 + $0xa50] sm:$0xff]  ;;  %v5454_v3 = vld [vmem:[#allocation11 + $0x838] sm:$0xff] }
 0xe72   :  { %6006 = vmatprep.subr.mxu1 %v5354_v2  ;;  %6075 = vmatprep.subr.mxu0 %v5420_v59  ;;  %v5453_v2 = vld [vmem:[#allocation11 + $0x830] sm:$0xff]  ;;  %v5519_v59 = vld [vmem:[#allocation11 + $0xa40] sm:$0xff] }
 0xe73   :  { %6007 = vmatpush2.msra.mxu1 %v5353_v48  ;;  %6076 = vmatpush2.msra.mxu0 %v5419_v15  ;;  %v5452_v48 = vld [vmem:[#allocation11 + $0x828] sm:$0xff]  ;;  %v5518_v15 = vld [vmem:[#allocation11 + $0xa38] sm:$0xff] }
 0xe74   :  { %6008 = vmatprep.subr.mxu1 %v5352_v55  ;;  %6077 = vmatprep.subr.mxu0 %v5418_v22  ;;  %v5451_v55 = vld [vmem:[#allocation11 + $0x820] sm:$0xff]  ;;  %v5517_v22 = vld [vmem:[#allocation11 + $0xa30] sm:$0xff] }
 0xe75   :  { %6009 = vmatpush2.msra.mxu1 %v5351_v19  ;;  %6078 = vmatpush2.msra.mxu0 %v5417_v52  ;;  %v5516_v19 = vld [vmem:[#allocation11 + $0xa28] sm:$0xff]  ;;  %v5449_v52 = vld [vmem:[#allocation11 + $0x810] sm:$0xff] }
 0xe76   :  { %6011 = vmatmul.mubr.f32.vlgmr.msra.gmra.mxu1 %v11250_v5  ;;  %6079 = vmatprep.subr.mxu0 %v5416_v16  ;;  %v5540_v5 = vld [vmem:[#allocation11 + $0xae8] sm:$0xff]  ;;  %v5515_v16 = vld [vmem:[#allocation11 + $0xa20] sm:$0xff] }
 0xe77   :  { %6088 = vmatprep.subr.mxu1 %v5478_v12  ;;  %6080 = vmatpush2.msra.mxu0 %v5415_v61  ;;  %v5448_v12 = vld [vmem:[#allocation11 + $0x808] sm:$0xff]  ;;  %v5514_v61 = vld [vmem:[#allocation11 + $0xa18] sm:$0xff] }
 0xe78   :  { %6089 = vmatpush1.msra.mxu1 %v5477_v18  ;;  %6152 = vmatprep.mubr.f32.mxu1 %v5769_v42  ;;  %v5447_v18 = vld [vmem:[#allocation11 + $0x800] sm:$0xff]  ;;  %v5513_v42 = vld [vmem:[#allocation11 + $0xa10] sm:$0xff] }
 0xe79   :  { %6082 = vmatmul.mubr.f32.vlgmr.msra.gmra.mxu0 %v11254_v43  ;;  %6090 = vmatprep.subr.mxu1 %v5476_v29  ;;  %v5470_v43 = vld [vmem:[#allocation11 + $0x8b8] sm:$0xff] }
 0xe7a   :  { %6159 = vmatprep.subr.mxu0 %v5542_v50  ;;  %6091 = vmatpush1.msra.mxu1 %v5475_v46  ;;  %v5510_v29 = vld [vmem:[#allocation11 + $0x9f8] sm:$0xff]  ;;  %v5512_v50 = vld [vmem:[#allocation11 + $0xa08] sm:$0xff]  ;;  %v5509_v46 = vld [vmem:[#allocation11 + $0x9f0] sm:$0xff] }
 0xe7b   :  { %6160 = vmatpush1.msra.mxu0 %v5541_v34  ;;  %6223 = vmatprep.mubr.f32.mxu0 %v5770_v10  ;;  %v5511_v34 = vld [vmem:[#allocation11 + $0xa00] sm:$0xff]  ;;  %v5508_v10 = vld [vmem:[#allocation11 + $0x9e8] sm:$0xff] }
 0xe7c   :  { %6092 = vmatprep.subr.mxu1 %v5474_v40  ;;  %6161 = vmatprep.subr.mxu0 %v5540_v5  ;;  %v5574_v40 = vld [vmem:[#allocation11 + $0xbf8] sm:$0xff]  ;;  %v5507_v5 = vld [vmem:[#allocation11 + $0x9e0] sm:$0xff] }
 0xe7d   :  { %6093 = vmatpush1.msra.mxu1 %v5473_v63  ;;  %6162 = vmatpush1.msra.mxu0 %v5539_v17  ;;  %v5573_v63 = vld [vmem:[#allocation11 + $0xbf0] sm:$0xff]  ;;  %v5506_v17 = vld [vmem:[#allocation11 + $0x9d8] sm:$0xff] }
 0xe7e   :  { %6094 = vmatprep.subr.mxu1 %v5472_v28  ;;  %6163 = vmatprep.subr.mxu0 %v5538_v26  ;;  %v5572_v28 = vld [vmem:[#allocation11 + $0xbe8] sm:$0xff]  ;;  %v5505_v26 = vld [vmem:[#allocation11 + $0x9d0] sm:$0xff] }
 0xe7f   :  { %6095 = vmatpush1.msra.mxu1 %v5471_v41  ;;  %6164 = vmatpush1.msra.mxu0 %v5537_v49  ;;  %v5571_v41 = vld [vmem:[#allocation11 + $0xbe0] sm:$0xff]  ;;  %v5504_v49 = vld [vmem:[#allocation11 + $0x9c8] sm:$0xff] }
 0xe80   :  { %6096 = vmatprep.subr.mxu1 %v5470_v43  ;;  %6165 = vmatprep.subr.mxu0 %v5536_v23  ;;  %v5570_v43 = vld [vmem:[#allocation11 + $0xbd8] sm:$0xff]  ;;  %v5503_v23 = vld [vmem:[#allocation11 + $0x9c0] sm:$0xff] }
 0xe81   :  { %6097 = vmatpush1.msra.mxu1 %v5469_v53  ;;  %6166 = vmatpush1.msra.mxu0 %v5535_v33  ;;  %v5569_v53 = vld [vmem:[#allocation11 + $0xbd0] sm:$0xff]  ;;  %v5502_v33 = vld [vmem:[#allocation11 + $0x9b8] sm:$0xff] }
 0xe82   :  { %6098 = vmatprep.subr.mxu1 %v5468_v31  ;;  %6167 = vmatprep.subr.mxu0 %v5534_v21  ;;  %v5568_v31 = vld [vmem:[#allocation11 + $0xbc8] sm:$0xff]  ;;  %v5501_v21 = vld [vmem:[#allocation11 + $0x9b0] sm:$0xff] }
 0xe83   :  { %6099 = vmatpush1.msra.mxu1 %v5467_v35  ;;  %6168 = vmatpush1.msra.mxu0 %v5533_v47  ;;  %v5567_v35 = vld [vmem:[#allocation11 + $0xbc0] sm:$0xff]  ;;  %v5500_v47 = vld [vmem:[#allocation11 + $0x9a8] sm:$0xff] }
 0xe84   :  { %6100 = vmatprep.subr.mxu1 %v5466_v39  ;;  %6169 = vmatprep.subr.mxu0 %v5532_v30  ;;  %v5566_v39 = vld [vmem:[#allocation11 + $0xbb8] sm:$0xff]  ;;  %v5499_v30 = vld [vmem:[#allocation11 + $0x9a0] sm:$0xff] }
 0xe85   :  { %6101 = vmatpush1.msra.mxu1 %v5465_v58  ;;  %6170 = vmatpush1.msra.mxu0 %v5531_v27  ;;  %v5565_v58 = vld [vmem:[#allocation11 + $0xbb0] sm:$0xff]  ;;  %v5498_v27 = vld [vmem:[#allocation11 + $0x998] sm:$0xff] }
 0xe86   :  { %6102 = vmatprep.subr.mxu1 %v5464_v8  ;;  %6171 = vmatprep.subr.mxu0 %v5530_v13  ;;  %v5564_v8 = vld [vmem:[#allocation11 + $0xba8] sm:$0xff]  ;;  %v5497_v13 = vld [vmem:[#allocation11 + $0x990] sm:$0xff] }
 0xe87   :  { %6103 = vmatpush1.msra.mxu1 %v5463_v37  ;;  %6172 = vmatpush1.msra.mxu0 %v5529_v38  ;;  %v5563_v37 = vld [vmem:[#allocation11 + $0xba0] sm:$0xff]  ;;  %v5496_v38 = vld [vmem:[#allocation11 + $0x988] sm:$0xff] }
 0xe88   :  { %6104 = vmatprep.subr.mxu1 %v5462_v57  ;;  %6173 = vmatprep.subr.mxu0 %v5528_v1  ;;  %v5562_v57 = vld [vmem:[#allocation11 + $0xb98] sm:$0xff]  ;;  %v5495_v1 = vld [vmem:[#allocation11 + $0x980] sm:$0xff] }
 0xe89   :  { %6105 = vmatpush1.msra.mxu1 %v5461_v25  ;;  %6174 = vmatpush1.msra.mxu0 %v5527_v4  ;;  %v5561_v25 = vld [vmem:[#allocation11 + $0xb90] sm:$0xff]  ;;  %v5494_v4 = vld [vmem:[#allocation11 + $0x978] sm:$0xff] }
 0xe8a   :  { %6106 = vmatprep.subr.mxu1 %v5460_v54  ;;  %6175 = vmatprep.subr.mxu0 %v5526_v24  ;;  %v5560_v54 = vld [vmem:[#allocation11 + $0xb88] sm:$0xff]  ;;  %v5493_v24 = vld [vmem:[#allocation11 + $0x970] sm:$0xff] }
 0xe8b   :  { %6107 = vmatpush1.msra.mxu1 %v5459_v36  ;;  %6176 = vmatpush1.msra.mxu0 %v5525_v44  ;;  %v5559_v36 = vld [vmem:[#allocation11 + $0xb80] sm:$0xff]  ;;  %v5492_v44 = vld [vmem:[#allocation11 + $0x968] sm:$0xff] }
 0xe8c   :  { %6108 = vmatprep.subr.mxu1 %v5458_v14  ;;  %6177 = vmatprep.subr.mxu0 %v5524_v11  ;;  %v5558_v14 = vld [vmem:[#allocation11 + $0xb78] sm:$0xff]  ;;  %v5491_v11 = vld [vmem:[#allocation11 + $0x960] sm:$0xff] }
 0xe8d   :  { %6109 = vmatpush1.msra.mxu1 %v5457_v60  ;;  %6178 = vmatpush1.msra.mxu0 %v5523_v62  ;;  %v5557_v60 = vld [vmem:[#allocation11 + $0xb70] sm:$0xff]  ;;  %v5490_v62 = vld [vmem:[#allocation11 + $0x958] sm:$0xff] }
 0xe8e   :  { %6110 = vmatprep.subr.mxu1 %v5456_v6  ;;  %6179 = vmatprep.subr.mxu0 %v5522_v45  ;;  %v5556_v6 = vld [vmem:[#allocation11 + $0xb68] sm:$0xff]  ;;  %v5489_v45 = vld [vmem:[#allocation11 + $0x950] sm:$0xff] }
 0xe8f   :  { %6111 = vmatpush1.msra.mxu1 %v5455_v0  ;;  %6180 = vmatpush1.msra.mxu0 %v5521_v51  ;;  %v5555_v0 = vld [vmem:[#allocation11 + $0xb60] sm:$0xff]  ;;  %v5488_v51 = vld [vmem:[#allocation11 + $0x948] sm:$0xff] }
 0xe90   :  { %6112 = vmatprep.subr.mxu1 %v5454_v3  ;;  %6181 = vmatprep.subr.mxu0 %v5520_v20  ;;  %v5554_v3 = vld [vmem:[#allocation11 + $0xb58] sm:$0xff]  ;;  %v5487_v20 = vld [vmem:[#allocation11 + $0x940] sm:$0xff] }
 0xe91   :  { %6113 = vmatpush1.msra.mxu1 %v5453_v2  ;;  %6182 = vmatpush1.msra.mxu0 %v5519_v59  ;;  %v5553_v2 = vld [vmem:[#allocation11 + $0xb50] sm:$0xff]  ;;  %v5486_v59 = vld [vmem:[#allocation11 + $0x938] sm:$0xff] }
 0xe92   :  { %6114 = vmatprep.subr.mxu1 %v5452_v48  ;;  %6183 = vmatprep.subr.mxu0 %v5518_v15  ;;  %v5552_v48 = vld [vmem:[#allocation11 + $0xb48] sm:$0xff]  ;;  %v5485_v15 = vld [vmem:[#allocation11 + $0x930] sm:$0xff] }
 0xe93   :  { %6115 = vmatpush1.msra.mxu1 %v5451_v55  ;;  %6184 = vmatpush1.msra.mxu0 %v5517_v22  ;;  %v5551_v55 = vld [vmem:[#allocation11 + $0xb40] sm:$0xff]  ;;  %v5484_v22 = vld [vmem:[#allocation11 + $0x928] sm:$0xff] }
 0xe94   :  { %6116 = vmatprep.subr.mxu1 %v5450_v32  ;;  %6185 = vmatprep.subr.mxu0 %v5516_v19  ;;  %v5550_v32 = vld [vmem:[#allocation11 + $0xb38] sm:$0xff]  ;;  %v5483_v19 = vld [vmem:[#allocation11 + $0x920] sm:$0xff] }
 0xe95   :  { %6117 = vmatpush1.msra.mxu1 %v5449_v52  ;;  %6186 = vmatpush1.msra.mxu0 %v5515_v16  ;;  %v5549_v52 = vld [vmem:[#allocation11 + $0xb30] sm:$0xff]  ;;  %v5190_v16 = vld [vmem:[#allocation4 + $0x18] sm:$0xff] }
 0xe96   :  { %6118 = vmatprep.subr.mxu1 %v5448_v12  ;;  %6187 = vmatprep.subr.mxu0 %v5514_v61  ;;  %v5482_v12 = vld [vmem:[#allocation11 + $0x918] sm:$0xff]  ;;  %v5548_v61 = vld [vmem:[#allocation11 + $0xb28] sm:$0xff] }
 0xe97   :  { %6119 = vmatpush1.msra.mxu1 %v5447_v18  ;;  %6188 = vmatpush1.msra.mxu0 %v5513_v42  ;;  %v5481_v18 = vld [vmem:[#allocation11 + $0x910] sm:$0xff]  ;;  %v5547_v42 = vld [vmem:[#allocation11 + $0xb20] sm:$0xff] }
 0xe98   :  { %6120 = vmatprep.subr.mxu1 %v5510_v29  ;;  %6189 = vmatprep.subr.mxu0 %v5512_v50  ;;  %v5480_v29 = vld [vmem:[#allocation11 + $0x908] sm:$0xff]  ;;  %v5546_v50 = vld [vmem:[#allocation11 + $0xb18] sm:$0xff] }
 0xe99   :  { %6121 = vmatpush2.msra.mxu1 %v5509_v46  ;;  %6190 = vmatpush1.msra.mxu0 %v5511_v34  ;;  %v5771_v46 = vcombine.high %v5190_v16, %v5190_v16  ;;  %v5479_v34 = vld [vmem:[#allocation11 + $0x900] sm:$0xff] }
 0xe9a   :  { %6122 = vmatprep.subr.mxu1 %v5508_v10  ;;  %6191 = vmatprep.subr.mxu0 %v5574_v40  ;;  %v5545_v10 = vld [vmem:[#allocation11 + $0xb10] sm:$0xff]  ;;  %v11273_v40 = vrot.slane %v5190_v16, %v11238_v56 }
 0xe9b   :  { %6123 = vmatpush2.msra.mxu1 %v5507_v5  ;;  %6192 = vmatpush2.msra.mxu0 %v5573_v63  ;;  %v5544_v5 = vld [vmem:[#allocation11 + $0xb08] sm:$0xff]  ;;  %v5606_v63 = vld [vmem:[#allocation11 + $0xcf8] sm:$0xff]  ;;  %v5581_v16 = vld [vmem:[#allocation11 + $0xc30] sm:$0xff] }
 0xe9c   :  { %6124 = vmatprep.subr.mxu1 %v5506_v17  ;;  %6193 = vmatprep.subr.mxu0 %v5572_v28  ;;  %v5543_v17 = vld [vmem:[#allocation11 + $0xb00] sm:$0xff]  ;;  %v5605_v28 = vld [vmem:[#allocation11 + $0xcf0] sm:$0xff] }
 0xe9d   :  { %6125 = vmatpush2.msra.mxu1 %v5505_v26  ;;  %6194 = vmatpush2.msra.mxu0 %v5571_v41  ;;  %v11276_v26 = vrot.slane %v5771_v46, %v11238_v56  ;;  %v5786_v41 = vcombine.high %v11273_v40, %v11273_v40  ;;  %v5644_v46 = vld [vmem:[#allocation11 + $0xe28] sm:$0xff] }
 0xe9e   :  { %6126 = vmatprep.subr.mxu1 %v5504_v49  ;;  %6195 = vmatprep.subr.mxu0 %v5570_v43  ;;  %v5604_v49 = vld [vmem:[#allocation11 + $0xce8] sm:$0xff]  ;;  %v5670_v43 = vld [vmem:[#allocation11 + $0xef8] sm:$0xff] }
 0xe9f   :  { %6127 = vmatpush2.msra.mxu1 %v5503_v23  ;;  %6196 = vmatpush2.msra.mxu0 %v5569_v53  ;;  %v5603_v23 = vld [vmem:[#allocation11 + $0xce0] sm:$0xff]  ;;  %v5669_v53 = vld [vmem:[#allocation11 + $0xef0] sm:$0xff]  ;;  %v5787_v56 = vcombine.high %v11276_v26, %v11276_v26 }
 0xea0   :  { %6128 = vmatprep.subr.mxu1 %v5502_v33  ;;  %6197 = vmatprep.subr.mxu0 %v5568_v31  ;;  %v5602_v33 = vld [vmem:[#allocation11 + $0xcd8] sm:$0xff]  ;;  %v5601_v31 = vld [vmem:[#allocation11 + $0xcd0] sm:$0xff] }
 0xea1   :  { %6129 = vmatpush2.msra.mxu1 %v5501_v21  ;;  %6198 = vmatpush2.msra.mxu0 %v5567_v35  ;;  %v5667_v21 = vld [vmem:[#allocation11 + $0xee0] sm:$0xff]  ;;  %v5600_v35 = vld [vmem:[#allocation11 + $0xcc8] sm:$0xff] }
 0xea2   :  { %6130 = vmatprep.subr.mxu1 %v5500_v47  ;;  %6199 = vmatprep.subr.mxu0 %v5566_v39  ;;  %v5666_v47 = vld [vmem:[#allocation11 + $0xed8] sm:$0xff]  ;;  %v5599_v39 = vld [vmem:[#allocation11 + $0xcc0] sm:$0xff] }
 0xea3   :  { %6131 = vmatpush2.msra.mxu1 %v5499_v30  ;;  %6200 = vmatpush2.msra.mxu0 %v5565_v58  ;;  %v5665_v30 = vld [vmem:[#allocation11 + $0xed0] sm:$0xff]  ;;  %v5664_v58 = vld [vmem:[#allocation11 + $0xec8] sm:$0xff] }
 0xea4   :  { %6132 = vmatprep.subr.mxu1 %v5498_v27  ;;  %6201 = vmatprep.subr.mxu0 %v5564_v8  ;;  %v5597_v27 = vld [vmem:[#allocation11 + $0xcb0] sm:$0xff]  ;;  %v5663_v8 = vld [vmem:[#allocation11 + $0xec0] sm:$0xff] }
 0xea5   :  { %6133 = vmatpush2.msra.mxu1 %v5497_v13  ;;  %6202 = vmatpush2.msra.mxu0 %v5563_v37  ;;  %v5596_v13 = vld [vmem:[#allocation11 + $0xca8] sm:$0xff]  ;;  %v5662_v37 = vld [vmem:[#allocation11 + $0xeb8] sm:$0xff] }
 0xea6   :  { %6134 = vmatprep.subr.mxu1 %v5496_v38  ;;  %6203 = vmatprep.subr.mxu0 %v5562_v57  ;;  %v5595_v38 = vld [vmem:[#allocation11 + $0xca0] sm:$0xff]  ;;  %v5661_v57 = vld [vmem:[#allocation11 + $0xeb0] sm:$0xff] }
 0xea7   :  { %6135 = vmatpush2.msra.mxu1 %v5495_v1  ;;  %6204 = vmatpush2.msra.mxu0 %v5561_v25  ;;  %v5594_v1 = vld [vmem:[#allocation11 + $0xc98] sm:$0xff]  ;;  %v5660_v25 = vld [vmem:[#allocation11 + $0xea8] sm:$0xff] }
 0xea8   :  { %6136 = vmatprep.subr.mxu1 %v5494_v4  ;;  %6205 = vmatprep.subr.mxu0 %v5560_v54  ;;  %v5593_v4 = vld [vmem:[#allocation11 + $0xc90] sm:$0xff]  ;;  %v5659_v54 = vld [vmem:[#allocation11 + $0xea0] sm:$0xff] }
 0xea9   :  { %6137 = vmatpush2.msra.mxu1 %v5493_v24  ;;  %6206 = vmatpush2.msra.mxu0 %v5559_v36  ;;  %v5592_v24 = vld [vmem:[#allocation11 + $0xc88] sm:$0xff]  ;;  %v5658_v36 = vld [vmem:[#allocation11 + $0xe98] sm:$0xff] }
 0xeaa   :  { %6138 = vmatprep.subr.mxu1 %v5492_v44  ;;  %6207 = vmatprep.subr.mxu0 %v5558_v14  ;;  %v5591_v44 = vld [vmem:[#allocation11 + $0xc80] sm:$0xff]  ;;  %v5657_v14 = vld [vmem:[#allocation11 + $0xe90] sm:$0xff] }
 0xeab   :  { %6139 = vmatpush2.msra.mxu1 %v5491_v11  ;;  %6208 = vmatpush2.msra.mxu0 %v5557_v60  ;;  %v5590_v11 = vld [vmem:[#allocation11 + $0xc78] sm:$0xff]  ;;  %v5656_v60 = vld [vmem:[#allocation11 + $0xe88] sm:$0xff] }
 0xeac   :  { %6140 = vmatprep.subr.mxu1 %v5490_v62  ;;  %6209 = vmatprep.subr.mxu0 %v5556_v6  ;;  %v5589_v62 = vld [vmem:[#allocation11 + $0xc70] sm:$0xff]  ;;  %v5655_v6 = vld [vmem:[#allocation11 + $0xe80] sm:$0xff] }
 0xead   :  { %6141 = vmatpush2.msra.mxu1 %v5489_v45  ;;  %6210 = vmatpush2.msra.mxu0 %v5555_v0  ;;  %v5588_v45 = vld [vmem:[#allocation11 + $0xc68] sm:$0xff]  ;;  %v5654_v0 = vld [vmem:[#allocation11 + $0xe78] sm:$0xff] }
 0xeae   :  { %6142 = vmatprep.subr.mxu1 %v5488_v51  ;;  %6211 = vmatprep.subr.mxu0 %v5554_v3  ;;  %v5587_v51 = vld [vmem:[#allocation11 + $0xc60] sm:$0xff]  ;;  %v5653_v3 = vld [vmem:[#allocation11 + $0xe70] sm:$0xff] }
 0xeaf   :  { %6143 = vmatpush2.msra.mxu1 %v5487_v20  ;;  %6212 = vmatpush2.msra.mxu0 %v5553_v2  ;;  %v5586_v20 = vld [vmem:[#allocation11 + $0xc58] sm:$0xff]  ;;  %v5652_v2 = vld [vmem:[#allocation11 + $0xe68] sm:$0xff] }
 0xeb0   :  { %6144 = vmatprep.subr.mxu1 %v5486_v59  ;;  %6213 = vmatprep.subr.mxu0 %v5552_v48  ;;  %v5585_v59 = vld [vmem:[#allocation11 + $0xc50] sm:$0xff]  ;;  %v5651_v48 = vld [vmem:[#allocation11 + $0xe60] sm:$0xff] }
 0xeb1   :  { %6145 = vmatpush2.msra.mxu1 %v5485_v15  ;;  %6214 = vmatpush2.msra.mxu0 %v5551_v55  ;;  %v5584_v15 = vld [vmem:[#allocation11 + $0xc48] sm:$0xff]  ;;  %v5650_v55 = vld [vmem:[#allocation11 + $0xe58] sm:$0xff] }
 0xeb2   :  { %6146 = vmatprep.subr.mxu1 %v5484_v22  ;;  %6215 = vmatprep.subr.mxu0 %v5550_v32  ;;  %v5583_v22 = vld [vmem:[#allocation11 + $0xc40] sm:$0xff]  ;;  %v5649_v32 = vld [vmem:[#allocation11 + $0xe50] sm:$0xff] }
 0xeb3   :  { %6147 = vmatpush2.msra.mxu1 %v5483_v19  ;;  %6216 = vmatpush2.msra.mxu0 %v5549_v52  ;;  %v5582_v19 = vld [vmem:[#allocation11 + $0xc38] sm:$0xff]  ;;  %v5648_v52 = vld [vmem:[#allocation11 + $0xe48] sm:$0xff] }
 0xeb4   :  { %6148 = vmatprep.subr.mxu1 %v5482_v12  ;;  %6217 = vmatprep.subr.mxu0 %v5548_v61  ;;  %v5647_v12 = vld [vmem:[#allocation11 + $0xe40] sm:$0xff]  ;;  %v5580_v61 = vld [vmem:[#allocation11 + $0xc28] sm:$0xff] }
 0xeb5   :  { %6149 = vmatpush2.msra.mxu1 %v5481_v18  ;;  %6218 = vmatpush2.msra.mxu0 %v5547_v42  ;;  %v5646_v18 = vld [vmem:[#allocation11 + $0xe38] sm:$0xff]  ;;  %v5579_v42 = vld [vmem:[#allocation11 + $0xc20] sm:$0xff] }
 0xeb6   :  { %6150 = vmatprep.subr.mxu1 %v5480_v29  ;;  %6219 = vmatprep.subr.mxu0 %v5546_v50  ;;  %v5645_v29 = vld [vmem:[#allocation11 + $0xe30] sm:$0xff]  ;;  %v5578_v50 = vld [vmem:[#allocation11 + $0xc18] sm:$0xff] }
 0xeb7   :  { %6151 = vmatpush2.msra.mxu1 %v5479_v34  ;;  %6220 = vmatpush2.msra.mxu0 %v5545_v10  ;;  %v5577_v34 = vld [vmem:[#allocation11 + $0xc10] sm:$0xff]  ;;  %v5643_v10 = vld [vmem:[#allocation11 + $0xe20] sm:$0xff] }
 0xeb8   :  { %6153 = vmatmul.mubr.f32.vlgmr.msra.gmra.mxu1 %v11261_v9  ;;  %6221 = vmatprep.subr.mxu0 %v5544_v5  ;;  %v5668_v9 = vld [vmem:[#allocation11 + $0xee8] sm:$0xff] }
 0xeb9   :  { %6230 = vmatprep.subr.mxu1 %v5606_v63  ;;  %6222 = vmatpush2.msra.mxu0 %v5543_v17  ;;  %v5576_v5 = vld [vmem:[#allocation11 + $0xc08] sm:$0xff]  ;;  %v5642_v63 = vld [vmem:[#allocation11 + $0xe18] sm:$0xff]  ;;  %v5575_v17 = vld [vmem:[#allocation11 + $0xc00] sm:$0xff] }
 0xeba   :  { %6231 = vmatpush1.msra.mxu1 %v5605_v28  ;;  %6294 = vmatprep.mubr.f32.mxu1 %v5786_v41  ;;  %v5641_v28 = vld [vmem:[#allocation11 + $0xe10] sm:$0xff]  ;;  %v5638_v41 = vld [vmem:[#allocation11 + $0xdf8] sm:$0xff] }
 0xebb   :  { %6224 = vmatmul.mubr.f32.vlgmr.msra.gmra.mxu0 %v11264_v7  ;;  %6232 = vmatprep.subr.mxu1 %v5604_v49  ;;  %v5598_v7 = vld [vmem:[#allocation11 + $0xcb8] sm:$0xff]  ;;  %v5640_v49 = vld [vmem:[#allocation11 + $0xe08] sm:$0xff] }
 0xebc   :  { %6301 = vmatprep.subr.mxu0 %v5670_v43  ;;  %6233 = vmatpush1.msra.mxu1 %v5603_v23  ;;  %v5637_v43 = vld [vmem:[#allocation11 + $0xdf0] sm:$0xff]  ;;  %v5639_v23 = vld [vmem:[#allocation11 + $0xe00] sm:$0xff] }
 0xebd   :  { %6302 = vmatpush1.msra.mxu0 %v5669_v53  ;;  %6365 = vmatprep.mubr.f32.mxu0 %v5787_v56  ;;  %v5636_v53 = vld [vmem:[#allocation11 + $0xde8] sm:$0xff]  ;;  %v5702_v56 = vld [vmem:[#allocation11 + $0xff8] sm:$0xff] }
 0xebe   :  { %6234 = vmatprep.subr.mxu1 %v5602_v33  ;;  %6303 = vmatprep.subr.mxu0 %v5668_v9  ;;  %v5635_v33 = vld [vmem:[#allocation11 + $0xde0] sm:$0xff]  ;;  %v5701_v9 = vld [vmem:[#allocation11 + $0xff0] sm:$0xff] }
 0xebf   :  { %6235 = vmatpush1.msra.mxu1 %v5601_v31  ;;  %6304 = vmatpush1.msra.mxu0 %v5667_v21  ;;  %v5634_v31 = vld [vmem:[#allocation11 + $0xdd8] sm:$0xff]  ;;  %v5700_v21 = vld [vmem:[#allocation11 + $0xfe8] sm:$0xff] }
 0xec0   :  { %6236 = vmatprep.subr.mxu1 %v5600_v35  ;;  %6305 = vmatprep.subr.mxu0 %v5666_v47  ;;  %v5633_v35 = vld [vmem:[#allocation11 + $0xdd0] sm:$0xff]  ;;  %v5699_v47 = vld [vmem:[#allocation11 + $0xfe0] sm:$0xff] }
 0xec1   :  { %6237 = vmatpush1.msra.mxu1 %v5599_v39  ;;  %6306 = vmatpush1.msra.mxu0 %v5665_v30  ;;  %v5632_v39 = vld [vmem:[#allocation11 + $0xdc8] sm:$0xff]  ;;  %v5698_v30 = vld [vmem:[#allocation11 + $0xfd8] sm:$0xff] }
 0xec2   :  { %6238 = vmatprep.subr.mxu1 %v5598_v7  ;;  %6307 = vmatprep.subr.mxu0 %v5664_v58  ;;  %v5631_v7 = vld [vmem:[#allocation11 + $0xdc0] sm:$0xff]  ;;  %v5697_v58 = vld [vmem:[#allocation11 + $0xfd0] sm:$0xff] }
 0xec3   :  { %6239 = vmatpush1.msra.mxu1 %v5597_v27  ;;  %6308 = vmatpush1.msra.mxu0 %v5663_v8  ;;  %v5630_v27 = vld [vmem:[#allocation11 + $0xdb8] sm:$0xff]  ;;  %v5696_v8 = vld [vmem:[#allocation11 + $0xfc8] sm:$0xff] }
 0xec4   :  { %6240 = vmatprep.subr.mxu1 %v5596_v13  ;;  %6309 = vmatprep.subr.mxu0 %v5662_v37  ;;  %v5629_v13 = vld [vmem:[#allocation11 + $0xdb0] sm:$0xff]  ;;  %v5695_v37 = vld [vmem:[#allocation11 + $0xfc0] sm:$0xff] }
 0xec5   :  { %6241 = vmatpush1.msra.mxu1 %v5595_v38  ;;  %6310 = vmatpush1.msra.mxu0 %v5661_v57  ;;  %v5628_v38 = vld [vmem:[#allocation11 + $0xda8] sm:$0xff]  ;;  %v5694_v57 = vld [vmem:[#allocation11 + $0xfb8] sm:$0xff] }
 0xec6   :  { %6242 = vmatprep.subr.mxu1 %v5594_v1  ;;  %6311 = vmatprep.subr.mxu0 %v5660_v25  ;;  %v5627_v1 = vld [vmem:[#allocation11 + $0xda0] sm:$0xff]  ;;  %v5693_v25 = vld [vmem:[#allocation11 + $0xfb0] sm:$0xff] }
 0xec7   :  { %6243 = vmatpush1.msra.mxu1 %v5593_v4  ;;  %6312 = vmatpush1.msra.mxu0 %v5659_v54  ;;  %v5626_v4 = vld [vmem:[#allocation11 + $0xd98] sm:$0xff]  ;;  %v5692_v54 = vld [vmem:[#allocation11 + $0xfa8] sm:$0xff] }
 0xec8   :  { %6244 = vmatprep.subr.mxu1 %v5592_v24  ;;  %6313 = vmatprep.subr.mxu0 %v5658_v36  ;;  %v5625_v24 = vld [vmem:[#allocation11 + $0xd90] sm:$0xff]  ;;  %v5691_v36 = vld [vmem:[#allocation11 + $0xfa0] sm:$0xff] }
 0xec9   :  { %6245 = vmatpush1.msra.mxu1 %v5591_v44  ;;  %6314 = vmatpush1.msra.mxu0 %v5657_v14  ;;  %v5624_v44 = vld [vmem:[#allocation11 + $0xd88] sm:$0xff]  ;;  %v5690_v14 = vld [vmem:[#allocation11 + $0xf98] sm:$0xff] }
 0xeca   :  { %6246 = vmatprep.subr.mxu1 %v5590_v11  ;;  %6315 = vmatprep.subr.mxu0 %v5656_v60  ;;  %v5623_v11 = vld [vmem:[#allocation11 + $0xd80] sm:$0xff]  ;;  %v5689_v60 = vld [vmem:[#allocation11 + $0xf90] sm:$0xff] }
 0xecb   :  { %6247 = vmatpush1.msra.mxu1 %v5589_v62  ;;  %6316 = vmatpush1.msra.mxu0 %v5655_v6  ;;  %v5622_v62 = vld [vmem:[#allocation11 + $0xd78] sm:$0xff]  ;;  %v5688_v6 = vld [vmem:[#allocation11 + $0xf88] sm:$0xff] }
 0xecc   :  { %6248 = vmatprep.subr.mxu1 %v5588_v45  ;;  %6317 = vmatprep.subr.mxu0 %v5654_v0  ;;  %v5621_v45 = vld [vmem:[#allocation11 + $0xd70] sm:$0xff]  ;;  %v5687_v0 = vld [vmem:[#allocation11 + $0xf80] sm:$0xff] }
 0xecd   :  { %6249 = vmatpush1.msra.mxu1 %v5587_v51  ;;  %6318 = vmatpush1.msra.mxu0 %v5653_v3  ;;  %v5620_v51 = vld [vmem:[#allocation11 + $0xd68] sm:$0xff]  ;;  %v5686_v3 = vld [vmem:[#allocation11 + $0xf78] sm:$0xff] }
 0xece   :  { %6250 = vmatprep.subr.mxu1 %v5586_v20  ;;  %6319 = vmatprep.subr.mxu0 %v5652_v2  ;;  %v5619_v20 = vld [vmem:[#allocation11 + $0xd60] sm:$0xff]  ;;  %v5685_v2 = vld [vmem:[#allocation11 + $0xf70] sm:$0xff] }
 0xecf   :  { %6251 = vmatpush1.msra.mxu1 %v5585_v59  ;;  %6320 = vmatpush1.msra.mxu0 %v5651_v48  ;;  %v5618_v59 = vld [vmem:[#allocation11 + $0xd58] sm:$0xff]  ;;  %v5684_v48 = vld [vmem:[#allocation11 + $0xf68] sm:$0xff] }
 0xed0   :  { %6252 = vmatprep.subr.mxu1 %v5584_v15  ;;  %6321 = vmatprep.subr.mxu0 %v5650_v55  ;;  %v5617_v15 = vld [vmem:[#allocation11 + $0xd50] sm:$0xff]  ;;  %v5683_v55 = vld [vmem:[#allocation11 + $0xf60] sm:$0xff] }
 0xed1   :  { %6253 = vmatpush1.msra.mxu1 %v5583_v22  ;;  %6322 = vmatpush1.msra.mxu0 %v5649_v32  ;;  %v5616_v22 = vld [vmem:[#allocation11 + $0xd48] sm:$0xff]  ;;  %v5682_v32 = vld [vmem:[#allocation11 + $0xf58] sm:$0xff] }
 0xed2   :  { %6254 = vmatprep.subr.mxu1 %v5582_v19  ;;  %6323 = vmatprep.subr.mxu0 %v5648_v52  ;;  %v5615_v19 = vld [vmem:[#allocation11 + $0xd40] sm:$0xff]  ;;  %v5681_v52 = vld [vmem:[#allocation11 + $0xf50] sm:$0xff] }
 0xed3   :  { %6255 = vmatpush1.msra.mxu1 %v5581_v16  ;;  %6324 = vmatpush1.msra.mxu0 %v5647_v12  ;;  %v5614_v16 = vld [vmem:[#allocation11 + $0xd38] sm:$0xff]  ;;  %v5680_v12 = vld [vmem:[#allocation11 + $0xf48] sm:$0xff] }
 0xed4   :  { %6256 = vmatprep.subr.mxu1 %v5580_v61  ;;  %6325 = vmatprep.subr.mxu0 %v5646_v18  ;;  %v5613_v61 = vld [vmem:[#allocation11 + $0xd30] sm:$0xff]  ;;  %v5679_v18 = vld [vmem:[#allocation11 + $0xf40] sm:$0xff] }
 0xed5   :  { %6257 = vmatpush1.msra.mxu1 %v5579_v42  ;;  %6326 = vmatpush1.msra.mxu0 %v5645_v29  ;;  %v5612_v42 = vld [vmem:[#allocation11 + $0xd28] sm:$0xff]  ;;  %v5678_v29 = vld [vmem:[#allocation11 + $0xf38] sm:$0xff] }
 0xed6   :  { %6258 = vmatprep.subr.mxu1 %v5578_v50  ;;  %6327 = vmatprep.subr.mxu0 %v5644_v46  ;;  %v5611_v50 = vld [vmem:[#allocation11 + $0xd20] sm:$0xff]  ;;  %v5677_v46 = vld [vmem:[#allocation11 + $0xf30] sm:$0xff] }
 0xed7   :  { %6259 = vmatpush1.msra.mxu1 %v5577_v34  ;;  %6328 = vmatpush1.msra.mxu0 %v5643_v10  ;;  %v5610_v34 = vld [vmem:[#allocation11 + $0xd18] sm:$0xff]  ;;  %v5676_v10 = vld [vmem:[#allocation11 + $0xf28] sm:$0xff] }
 0xed8   :  { %6260 = vmatprep.subr.mxu1 %v5576_v5  ;;  %6329 = vmatprep.subr.mxu0 %v5642_v63  ;;  %v5609_v5 = vld [vmem:[#allocation11 + $0xd10] sm:$0xff]  ;;  %v5675_v63 = vld [vmem:[#allocation11 + $0xf20] sm:$0xff] }
 0xed9   :  { %6261 = vmatpush1.msra.mxu1 %v5575_v17  ;;  %6330 = vmatpush1.msra.mxu0 %v5641_v28  ;;  %v5608_v17 = vld [vmem:[#allocation11 + $0xd08] sm:$0xff]  ;;  %v5674_v28 = vld [vmem:[#allocation11 + $0xf18] sm:$0xff] }
 0xeda   :  { %6262 = vmatprep.subr.mxu1 %v5638_v41  ;;  %6331 = vmatprep.subr.mxu0 %v5640_v49  ;;  %v5607_v41 = vld [vmem:[#allocation11 + $0xd00] sm:$0xff]  ;;  %v5673_v49 = vld [vmem:[#allocation11 + $0xf10] sm:$0xff] }
 0xedb   :  { %6263 = vmatpush2.msra.mxu1 %v5637_v43  ;;  %6332 = vmatpush1.msra.mxu0 %v5639_v23  ;;  %v5672_v43 = vld [vmem:[#allocation11 + $0xf08] sm:$0xff]  ;;  %v5671_v23 = vld [vmem:[#allocation11 + $0xf00] sm:$0xff] }
 0xedc   :  { %6264 = vmatprep.subr.mxu1 %v5636_v53  ;;  %6333 = vmatprep.subr.mxu0 %v5702_v56  ;;  %v6405_v53 = vld [vmem:[%s11397_s7 + $0xf8] sm:$0xff] }
 0xedd   :  { %6265 = vmatpush2.msra.mxu1 %v5635_v33  ;;  %6334 = vmatpush2.msra.mxu0 %v5701_v9  ;;  %v6389_v56 = vld [vmem:[%s11397_s7 + $0x78] sm:$0xff]  ;;  %v6404_v33 = vld [vmem:[%s11397_s7 + $0xf0] sm:$0xff]  ;;  %v6387_v9 = vld [vmem:[%s11397_s7 + $0x68] sm:$0xff] }
 0xede   :  { %6266 = vmatprep.subr.mxu1 %v5634_v31  ;;  %6335 = vmatprep.subr.mxu0 %v5700_v21  ;;  %v6402_v31 = vld [vmem:[%s11397_s7 + $0xe0] sm:$0xff] }
 0xedf   :  { %6267 = vmatpush2.msra.mxu1 %v5633_v35  ;;  %6336 = vmatpush2.msra.mxu0 %v5699_v47  ;;  %v6386_v21 = vld [vmem:[%s11397_s7 + $0x60] sm:$0xff]  ;;  %v6401_v35 = vld [vmem:[%s11397_s7 + $0xd8] sm:$0xff] }
 0xee0   :  { %6268 = vmatprep.subr.mxu1 %v5632_v39  ;;  %6337 = vmatprep.subr.mxu0 %v5698_v30  ;;  %v6385_v47 = vld [vmem:[%s11397_s7 + $0x58] sm:$0xff]  ;;  %v6400_v39 = vld [vmem:[%s11397_s7 + $0xd0] sm:$0xff] }
 0xee1   :  { %6269 = vmatpush2.msra.mxu1 %v5631_v7  ;;  %6338 = vmatpush2.msra.mxu0 %v5697_v58  ;;  %v6384_v30 = vld [vmem:[%s11397_s7 + $0x50] sm:$0xff]  ;;  %v6399_v7 = vld [vmem:[%s11397_s7 + $0xc8] sm:$0xff] }
 0xee2   :  { %6270 = vmatprep.subr.mxu1 %v5630_v27  ;;  %6339 = vmatprep.subr.mxu0 %v5696_v8  ;;  %v6383_v58 = vld [vmem:[%s11397_s7 + $0x48] sm:$0xff]  ;;  %v6398_v27 = vld [vmem:[%s11397_s7 + $0xc0] sm:$0xff] }
 0xee3   :  { %6271 = vmatpush2.msra.mxu1 %v5629_v13  ;;  %6340 = vmatpush2.msra.mxu0 %v5695_v37  ;;  %v6382_v8 = vld [vmem:[%s11397_s7 + $0x40] sm:$0xff]  ;;  %v6397_v13 = vld [vmem:[%s11397_s7 + $0xb8] sm:$0xff] }
 0xee4   :  { %6272 = vmatprep.subr.mxu1 %v5628_v38  ;;  %6341 = vmatprep.subr.mxu0 %v5694_v57  ;;  %v6381_v37 = vld [vmem:[%s11397_s7 + $0x38] sm:$0xff]  ;;  %v6396_v38 = vld [vmem:[%s11397_s7 + $0xb0] sm:$0xff] }
 0xee5   :  { %6273 = vmatpush2.msra.mxu1 %v5627_v1  ;;  %6342 = vmatpush2.msra.mxu0 %v5693_v25  ;;  %v6380_v57 = vld [vmem:[%s11397_s7 + $0x30] sm:$0xff]  ;;  %v6395_v1 = vld [vmem:[%s11397_s7 + $0xa8] sm:$0xff] }
 0xee6   :  { %6274 = vmatprep.subr.mxu1 %v5626_v4  ;;  %6343 = vmatprep.subr.mxu0 %v5692_v54  ;;  %v6379_v25 = vld [vmem:[%s11397_s7 + $0x28] sm:$0xff]  ;;  %v6394_v4 = vld [vmem:[%s11397_s7 + $0xa0] sm:$0xff] }
 0xee7   :  { %6275 = vmatpush2.msra.mxu1 %v5625_v24  ;;  %6344 = vmatpush2.msra.mxu0 %v5691_v36  ;;  %v6378_v54 = vld [vmem:[%s11397_s7 + $0x20] sm:$0xff]  ;;  %v6393_v24 = vld [vmem:[%s11397_s7 + $0x98] sm:$0xff] }
 0xee8   :  { %6276 = vmatprep.subr.mxu1 %v5624_v44  ;;  %6345 = vmatprep.subr.mxu0 %v5690_v14  ;;  %v6377_v36 = vld [vmem:[%s11397_s7 + $0x18] sm:$0xff]  ;;  %v6392_v44 = vld [vmem:[%s11397_s7 + $0x90] sm:$0xff] }
 0xee9   :  { %6277 = vmatpush2.msra.mxu1 %v5623_v11  ;;  %6346 = vmatpush2.msra.mxu0 %v5689_v60  ;;  %v6376_v14 = vld [vmem:[%s11397_s7 + $0x10] sm:$0xff]  ;;  %v6391_v11 = vld [vmem:[%s11397_s7 + $0x88] sm:$0xff] }
 0xeea   :  { %6278 = vmatprep.subr.mxu1 %v5622_v62  ;;  %6347 = vmatprep.subr.mxu0 %v5688_v6  ;;  %v6375_v60 = vld [vmem:[%s11397_s7 + $0x8] sm:$0xff]  ;;  %v6390_v62 = vld [vmem:[%s11397_s7 + $0x80] sm:$0xff] }
 0xeeb   :  { %6279 = vmatpush2.msra.mxu1 %v5621_v45  ;;  %6348 = vmatpush2.msra.mxu0 %v5687_v0  ;;  %v6374_v6 = vld [vmem:[%s11397_s7] sm:$0xff] }
 0xeec   :  { %6280 = vmatprep.subr.mxu1 %v5620_v51  ;;  %6349 = vmatprep.subr.mxu0 %v5686_v3  ;;  %v5704_v45 = vld [vmem:[#allocation11 + $0x1000] ss:$8 sm:$0x3]  ;;  %v13107_v51 = vld [vmem:[#allocation110_spill] sm:$0xff] }
 0xeed   :  { %6281 = vmatpush2.msra.mxu1 %v5619_v20  ;;  %6350 = vmatpush2.msra.mxu0 %v5685_v2  ;;  %v5709_v3 = vrot.slane %v5704_v45, %v13107_v51  ;;  %v13108_v20 = vld [vmem:[#allocation111_spill] sm:$0xff] }
 0xeee   :  { %6282 = vmatprep.subr.mxu1 %v5618_v59  ;;  %6351 = vmatprep.subr.mxu0 %v5684_v48  ;;  %v5713_v2 = vrot.slane %v5704_v45, %v13108_v20 }
 0xeef   :  { %6283 = vmatpush2.msra.mxu1 %v5617_v15  ;;  %6352 = vmatpush2.msra.mxu0 %v5683_v55 }
 0xef0   :  { %6284 = vmatprep.subr.mxu1 %v5616_v22  ;;  %6353 = vmatprep.subr.mxu0 %v5682_v32 }
 0xef1   :  { %6285 = vmatpush2.msra.mxu1 %v5615_v19  ;;  %6354 = vmatpush2.msra.mxu0 %v5681_v52 }
 0xef2   :  { %6286 = vmatprep.subr.mxu1 %v5614_v16  ;;  %6355 = vmatprep.subr.mxu0 %v5680_v12 }
 0xef3   :  { %6287 = vmatpush2.msra.mxu1 %v5613_v61  ;;  %6356 = vmatpush2.msra.mxu0 %v5679_v18 }
 0xef4   :  { %6288 = vmatprep.subr.mxu1 %v5612_v42  ;;  %6357 = vmatprep.subr.mxu0 %v5678_v29 }
 0xef5   :  { %6289 = vmatpush2.msra.mxu1 %v5611_v50  ;;  %6358 = vmatpush2.msra.mxu0 %v5677_v46  ;;  %v5870_v0 = vpop.f32.mrf.mxu1 }
 0xef6   :  { %6290 = vmatprep.subr.mxu1 %v5610_v34  ;;  %6359 = vmatprep.subr.mxu0 %v5676_v10  ;;  %v5871_v15 = vadd.f32 %v5870_v0, %v5709_v3 }
 0xef7   :  { %6291 = vmatpush2.msra.mxu1 %v5609_v5  ;;  %6360 = vmatpush2.msra.mxu0 %v5675_v63  ;;  %v5872_v59 = vpop.f32.mrf.mxu1 }
 0xef8   :  { %6292 = vmatprep.subr.mxu1 %v5608_v17  ;;  %6361 = vmatprep.subr.mxu0 %v5674_v28  ;;  %v5941_v48 = vpop.f32.mrf.mxu0  ;;  %v5873_v22 = vadd.f32 %v5872_v59, %v5713_v2 }
 0xef9   :  { %6293 = vmatpush2.msra.mxu1 %v5607_v41  ;;  %6362 = vmatpush2.msra.mxu0 %v5673_v49  ;;  %v5942_v19 = vadd.f32 %v5941_v48, %v5871_v15 }
 0xefa   :  { %6295 = vmatmul.mubr.f32.vlgmr.msra.gmra.mxu1 %v11273_v40  ;;  %6363 = vmatprep.subr.mxu0 %v5672_v43  ;;  %v6388_v40 = vld [vmem:[%s11397_s7 + $0x70] sm:$0xff]  ;;  %v5943_v32 = vpop.f32.mrf.mxu0 }
 0xefb   :  { %6364 = vmatpush2.msra.mxu0 %v5671_v23  ;;  %6616 = vmatprep.subr.mxu1 %v6405_v53  ;;  %v5944_v12 = vadd.f32 %v5943_v32, %v5873_v22 }
 0xefc   :  { %6366 = vmatmul.mubr.f32.vlgmr.msra.gmra.mxu0 %v11276_v26  ;;  %6617 = vmatpush3.msra.mxu1 %v6389_v56  ;;  %v6403_v26 = vld [vmem:[%s11397_s7 + $0xe8] sm:$0xff] }
 0xefd   :  { %6618 = vmatprep.subr.mxu1 %v6404_v33 }
 0xefe   :  { %6619 = vmatpush3.msra.mxu1 %v6388_v40 }
 0xeff   :  { %6620 = vmatprep.subr.mxu1 %v6403_v26 }
 0xf00   :  { %6621 = vmatpush3.msra.mxu1 %v6387_v9 }
 0xf01   :  { %6622 = vmatprep.subr.mxu1 %v6402_v31 }
 0xf02   :  { %6623 = vmatpush3.msra.mxu1 %v6386_v21 }
 0xf03   :  { %6624 = vmatprep.subr.mxu1 %v6401_v35  ;;  %v6581_v35 = vld [vmem:[%s11397_s7 + $0x100] ss:$0 sm:$0xff] }
 0xf04   :  { %6625 = vmatpush3.msra.mxu1 %v6385_v47 }
 0xf05   :  { %6626 = vmatprep.subr.mxu1 %v6400_v39 }
 0xf06   :  { %6627 = vmatpush3.msra.mxu1 %v6384_v30 }
 0xf07   :  { %6628 = vmatprep.subr.mxu1 %v6399_v7 }
 0xf08   :  { %6629 = vmatpush3.msra.mxu1 %v6383_v58 }
 0xf09   :  { %6630 = vmatprep.subr.mxu1 %v6398_v27 }
 0xf0a   :  { %6631 = vmatpush3.msra.mxu1 %v6382_v8 }
 0xf0b   :  { %6632 = vmatprep.subr.mxu1 %v6397_v13 }
 0xf0c   :  { %6633 = vmatpush3.msra.mxu1 %v6381_v37 }
 0xf0d   :  { %6634 = vmatprep.subr.mxu1 %v6396_v38 }
 0xf0e   :  { %6635 = vmatpush3.msra.mxu1 %v6380_v57 }
 0xf0f   :  { %6636 = vmatprep.subr.mxu1 %v6395_v1 }
 0xf10   :  { %6637 = vmatpush3.msra.mxu1 %v6379_v25 }
 0xf11   :  { %6638 = vmatprep.subr.mxu1 %v6394_v4 }
 0xf12   :  { %6639 = vmatpush3.msra.mxu1 %v6378_v54 }
 0xf13   :  { %6640 = vmatprep.subr.mxu1 %v6393_v24 }
 0xf14   :  { %6641 = vmatpush3.msra.mxu1 %v6377_v36 }
 0xf15   :  { %6642 = vmatprep.subr.mxu1 %v6392_v44 }
 0xf16   :  { %6643 = vmatpush3.msra.mxu1 %v6376_v14 }
 0xf17   :  { %6644 = vmatprep.subr.mxu1 %v6391_v11 }
 0xf18   :  { %6645 = vmatpush3.msra.mxu1 %v6375_v60 }
 0xf19   :  { %6646 = vmatprep.subr.mxu1 %v6390_v62 }
 0xf1a   :  { %6647 = vmatpush3.msra.mxu1 %v6374_v6 }
 0xf36   :  { %v6012_v55 = vpop.f32.mrf.mxu1 }
 0xf37   :  { %v6013_v61 = vadd.f32 %v6012_v55, %v5942_v19 }
 0xf38   :  { %v6014_v52 = vpop.f32.mrf.mxu1 }
 0xf39   :  { %v6083_v16 = vpop.f32.mrf.mxu0  ;;  %v6015_v42 = vadd.f32 %v6014_v52, %v5944_v12 }
 0xf3a   :  { %v6084_v50 = vadd.f32 %v6083_v16, %v6013_v61 }
 0xf3b   :  { %v6085_v29 = vpop.f32.mrf.mxu0 }
 0xf3c   :  { %v6086_v10 = vadd.f32 %v6085_v29, %v6015_v42 }
 0xf78   :  { %v6154_v18 = vpop.f32.mrf.mxu1 }
 0xf79   :  { %v6155_v5 = vadd.f32 %v6154_v18, %v6084_v50 }
 0xf7a   :  { %v6156_v46 = vpop.f32.mrf.mxu1 }
 0xf7b   :  { %v6225_v34 = vpop.f32.mrf.mxu0  ;;  %v6157_v63 = vadd.f32 %v6156_v46, %v6086_v10 }
 0xf7c   :  { %v6226_v28 = vadd.f32 %v6225_v34, %v6155_v5 }
 0xf7d   :  { %v6227_v17 = vpop.f32.mrf.mxu0 }
 0xf7e   :  { %v6228_v49 = vadd.f32 %v6227_v17, %v6157_v63 }
 0xfba   :  { %v6296_v41 = vpop.f32.mrf.mxu1 }
 0xfbb   :  { %v6297_v43 = vadd.f32 %v6296_v41, %v6226_v28 }
 0xfbc   :  { %v6298_v23 = vpop.f32.mrf.mxu1  ;;  %v6367_v53 = vpop.f32.mrf.mxu0 }
 0xfbd   :  { %v6299_v56 = vadd.f32 %v6298_v23, %v6228_v49  ;;  %v6368_v33 = vadd.f32 %v6367_v53, %v6297_v43 }
 0xfbe   :  { %v6369_v40 = vpop.f32.mrf.mxu0 }
 0xfbf   :  { %v6370_v26 = vadd.f32 %v6369_v40, %v6299_v56  ;;  %v6372_v31 = vmax.f32 %v6368_v33, 0.0 }
 0xfc1   :  { %v6373_v9 = vmax.f32 %v6370_v26, 0.0 }
 0xfc3   :  { %6475 = vmatprep.mubr.f32.mxu1 %v6373_v9 }
 0xfc4   :  { %6476 = vmatmul.mubr.f32.vlgmr.msra.gmra.mxu1 %v6372_v31 }
0x1084   :  { %v6648_v21 = vpop.f32.mrf.mxu1 }
0x1086   :  { %v6649_v47 = vpop.f32.mrf.mxu1 }
0x1087   :  { %v6650_v39 = vadd.f32 %v6649_v47, %v6648_v21 }
0x1089   :  { %v6478_v30 = vadd.f32 %v6650_v39, %v6581_v35 }
0x108b   :  { %6482 = vst.msk [vmem:[#allocation13] sm:$0x3] %vm6481_vm8, %v6478_v30 }
0x108c   :  { %7654 = shalt.err (!%p7651_p10)
}
0x108d   :  { %6492 = dma.vmem_to_hbm [thread:$0]  %s6490_s16, 32, %s11398_s8, [#allocation7]  }
0x108e   :  { %7669 = dma.done.wait [#allocation7], 32  }
0x108f   :  { %7670 = vsyncadd [#allocation7], 4294967264 }
0x1090   :  { %6496 = vsyncpa [#allocation6], 1 }
0x1091   :  { %6497 = vsyncpa [#allocation9], 1 }
0x1092   :  { %6498 = vsyncpa [#allocation12], 1 }
0x1093   :  { %6499 = vsyncpa [#allocation7], 1 }

</bundles_post_ra>
